<compile_context>
chip_gen: v7x
topology: tpu7x:2x2x1
jax: 0.10.0
libtpu: 0.0.40
codegen_flags: <defaults>
</compile_context>

<pallas_src>
import functools

import jax
import jax.numpy as jnp
from jax.experimental import pallas as pl
from jax.experimental.pallas import tpu as pltpu

EPS = 1e-5
LANES = 128                       # lane-padded channel width (and Cout_p)
VMEM_LIMIT = 32 * 1024 * 1024     # explicit scoped-VMEM cap, safe on v5e/v6e/v7x


def _round_up(x, m):
    return ((x + m - 1) // m) * m


def _out_size(size, k, s, p):
    return (size + 2 * p - k) // s + 1


# ----------------------------- Pallas kernels ------------------------------

def _gate_kernel(p_ref, w_ref, b_ref, o_ref, *, ho, wo, pho, pwo):
    """conv7x7 (taps packed into K, BN folded) -> ReLU -> MaxPool(3,2,1)."""
    y = jnp.dot(p_ref[...], w_ref[...], preferred_element_type=jnp.float32)
    y = jnp.maximum(y + b_ref[...], 0.0)                        # (ho*wo, Cp) f32
    pieces = []
    for r in range(pho):
        rows = [h for h in (2 * r - 1, 2 * r, 2 * r + 1) if 0 <= h < ho]
        rm = y[rows[0] * wo:(rows[0] + 1) * wo, :]               # (wo, Cp)
        for h in rows[1:]:
            rm = jnp.maximum(rm, y[h * wo:(h + 1) * wo, :])
        for c in range(pwo):
            cols = [q for q in (2 * c - 1, 2 * c, 2 * c + 1) if 0 <= q < wo]
            cm = rm[cols[0]:cols[0] + 1, :]                      # (1, Cp)
            for q in cols[1:]:
                cm = jnp.maximum(cm, rm[q:q + 1, :])
            pieces.append(cm)
    o_ref[...] = jnp.concatenate(pieces, axis=0).astype(o_ref.dtype)


def _block_kernel(p1_ref, rsrc_ref, w1_ref, b1_ref, w2_ref, b2_ref, *rest,
                  ho, wo, has_shortcut):
    """Fused ResNetBasicBlock: conv1+BN+ReLU -> conv2+BN -> (+shortcut) -> ReLU."""
    if has_shortcut:
        wsc_ref, bsc_ref, o_ref, ypad = rest
    else:
        o_ref, ypad = rest

    # conv1 + folded BN + ReLU; dense K = kh*kw*Cin_real (im2col done in wrapper).
    y1 = jnp.dot(p1_ref[...], w1_ref[...], preferred_element_type=jnp.float32)
    y1 = jnp.maximum(y1 + b1_ref[...], 0.0).astype(jnp.bfloat16)   # (ho*wo, Cp)

    # Residual branch: 1x1 strided conv + BN, or identity.
    if has_shortcut:
        r = jnp.dot(rsrc_ref[...], wsc_ref[...],
                    preferred_element_type=jnp.float32) + bsc_ref[...]
    else:
        r = rsrc_ref[...].astype(jnp.float32)

    # Stage conv1 output into a zero-padded spatial VMEM scratch (1-px halo).
    ypad[...] = jnp.zeros_like(ypad)
    for h in range(ho):
        ypad[1 + h, 1:1 + wo, :] = y1[h * wo:(h + 1) * wo, :]

    # conv2 + folded BN: per output row, lane-concatenate the 9 taps into K
    # (K = 9 * Cp) and do one dense GEMM per row — no masked output adds.
    rows = []
    for h in range(ho):
        patch = jnp.concatenate(
            [ypad[h + i, j:j + wo, :] for i in range(3) for j in range(3)],
            axis=-1)                                             # (wo, 9*Cp)
        rows.append(jnp.dot(patch, w2_ref[...],
                            preferred_element_type=jnp.float32))
    y2 = jnp.concatenate(rows, axis=0) + b2_ref[...] + r          # (ho*wo, Cp)
    o_ref[...] = jnp.maximum(y2, 0.0).astype(o_ref.dtype)


# ------------------------- wrapper glue (XLA side) --------------------------

def _im2col(x, kh, kw, sh, sw, ph, pw):
    """NHWC -> (N, Ho*Wo, kh*kw*C) patches; taps K-major, channels K-minor."""
    n, h, w, c = x.shape
    ho = _out_size(h, kh, sh, ph)
    wo = _out_size(w, kw, sw, pw)
    xp = jnp.pad(x, ((0, 0), (ph, ph), (pw, pw), (0, 0)))
    cols = []
    for i in range(kh):
        for j in range(kw):
            cols.append(xp[:, i:i + (ho - 1) * sh + 1:sh,
                           j:j + (wo - 1) * sw + 1:sw, :])
    pat = jnp.concatenate(cols, axis=-1).reshape(n, ho * wo, kh * kw * c)
    return pat, ho, wo


def _pad_k(pat, k_target):
    return jnp.pad(pat, ((0, 0), (0, 0), (0, k_target - pat.shape[-1])))


def gate_forward(x, gate_p):
    """x: (N,H,W,Cin_real) f32 -> pooled activation (N, H//4, W//4, LANES) bf16."""
    w, b = gate_p
    n = x.shape[0]
    pat, ho, wo = _im2col(x, 7, 7, 2, 2, 3, 3)
    pat = _pad_k(pat, w.shape[0]).astype(jnp.bfloat16)
    pho, pwo = _out_size(ho, 3, 2, 1), _out_size(wo, 3, 2, 1)
    mg, mp, kq, cop = ho * wo, pho * pwo, w.shape[0], w.shape[1]
    out = pl.pallas_call(
        functools.partial(_gate_kernel, ho=ho, wo=wo, pho=pho, pwo=pwo),
        out_shape=jax.ShapeDtypeStruct((n, mp, cop), jnp.bfloat16),
        grid=(n,),
        in_specs=[pl.BlockSpec((None, mg, kq), lambda i: (i, 0, 0)),
                  pl.BlockSpec((kq, cop), lambda i: (0, 0)),
                  pl.BlockSpec((1, cop), lambda i: (0, 0))],
        out_specs=pl.BlockSpec((None, mp, cop), lambda i: (i, 0, 0)),
        compiler_params=pltpu.CompilerParams(
            dimension_semantics=("parallel",), vmem_limit_bytes=VMEM_LIMIT),
    )(pat, w, b)
    return out.reshape(n, pho, pwo, cop)


def residual_block(x, blk):
    """x: (N,H,W,LANES) lane-padded bf16 -> (N,Ho,Wo,LANES) bf16 (one pallas_call)."""
    n, h, wd, cop = x.shape
    cin, ds = blk["cin"], blk["ds"]
    w1, b1 = blk["conv1"]
    w2, b2 = blk["conv2"]
    has_sc = "shortcut" in blk

    pat, ho, wo = _im2col(x[..., :cin], 3, 3, ds[0], ds[1], 1, 1)
    pat = _pad_k(pat, w1.shape[0]).astype(jnp.bfloat16)
    rsrc = x[:, ::ds[0], ::ds[1], :].reshape(n, ho * wo, cop)
    m, k1 = ho * wo, w1.shape[0]

    args = [pat, rsrc, w1, b1, w2, b2]
    in_specs = [pl.BlockSpec((None, m, k1), lambda i: (i, 0, 0)),
                pl.BlockSpec((None, m, cop), lambda i: (i, 0, 0)),
                pl.BlockSpec((k1, cop), lambda i: (0, 0)),
                pl.BlockSpec((1, cop), lambda i: (0, 0)),
                pl.BlockSpec((w2.shape[0], cop), lambda i: (0, 0)),
                pl.BlockSpec((1, cop), lambda i: (0, 0))]
    if has_sc:
        wsc, bsc = blk["shortcut"]
        args += [wsc, bsc]
        in_specs += [pl.BlockSpec((wsc.shape[0], cop), lambda i: (0, 0)),
                     pl.BlockSpec((1, cop), lambda i: (0, 0))]

    out = pl.pallas_call(
        functools.partial(_block_kernel, ho=ho, wo=wo, has_shortcut=has_sc),
        out_shape=jax.ShapeDtypeStruct((n, m, cop), jnp.bfloat16),
        grid=(n,),
        in_specs=in_specs,
        out_specs=pl.BlockSpec((None, m, cop), lambda i: (i, 0, 0)),
        scratch_shapes=[pltpu.VMEM((ho + 2, wo + 2, cop), jnp.bfloat16)],
        compiler_params=pltpu.CompilerParams(
            dimension_semantics=("parallel",), vmem_limit_bytes=VMEM_LIMIT),
    )(*args)
    return out.reshape(n, ho, wo, cop)


# --------------- parameters: init, BN folding, dense-K packing --------------

def _bn_fold(gamma, beta, mean, var):
    scale = gamma / jnp.sqrt(var + EPS)
    return scale, beta - mean * scale


def _pack_conv_bn(w, scale, bias, cin_pad_to=None):
    """(Cout,Cin,kh,kw) f32 + folded BN -> (K, Cout_p) bf16 GEMM weight, (1,Cout_p) f32 bias.

    K layout: taps major (row-major over kh,kw), channels minor — matching both
    the wrapper-side im2col and the in-kernel conv2 patch concatenation order.
    """
    cout, cin, kh, kw = w.shape
    cin_p = cin if cin_pad_to is None else cin_pad_to
    cout_p = _round_up(cout, LANES)
    w = w * scale[:, None, None, None]                      # fold BN scale
    w = jnp.transpose(w, (2, 3, 1, 0))                       # (kh,kw,cin,cout)
    w = jnp.pad(w, ((0, 0), (0, 0), (0, cin_p - cin), (0, cout_p - cout)))
    w = w.reshape(kh * kw * cin_p, cout_p)
    w = jnp.pad(w, ((0, _round_up(w.shape[0], LANES) - w.shape[0]), (0, 0)))
    b = jnp.pad(bias, (0, cout_p - cout)).reshape(1, cout_p)
    return w.astype(jnp.bfloat16), b.astype(jnp.float32)


def _init_conv(key, cout, cin, kh, kw):
    fan_in = cin * kh * kw
    return jax.random.normal(key, (cout, cin, kh, kw), jnp.float32) / (fan_in ** 0.5)


def _init_bn(key, c):
    k1, k2, k3, k4 = jax.random.split(key, 4)
    gamma = 1.0 + 0.1 * jax.random.normal(k1, (c,), jnp.float32)
    beta = 0.1 * jax.random.normal(k2, (c,), jnp.float32)
    mean = 0.1 * jax.random.normal(k3, (c,), jnp.float32)
    var = jnp.abs(1.0 + 0.1 * jax.random.normal(k4, (c,), jnp.float32))
    return _bn_fold(gamma, beta, mean, var)


def build_resnet_encoder_params(key, in_channels, block_sizes, deepths):
    keys = iter(jax.random.split(key, 256))

    def conv_bn_params(cout, cin, kh, kw, cin_pad_to=None):
        w = _init_conv(next(keys), cout, cin, kh, kw)
        scale, bias = _init_bn(next(keys), cout)
        return _pack_conv_bn(w, scale, bias, cin_pad_to=cin_pad_to)

    params = {
        "gate": conv_bn_params(block_sizes[0], in_channels, 7, 7),
        "layers": [],
        "out_channels": block_sizes[-1],
    }
    # ResNetEncoder: first layer (b0 -> b0), then (b_i -> b_{i+1})
    layer_io = [(block_sizes[0], block_sizes[0])] + list(
        zip(block_sizes, block_sizes[1:]))
    for (cin, cout), nblk in zip(layer_io, deepths):
        blocks = []
        for b in range(nblk):
            bin_c = cin if b == 0 else cout
            # ResNetLayer: downsampling = (1, 2) if in != out, first block only
            ds = (1, 2) if (b == 0 and cin != cout) else (1, 1)
            blk = {
                "ds": ds, "cin": bin_c, "cout": cout,
                "conv1": conv_bn_params(cout, bin_c, 3, 3),
                # conv2 taps are concatenated in-kernel on lane-padded channels.
                "conv2": conv_bn_params(cout, cout, 3, 3, cin_pad_to=LANES),
            }
            if bin_c != cout:  # should_apply_shortcut (expansion == 1)
                blk["shortcut"] = conv_bn_params(cout, bin_c, 1, 1)
            blocks.append(blk)
        params["layers"].append(blocks)
    return params


# ------------------------------- forward pass -------------------------------

def resnet_encoder_forward(params, x_nchw):
    x = jnp.transpose(x_nchw, (0, 2, 3, 1)).astype(jnp.float32)  # NCHW -> NHWC
    # gate: conv7x7 s2 p3 -> BN -> ReLU -> maxpool 3x3 s2 p1 (single fused kernel)
    x = gate_forward(x, params["gate"])
    # residual layers: one fused kernel per ResNetBasicBlock
    for blocks in params["layers"]:
        for blk in blocks:
            x = residual_block(x, blk)
    x = x[..., :params["out_channels"]].astype(jnp.float32)      # drop lane padding
    return jnp.transpose(x, (0, 3, 1, 2))                        # NHWC -> NCHW


if __name__ == "__main__":
    key = jax.random.PRNGKey(0)
    pkey, xkey = jax.random.split(key)

    in_channels = 4
    block_sizes = [8, 16, 32, 64]
    deepths = [2, 1, 1, 1]

    params = build_resnet_encoder_params(pkey, in_channels, block_sizes, deepths)
    x = jax.random.normal(xkey, (2, in_channels, 16, 16), jnp.float32)

    fwd = jax.jit(lambda inp: resnet_encoder_forward(params, inp))
    out = jax.block_until_ready(fwd(x))

    # 16x16 -> conv s2 -> 8x8 -> maxpool s2 -> 4x4 -> three (1,2) W-downsamples
    assert out.shape == (2, block_sizes[-1], 4, 1), out.shape
    assert bool(jnp.all(jnp.isfinite(out)))
    print("KERNEL_OK")
</pallas_src>

<mosaic_0001>
module attributes {stable_mosaic.version = 11 : i64} {
  func.func @_gate_kernel(%arg0: i32, %arg1: memref<1x64x256xbf16, #tpu.memory_space<vmem>>, %arg2: memref<256x128xbf16, #tpu.memory_space<vmem>>, %arg3: memref<1x128xf32, #tpu.memory_space<vmem>>, %arg4: memref<1x16x128xbf16, #tpu.memory_space<vmem>>) attributes {dimension_semantics = [#tpu.dimension_semantics<parallel>], iteration_bounds = array<i64: 2>, scalar_prefetch = 0 : i64, scratch_operands = 0 : i64, tpu.core_type = #tpu.core_type<tc>, window_params = [{transform_indices = @transform_0, window_bounds = array<i64: 1, 64, 256>}, {pipeline_mode = #tpu.pipeline_mode<synchronous>, transform_indices = @transform_1, window_bounds = array<i64: 256, 128>}, {pipeline_mode = #tpu.pipeline_mode<synchronous>, transform_indices = @transform_2, window_bounds = array<i64: 1, 128>}, {transform_indices = @transform_3, window_bounds = array<i64: 1, 16, 128>}]} {
    %c0 = arith.constant 0 : index
    %c0_0 = arith.constant 0 : index
    %c0_1 = arith.constant 0 : index
    %0 = vector.load %arg1[%c0, %c0_0, %c0_1] : memref<1x64x256xbf16, #tpu.memory_space<vmem>>, vector<1x64x256xbf16>
    %1 = vector.shape_cast %0 : vector<1x64x256xbf16> to vector<64x256xbf16>
    %c0_2 = arith.constant 0 : index
    %c0_3 = arith.constant 0 : index
    %2 = vector.load %arg2[%c0_2, %c0_3] : memref<256x128xbf16, #tpu.memory_space<vmem>>, vector<256x128xbf16>
    %cst = arith.constant dense<0.000000e+00> : vector<64x128xf32>
    %3 = tpu.matmul %1, %2, %cst {dimension_numbers = #tpu.dot_dimension_numbers<[1], [0], [0], [1], [0, 0, 1, 1], [], []>} : vector<64x256xbf16>, vector<256x128xbf16>, vector<64x128xf32> -> vector<64x128xf32>
    %c0_4 = arith.constant 0 : index
    %c0_5 = arith.constant 0 : index
    %4 = vector.load %arg3[%c0_4, %c0_5] : memref<1x128xf32, #tpu.memory_space<vmem>>, vector<1x128xf32>
    %5 = vector.broadcast %4 : vector<1x128xf32> to vector<64x128xf32>
    %6 = arith.addf %3, %5 : vector<64x128xf32>
    %cst_6 = arith.constant 0.000000e+00 : f32
    %7 = vector.broadcast %cst_6 : f32 to vector<64x128xf32>
    %8 = arith.maximumf %6, %7 : vector<64x128xf32>
    %9 = vector.extract_strided_slice %8 {offsets = [0, 0], sizes = [8, 128], strides = [1, 1]} : vector<64x128xf32> to vector<8x128xf32>
    %10 = vector.extract_strided_slice %8 {offsets = [8, 0], sizes = [8, 128], strides = [1, 1]} : vector<64x128xf32> to vector<8x128xf32>
    %11 = arith.maximumf %9, %10 : vector<8x128xf32>
    %12 = vector.extract_strided_slice %11 {offsets = [0, 0], sizes = [1, 128], strides = [1, 1]} : vector<8x128xf32> to vector<1x128xf32>
    %13 = vector.extract_strided_slice %11 {offsets = [1, 0], sizes = [1, 128], strides = [1, 1]} : vector<8x128xf32> to vector<1x128xf32>
    %14 = arith.maximumf %12, %13 : vector<1x128xf32>
    %15 = vector.extract_strided_slice %11 {offsets = [1, 0], sizes = [1, 128], strides = [1, 1]} : vector<8x128xf32> to vector<1x128xf32>
    %16 = vector.extract_strided_slice %11 {offsets = [2, 0], sizes = [1, 128], strides = [1, 1]} : vector<8x128xf32> to vector<1x128xf32>
    %17 = arith.maximumf %15, %16 : vector<1x128xf32>
    %18 = vector.extract_strided_slice %11 {offsets = [3, 0], sizes = [1, 128], strides = [1, 1]} : vector<8x128xf32> to vector<1x128xf32>
    %19 = arith.maximumf %17, %18 : vector<1x128xf32>
    %20 = vector.extract_strided_slice %11 {offsets = [3, 0], sizes = [1, 128], strides = [1, 1]} : vector<8x128xf32> to vector<1x128xf32>
    %21 = vector.extract_strided_slice %11 {offsets = [4, 0], sizes = [1, 128], strides = [1, 1]} : vector<8x128xf32> to vector<1x128xf32>
    %22 = arith.maximumf %20, %21 : vector<1x128xf32>
    %23 = vector.extract_strided_slice %11 {offsets = [5, 0], sizes = [1, 128], strides = [1, 1]} : vector<8x128xf32> to vector<1x128xf32>
    %24 = arith.maximumf %22, %23 : vector<1x128xf32>
    %25 = vector.extract_strided_slice %11 {offsets = [5, 0], sizes = [1, 128], strides = [1, 1]} : vector<8x128xf32> to vector<1x128xf32>
    %26 = vector.extract_strided_slice %11 {offsets = [6, 0], sizes = [1, 128], strides = [1, 1]} : vector<8x128xf32> to vector<1x128xf32>
    %27 = arith.maximumf %25, %26 : vector<1x128xf32>
    %28 = vector.extract_strided_slice %11 {offsets = [7, 0], sizes = [1, 128], strides = [1, 1]} : vector<8x128xf32> to vector<1x128xf32>
    %29 = arith.maximumf %27, %28 : vector<1x128xf32>
    %30 = vector.extract_strided_slice %8 {offsets = [8, 0], sizes = [8, 128], strides = [1, 1]} : vector<64x128xf32> to vector<8x128xf32>
    %31 = vector.extract_strided_slice %8 {offsets = [16, 0], sizes = [8, 128], strides = [1, 1]} : vector<64x128xf32> to vector<8x128xf32>
    %32 = arith.maximumf %30, %31 : vector<8x128xf32>
    %33 = vector.extract_strided_slice %8 {offsets = [24, 0], sizes = [8, 128], strides = [1, 1]} : vector<64x128xf32> to vector<8x128xf32>
    %34 = arith.maximumf %32, %33 : vector<8x128xf32>
    %35 = vector.extract_strided_slice %34 {offsets = [0, 0], sizes = [1, 128], strides = [1, 1]} : vector<8x128xf32> to vector<1x128xf32>
    %36 = vector.extract_strided_slice %34 {offsets = [1, 0], sizes = [1, 128], strides = [1, 1]} : vector<8x128xf32> to vector<1x128xf32>
    %37 = arith.maximumf %35, %36 : vector<1x128xf32>
    %38 = vector.extract_strided_slice %34 {offsets = [1, 0], sizes = [1, 128], strides = [1, 1]} : vector<8x128xf32> to vector<1x128xf32>
    %39 = vector.extract_strided_slice %34 {offsets = [2, 0], sizes = [1, 128], strides = [1, 1]} : vector<8x128xf32> to vector<1x128xf32>
    %40 = arith.maximumf %38, %39 : vector<1x128xf32>
    %41 = vector.extract_strided_slice %34 {offsets = [3, 0], sizes = [1, 128], strides = [1, 1]} : vector<8x128xf32> to vector<1x128xf32>
    %42 = arith.maximumf %40, %41 : vector<1x128xf32>
    %43 = vector.extract_strided_slice %34 {offsets = [3, 0], sizes = [1, 128], strides = [1, 1]} : vector<8x128xf32> to vector<1x128xf32>
    %44 = vector.extract_strided_slice %34 {offsets = [4, 0], sizes = [1, 128], strides = [1, 1]} : vector<8x128xf32> to vector<1x128xf32>
    %45 = arith.maximumf %43, %44 : vector<1x128xf32>
    %46 = vector.extract_strided_slice %34 {offsets = [5, 0], sizes = [1, 128], strides = [1, 1]} : vector<8x128xf32> to vector<1x128xf32>
    %47 = arith.maximumf %45, %46 : vector<1x128xf32>
    %48 = vector.extract_strided_slice %34 {offsets = [5, 0], sizes = [1, 128], strides = [1, 1]} : vector<8x128xf32> to vector<1x128xf32>
    %49 = vector.extract_strided_slice %34 {offsets = [6, 0], sizes = [1, 128], strides = [1, 1]} : vector<8x128xf32> to vector<1x128xf32>
    %50 = arith.maximumf %48, %49 : vector<1x128xf32>
    %51 = vector.extract_strided_slice %34 {offsets = [7, 0], sizes = [1, 128], strides = [1, 1]} : vector<8x128xf32> to vector<1x128xf32>
    %52 = arith.maximumf %50, %51 : vector<1x128xf32>
    %53 = vector.extract_strided_slice %8 {offsets = [24, 0], sizes = [8, 128], strides = [1, 1]} : vector<64x128xf32> to vector<8x128xf32>
    %54 = vector.extract_strided_slice %8 {offsets = [32, 0], sizes = [8, 128], strides = [1, 1]} : vector<64x128xf32> to vector<8x128xf32>
    %55 = arith.maximumf %53, %54 : vector<8x128xf32>
    %56 = vector.extract_strided_slice %8 {offsets = [40, 0], sizes = [8, 128], strides = [1, 1]} : vector<64x128xf32> to vector<8x128xf32>
    %57 = arith.maximumf %55, %56 : vector<8x128xf32>
    %58 = vector.extract_strided_slice %57 {offsets = [0, 0], sizes = [1, 128], strides = [1, 1]} : vector<8x128xf32> to vector<1x128xf32>
    %59 = vector.extract_strided_slice %57 {offsets = [1, 0], sizes = [1, 128], strides = [1, 1]} : vector<8x128xf32> to vector<1x128xf32>
    %60 = arith.maximumf %58, %59 : vector<1x128xf32>
    %61 = vector.extract_strided_slice %57 {offsets = [1, 0], sizes = [1, 128], strides = [1, 1]} : vector<8x128xf32> to vector<1x128xf32>
    %62 = vector.extract_strided_slice %57 {offsets = [2, 0], sizes = [1, 128], strides = [1, 1]} : vector<8x128xf32> to vector<1x128xf32>
    %63 = arith.maximumf %61, %62 : vector<1x128xf32>
    %64 = vector.extract_strided_slice %57 {offsets = [3, 0], sizes = [1, 128], strides = [1, 1]} : vector<8x128xf32> to vector<1x128xf32>
    %65 = arith.maximumf %63, %64 : vector<1x128xf32>
    %66 = vector.extract_strided_slice %57 {offsets = [3, 0], sizes = [1, 128], strides = [1, 1]} : vector<8x128xf32> to vector<1x128xf32>
    %67 = vector.extract_strided_slice %57 {offsets = [4, 0], sizes = [1, 128], strides = [1, 1]} : vector<8x128xf32> to vector<1x128xf32>
    %68 = arith.maximumf %66, %67 : vector<1x128xf32>
    %69 = vector.extract_strided_slice %57 {offsets = [5, 0], sizes = [1, 128], strides = [1, 1]} : vector<8x128xf32> to vector<1x128xf32>
    %70 = arith.maximumf %68, %69 : vector<1x128xf32>
    %71 = vector.extract_strided_slice %57 {offsets = [5, 0], sizes = [1, 128], strides = [1, 1]} : vector<8x128xf32> to vector<1x128xf32>
    %72 = vector.extract_strided_slice %57 {offsets = [6, 0], sizes = [1, 128], strides = [1, 1]} : vector<8x128xf32> to vector<1x128xf32>
    %73 = arith.maximumf %71, %72 : vector<1x128xf32>
    %74 = vector.extract_strided_slice %57 {offsets = [7, 0], sizes = [1, 128], strides = [1, 1]} : vector<8x128xf32> to vector<1x128xf32>
    %75 = arith.maximumf %73, %74 : vector<1x128xf32>
    %76 = vector.extract_strided_slice %8 {offsets = [40, 0], sizes = [8, 128], strides = [1, 1]} : vector<64x128xf32> to vector<8x128xf32>
    %77 = vector.extract_strided_slice %8 {offsets = [48, 0], sizes = [8, 128], strides = [1, 1]} : vector<64x128xf32> to vector<8x128xf32>
    %78 = arith.maximumf %76, %77 : vector<8x128xf32>
    %79 = vector.extract_strided_slice %8 {offsets = [56, 0], sizes = [8, 128], strides = [1, 1]} : vector<64x128xf32> to vector<8x128xf32>
    %80 = arith.maximumf %78, %79 : vector<8x128xf32>
    %81 = vector.extract_strided_slice %80 {offsets = [0, 0], sizes = [1, 128], strides = [1, 1]} : vector<8x128xf32> to vector<1x128xf32>
    %82 = vector.extract_strided_slice %80 {offsets = [1, 0], sizes = [1, 128], strides = [1, 1]} : vector<8x128xf32> to vector<1x128xf32>
    %83 = arith.maximumf %81, %82 : vector<1x128xf32>
    %84 = vector.extract_strided_slice %80 {offsets = [1, 0], sizes = [1, 128], strides = [1, 1]} : vector<8x128xf32> to vector<1x128xf32>
    %85 = vector.extract_strided_slice %80 {offsets = [2, 0], sizes = [1, 128], strides = [1, 1]} : vector<8x128xf32> to vector<1x128xf32>
    %86 = arith.maximumf %84, %85 : vector<1x128xf32>
    %87 = vector.extract_strided_slice %80 {offsets = [3, 0], sizes = [1, 128], strides = [1, 1]} : vector<8x128xf32> to vector<1x128xf32>
    %88 = arith.maximumf %86, %87 : vector<1x128xf32>
    %89 = vector.extract_strided_slice %80 {offsets = [3, 0], sizes = [1, 128], strides = [1, 1]} : vector<8x128xf32> to vector<1x128xf32>
    %90 = vector.extract_strided_slice %80 {offsets = [4, 0], sizes = [1, 128], strides = [1, 1]} : vector<8x128xf32> to vector<1x128xf32>
    %91 = arith.maximumf %89, %90 : vector<1x128xf32>
    %92 = vector.extract_strided_slice %80 {offsets = [5, 0], sizes = [1, 128], strides = [1, 1]} : vector<8x128xf32> to vector<1x128xf32>
    %93 = arith.maximumf %91, %92 : vector<1x128xf32>
    %94 = vector.extract_strided_slice %80 {offsets = [5, 0], sizes = [1, 128], strides = [1, 1]} : vector<8x128xf32> to vector<1x128xf32>
    %95 = vector.extract_strided_slice %80 {offsets = [6, 0], sizes = [1, 128], strides = [1, 1]} : vector<8x128xf32> to vector<1x128xf32>
    %96 = arith.maximumf %94, %95 : vector<1x128xf32>
    %97 = vector.extract_strided_slice %80 {offsets = [7, 0], sizes = [1, 128], strides = [1, 1]} : vector<8x128xf32> to vector<1x128xf32>
    %98 = arith.maximumf %96, %97 : vector<1x128xf32>
    %99 = tpu.concatenate %14, %19, %24, %29, %37, %42, %47, %52, %60, %65, %70, %75, %83, %88, %93, %98 in 0 : vector<1x128xf32>, vector<1x128xf32>, vector<1x128xf32>, vector<1x128xf32>, vector<1x128xf32>, vector<1x128xf32>, vector<1x128xf32>, vector<1x128xf32>, vector<1x128xf32>, vector<1x128xf32>, vector<1x128xf32>, vector<1x128xf32>, vector<1x128xf32>, vector<1x128xf32>, vector<1x128xf32>, vector<1x128xf32> -> vector<16x128xf32>
    %100 = arith.truncf %99 : vector<16x128xf32> to vector<16x128xbf16>
    %c0_7 = arith.constant 0 : index
    %c0_8 = arith.constant 0 : index
    %c0_9 = arith.constant 0 : index
    %101 = vector.load %arg4[%c0_7, %c0_8, %c0_9] : memref<1x16x128xbf16, #tpu.memory_space<vmem>>, vector<1x16x128xbf16>
    %102 = vector.shape_cast %101 : vector<1x16x128xbf16> to vector<16x128xbf16>
    %103 = vector.shape_cast %100 : vector<16x128xbf16> to vector<1x16x128xbf16>
    tpu.vector_store %arg4[%c0_7, %c0_8, %c0_9], %103 {strides = array<i32>} : memref<1x16x128xbf16, #tpu.memory_space<vmem>>, vector<1x16x128xbf16>,
    return
  }
  func.func @transform_0(%arg0: i32) -> (i32, i32, i32) {
    %c0_i32 = arith.constant 0 : i32
    %c0_i32_0 = arith.constant 0 : i32
    %c0_i32_1 = arith.constant 0 : i32
    return %arg0, %c0_i32, %c0_i32_0 : i32, i32, i32
  }
  func.func @transform_1(%arg0: i32) -> (i32, i32) {
    %c0_i32 = arith.constant 0 : i32
    %c0_i32_0 = arith.constant 0 : i32
    %c0_i32_1 = arith.constant 0 : i32
    return %c0_i32, %c0_i32_0 : i32, i32
  }
  func.func @transform_2(%arg0: i32) -> (i32, i32) {
    %c0_i32 = arith.constant 0 : i32
    %c0_i32_0 = arith.constant 0 : i32
    %c0_i32_1 = arith.constant 0 : i32
    return %c0_i32, %c0_i32_0 : i32, i32
  }
  func.func @transform_3(%arg0: i32) -> (i32, i32, i32) {
    %c0_i32 = arith.constant 0 : i32
    %c0_i32_0 = arith.constant 0 : i32
    %c0_i32_1 = arith.constant 0 : i32
    return %arg0, %c0_i32, %c0_i32_0 : i32, i32, i32
  }
}

module attributes {stable_mosaic.version = 11 : i64} {
  func.func @_block_kernel(%arg0: i32, %arg1: memref<1x16x128xbf16, #tpu.memory_space<vmem>>, %arg2: memref<1x16x128xbf16, #tpu.memory_space<vmem>>, %arg3: memref<128x128xbf16, #tpu.memory_space<vmem>>, %arg4: memref<1x128xf32, #tpu.memory_space<vmem>>, %arg5: memref<1152x128xbf16, #tpu.memory_space<vmem>>, %arg6: memref<1x128xf32, #tpu.memory_space<vmem>>, %arg7: memref<1x16x128xbf16, #tpu.memory_space<vmem>>, %arg8: memref<6x6x128xbf16, #tpu.memory_space<vmem>>) attributes {dimension_semantics = [#tpu.dimension_semantics<parallel>], iteration_bounds = array<i64: 2>, scalar_prefetch = 0 : i64, scratch_operands = 1 : i64, tpu.core_type = #tpu.core_type<tc>, window_params = [{transform_indices = @transform_0, window_bounds = array<i64: 1, 16, 128>}, {transform_indices = @transform_1, window_bounds = array<i64: 1, 16, 128>}, {pipeline_mode = #tpu.pipeline_mode<synchronous>, transform_indices = @transform_2, window_bounds = array<i64: 128, 128>}, {pipeline_mode = #tpu.pipeline_mode<synchronous>, transform_indices = @transform_3, window_bounds = array<i64: 1, 128>}, {pipeline_mode = #tpu.pipeline_mode<synchronous>, transform_indices = @transform_4, window_bounds = array<i64: 1152, 128>}, {pipeline_mode = #tpu.pipeline_mode<synchronous>, transform_indices = @transform_5, window_bounds = array<i64: 1, 128>}, {transform_indices = @transform_6, window_bounds = array<i64: 1, 16, 128>}]} {
    %c0 = arith.constant 0 : index
    %c0_0 = arith.constant 0 : index
    %c0_1 = arith.constant 0 : index
    %0 = vector.load %arg1[%c0, %c0_0, %c0_1] : memref<1x16x128xbf16, #tpu.memory_space<vmem>>, vector<1x16x128xbf16>
    %1 = vector.shape_cast %0 : vector<1x16x128xbf16> to vector<16x128xbf16>
    %c0_2 = arith.constant 0 : index
    %c0_3 = arith.constant 0 : index
    %2 = vector.load %arg3[%c0_2, %c0_3] : memref<128x128xbf16, #tpu.memory_space<vmem>>, vector<128x128xbf16>
    %cst = arith.constant dense<0.000000e+00> : vector<16x128xf32>
    %3 = tpu.matmul %1, %2, %cst {dimension_numbers = #tpu.dot_dimension_numbers<[1], [0], [0], [1], [0, 0, 1, 1], [], []>} : vector<16x128xbf16>, vector<128x128xbf16>, vector<16x128xf32> -> vector<16x128xf32>
    %c0_4 = arith.constant 0 : index
    %c0_5 = arith.constant 0 : index
    %4 = vector.load %arg4[%c0_4, %c0_5] : memref<1x128xf32, #tpu.memory_space<vmem>>, vector<1x128xf32>
    %5 = vector.broadcast %4 : vector<1x128xf32> to vector<16x128xf32>
    %6 = arith.addf %3, %5 : vector<16x128xf32>
    %cst_6 = arith.constant 0.000000e+00 : f32
    %7 = vector.broadcast %cst_6 : f32 to vector<16x128xf32>
    %8 = arith.maximumf %6, %7 : vector<16x128xf32>
    %9 = arith.truncf %8 : vector<16x128xf32> to vector<16x128xbf16>
    %c0_7 = arith.constant 0 : index
    %c0_8 = arith.constant 0 : index
    %c0_9 = arith.constant 0 : index
    %10 = vector.load %arg2[%c0_7, %c0_8, %c0_9] : memref<1x16x128xbf16, #tpu.memory_space<vmem>>, vector<1x16x128xbf16>
    %11 = vector.shape_cast %10 : vector<1x16x128xbf16> to vector<16x128xbf16>
    %12 = arith.extf %11 : vector<16x128xbf16> to vector<16x128xf32>
    %cst_10 = arith.constant 0.000000e+00 : bf16
    %13 = vector.broadcast %cst_10 : bf16 to vector<6x6x128xbf16>
    %c0_11 = arith.constant 0 : index
    %c0_12 = arith.constant 0 : index
    %c0_13 = arith.constant 0 : index
    %14 = vector.load %arg8[%c0_11, %c0_12, %c0_13] : memref<6x6x128xbf16, #tpu.memory_space<vmem>>, vector<6x6x128xbf16>
    tpu.vector_store %arg8[%c0_11, %c0_12, %c0_13], %13 {strides = array<i32>} : memref<6x6x128xbf16, #tpu.memory_space<vmem>>, vector<6x6x128xbf16>,
    %15 = vector.extract_strided_slice %9 {offsets = [0, 0], sizes = [4, 128], strides = [1, 1]} : vector<16x128xbf16> to vector<4x128xbf16>
    %c1 = arith.constant 1 : index
    %c1_14 = arith.constant 1 : index
    %c0_15 = arith.constant 0 : index
    %16 = vector.load %arg8[%c1, %c1_14, %c0_15] : memref<6x6x128xbf16, #tpu.memory_space<vmem>>, vector<1x4x128xbf16>
    %17 = vector.shape_cast %16 : vector<1x4x128xbf16> to vector<4x128xbf16>
    %18 = vector.shape_cast %15 : vector<4x128xbf16> to vector<1x4x128xbf16>
    tpu.vector_store %arg8[%c1, %c1_14, %c0_15], %18 {strides = array<i32>} : memref<6x6x128xbf16, #tpu.memory_space<vmem>>, vector<1x4x128xbf16>,
    %19 = vector.extract_strided_slice %9 {offsets = [4, 0], sizes = [4, 128], strides = [1, 1]} : vector<16x128xbf16> to vector<4x128xbf16>
    %c2 = arith.constant 2 : index
    %c1_16 = arith.constant 1 : index
    %c0_17 = arith.constant 0 : index
    %20 = vector.load %arg8[%c2, %c1_16, %c0_17] : memref<6x6x128xbf16, #tpu.memory_space<vmem>>, vector<1x4x128xbf16>
    %21 = vector.shape_cast %20 : vector<1x4x128xbf16> to vector<4x128xbf16>
    %22 = vector.shape_cast %19 : vector<4x128xbf16> to vector<1x4x128xbf16>
    tpu.vector_store %arg8[%c2, %c1_16, %c0_17], %22 {strides = array<i32>} : memref<6x6x128xbf16, #tpu.memory_space<vmem>>, vector<1x4x128xbf16>,
    %23 = vector.extract_strided_slice %9 {offsets = [8, 0], sizes = [4, 128], strides = [1, 1]} : vector<16x128xbf16> to vector<4x128xbf16>
    %c3 = arith.constant 3 : index
    %c1_18 = arith.constant 1 : index
    %c0_19 = arith.constant 0 : index
    %24 = vector.load %arg8[%c3, %c1_18, %c0_19] : memref<6x6x128xbf16, #tpu.memory_space<vmem>>, vector<1x4x128xbf16>
    %25 = vector.shape_cast %24 : vector<1x4x128xbf16> to vector<4x128xbf16>
    %26 = vector.shape_cast %23 : vector<4x128xbf16> to vector<1x4x128xbf16>
    tpu.vector_store %arg8[%c3, %c1_18, %c0_19], %26 {strides = array<i32>} : memref<6x6x128xbf16, #tpu.memory_space<vmem>>, vector<1x4x128xbf16>,
    %27 = vector.extract_strided_slice %9 {offsets = [12, 0], sizes = [4, 128], strides = [1, 1]} : vector<16x128xbf16> to vector<4x128xbf16>
    %c4 = arith.constant 4 : index
    %c1_20 = arith.constant 1 : index
    %c0_21 = arith.constant 0 : index
    %28 = vector.load %arg8[%c4, %c1_20, %c0_21] : memref<6x6x128xbf16, #tpu.memory_space<vmem>>, vector<1x4x128xbf16>
    %29 = vector.shape_cast %28 : vector<1x4x128xbf16> to vector<4x128xbf16>
    %30 = vector.shape_cast %27 : vector<4x128xbf16> to vector<1x4x128xbf16>
    tpu.vector_store %arg8[%c4, %c1_20, %c0_21], %30 {strides = array<i32>} : memref<6x6x128xbf16, #tpu.memory_space<vmem>>, vector<1x4x128xbf16>,
    %c0_22 = arith.constant 0 : index
    %c0_23 = arith.constant 0 : index
    %c0_24 = arith.constant 0 : index
    %31 = vector.load %arg8[%c0_22, %c0_23, %c0_24] : memref<6x6x128xbf16, #tpu.memory_space<vmem>>, vector<1x4x128xbf16>
    %32 = vector.shape_cast %31 : vector<1x4x128xbf16> to vector<4x128xbf16>
    %c0_25 = arith.constant 0 : index
    %c1_26 = arith.constant 1 : index
    %c0_27 = arith.constant 0 : index
    %33 = vector.load %arg8[%c0_25, %c1_26, %c0_27] : memref<6x6x128xbf16, #tpu.memory_space<vmem>>, vector<1x4x128xbf16>
    %34 = vector.shape_cast %33 : vector<1x4x128xbf16> to vector<4x128xbf16>
    %c0_28 = arith.constant 0 : index
    %c2_29 = arith.constant 2 : index
    %c0_30 = arith.constant 0 : index
    %35 = vector.load %arg8[%c0_28, %c2_29, %c0_30] : memref<6x6x128xbf16, #tpu.memory_space<vmem>>, vector<1x4x128xbf16>
    %36 = vector.shape_cast %35 : vector<1x4x128xbf16> to vector<4x128xbf16>
    %c1_31 = arith.constant 1 : index
    %c0_32 = arith.constant 0 : index
    %c0_33 = arith.constant 0 : index
    %37 = vector.load %arg8[%c1_31, %c0_32, %c0_33] : memref<6x6x128xbf16, #tpu.memory_space<vmem>>, vector<1x4x128xbf16>
    %38 = vector.shape_cast %37 : vector<1x4x128xbf16> to vector<4x128xbf16>
    %c1_34 = arith.constant 1 : index
    %c1_35 = arith.constant 1 : index
    %c0_36 = arith.constant 0 : index
    %39 = vector.load %arg8[%c1_34, %c1_35, %c0_36] : memref<6x6x128xbf16, #tpu.memory_space<vmem>>, vector<1x4x128xbf16>
    %40 = vector.shape_cast %39 : vector<1x4x128xbf16> to vector<4x128xbf16>
    %c1_37 = arith.constant 1 : index
    %c2_38 = arith.constant 2 : index
    %c0_39 = arith.constant 0 : index
    %41 = vector.load %arg8[%c1_37, %c2_38, %c0_39] : memref<6x6x128xbf16, #tpu.memory_space<vmem>>, vector<1x4x128xbf16>
    %42 = vector.shape_cast %41 : vector<1x4x128xbf16> to vector<4x128xbf16>
    %c2_40 = arith.constant 2 : index
    %c0_41 = arith.constant 0 : index
    %c0_42 = arith.constant 0 : index
    %43 = vector.load %arg8[%c2_40, %c0_41, %c0_42] : memref<6x6x128xbf16, #tpu.memory_space<vmem>>, vector<1x4x128xbf16>
    %44 = vector.shape_cast %43 : vector<1x4x128xbf16> to vector<4x128xbf16>
    %c2_43 = arith.constant 2 : index
    %c1_44 = arith.constant 1 : index
    %c0_45 = arith.constant 0 : index
    %45 = vector.load %arg8[%c2_43, %c1_44, %c0_45] : memref<6x6x128xbf16, #tpu.memory_space<vmem>>, vector<1x4x128xbf16>
    %46 = vector.shape_cast %45 : vector<1x4x128xbf16> to vector<4x128xbf16>
    %c2_46 = arith.constant 2 : index
    %c2_47 = arith.constant 2 : index
    %c0_48 = arith.constant 0 : index
    %47 = vector.load %arg8[%c2_46, %c2_47, %c0_48] : memref<6x6x128xbf16, #tpu.memory_space<vmem>>, vector<1x4x128xbf16>
    %48 = vector.shape_cast %47 : vector<1x4x128xbf16> to vector<4x128xbf16>
    %49 = tpu.concatenate %32, %34, %36, %38, %40, %42, %44, %46, %48 in 1 : vector<4x128xbf16>, vector<4x128xbf16>, vector<4x128xbf16>, vector<4x128xbf16>, vector<4x128xbf16>, vector<4x128xbf16>, vector<4x128xbf16>, vector<4x128xbf16>, vector<4x128xbf16> -> vector<4x1152xbf16>
    %c0_49 = arith.constant 0 : index
    %c0_50 = arith.constant 0 : index
    %50 = vector.load %arg5[%c0_49, %c0_50] : memref<1152x128xbf16, #tpu.memory_space<vmem>>, vector<1152x128xbf16>
    %cst_51 = arith.constant dense<0.000000e+00> : vector<4x128xf32>
    %51 = tpu.matmul %49, %50, %cst_51 {dimension_numbers = #tpu.dot_dimension_numbers<[1], [0], [0], [1], [0, 0, 1, 1], [], []>} : vector<4x1152xbf16>, vector<1152x128xbf16>, vector<4x128xf32> -> vector<4x128xf32>
    %c1_52 = arith.constant 1 : index
    %c0_53 = arith.constant 0 : index
    %c0_54 = arith.constant 0 : index
    %52 = vector.load %arg8[%c1_52, %c0_53, %c0_54] : memref<6x6x128xbf16, #tpu.memory_space<vmem>>, vector<1x4x128xbf16>
    %53 = vector.shape_cast %52 : vector<1x4x128xbf16> to vector<4x128xbf16>
    %c1_55 = arith.constant 1 : index
    %c1_56 = arith.constant 1 : index
    %c0_57 = arith.constant 0 : index
    %54 = vector.load %arg8[%c1_55, %c1_56, %c0_57] : memref<6x6x128xbf16, #tpu.memory_space<vmem>>, vector<1x4x128xbf16>
    %55 = vector.shape_cast %54 : vector<1x4x128xbf16> to vector<4x128xbf16>
    %c1_58 = arith.constant 1 : index
    %c2_59 = arith.constant 2 : index
    %c0_60 = arith.constant 0 : index
    %56 = vector.load %arg8[%c1_58, %c2_59, %c0_60] : memref<6x6x128xbf16, #tpu.memory_space<vmem>>, vector<1x4x128xbf16>
    %57 = vector.shape_cast %56 : vector<1x4x128xbf16> to vector<4x128xbf16>
    %c2_61 = arith.constant 2 : index
    %c0_62 = arith.constant 0 : index
    %c0_63 = arith.constant 0 : index
    %58 = vector.load %arg8[%c2_61, %c0_62, %c0_63] : memref<6x6x128xbf16, #tpu.memory_space<vmem>>, vector<1x4x128xbf16>
    %59 = vector.shape_cast %58 : vector<1x4x128xbf16> to vector<4x128xbf16>
    %c2_64 = arith.constant 2 : index
    %c1_65 = arith.constant 1 : index
    %c0_66 = arith.constant 0 : index
    %60 = vector.load %arg8[%c2_64, %c1_65, %c0_66] : memref<6x6x128xbf16, #tpu.memory_space<vmem>>, vector<1x4x128xbf16>
    %61 = vector.shape_cast %60 : vector<1x4x128xbf16> to vector<4x128xbf16>
    %c2_67 = arith.constant 2 : index
    %c2_68 = arith.constant 2 : index
    %c0_69 = arith.constant 0 : index
    %62 = vector.load %arg8[%c2_67, %c2_68, %c0_69] : memref<6x6x128xbf16, #tpu.memory_space<vmem>>, vector<1x4x128xbf16>
    %63 = vector.shape_cast %62 : vector<1x4x128xbf16> to vector<4x128xbf16>
    %c3_70 = arith.constant 3 : index
    %c0_71 = arith.constant 0 : index
    %c0_72 = arith.constant 0 : index
    %64 = vector.load %arg8[%c3_70, %c0_71, %c0_72] : memref<6x6x128xbf16, #tpu.memory_space<vmem>>, vector<1x4x128xbf16>
    %65 = vector.shape_cast %64 : vector<1x4x128xbf16> to vector<4x128xbf16>
    %c3_73 = arith.constant 3 : index
    %c1_74 = arith.constant 1 : index
    %c0_75 = arith.constant 0 : index
    %66 = vector.load %arg8[%c3_73, %c1_74, %c0_75] : memref<6x6x128xbf16, #tpu.memory_space<vmem>>, vector<1x4x128xbf16>
    %67 = vector.shape_cast %66 : vector<1x4x128xbf16> to vector<4x128xbf16>
    %c3_76 = arith.constant 3 : index
    %c2_77 = arith.constant 2 : index
    %c0_78 = arith.constant 0 : index
    %68 = vector.load %arg8[%c3_76, %c2_77, %c0_78] : memref<6x6x128xbf16, #tpu.memory_space<vmem>>, vector<1x4x128xbf16>
    %69 = vector.shape_cast %68 : vector<1x4x128xbf16> to vector<4x128xbf16>
    %70 = tpu.concatenate %53, %55, %57, %59, %61, %63, %65, %67, %69 in 1 : vector<4x128xbf16>, vector<4x128xbf16>, vector<4x128xbf16>, vector<4x128xbf16>, vector<4x128xbf16>, vector<4x128xbf16>, vector<4x128xbf16>, vector<4x128xbf16>, vector<4x128xbf16> -> vector<4x1152xbf16>
    %c0_79 = arith.constant 0 : index
    %c0_80 = arith.constant 0 : index
    %71 = vector.load %arg5[%c0_79, %c0_80] : memref<1152x128xbf16, #tpu.memory_space<vmem>>, vector<1152x128xbf16>
    %cst_81 = arith.constant dense<0.000000e+00> : vector<4x128xf32>
    %72 = tpu.matmul %70, %71, %cst_81 {dimension_numbers = #tpu.dot_dimension_numbers<[1], [0], [0], [1], [0, 0, 1, 1], [], []>} : vector<4x1152xbf16>, vector<1152x128xbf16>, vector<4x128xf32> -> vector<4x128xf32>
    %c2_82 = arith.constant 2 : index
    %c0_83 = arith.constant 0 : index
    %c0_84 = arith.constant 0 : index
    %73 = vector.load %arg8[%c2_82, %c0_83, %c0_84] : memref<6x6x128xbf16, #tpu.memory_space<vmem>>, vector<1x4x128xbf16>
    %74 = vector.shape_cast %73 : vector<1x4x128xbf16> to vector<4x128xbf16>
    %c2_85 = arith.constant 2 : index
    %c1_86 = arith.constant 1 : index
    %c0_87 = arith.constant 0 : index
    %75 = vector.load %arg8[%c2_85, %c1_86, %c0_87] : memref<6x6x128xbf16, #tpu.memory_space<vmem>>, vector<1x4x128xbf16>
    %76 = vector.shape_cast %75 : vector<1x4x128xbf16> to vector<4x128xbf16>
    %c2_88 = arith.constant 2 : index
    %c2_89 = arith.constant 2 : index
    %c0_90 = arith.constant 0 : index
    %77 = vector.load %arg8[%c2_88, %c2_89, %c0_90] : memref<6x6x128xbf16, #tpu.memory_space<vmem>>, vector<1x4x128xbf16>
    %78 = vector.shape_cast %77 : vector<1x4x128xbf16> to vector<4x128xbf16>
    %c3_91 = arith.constant 3 : index
    %c0_92 = arith.constant 0 : index
    %c0_93 = arith.constant 0 : index
    %79 = vector.load %arg8[%c3_91, %c0_92, %c0_93] : memref<6x6x128xbf16, #tpu.memory_space<vmem>>, vector<1x4x128xbf16>
    %80 = vector.shape_cast %79 : vector<1x4x128xbf16> to vector<4x128xbf16>
    %c3_94 = arith.constant 3 : index
    %c1_95 = arith.constant 1 : index
    %c0_96 = arith.constant 0 : index
    %81 = vector.load %arg8[%c3_94, %c1_95, %c0_96] : memref<6x6x128xbf16, #tpu.memory_space<vmem>>, vector<1x4x128xbf16>
    %82 = vector.shape_cast %81 : vector<1x4x128xbf16> to vector<4x128xbf16>
    %c3_97 = arith.constant 3 : index
    %c2_98 = arith.constant 2 : index
    %c0_99 = arith.constant 0 : index
    %83 = vector.load %arg8[%c3_97, %c2_98, %c0_99] : memref<6x6x128xbf16, #tpu.memory_space<vmem>>, vector<1x4x128xbf16>
    %84 = vector.shape_cast %83 : vector<1x4x128xbf16> to vector<4x128xbf16>
    %c4_100 = arith.constant 4 : index
    %c0_101 = arith.constant 0 : index
    %c0_102 = arith.constant 0 : index
    %85 = vector.load %arg8[%c4_100, %c0_101, %c0_102] : memref<6x6x128xbf16, #tpu.memory_space<vmem>>, vector<1x4x128xbf16>
    %86 = vector.shape_cast %85 : vector<1x4x128xbf16> to vector<4x128xbf16>
    %c4_103 = arith.constant 4 : index
    %c1_104 = arith.constant 1 : index
    %c0_105 = arith.constant 0 : index
    %87 = vector.load %arg8[%c4_103, %c1_104, %c0_105] : memref<6x6x128xbf16, #tpu.memory_space<vmem>>, vector<1x4x128xbf16>
    %88 = vector.shape_cast %87 : vector<1x4x128xbf16> to vector<4x128xbf16>
    %c4_106 = arith.constant 4 : index
    %c2_107 = arith.constant 2 : index
    %c0_108 = arith.constant 0 : index
    %89 = vector.load %arg8[%c4_106, %c2_107, %c0_108] : memref<6x6x128xbf16, #tpu.memory_space<vmem>>, vector<1x4x128xbf16>
    %90 = vector.shape_cast %89 : vector<1x4x128xbf16> to vector<4x128xbf16>
    %91 = tpu.concatenate %74, %76, %78, %80, %82, %84, %86, %88, %90 in 1 : vector<4x128xbf16>, vector<4x128xbf16>, vector<4x128xbf16>, vector<4x128xbf16>, vector<4x128xbf16>, vector<4x128xbf16>, vector<4x128xbf16>, vector<4x128xbf16>, vector<4x128xbf16> -> vector<4x1152xbf16>
    %c0_109 = arith.constant 0 : index
    %c0_110 = arith.constant 0 : index
    %92 = vector.load %arg5[%c0_109, %c0_110] : memref<1152x128xbf16, #tpu.memory_space<vmem>>, vector<1152x128xbf16>
    %cst_111 = arith.constant dense<0.000000e+00> : vector<4x128xf32>
    %93 = tpu.matmul %91, %92, %cst_111 {dimension_numbers = #tpu.dot_dimension_numbers<[1], [0], [0], [1], [0, 0, 1, 1], [], []>} : vector<4x1152xbf16>, vector<1152x128xbf16>, vector<4x128xf32> -> vector<4x128xf32>
    %c3_112 = arith.constant 3 : index
    %c0_113 = arith.constant 0 : index
    %c0_114 = arith.constant 0 : index
    %94 = vector.load %arg8[%c3_112, %c0_113, %c0_114] : memref<6x6x128xbf16, #tpu.memory_space<vmem>>, vector<1x4x128xbf16>
    %95 = vector.shape_cast %94 : vector<1x4x128xbf16> to vector<4x128xbf16>
    %c3_115 = arith.constant 3 : index
    %c1_116 = arith.constant 1 : index
    %c0_117 = arith.constant 0 : index
    %96 = vector.load %arg8[%c3_115, %c1_116, %c0_117] : memref<6x6x128xbf16, #tpu.memory_space<vmem>>, vector<1x4x128xbf16>
    %97 = vector.shape_cast %96 : vector<1x4x128xbf16> to vector<4x128xbf16>
    %c3_118 = arith.constant 3 : index
    %c2_119 = arith.constant 2 : index
    %c0_120 = arith.constant 0 : index
    %98 = vector.load %arg8[%c3_118, %c2_119, %c0_120] : memref<6x6x128xbf16, #tpu.memory_space<vmem>>, vector<1x4x128xbf16>
    %99 = vector.shape_cast %98 : vector<1x4x128xbf16> to vector<4x128xbf16>
    %c4_121 = arith.constant 4 : index
    %c0_122 = arith.constant 0 : index
    %c0_123 = arith.constant 0 : index
    %100 = vector.load %arg8[%c4_121, %c0_122, %c0_123] : memref<6x6x128xbf16, #tpu.memory_space<vmem>>, vector<1x4x128xbf16>
    %101 = vector.shape_cast %100 : vector<1x4x128xbf16> to vector<4x128xbf16>
    %c4_124 = arith.constant 4 : index
    %c1_125 = arith.constant 1 : index
    %c0_126 = arith.constant 0 : index
    %102 = vector.load %arg8[%c4_124, %c1_125, %c0_126] : memref<6x6x128xbf16, #tpu.memory_space<vmem>>, vector<1x4x128xbf16>
    %103 = vector.shape_cast %102 : vector<1x4x128xbf16> to vector<4x128xbf16>
    %c4_127 = arith.constant 4 : index
    %c2_128 = arith.constant 2 : index
    %c0_129 = arith.constant 0 : index
    %104 = vector.load %arg8[%c4_127, %c2_128, %c0_129] : memref<6x6x128xbf16, #tpu.memory_space<vmem>>, vector<1x4x128xbf16>
    %105 = vector.shape_cast %104 : vector<1x4x128xbf16> to vector<4x128xbf16>
    %c5 = arith.constant 5 : index
    %c0_130 = arith.constant 0 : index
    %c0_131 = arith.constant 0 : index
    %106 = vector.load %arg8[%c5, %c0_130, %c0_131] : memref<6x6x128xbf16, #tpu.memory_space<vmem>>, vector<1x4x128xbf16>
    %107 = vector.shape_cast %106 : vector<1x4x128xbf16> to vector<4x128xbf16>
    %c5_132 = arith.constant 5 : index
    %c1_133 = arith.constant 1 : index
    %c0_134 = arith.constant 0 : index
    %108 = vector.load %arg8[%c5_132, %c1_133, %c0_134] : memref<6x6x128xbf16, #tpu.memory_space<vmem>>, vector<1x4x128xbf16>
    %109 = vector.shape_cast %108 : vector<1x4x128xbf16> to vector<4x128xbf16>
    %c5_135 = arith.constant 5 : index
    %c2_136 = arith.constant 2 : index
    %c0_137 = arith.constant 0 : index
    %110 = vector.load %arg8[%c5_135, %c2_136, %c0_137] : memref<6x6x128xbf16, #tpu.memory_space<vmem>>, vector<1x4x128xbf16>
    %111 = vector.shape_cast %110 : vector<1x4x128xbf16> to vector<4x128xbf16>
    %112 = tpu.concatenate %95, %97, %99, %101, %103, %105, %107, %109, %111 in 1 : vector<4x128xbf16>, vector<4x128xbf16>, vector<4x128xbf16>, vector<4x128xbf16>, vector<4x128xbf16>, vector<4x128xbf16>, vector<4x128xbf16>, vector<4x128xbf16>, vector<4x128xbf16> -> vector<4x1152xbf16>
    %c0_138 = arith.constant 0 : index
    %c0_139 = arith.constant 0 : index
    %113 = vector.load %arg5[%c0_138, %c0_139] : memref<1152x128xbf16, #tpu.memory_space<vmem>>, vector<1152x128xbf16>
    %cst_140 = arith.constant dense<0.000000e+00> : vector<4x128xf32>
    %114 = tpu.matmul %112, %113, %cst_140 {dimension_numbers = #tpu.dot_dimension_numbers<[1], [0], [0], [1], [0, 0, 1, 1], [], []>} : vector<4x1152xbf16>, vector<1152x128xbf16>, vector<4x128xf32> -> vector<4x128xf32>
    %115 = tpu.concatenate %51, %72, %93, %114 in 0 : vector<4x128xf32>, vector<4x128xf32>, vector<4x128xf32>, vector<4x128xf32> -> vector<16x128xf32>
    %c0_141 = arith.constant 0 : index
    %c0_142 = arith.constant 0 : index
    %116 = vector.load %arg6[%c0_141, %c0_142] : memref<1x128xf32, #tpu.memory_space<vmem>>, vector<1x128xf32>
    %117 = vector.broadcast %116 : vector<1x128xf32> to vector<16x128xf32>
    %118 = arith.addf %115, %117 : vector<16x128xf32>
    %119 = arith.addf %118, %12 : vector<16x128xf32>
    %cst_143 = arith.constant 0.000000e+00 : f32
    %120 = vector.broadcast %cst_143 : f32 to vector<16x128xf32>
    %121 = arith.maximumf %119, %120 : vector<16x128xf32>
    %122 = arith.truncf %121 : vector<16x128xf32> to vector<16x128xbf16>
    %c0_144 = arith.constant 0 : index
    %c0_145 = arith.constant 0 : index
    %c0_146 = arith.constant 0 : index
    %123 = vector.load %arg7[%c0_144, %c0_145, %c0_146] : memref<1x16x128xbf16, #tpu.memory_space<vmem>>, vector<1x16x128xbf16>
    %124 = vector.shape_cast %123 : vector<1x16x128xbf16> to vector<16x128xbf16>
    %125 = vector.shape_cast %122 : vector<16x128xbf16> to vector<1x16x128xbf16>
    tpu.vector_store %arg7[%c0_144, %c0_145, %c0_146], %125 {strides = array<i32>} : memref<1x16x128xbf16, #tpu.memory_space<vmem>>, vector<1x16x128xbf16>,
    return
  }
  func.func @transform_0(%arg0: i32) -> (i32, i32, i32) {
    %c0_i32 = arith.constant 0 : i32
    %c0_i32_0 = arith.constant 0 : i32
    %c0_i32_1 = arith.constant 0 : i32
    return %arg0, %c0_i32, %c0_i32_0 : i32, i32, i32
  }
  func.func @transform_1(%arg0: i32) -> (i32, i32, i32) {
    %c0_i32 = arith.constant 0 : i32
    %c0_i32_0 = arith.constant 0 : i32
    %c0_i32_1 = arith.constant 0 : i32
    return %arg0, %c0_i32, %c0_i32_0 : i32, i32, i32
  }
  func.func @transform_2(%arg0: i32) -> (i32, i32) {
    %c0_i32 = arith.constant 0 : i32
    %c0_i32_0 = arith.constant 0 : i32
    %c0_i32_1 = arith.constant 0 : i32
    return %c0_i32, %c0_i32_0 : i32, i32
  }
  func.func @transform_3(%arg0: i32) -> (i32, i32) {
    %c0_i32 = arith.constant 0 : i32
    %c0_i32_0 = arith.constant 0 : i32
    %c0_i32_1 = arith.constant 0 : i32
    return %c0_i32, %c0_i32_0 : i32, i32
  }
  func.func @transform_4(%arg0: i32) -> (i32, i32) {
    %c0_i32 = arith.constant 0 : i32
    %c0_i32_0 = arith.constant 0 : i32
    %c0_i32_1 = arith.constant 0 : i32
    return %c0_i32, %c0_i32_0 : i32, i32
  }
  func.func @transform_5(%arg0: i32) -> (i32, i32) {
    %c0_i32 = arith.constant 0 : i32
    %c0_i32_0 = arith.constant 0 : i32
    %c0_i32_1 = arith.constant 0 : i32
    return %c0_i32, %c0_i32_0 : i32, i32
  }
  func.func @transform_6(%arg0: i32) -> (i32, i32, i32) {
    %c0_i32 = arith.constant 0 : i32
    %c0_i32_0 = arith.constant 0 : i32
    %c0_i32_1 = arith.constant 0 : i32
    return %arg0, %c0_i32, %c0_i32_0 : i32, i32, i32
  }
}

module attributes {stable_mosaic.version = 11 : i64} {
  func.func @_block_kernel(%arg0: i32, %arg1: memref<1x8x128xbf16, #tpu.memory_space<vmem>>, %arg2: memref<1x8x128xbf16, #tpu.memory_space<vmem>>, %arg3: memref<128x128xbf16, #tpu.memory_space<vmem>>, %arg4: memref<1x128xf32, #tpu.memory_space<vmem>>, %arg5: memref<1152x128xbf16, #tpu.memory_space<vmem>>, %arg6: memref<1x128xf32, #tpu.memory_space<vmem>>, %arg7: memref<128x128xbf16, #tpu.memory_space<vmem>>, %arg8: memref<1x128xf32, #tpu.memory_space<vmem>>, %arg9: memref<1x8x128xbf16, #tpu.memory_space<vmem>>, %arg10: memref<6x4x128xbf16, #tpu.memory_space<vmem>>) attributes {dimension_semantics = [#tpu.dimension_semantics<parallel>], iteration_bounds = array<i64: 2>, scalar_prefetch = 0 : i64, scratch_operands = 1 : i64, tpu.core_type = #tpu.core_type<tc>, window_params = [{transform_indices = @transform_0, window_bounds = array<i64: 1, 8, 128>}, {transform_indices = @transform_1, window_bounds = array<i64: 1, 8, 128>}, {pipeline_mode = #tpu.pipeline_mode<synchronous>, transform_indices = @transform_2, window_bounds = array<i64: 128, 128>}, {pipeline_mode = #tpu.pipeline_mode<synchronous>, transform_indices = @transform_3, window_bounds = array<i64: 1, 128>}, {pipeline_mode = #tpu.pipeline_mode<synchronous>, transform_indices = @transform_4, window_bounds = array<i64: 1152, 128>}, {pipeline_mode = #tpu.pipeline_mode<synchronous>, transform_indices = @transform_5, window_bounds = array<i64: 1, 128>}, {pipeline_mode = #tpu.pipeline_mode<synchronous>, transform_indices = @transform_6, window_bounds = array<i64: 128, 128>}, {pipeline_mode = #tpu.pipeline_mode<synchronous>, transform_indices = @transform_7, window_bounds = array<i64: 1, 128>}, {transform_indices = @transform_8, window_bounds = array<i64: 1, 8, 128>}]} {
    %c0 = arith.constant 0 : index
    %c0_0 = arith.constant 0 : index
    %c0_1 = arith.constant 0 : index
    %0 = vector.load %arg1[%c0, %c0_0, %c0_1] : memref<1x8x128xbf16, #tpu.memory_space<vmem>>, vector<1x8x128xbf16>
    %1 = vector.shape_cast %0 : vector<1x8x128xbf16> to vector<8x128xbf16>
    %c0_2 = arith.constant 0 : index
    %c0_3 = arith.constant 0 : index
    %2 = vector.load %arg3[%c0_2, %c0_3] : memref<128x128xbf16, #tpu.memory_space<vmem>>, vector<128x128xbf16>
    %cst = arith.constant dense<0.000000e+00> : vector<8x128xf32>
    %3 = tpu.matmul %1, %2, %cst {dimension_numbers = #tpu.dot_dimension_numbers<[1], [0], [0], [1], [0, 0, 1, 1], [], []>} : vector<8x128xbf16>, vector<128x128xbf16>, vector<8x128xf32> -> vector<8x128xf32>
    %c0_4 = arith.constant 0 : index
    %c0_5 = arith.constant 0 : index
    %4 = vector.load %arg4[%c0_4, %c0_5] : memref<1x128xf32, #tpu.memory_space<vmem>>, vector<1x128xf32>
    %5 = vector.broadcast %4 : vector<1x128xf32> to vector<8x128xf32>
    %6 = arith.addf %3, %5 : vector<8x128xf32>
    %cst_6 = arith.constant 0.000000e+00 : f32
    %7 = vector.broadcast %cst_6 : f32 to vector<8x128xf32>
    %8 = arith.maximumf %6, %7 : vector<8x128xf32>
    %9 = arith.truncf %8 : vector<8x128xf32> to vector<8x128xbf16>
    %c0_7 = arith.constant 0 : index
    %c0_8 = arith.constant 0 : index
    %c0_9 = arith.constant 0 : index
    %10 = vector.load %arg2[%c0_7, %c0_8, %c0_9] : memref<1x8x128xbf16, #tpu.memory_space<vmem>>, vector<1x8x128xbf16>
    %11 = vector.shape_cast %10 : vector<1x8x128xbf16> to vector<8x128xbf16>
    %c0_10 = arith.constant 0 : index
    %c0_11 = arith.constant 0 : index
    %12 = vector.load %arg7[%c0_10, %c0_11] : memref<128x128xbf16, #tpu.memory_space<vmem>>, vector<128x128xbf16>
    %cst_12 = arith.constant dense<0.000000e+00> : vector<8x128xf32>
    %13 = tpu.matmul %11, %12, %cst_12 {dimension_numbers = #tpu.dot_dimension_numbers<[1], [0], [0], [1], [0, 0, 1, 1], [], []>} : vector<8x128xbf16>, vector<128x128xbf16>, vector<8x128xf32> -> vector<8x128xf32>
    %c0_13 = arith.constant 0 : index
    %c0_14 = arith.constant 0 : index
    %14 = vector.load %arg8[%c0_13, %c0_14] : memref<1x128xf32, #tpu.memory_space<vmem>>, vector<1x128xf32>
    %15 = vector.broadcast %14 : vector<1x128xf32> to vector<8x128xf32>
    %16 = arith.addf %13, %15 : vector<8x128xf32>
    %cst_15 = arith.constant 0.000000e+00 : bf16
    %17 = vector.broadcast %cst_15 : bf16 to vector<6x4x128xbf16>
    %c0_16 = arith.constant 0 : index
    %c0_17 = arith.constant 0 : index
    %c0_18 = arith.constant 0 : index
    %18 = vector.load %arg10[%c0_16, %c0_17, %c0_18] : memref<6x4x128xbf16, #tpu.memory_space<vmem>>, vector<6x4x128xbf16>
    tpu.vector_store %arg10[%c0_16, %c0_17, %c0_18], %17 {strides = array<i32>} : memref<6x4x128xbf16, #tpu.memory_space<vmem>>, vector<6x4x128xbf16>,
    %19 = vector.extract_strided_slice %9 {offsets = [0, 0], sizes = [2, 128], strides = [1, 1]} : vector<8x128xbf16> to vector<2x128xbf16>
    %c1 = arith.constant 1 : index
    %c1_19 = arith.constant 1 : index
    %c0_20 = arith.constant 0 : index
    %20 = vector.load %arg10[%c1, %c1_19, %c0_20] : memref<6x4x128xbf16, #tpu.memory_space<vmem>>, vector<1x2x128xbf16>
    %21 = vector.shape_cast %20 : vector<1x2x128xbf16> to vector<2x128xbf16>
    %22 = vector.shape_cast %19 : vector<2x128xbf16> to vector<1x2x128xbf16>
    tpu.vector_store %arg10[%c1, %c1_19, %c0_20], %22 {strides = array<i32>} : memref<6x4x128xbf16, #tpu.memory_space<vmem>>, vector<1x2x128xbf16>,
    %23 = vector.extract_strided_slice %9 {offsets = [2, 0], sizes = [2, 128], strides = [1, 1]} : vector<8x128xbf16> to vector<2x128xbf16>
    %c2 = arith.constant 2 : index
    %c1_21 = arith.constant 1 : index
    %c0_22 = arith.constant 0 : index
    %24 = vector.load %arg10[%c2, %c1_21, %c0_22] : memref<6x4x128xbf16, #tpu.memory_space<vmem>>, vector<1x2x128xbf16>
    %25 = vector.shape_cast %24 : vector<1x2x128xbf16> to vector<2x128xbf16>
    %26 = vector.shape_cast %23 : vector<2x128xbf16> to vector<1x2x128xbf16>
    tpu.vector_store %arg10[%c2, %c1_21, %c0_22], %26 {strides = array<i32>} : memref<6x4x128xbf16, #tpu.memory_space<vmem>>, vector<1x2x128xbf16>,
    %27 = vector.extract_strided_slice %9 {offsets = [4, 0], sizes = [2, 128], strides = [1, 1]} : vector<8x128xbf16> to vector<2x128xbf16>
    %c3 = arith.constant 3 : index
    %c1_23 = arith.constant 1 : index
    %c0_24 = arith.constant 0 : index
    %28 = vector.load %arg10[%c3, %c1_23, %c0_24] : memref<6x4x128xbf16, #tpu.memory_space<vmem>>, vector<1x2x128xbf16>
    %29 = vector.shape_cast %28 : vector<1x2x128xbf16> to vector<2x128xbf16>
    %30 = vector.shape_cast %27 : vector<2x128xbf16> to vector<1x2x128xbf16>
    tpu.vector_store %arg10[%c3, %c1_23, %c0_24], %30 {strides = array<i32>} : memref<6x4x128xbf16, #tpu.memory_space<vmem>>, vector<1x2x128xbf16>,
    %31 = vector.extract_strided_slice %9 {offsets = [6, 0], sizes = [2, 128], strides = [1, 1]} : vector<8x128xbf16> to vector<2x128xbf16>
    %c4 = arith.constant 4 : index
    %c1_25 = arith.constant 1 : index
    %c0_26 = arith.constant 0 : index
    %32 = vector.load %arg10[%c4, %c1_25, %c0_26] : memref<6x4x128xbf16, #tpu.memory_space<vmem>>, vector<1x2x128xbf16>
    %33 = vector.shape_cast %32 : vector<1x2x128xbf16> to vector<2x128xbf16>
    %34 = vector.shape_cast %31 : vector<2x128xbf16> to vector<1x2x128xbf16>
    tpu.vector_store %arg10[%c4, %c1_25, %c0_26], %34 {strides = array<i32>} : memref<6x4x128xbf16, #tpu.memory_space<vmem>>, vector<1x2x128xbf16>,
    %c0_27 = arith.constant 0 : index
    %c0_28 = arith.constant 0 : index
    %c0_29 = arith.constant 0 : index
    %35 = vector.load %arg10[%c0_27, %c0_28, %c0_29] : memref<6x4x128xbf16, #tpu.memory_space<vmem>>, vector<1x2x128xbf16>
    %36 = vector.shape_cast %35 : vector<1x2x128xbf16> to vector<2x128xbf16>
    %c0_30 = arith.constant 0 : index
    %c1_31 = arith.constant 1 : index
    %c0_32 = arith.constant 0 : index
    %37 = vector.load %arg10[%c0_30, %c1_31, %c0_32] : memref<6x4x128xbf16, #tpu.memory_space<vmem>>, vector<1x2x128xbf16>
    %38 = vector.shape_cast %37 : vector<1x2x128xbf16> to vector<2x128xbf16>
    %c0_33 = arith.constant 0 : index
    %c2_34 = arith.constant 2 : index
    %c0_35 = arith.constant 0 : index
    %39 = vector.load %arg10[%c0_33, %c2_34, %c0_35] : memref<6x4x128xbf16, #tpu.memory_space<vmem>>, vector<1x2x128xbf16>
    %40 = vector.shape_cast %39 : vector<1x2x128xbf16> to vector<2x128xbf16>
    %c1_36 = arith.constant 1 : index
    %c0_37 = arith.constant 0 : index
    %c0_38 = arith.constant 0 : index
    %41 = vector.load %arg10[%c1_36, %c0_37, %c0_38] : memref<6x4x128xbf16, #tpu.memory_space<vmem>>, vector<1x2x128xbf16>
    %42 = vector.shape_cast %41 : vector<1x2x128xbf16> to vector<2x128xbf16>
    %c1_39 = arith.constant 1 : index
    %c1_40 = arith.constant 1 : index
    %c0_41 = arith.constant 0 : index
    %43 = vector.load %arg10[%c1_39, %c1_40, %c0_41] : memref<6x4x128xbf16, #tpu.memory_space<vmem>>, vector<1x2x128xbf16>
    %44 = vector.shape_cast %43 : vector<1x2x128xbf16> to vector<2x128xbf16>
    %c1_42 = arith.constant 1 : index
    %c2_43 = arith.constant 2 : index
    %c0_44 = arith.constant 0 : index
    %45 = vector.load %arg10[%c1_42, %c2_43, %c0_44] : memref<6x4x128xbf16, #tpu.memory_space<vmem>>, vector<1x2x128xbf16>
    %46 = vector.shape_cast %45 : vector<1x2x128xbf16> to vector<2x128xbf16>
    %c2_45 = arith.constant 2 : index
    %c0_46 = arith.constant 0 : index
    %c0_47 = arith.constant 0 : index
    %47 = vector.load %arg10[%c2_45, %c0_46, %c0_47] : memref<6x4x128xbf16, #tpu.memory_space<vmem>>, vector<1x2x128xbf16>
    %48 = vector.shape_cast %47 : vector<1x2x128xbf16> to vector<2x128xbf16>
    %c2_48 = arith.constant 2 : index
    %c1_49 = arith.constant 1 : index
    %c0_50 = arith.constant 0 : index
    %49 = vector.load %arg10[%c2_48, %c1_49, %c0_50] : memref<6x4x128xbf16, #tpu.memory_space<vmem>>, vector<1x2x128xbf16>
    %50 = vector.shape_cast %49 : vector<1x2x128xbf16> to vector<2x128xbf16>
    %c2_51 = arith.constant 2 : index
    %c2_52 = arith.constant 2 : index
    %c0_53 = arith.constant 0 : index
    %51 = vector.load %arg10[%c2_51, %c2_52, %c0_53] : memref<6x4x128xbf16, #tpu.memory_space<vmem>>, vector<1x2x128xbf16>
    %52 = vector.shape_cast %51 : vector<1x2x128xbf16> to vector<2x128xbf16>
    %53 = tpu.concatenate %36, %38, %40, %42, %44, %46, %48, %50, %52 in 1 : vector<2x128xbf16>, vector<2x128xbf16>, vector<2x128xbf16>, vector<2x128xbf16>, vector<2x128xbf16>, vector<2x128xbf16>, vector<2x128xbf16>, vector<2x128xbf16>, vector<2x128xbf16> -> vector<2x1152xbf16>
    %c0_54 = arith.constant 0 : index
    %c0_55 = arith.constant 0 : index
    %54 = vector.load %arg5[%c0_54, %c0_55] : memref<1152x128xbf16, #tpu.memory_space<vmem>>, vector<1152x128xbf16>
    %cst_56 = arith.constant dense<0.000000e+00> : vector<2x128xf32>
    %55 = tpu.matmul %53, %54, %cst_56 {dimension_numbers = #tpu.dot_dimension_numbers<[1], [0], [0], [1], [0, 0, 1, 1], [], []>} : vector<2x1152xbf16>, vector<1152x128xbf16>, vector<2x128xf32> -> vector<2x128xf32>
    %c1_57 = arith.constant 1 : index
    %c0_58 = arith.constant 0 : index
    %c0_59 = arith.constant 0 : index
    %56 = vector.load %arg10[%c1_57, %c0_58, %c0_59] : memref<6x4x128xbf16, #tpu.memory_space<vmem>>, vector<1x2x128xbf16>
    %57 = vector.shape_cast %56 : vector<1x2x128xbf16> to vector<2x128xbf16>
    %c1_60 = arith.constant 1 : index
    %c1_61 = arith.constant 1 : index
    %c0_62 = arith.constant 0 : index
    %58 = vector.load %arg10[%c1_60, %c1_61, %c0_62] : memref<6x4x128xbf16, #tpu.memory_space<vmem>>, vector<1x2x128xbf16>
    %59 = vector.shape_cast %58 : vector<1x2x128xbf16> to vector<2x128xbf16>
    %c1_63 = arith.constant 1 : index
    %c2_64 = arith.constant 2 : index
    %c0_65 = arith.constant 0 : index
    %60 = vector.load %arg10[%c1_63, %c2_64, %c0_65] : memref<6x4x128xbf16, #tpu.memory_space<vmem>>, vector<1x2x128xbf16>
    %61 = vector.shape_cast %60 : vector<1x2x128xbf16> to vector<2x128xbf16>
    %c2_66 = arith.constant 2 : index
    %c0_67 = arith.constant 0 : index
    %c0_68 = arith.constant 0 : index
    %62 = vector.load %arg10[%c2_66, %c0_67, %c0_68] : memref<6x4x128xbf16, #tpu.memory_space<vmem>>, vector<1x2x128xbf16>
    %63 = vector.shape_cast %62 : vector<1x2x128xbf16> to vector<2x128xbf16>
    %c2_69 = arith.constant 2 : index
    %c1_70 = arith.constant 1 : index
    %c0_71 = arith.constant 0 : index
    %64 = vector.load %arg10[%c2_69, %c1_70, %c0_71] : memref<6x4x128xbf16, #tpu.memory_space<vmem>>, vector<1x2x128xbf16>
    %65 = vector.shape_cast %64 : vector<1x2x128xbf16> to vector<2x128xbf16>
    %c2_72 = arith.constant 2 : index
    %c2_73 = arith.constant 2 : index
    %c0_74 = arith.constant 0 : index
    %66 = vector.load %arg10[%c2_72, %c2_73, %c0_74] : memref<6x4x128xbf16, #tpu.memory_space<vmem>>, vector<1x2x128xbf16>
    %67 = vector.shape_cast %66 : vector<1x2x128xbf16> to vector<2x128xbf16>
    %c3_75 = arith.constant 3 : index
    %c0_76 = arith.constant 0 : index
    %c0_77 = arith.constant 0 : index
    %68 = vector.load %arg10[%c3_75, %c0_76, %c0_77] : memref<6x4x128xbf16, #tpu.memory_space<vmem>>, vector<1x2x128xbf16>
    %69 = vector.shape_cast %68 : vector<1x2x128xbf16> to vector<2x128xbf16>
    %c3_78 = arith.constant 3 : index
    %c1_79 = arith.constant 1 : index
    %c0_80 = arith.constant 0 : index
    %70 = vector.load %arg10[%c3_78, %c1_79, %c0_80] : memref<6x4x128xbf16, #tpu.memory_space<vmem>>, vector<1x2x128xbf16>
    %71 = vector.shape_cast %70 : vector<1x2x128xbf16> to vector<2x128xbf16>
    %c3_81 = arith.constant 3 : index
    %c2_82 = arith.constant 2 : index
    %c0_83 = arith.constant 0 : index
    %72 = vector.load %arg10[%c3_81, %c2_82, %c0_83] : memref<6x4x128xbf16, #tpu.memory_space<vmem>>, vector<1x2x128xbf16>
    %73 = vector.shape_cast %72 : vector<1x2x128xbf16> to vector<2x128xbf16>
    %74 = tpu.concatenate %57, %59, %61, %63, %65, %67, %69, %71, %73 in 1 : vector<2x128xbf16>, vector<2x128xbf16>, vector<2x128xbf16>, vector<2x128xbf16>, vector<2x128xbf16>, vector<2x128xbf16>, vector<2x128xbf16>, vector<2x128xbf16>, vector<2x128xbf16> -> vector<2x1152xbf16>
    %c0_84 = arith.constant 0 : index
    %c0_85 = arith.constant 0 : index
    %75 = vector.load %arg5[%c0_84, %c0_85] : memref<1152x128xbf16, #tpu.memory_space<vmem>>, vector<1152x128xbf16>
    %cst_86 = arith.constant dense<0.000000e+00> : vector<2x128xf32>
    %76 = tpu.matmul %74, %75, %cst_86 {dimension_numbers = #tpu.dot_dimension_numbers<[1], [0], [0], [1], [0, 0, 1, 1], [], []>} : vector<2x1152xbf16>, vector<1152x128xbf16>, vector<2x128xf32> -> vector<2x128xf32>
    %c2_87 = arith.constant 2 : index
    %c0_88 = arith.constant 0 : index
    %c0_89 = arith.constant 0 : index
    %77 = vector.load %arg10[%c2_87, %c0_88, %c0_89] : memref<6x4x128xbf16, #tpu.memory_space<vmem>>, vector<1x2x128xbf16>
    %78 = vector.shape_cast %77 : vector<1x2x128xbf16> to vector<2x128xbf16>
    %c2_90 = arith.constant 2 : index
    %c1_91 = arith.constant 1 : index
    %c0_92 = arith.constant 0 : index
    %79 = vector.load %arg10[%c2_90, %c1_91, %c0_92] : memref<6x4x128xbf16, #tpu.memory_space<vmem>>, vector<1x2x128xbf16>
    %80 = vector.shape_cast %79 : vector<1x2x128xbf16> to vector<2x128xbf16>
    %c2_93 = arith.constant 2 : index
    %c2_94 = arith.constant 2 : index
    %c0_95 = arith.constant 0 : index
    %81 = vector.load %arg10[%c2_93, %c2_94, %c0_95] : memref<6x4x128xbf16, #tpu.memory_space<vmem>>, vector<1x2x128xbf16>
    %82 = vector.shape_cast %81 : vector<1x2x128xbf16> to vector<2x128xbf16>
    %c3_96 = arith.constant 3 : index
    %c0_97 = arith.constant 0 : index
    %c0_98 = arith.constant 0 : index
    %83 = vector.load %arg10[%c3_96, %c0_97, %c0_98] : memref<6x4x128xbf16, #tpu.memory_space<vmem>>, vector<1x2x128xbf16>
    %84 = vector.shape_cast %83 : vector<1x2x128xbf16> to vector<2x128xbf16>
    %c3_99 = arith.constant 3 : index
    %c1_100 = arith.constant 1 : index
    %c0_101 = arith.constant 0 : index
    %85 = vector.load %arg10[%c3_99, %c1_100, %c0_101] : memref<6x4x128xbf16, #tpu.memory_space<vmem>>, vector<1x2x128xbf16>
    %86 = vector.shape_cast %85 : vector<1x2x128xbf16> to vector<2x128xbf16>
    %c3_102 = arith.constant 3 : index
    %c2_103 = arith.constant 2 : index
    %c0_104 = arith.constant 0 : index
    %87 = vector.load %arg10[%c3_102, %c2_103, %c0_104] : memref<6x4x128xbf16, #tpu.memory_space<vmem>>, vector<1x2x128xbf16>
    %88 = vector.shape_cast %87 : vector<1x2x128xbf16> to vector<2x128xbf16>
    %c4_105 = arith.constant 4 : index
    %c0_106 = arith.constant 0 : index
    %c0_107 = arith.constant 0 : index
    %89 = vector.load %arg10[%c4_105, %c0_106, %c0_107] : memref<6x4x128xbf16, #tpu.memory_space<vmem>>, vector<1x2x128xbf16>
    %90 = vector.shape_cast %89 : vector<1x2x128xbf16> to vector<2x128xbf16>
    %c4_108 = arith.constant 4 : index
    %c1_109 = arith.constant 1 : index
    %c0_110 = arith.constant 0 : index
    %91 = vector.load %arg10[%c4_108, %c1_109, %c0_110] : memref<6x4x128xbf16, #tpu.memory_space<vmem>>, vector<1x2x128xbf16>
    %92 = vector.shape_cast %91 : vector<1x2x128xbf16> to vector<2x128xbf16>
    %c4_111 = arith.constant 4 : index
    %c2_112 = arith.constant 2 : index
    %c0_113 = arith.constant 0 : index
    %93 = vector.load %arg10[%c4_111, %c2_112, %c0_113] : memref<6x4x128xbf16, #tpu.memory_space<vmem>>, vector<1x2x128xbf16>
    %94 = vector.shape_cast %93 : vector<1x2x128xbf16> to vector<2x128xbf16>
    %95 = tpu.concatenate %78, %80, %82, %84, %86, %88, %90, %92, %94 in 1 : vector<2x128xbf16>, vector<2x128xbf16>, vector<2x128xbf16>, vector<2x128xbf16>, vector<2x128xbf16>, vector<2x128xbf16>, vector<2x128xbf16>, vector<2x128xbf16>, vector<2x128xbf16> -> vector<2x1152xbf16>
    %c0_114 = arith.constant 0 : index
    %c0_115 = arith.constant 0 : index
    %96 = vector.load %arg5[%c0_114, %c0_115] : memref<1152x128xbf16, #tpu.memory_space<vmem>>, vector<1152x128xbf16>
    %cst_116 = arith.constant dense<0.000000e+00> : vector<2x128xf32>
    %97 = tpu.matmul %95, %96, %cst_116 {dimension_numbers = #tpu.dot_dimension_numbers<[1], [0], [0], [1], [0, 0, 1, 1], [], []>} : vector<2x1152xbf16>, vector<1152x128xbf16>, vector<2x128xf32> -> vector<2x128xf32>
    %c3_117 = arith.constant 3 : index
    %c0_118 = arith.constant 0 : index
    %c0_119 = arith.constant 0 : index
    %98 = vector.load %arg10[%c3_117, %c0_118, %c0_119] : memref<6x4x128xbf16, #tpu.memory_space<vmem>>, vector<1x2x128xbf16>
    %99 = vector.shape_cast %98 : vector<1x2x128xbf16> to vector<2x128xbf16>
    %c3_120 = arith.constant 3 : index
    %c1_121 = arith.constant 1 : index
    %c0_122 = arith.constant 0 : index
    %100 = vector.load %arg10[%c3_120, %c1_121, %c0_122] : memref<6x4x128xbf16, #tpu.memory_space<vmem>>, vector<1x2x128xbf16>
    %101 = vector.shape_cast %100 : vector<1x2x128xbf16> to vector<2x128xbf16>
    %c3_123 = arith.constant 3 : index
    %c2_124 = arith.constant 2 : index
    %c0_125 = arith.constant 0 : index
    %102 = vector.load %arg10[%c3_123, %c2_124, %c0_125] : memref<6x4x128xbf16, #tpu.memory_space<vmem>>, vector<1x2x128xbf16>
    %103 = vector.shape_cast %102 : vector<1x2x128xbf16> to vector<2x128xbf16>
    %c4_126 = arith.constant 4 : index
    %c0_127 = arith.constant 0 : index
    %c0_128 = arith.constant 0 : index
    %104 = vector.load %arg10[%c4_126, %c0_127, %c0_128] : memref<6x4x128xbf16, #tpu.memory_space<vmem>>, vector<1x2x128xbf16>
    %105 = vector.shape_cast %104 : vector<1x2x128xbf16> to vector<2x128xbf16>
    %c4_129 = arith.constant 4 : index
    %c1_130 = arith.constant 1 : index
    %c0_131 = arith.constant 0 : index
    %106 = vector.load %arg10[%c4_129, %c1_130, %c0_131] : memref<6x4x128xbf16, #tpu.memory_space<vmem>>, vector<1x2x128xbf16>
    %107 = vector.shape_cast %106 : vector<1x2x128xbf16> to vector<2x128xbf16>
    %c4_132 = arith.constant 4 : index
    %c2_133 = arith.constant 2 : index
    %c0_134 = arith.constant 0 : index
    %108 = vector.load %arg10[%c4_132, %c2_133, %c0_134] : memref<6x4x128xbf16, #tpu.memory_space<vmem>>, vector<1x2x128xbf16>
    %109 = vector.shape_cast %108 : vector<1x2x128xbf16> to vector<2x128xbf16>
    %c5 = arith.constant 5 : index
    %c0_135 = arith.constant 0 : index
    %c0_136 = arith.constant 0 : index
    %110 = vector.load %arg10[%c5, %c0_135, %c0_136] : memref<6x4x128xbf16, #tpu.memory_space<vmem>>, vector<1x2x128xbf16>
    %111 = vector.shape_cast %110 : vector<1x2x128xbf16> to vector<2x128xbf16>
    %c5_137 = arith.constant 5 : index
    %c1_138 = arith.constant 1 : index
    %c0_139 = arith.constant 0 : index
    %112 = vector.load %arg10[%c5_137, %c1_138, %c0_139] : memref<6x4x128xbf16, #tpu.memory_space<vmem>>, vector<1x2x128xbf16>
    %113 = vector.shape_cast %112 : vector<1x2x128xbf16> to vector<2x128xbf16>
    %c5_140 = arith.constant 5 : index
    %c2_141 = arith.constant 2 : index
    %c0_142 = arith.constant 0 : index
    %114 = vector.load %arg10[%c5_140, %c2_141, %c0_142] : memref<6x4x128xbf16, #tpu.memory_space<vmem>>, vector<1x2x128xbf16>
    %115 = vector.shape_cast %114 : vector<1x2x128xbf16> to vector<2x128xbf16>
    %116 = tpu.concatenate %99, %101, %103, %105, %107, %109, %111, %113, %115 in 1 : vector<2x128xbf16>, vector<2x128xbf16>, vector<2x128xbf16>, vector<2x128xbf16>, vector<2x128xbf16>, vector<2x128xbf16>, vector<2x128xbf16>, vector<2x128xbf16>, vector<2x128xbf16> -> vector<2x1152xbf16>
    %c0_143 = arith.constant 0 : index
    %c0_144 = arith.constant 0 : index
    %117 = vector.load %arg5[%c0_143, %c0_144] : memref<1152x128xbf16, #tpu.memory_space<vmem>>, vector<1152x128xbf16>
    %cst_145 = arith.constant dense<0.000000e+00> : vector<2x128xf32>
    %118 = tpu.matmul %116, %117, %cst_145 {dimension_numbers = #tpu.dot_dimension_numbers<[1], [0], [0], [1], [0, 0, 1, 1], [], []>} : vector<2x1152xbf16>, vector<1152x128xbf16>, vector<2x128xf32> -> vector<2x128xf32>
    %119 = tpu.concatenate %55, %76, %97, %118 in 0 : vector<2x128xf32>, vector<2x128xf32>, vector<2x128xf32>, vector<2x128xf32> -> vector<8x128xf32>
    %c0_146 = arith.constant 0 : index
    %c0_147 = arith.constant 0 : index
    %120 = vector.load %arg6[%c0_146, %c0_147] : memref<1x128xf32, #tpu.memory_space<vmem>>, vector<1x128xf32>
    %121 = vector.broadcast %120 : vector<1x128xf32> to vector<8x128xf32>
    %122 = arith.addf %119, %121 : vector<8x128xf32>
    %123 = arith.addf %122, %16 : vector<8x128xf32>
    %cst_148 = arith.constant 0.000000e+00 : f32
    %124 = vector.broadcast %cst_148 : f32 to vector<8x128xf32>
    %125 = arith.maximumf %123, %124 : vector<8x128xf32>
    %126 = arith.truncf %125 : vector<8x128xf32> to vector<8x128xbf16>
    %c0_149 = arith.constant 0 : index
    %c0_150 = arith.constant 0 : index
    %c0_151 = arith.constant 0 : index
    %127 = vector.load %arg9[%c0_149, %c0_150, %c0_151] : memref<1x8x128xbf16, #tpu.memory_space<vmem>>, vector<1x8x128xbf16>
    %128 = vector.shape_cast %127 : vector<1x8x128xbf16> to vector<8x128xbf16>
    %129 = vector.shape_cast %126 : vector<8x128xbf16> to vector<1x8x128xbf16>
    tpu.vector_store %arg9[%c0_149, %c0_150, %c0_151], %129 {strides = array<i32>} : memref<1x8x128xbf16, #tpu.memory_space<vmem>>, vector<1x8x128xbf16>,
    return
  }
  func.func @transform_0(%arg0: i32) -> (i32, i32, i32) {
    %c0_i32 = arith.constant 0 : i32
    %c0_i32_0 = arith.constant 0 : i32
    %c0_i32_1 = arith.constant 0 : i32
    return %arg0, %c0_i32, %c0_i32_0 : i32, i32, i32
  }
  func.func @transform_1(%arg0: i32) -> (i32, i32, i32) {
    %c0_i32 = arith.constant 0 : i32
    %c0_i32_0 = arith.constant 0 : i32
    %c0_i32_1 = arith.constant 0 : i32
    return %arg0, %c0_i32, %c0_i32_0 : i32, i32, i32
  }
  func.func @transform_2(%arg0: i32) -> (i32, i32) {
    %c0_i32 = arith.constant 0 : i32
    %c0_i32_0 = arith.constant 0 : i32
    %c0_i32_1 = arith.constant 0 : i32
    return %c0_i32, %c0_i32_0 : i32, i32
  }
  func.func @transform_3(%arg0: i32) -> (i32, i32) {
    %c0_i32 = arith.constant 0 : i32
    %c0_i32_0 = arith.constant 0 : i32
    %c0_i32_1 = arith.constant 0 : i32
    return %c0_i32, %c0_i32_0 : i32, i32
  }
  func.func @transform_4(%arg0: i32) -> (i32, i32) {
    %c0_i32 = arith.constant 0 : i32
    %c0_i32_0 = arith.constant 0 : i32
    %c0_i32_1 = arith.constant 0 : i32
    return %c0_i32, %c0_i32_0 : i32, i32
  }
  func.func @transform_5(%arg0: i32) -> (i32, i32) {
    %c0_i32 = arith.constant 0 : i32
    %c0_i32_0 = arith.constant 0 : i32
    %c0_i32_1 = arith.constant 0 : i32
    return %c0_i32, %c0_i32_0 : i32, i32
  }
  func.func @transform_6(%arg0: i32) -> (i32, i32) {
    %c0_i32 = arith.constant 0 : i32
    %c0_i32_0 = arith.constant 0 : i32
    %c0_i32_1 = arith.constant 0 : i32
    return %c0_i32, %c0_i32_0 : i32, i32
  }
  func.func @transform_7(%arg0: i32) -> (i32, i32) {
    %c0_i32 = arith.constant 0 : i32
    %c0_i32_0 = arith.constant 0 : i32
    %c0_i32_1 = arith.constant 0 : i32
    return %c0_i32, %c0_i32_0 : i32, i32
  }
  func.func @transform_8(%arg0: i32) -> (i32, i32, i32) {
    %c0_i32 = arith.constant 0 : i32
    %c0_i32_0 = arith.constant 0 : i32
    %c0_i32_1 = arith.constant 0 : i32
    return %arg0, %c0_i32, %c0_i32_0 : i32, i32, i32
  }
}

module attributes {stable_mosaic.version = 11 : i64} {
  func.func @_block_kernel(%arg0: i32, %arg1: memref<1x4x256xbf16, #tpu.memory_space<vmem>>, %arg2: memref<1x4x128xbf16, #tpu.memory_space<vmem>>, %arg3: memref<256x128xbf16, #tpu.memory_space<vmem>>, %arg4: memref<1x128xf32, #tpu.memory_space<vmem>>, %arg5: memref<1152x128xbf16, #tpu.memory_space<vmem>>, %arg6: memref<1x128xf32, #tpu.memory_space<vmem>>, %arg7: memref<128x128xbf16, #tpu.memory_space<vmem>>, %arg8: memref<1x128xf32, #tpu.memory_space<vmem>>, %arg9: memref<1x4x128xbf16, #tpu.memory_space<vmem>>, %arg10: memref<6x3x128xbf16, #tpu.memory_space<vmem>>) attributes {dimension_semantics = [#tpu.dimension_semantics<parallel>], iteration_bounds = array<i64: 2>, scalar_prefetch = 0 : i64, scratch_operands = 1 : i64, tpu.core_type = #tpu.core_type<tc>, window_params = [{transform_indices = @transform_0, window_bounds = array<i64: 1, 4, 256>}, {transform_indices = @transform_1, window_bounds = array<i64: 1, 4, 128>}, {pipeline_mode = #tpu.pipeline_mode<synchronous>, transform_indices = @transform_2, window_bounds = array<i64: 256, 128>}, {pipeline_mode = #tpu.pipeline_mode<synchronous>, transform_indices = @transform_3, window_bounds = array<i64: 1, 128>}, {pipeline_mode = #tpu.pipeline_mode<synchronous>, transform_indices = @transform_4, window_bounds = array<i64: 1152, 128>}, {pipeline_mode = #tpu.pipeline_mode<synchronous>, transform_indices = @transform_5, window_bounds = array<i64: 1, 128>}, {pipeline_mode = #tpu.pipeline_mode<synchronous>, transform_indices = @transform_6, window_bounds = array<i64: 128, 128>}, {pipeline_mode = #tpu.pipeline_mode<synchronous>, transform_indices = @transform_7, window_bounds = array<i64: 1, 128>}, {transform_indices = @transform_8, window_bounds = array<i64: 1, 4, 128>}]} {
    %c0 = arith.constant 0 : index
    %c0_0 = arith.constant 0 : index
    %c0_1 = arith.constant 0 : index
    %0 = vector.load %arg1[%c0, %c0_0, %c0_1] : memref<1x4x256xbf16, #tpu.memory_space<vmem>>, vector<1x4x256xbf16>
    %1 = vector.shape_cast %0 : vector<1x4x256xbf16> to vector<4x256xbf16>
    %c0_2 = arith.constant 0 : index
    %c0_3 = arith.constant 0 : index
    %2 = vector.load %arg3[%c0_2, %c0_3] : memref<256x128xbf16, #tpu.memory_space<vmem>>, vector<256x128xbf16>
    %cst = arith.constant dense<0.000000e+00> : vector<4x128xf32>
    %3 = tpu.matmul %1, %2, %cst {dimension_numbers = #tpu.dot_dimension_numbers<[1], [0], [0], [1], [0, 0, 1, 1], [], []>} : vector<4x256xbf16>, vector<256x128xbf16>, vector<4x128xf32> -> vector<4x128xf32>
    %c0_4 = arith.constant 0 : index
    %c0_5 = arith.constant 0 : index
    %4 = vector.load %arg4[%c0_4, %c0_5] : memref<1x128xf32, #tpu.memory_space<vmem>>, vector<1x128xf32>
    %5 = vector.broadcast %4 : vector<1x128xf32> to vector<4x128xf32>
    %6 = arith.addf %3, %5 : vector<4x128xf32>
    %cst_6 = arith.constant 0.000000e+00 : f32
    %7 = vector.broadcast %cst_6 : f32 to vector<4x128xf32>
    %8 = arith.maximumf %6, %7 : vector<4x128xf32>
    %9 = arith.truncf %8 : vector<4x128xf32> to vector<4x128xbf16>
    %c0_7 = arith.constant 0 : index
    %c0_8 = arith.constant 0 : index
    %c0_9 = arith.constant 0 : index
    %10 = vector.load %arg2[%c0_7, %c0_8, %c0_9] : memref<1x4x128xbf16, #tpu.memory_space<vmem>>, vector<1x4x128xbf16>
    %11 = vector.shape_cast %10 : vector<1x4x128xbf16> to vector<4x128xbf16>
    %c0_10 = arith.constant 0 : index
    %c0_11 = arith.constant 0 : index
    %12 = vector.load %arg7[%c0_10, %c0_11] : memref<128x128xbf16, #tpu.memory_space<vmem>>, vector<128x128xbf16>
    %cst_12 = arith.constant dense<0.000000e+00> : vector<4x128xf32>
    %13 = tpu.matmul %11, %12, %cst_12 {dimension_numbers = #tpu.dot_dimension_numbers<[1], [0], [0], [1], [0, 0, 1, 1], [], []>} : vector<4x128xbf16>, vector<128x128xbf16>, vector<4x128xf32> -> vector<4x128xf32>
    %c0_13 = arith.constant 0 : index
    %c0_14 = arith.constant 0 : index
    %14 = vector.load %arg8[%c0_13, %c0_14] : memref<1x128xf32, #tpu.memory_space<vmem>>, vector<1x128xf32>
    %15 = vector.broadcast %14 : vector<1x128xf32> to vector<4x128xf32>
    %16 = arith.addf %13, %15 : vector<4x128xf32>
    %cst_15 = arith.constant 0.000000e+00 : bf16
    %17 = vector.broadcast %cst_15 : bf16 to vector<6x3x128xbf16>
    %c0_16 = arith.constant 0 : index
    %c0_17 = arith.constant 0 : index
    %c0_18 = arith.constant 0 : index
    %18 = vector.load %arg10[%c0_16, %c0_17, %c0_18] : memref<6x3x128xbf16, #tpu.memory_space<vmem>>, vector<6x3x128xbf16>
    tpu.vector_store %arg10[%c0_16, %c0_17, %c0_18], %17 {strides = array<i32>} : memref<6x3x128xbf16, #tpu.memory_space<vmem>>, vector<6x3x128xbf16>,
    %19 = vector.extract_strided_slice %9 {offsets = [0, 0], sizes = [1, 128], strides = [1, 1]} : vector<4x128xbf16> to vector<1x128xbf16>
    %c1 = arith.constant 1 : index
    %c1_19 = arith.constant 1 : index
    %c0_20 = arith.constant 0 : index
    %20 = vector.load %arg10[%c1, %c1_19, %c0_20] : memref<6x3x128xbf16, #tpu.memory_space<vmem>>, vector<1x1x128xbf16>
    %21 = vector.shape_cast %20 : vector<1x1x128xbf16> to vector<1x128xbf16>
    %22 = vector.shape_cast %19 : vector<1x128xbf16> to vector<1x1x128xbf16>
    tpu.vector_store %arg10[%c1, %c1_19, %c0_20], %22 {strides = array<i32>} : memref<6x3x128xbf16, #tpu.memory_space<vmem>>, vector<1x1x128xbf16>,
    %23 = vector.extract_strided_slice %9 {offsets = [1, 0], sizes = [1, 128], strides = [1, 1]} : vector<4x128xbf16> to vector<1x128xbf16>
    %c2 = arith.constant 2 : index
    %c1_21 = arith.constant 1 : index
    %c0_22 = arith.constant 0 : index
    %24 = vector.load %arg10[%c2, %c1_21, %c0_22] : memref<6x3x128xbf16, #tpu.memory_space<vmem>>, vector<1x1x128xbf16>
    %25 = vector.shape_cast %24 : vector<1x1x128xbf16> to vector<1x128xbf16>
    %26 = vector.shape_cast %23 : vector<1x128xbf16> to vector<1x1x128xbf16>
    tpu.vector_store %arg10[%c2, %c1_21, %c0_22], %26 {strides = array<i32>} : memref<6x3x128xbf16, #tpu.memory_space<vmem>>, vector<1x1x128xbf16>,
    %27 = vector.extract_strided_slice %9 {offsets = [2, 0], sizes = [1, 128], strides = [1, 1]} : vector<4x128xbf16> to vector<1x128xbf16>
    %c3 = arith.constant 3 : index
    %c1_23 = arith.constant 1 : index
    %c0_24 = arith.constant 0 : index
    %28 = vector.load %arg10[%c3, %c1_23, %c0_24] : memref<6x3x128xbf16, #tpu.memory_space<vmem>>, vector<1x1x128xbf16>
    %29 = vector.shape_cast %28 : vector<1x1x128xbf16> to vector<1x128xbf16>
    %30 = vector.shape_cast %27 : vector<1x128xbf16> to vector<1x1x128xbf16>
    tpu.vector_store %arg10[%c3, %c1_23, %c0_24], %30 {strides = array<i32>} : memref<6x3x128xbf16, #tpu.memory_space<vmem>>, vector<1x1x128xbf16>,
    %31 = vector.extract_strided_slice %9 {offsets = [3, 0], sizes = [1, 128], strides = [1, 1]} : vector<4x128xbf16> to vector<1x128xbf16>
    %c4 = arith.constant 4 : index
    %c1_25 = arith.constant 1 : index
    %c0_26 = arith.constant 0 : index
    %32 = vector.load %arg10[%c4, %c1_25, %c0_26] : memref<6x3x128xbf16, #tpu.memory_space<vmem>>, vector<1x1x128xbf16>
    %33 = vector.shape_cast %32 : vector<1x1x128xbf16> to vector<1x128xbf16>
    %34 = vector.shape_cast %31 : vector<1x128xbf16> to vector<1x1x128xbf16>
    tpu.vector_store %arg10[%c4, %c1_25, %c0_26], %34 {strides = array<i32>} : memref<6x3x128xbf16, #tpu.memory_space<vmem>>, vector<1x1x128xbf16>,
    %c0_27 = arith.constant 0 : index
    %c0_28 = arith.constant 0 : index
    %c0_29 = arith.constant 0 : index
    %35 = vector.load %arg10[%c0_27, %c0_28, %c0_29] : memref<6x3x128xbf16, #tpu.memory_space<vmem>>, vector<1x1x128xbf16>
    %36 = vector.shape_cast %35 : vector<1x1x128xbf16> to vector<1x128xbf16>
    %c0_30 = arith.constant 0 : index
    %c1_31 = arith.constant 1 : index
    %c0_32 = arith.constant 0 : index
    %37 = vector.load %arg10[%c0_30, %c1_31, %c0_32] : memref<6x3x128xbf16, #tpu.memory_space<vmem>>, vector<1x1x128xbf16>
    %38 = vector.shape_cast %37 : vector<1x1x128xbf16> to vector<1x128xbf16>
    %c0_33 = arith.constant 0 : index
    %c2_34 = arith.constant 2 : index
    %c0_35 = arith.constant 0 : index
    %39 = vector.load %arg10[%c0_33, %c2_34, %c0_35] : memref<6x3x128xbf16, #tpu.memory_space<vmem>>, vector<1x1x128xbf16>
    %40 = vector.shape_cast %39 : vector<1x1x128xbf16> to vector<1x128xbf16>
    %c1_36 = arith.constant 1 : index
    %c0_37 = arith.constant 0 : index
    %c0_38 = arith.constant 0 : index
    %41 = vector.load %arg10[%c1_36, %c0_37, %c0_38] : memref<6x3x128xbf16, #tpu.memory_space<vmem>>, vector<1x1x128xbf16>
    %42 = vector.shape_cast %41 : vector<1x1x128xbf16> to vector<1x128xbf16>
    %c1_39 = arith.constant 1 : index
    %c1_40 = arith.constant 1 : index
    %c0_41 = arith.constant 0 : index
    %43 = vector.load %arg10[%c1_39, %c1_40, %c0_41] : memref<6x3x128xbf16, #tpu.memory_space<vmem>>, vector<1x1x128xbf16>
    %44 = vector.shape_cast %43 : vector<1x1x128xbf16> to vector<1x128xbf16>
    %c1_42 = arith.constant 1 : index
    %c2_43 = arith.constant 2 : index
    %c0_44 = arith.constant 0 : index
    %45 = vector.load %arg10[%c1_42, %c2_43, %c0_44] : memref<6x3x128xbf16, #tpu.memory_space<vmem>>, vector<1x1x128xbf16>
    %46 = vector.shape_cast %45 : vector<1x1x128xbf16> to vector<1x128xbf16>
    %c2_45 = arith.constant 2 : index
    %c0_46 = arith.constant 0 : index
    %c0_47 = arith.constant 0 : index
    %47 = vector.load %arg10[%c2_45, %c0_46, %c0_47] : memref<6x3x128xbf16, #tpu.memory_space<vmem>>, vector<1x1x128xbf16>
    %48 = vector.shape_cast %47 : vector<1x1x128xbf16> to vector<1x128xbf16>
    %c2_48 = arith.constant 2 : index
    %c1_49 = arith.constant 1 : index
    %c0_50 = arith.constant 0 : index
    %49 = vector.load %arg10[%c2_48, %c1_49, %c0_50] : memref<6x3x128xbf16, #tpu.memory_space<vmem>>, vector<1x1x128xbf16>
    %50 = vector.shape_cast %49 : vector<1x1x128xbf16> to vector<1x128xbf16>
    %c2_51 = arith.constant 2 : index
    %c2_52 = arith.constant 2 : index
    %c0_53 = arith.constant 0 : index
    %51 = vector.load %arg10[%c2_51, %c2_52, %c0_53] : memref<6x3x128xbf16, #tpu.memory_space<vmem>>, vector<1x1x128xbf16>
    %52 = vector.shape_cast %51 : vector<1x1x128xbf16> to vector<1x128xbf16>
    %53 = tpu.concatenate %36, %38, %40, %42, %44, %46, %48, %50, %52 in 1 : vector<1x128xbf16>, vector<1x128xbf16>, vector<1x128xbf16>, vector<1x128xbf16>, vector<1x128xbf16>, vector<1x128xbf16>, vector<1x128xbf16>, vector<1x128xbf16>, vector<1x128xbf16> -> vector<1x1152xbf16>
    %c0_54 = arith.constant 0 : index
    %c0_55 = arith.constant 0 : index
    %54 = vector.load %arg5[%c0_54, %c0_55] : memref<1152x128xbf16, #tpu.memory_space<vmem>>, vector<1152x128xbf16>
    %cst_56 = arith.constant dense<0.000000e+00> : vector<1x128xf32>
    %55 = tpu.matmul %53, %54, %cst_56 {dimension_numbers = #tpu.dot_dimension_numbers<[1], [0], [0], [1], [0, 0, 1, 1], [], []>} : vector<1x1152xbf16>, vector<1152x128xbf16>, vector<1x128xf32> -> vector<1x128xf32>
    %c1_57 = arith.constant 1 : index
    %c0_58 = arith.constant 0 : index
    %c0_59 = arith.constant 0 : index
    %56 = vector.load %arg10[%c1_57, %c0_58, %c0_59] : memref<6x3x128xbf16, #tpu.memory_space<vmem>>, vector<1x1x128xbf16>
    %57 = vector.shape_cast %56 : vector<1x1x128xbf16> to vector<1x128xbf16>
    %c1_60 = arith.constant 1 : index
    %c1_61 = arith.constant 1 : index
    %c0_62 = arith.constant 0 : index
    %58 = vector.load %arg10[%c1_60, %c1_61, %c0_62] : memref<6x3x128xbf16, #tpu.memory_space<vmem>>, vector<1x1x128xbf16>
    %59 = vector.shape_cast %58 : vector<1x1x128xbf16> to vector<1x128xbf16>
    %c1_63 = arith.constant 1 : index
    %c2_64 = arith.constant 2 : index
    %c0_65 = arith.constant 0 : index
    %60 = vector.load %arg10[%c1_63, %c2_64, %c0_65] : memref<6x3x128xbf16, #tpu.memory_space<vmem>>, vector<1x1x128xbf16>
    %61 = vector.shape_cast %60 : vector<1x1x128xbf16> to vector<1x128xbf16>
    %c2_66 = arith.constant 2 : index
    %c0_67 = arith.constant 0 : index
    %c0_68 = arith.constant 0 : index
    %62 = vector.load %arg10[%c2_66, %c0_67, %c0_68] : memref<6x3x128xbf16, #tpu.memory_space<vmem>>, vector<1x1x128xbf16>
    %63 = vector.shape_cast %62 : vector<1x1x128xbf16> to vector<1x128xbf16>
    %c2_69 = arith.constant 2 : index
    %c1_70 = arith.constant 1 : index
    %c0_71 = arith.constant 0 : index
    %64 = vector.load %arg10[%c2_69, %c1_70, %c0_71] : memref<6x3x128xbf16, #tpu.memory_space<vmem>>, vector<1x1x128xbf16>
    %65 = vector.shape_cast %64 : vector<1x1x128xbf16> to vector<1x128xbf16>
    %c2_72 = arith.constant 2 : index
    %c2_73 = arith.constant 2 : index
    %c0_74 = arith.constant 0 : index
    %66 = vector.load %arg10[%c2_72, %c2_73, %c0_74] : memref<6x3x128xbf16, #tpu.memory_space<vmem>>, vector<1x1x128xbf16>
    %67 = vector.shape_cast %66 : vector<1x1x128xbf16> to vector<1x128xbf16>
    %c3_75 = arith.constant 3 : index
    %c0_76 = arith.constant 0 : index
    %c0_77 = arith.constant 0 : index
    %68 = vector.load %arg10[%c3_75, %c0_76, %c0_77] : memref<6x3x128xbf16, #tpu.memory_space<vmem>>, vector<1x1x128xbf16>
    %69 = vector.shape_cast %68 : vector<1x1x128xbf16> to vector<1x128xbf16>
    %c3_78 = arith.constant 3 : index
    %c1_79 = arith.constant 1 : index
    %c0_80 = arith.constant 0 : index
    %70 = vector.load %arg10[%c3_78, %c1_79, %c0_80] : memref<6x3x128xbf16, #tpu.memory_space<vmem>>, vector<1x1x128xbf16>
    %71 = vector.shape_cast %70 : vector<1x1x128xbf16> to vector<1x128xbf16>
    %c3_81 = arith.constant 3 : index
    %c2_82 = arith.constant 2 : index
    %c0_83 = arith.constant 0 : index
    %72 = vector.load %arg10[%c3_81, %c2_82, %c0_83] : memref<6x3x128xbf16, #tpu.memory_space<vmem>>, vector<1x1x128xbf16>
    %73 = vector.shape_cast %72 : vector<1x1x128xbf16> to vector<1x128xbf16>
    %74 = tpu.concatenate %57, %59, %61, %63, %65, %67, %69, %71, %73 in 1 : vector<1x128xbf16>, vector<1x128xbf16>, vector<1x128xbf16>, vector<1x128xbf16>, vector<1x128xbf16>, vector<1x128xbf16>, vector<1x128xbf16>, vector<1x128xbf16>, vector<1x128xbf16> -> vector<1x1152xbf16>
    %c0_84 = arith.constant 0 : index
    %c0_85 = arith.constant 0 : index
    %75 = vector.load %arg5[%c0_84, %c0_85] : memref<1152x128xbf16, #tpu.memory_space<vmem>>, vector<1152x128xbf16>
    %cst_86 = arith.constant dense<0.000000e+00> : vector<1x128xf32>
    %76 = tpu.matmul %74, %75, %cst_86 {dimension_numbers = #tpu.dot_dimension_numbers<[1], [0], [0], [1], [0, 0, 1, 1], [], []>} : vector<1x1152xbf16>, vector<1152x128xbf16>, vector<1x128xf32> -> vector<1x128xf32>
    %c2_87 = arith.constant 2 : index
    %c0_88 = arith.constant 0 : index
    %c0_89 = arith.constant 0 : index
    %77 = vector.load %arg10[%c2_87, %c0_88, %c0_89] : memref<6x3x128xbf16, #tpu.memory_space<vmem>>, vector<1x1x128xbf16>
    %78 = vector.shape_cast %77 : vector<1x1x128xbf16> to vector<1x128xbf16>
    %c2_90 = arith.constant 2 : index
    %c1_91 = arith.constant 1 : index
    %c0_92 = arith.constant 0 : index
    %79 = vector.load %arg10[%c2_90, %c1_91, %c0_92] : memref<6x3x128xbf16, #tpu.memory_space<vmem>>, vector<1x1x128xbf16>
    %80 = vector.shape_cast %79 : vector<1x1x128xbf16> to vector<1x128xbf16>
    %c2_93 = arith.constant 2 : index
    %c2_94 = arith.constant 2 : index
    %c0_95 = arith.constant 0 : index
    %81 = vector.load %arg10[%c2_93, %c2_94, %c0_95] : memref<6x3x128xbf16, #tpu.memory_space<vmem>>, vector<1x1x128xbf16>
    %82 = vector.shape_cast %81 : vector<1x1x128xbf16> to vector<1x128xbf16>
    %c3_96 = arith.constant 3 : index
    %c0_97 = arith.constant 0 : index
    %c0_98 = arith.constant 0 : index
    %83 = vector.load %arg10[%c3_96, %c0_97, %c0_98] : memref<6x3x128xbf16, #tpu.memory_space<vmem>>, vector<1x1x128xbf16>
    %84 = vector.shape_cast %83 : vector<1x1x128xbf16> to vector<1x128xbf16>
    %c3_99 = arith.constant 3 : index
    %c1_100 = arith.constant 1 : index
    %c0_101 = arith.constant 0 : index
    %85 = vector.load %arg10[%c3_99, %c1_100, %c0_101] : memref<6x3x128xbf16, #tpu.memory_space<vmem>>, vector<1x1x128xbf16>
    %86 = vector.shape_cast %85 : vector<1x1x128xbf16> to vector<1x128xbf16>
    %c3_102 = arith.constant 3 : index
    %c2_103 = arith.constant 2 : index
    %c0_104 = arith.constant 0 : index
    %87 = vector.load %arg10[%c3_102, %c2_103, %c0_104] : memref<6x3x128xbf16, #tpu.memory_space<vmem>>, vector<1x1x128xbf16>
    %88 = vector.shape_cast %87 : vector<1x1x128xbf16> to vector<1x128xbf16>
    %c4_105 = arith.constant 4 : index
    %c0_106 = arith.constant 0 : index
    %c0_107 = arith.constant 0 : index
    %89 = vector.load %arg10[%c4_105, %c0_106, %c0_107] : memref<6x3x128xbf16, #tpu.memory_space<vmem>>, vector<1x1x128xbf16>
    %90 = vector.shape_cast %89 : vector<1x1x128xbf16> to vector<1x128xbf16>
    %c4_108 = arith.constant 4 : index
    %c1_109 = arith.constant 1 : index
    %c0_110 = arith.constant 0 : index
    %91 = vector.load %arg10[%c4_108, %c1_109, %c0_110] : memref<6x3x128xbf16, #tpu.memory_space<vmem>>, vector<1x1x128xbf16>
    %92 = vector.shape_cast %91 : vector<1x1x128xbf16> to vector<1x128xbf16>
    %c4_111 = arith.constant 4 : index
    %c2_112 = arith.constant 2 : index
    %c0_113 = arith.constant 0 : index
    %93 = vector.load %arg10[%c4_111, %c2_112, %c0_113] : memref<6x3x128xbf16, #tpu.memory_space<vmem>>, vector<1x1x128xbf16>
    %94 = vector.shape_cast %93 : vector<1x1x128xbf16> to vector<1x128xbf16>
    %95 = tpu.concatenate %78, %80, %82, %84, %86, %88, %90, %92, %94 in 1 : vector<1x128xbf16>, vector<1x128xbf16>, vector<1x128xbf16>, vector<1x128xbf16>, vector<1x128xbf16>, vector<1x128xbf16>, vector<1x128xbf16>, vector<1x128xbf16>, vector<1x128xbf16> -> vector<1x1152xbf16>
    %c0_114 = arith.constant 0 : index
    %c0_115 = arith.constant 0 : index
    %96 = vector.load %arg5[%c0_114, %c0_115] : memref<1152x128xbf16, #tpu.memory_space<vmem>>, vector<1152x128xbf16>
    %cst_116 = arith.constant dense<0.000000e+00> : vector<1x128xf32>
    %97 = tpu.matmul %95, %96, %cst_116 {dimension_numbers = #tpu.dot_dimension_numbers<[1], [0], [0], [1], [0, 0, 1, 1], [], []>} : vector<1x1152xbf16>, vector<1152x128xbf16>, vector<1x128xf32> -> vector<1x128xf32>
    %c3_117 = arith.constant 3 : index
    %c0_118 = arith.constant 0 : index
    %c0_119 = arith.constant 0 : index
    %98 = vector.load %arg10[%c3_117, %c0_118, %c0_119] : memref<6x3x128xbf16, #tpu.memory_space<vmem>>, vector<1x1x128xbf16>
    %99 = vector.shape_cast %98 : vector<1x1x128xbf16> to vector<1x128xbf16>
    %c3_120 = arith.constant 3 : index
    %c1_121 = arith.constant 1 : index
    %c0_122 = arith.constant 0 : index
    %100 = vector.load %arg10[%c3_120, %c1_121, %c0_122] : memref<6x3x128xbf16, #tpu.memory_space<vmem>>, vector<1x1x128xbf16>
    %101 = vector.shape_cast %100 : vector<1x1x128xbf16> to vector<1x128xbf16>
    %c3_123 = arith.constant 3 : index
    %c2_124 = arith.constant 2 : index
    %c0_125 = arith.constant 0 : index
    %102 = vector.load %arg10[%c3_123, %c2_124, %c0_125] : memref<6x3x128xbf16, #tpu.memory_space<vmem>>, vector<1x1x128xbf16>
    %103 = vector.shape_cast %102 : vector<1x1x128xbf16> to vector<1x128xbf16>
    %c4_126 = arith.constant 4 : index
    %c0_127 = arith.constant 0 : index
    %c0_128 = arith.constant 0 : index
    %104 = vector.load %arg10[%c4_126, %c0_127, %c0_128] : memref<6x3x128xbf16, #tpu.memory_space<vmem>>, vector<1x1x128xbf16>
    %105 = vector.shape_cast %104 : vector<1x1x128xbf16> to vector<1x128xbf16>
    %c4_129 = arith.constant 4 : index
    %c1_130 = arith.constant 1 : index
    %c0_131 = arith.constant 0 : index
    %106 = vector.load %arg10[%c4_129, %c1_130, %c0_131] : memref<6x3x128xbf16, #tpu.memory_space<vmem>>, vector<1x1x128xbf16>
    %107 = vector.shape_cast %106 : vector<1x1x128xbf16> to vector<1x128xbf16>
    %c4_132 = arith.constant 4 : index
    %c2_133 = arith.constant 2 : index
    %c0_134 = arith.constant 0 : index
    %108 = vector.load %arg10[%c4_132, %c2_133, %c0_134] : memref<6x3x128xbf16, #tpu.memory_space<vmem>>, vector<1x1x128xbf16>
    %109 = vector.shape_cast %108 : vector<1x1x128xbf16> to vector<1x128xbf16>
    %c5 = arith.constant 5 : index
    %c0_135 = arith.constant 0 : index
    %c0_136 = arith.constant 0 : index
    %110 = vector.load %arg10[%c5, %c0_135, %c0_136] : memref<6x3x128xbf16, #tpu.memory_space<vmem>>, vector<1x1x128xbf16>
    %111 = vector.shape_cast %110 : vector<1x1x128xbf16> to vector<1x128xbf16>
    %c5_137 = arith.constant 5 : index
    %c1_138 = arith.constant 1 : index
    %c0_139 = arith.constant 0 : index
    %112 = vector.load %arg10[%c5_137, %c1_138, %c0_139] : memref<6x3x128xbf16, #tpu.memory_space<vmem>>, vector<1x1x128xbf16>
    %113 = vector.shape_cast %112 : vector<1x1x128xbf16> to vector<1x128xbf16>
    %c5_140 = arith.constant 5 : index
    %c2_141 = arith.constant 2 : index
    %c0_142 = arith.constant 0 : index
    %114 = vector.load %arg10[%c5_140, %c2_141, %c0_142] : memref<6x3x128xbf16, #tpu.memory_space<vmem>>, vector<1x1x128xbf16>
    %115 = vector.shape_cast %114 : vector<1x1x128xbf16> to vector<1x128xbf16>
    %116 = tpu.concatenate %99, %101, %103, %105, %107, %109, %111, %113, %115 in 1 : vector<1x128xbf16>, vector<1x128xbf16>, vector<1x128xbf16>, vector<1x128xbf16>, vector<1x128xbf16>, vector<1x128xbf16>, vector<1x128xbf16>, vector<1x128xbf16>, vector<1x128xbf16> -> vector<1x1152xbf16>
    %c0_143 = arith.constant 0 : index
    %c0_144 = arith.constant 0 : index
    %117 = vector.load %arg5[%c0_143, %c0_144] : memref<1152x128xbf16, #tpu.memory_space<vmem>>, vector<1152x128xbf16>
    %cst_145 = arith.constant dense<0.000000e+00> : vector<1x128xf32>
    %118 = tpu.matmul %116, %117, %cst_145 {dimension_numbers = #tpu.dot_dimension_numbers<[1], [0], [0], [1], [0, 0, 1, 1], [], []>} : vector<1x1152xbf16>, vector<1152x128xbf16>, vector<1x128xf32> -> vector<1x128xf32>
    %119 = tpu.concatenate %55, %76, %97, %118 in 0 : vector<1x128xf32>, vector<1x128xf32>, vector<1x128xf32>, vector<1x128xf32> -> vector<4x128xf32>
    %c0_146 = arith.constant 0 : index
    %c0_147 = arith.constant 0 : index
    %120 = vector.load %arg6[%c0_146, %c0_147] : memref<1x128xf32, #tpu.memory_space<vmem>>, vector<1x128xf32>
    %121 = vector.broadcast %120 : vector<1x128xf32> to vector<4x128xf32>
    %122 = arith.addf %119, %121 : vector<4x128xf32>
    %123 = arith.addf %122, %16 : vector<4x128xf32>
    %cst_148 = arith.constant 0.000000e+00 : f32
    %124 = vector.broadcast %cst_148 : f32 to vector<4x128xf32>
    %125 = arith.maximumf %123, %124 : vector<4x128xf32>
    %126 = arith.truncf %125 : vector<4x128xf32> to vector<4x128xbf16>
    %c0_149 = arith.constant 0 : index
    %c0_150 = arith.constant 0 : index
    %c0_151 = arith.constant 0 : index
    %127 = vector.load %arg9[%c0_149, %c0_150, %c0_151] : memref<1x4x128xbf16, #tpu.memory_space<vmem>>, vector<1x4x128xbf16>
    %128 = vector.shape_cast %127 : vector<1x4x128xbf16> to vector<4x128xbf16>
    %129 = vector.shape_cast %126 : vector<4x128xbf16> to vector<1x4x128xbf16>
    tpu.vector_store %arg9[%c0_149, %c0_150, %c0_151], %129 {strides = array<i32>} : memref<1x4x128xbf16, #tpu.memory_space<vmem>>, vector<1x4x128xbf16>,
    return
  }
  func.func @transform_0(%arg0: i32) -> (i32, i32, i32) {
    %c0_i32 = arith.constant 0 : i32
    %c0_i32_0 = arith.constant 0 : i32
    %c0_i32_1 = arith.constant 0 : i32
    return %arg0, %c0_i32, %c0_i32_0 : i32, i32, i32
  }
  func.func @transform_1(%arg0: i32) -> (i32, i32, i32) {
    %c0_i32 = arith.constant 0 : i32
    %c0_i32_0 = arith.constant 0 : i32
    %c0_i32_1 = arith.constant 0 : i32
    return %arg0, %c0_i32, %c0_i32_0 : i32, i32, i32
  }
  func.func @transform_2(%arg0: i32) -> (i32, i32) {
    %c0_i32 = arith.constant 0 : i32
    %c0_i32_0 = arith.constant 0 : i32
    %c0_i32_1 = arith.constant 0 : i32
    return %c0_i32, %c0_i32_0 : i32, i32
  }
  func.func @transform_3(%arg0: i32) -> (i32, i32) {
    %c0_i32 = arith.constant 0 : i32
    %c0_i32_0 = arith.constant 0 : i32
    %c0_i32_1 = arith.constant 0 : i32
    return %c0_i32, %c0_i32_0 : i32, i32
  }
  func.func @transform_4(%arg0: i32) -> (i32, i32) {
    %c0_i32 = arith.constant 0 : i32
    %c0_i32_0 = arith.constant 0 : i32
    %c0_i32_1 = arith.constant 0 : i32
    return %c0_i32, %c0_i32_0 : i32, i32
  }
  func.func @transform_5(%arg0: i32) -> (i32, i32) {
    %c0_i32 = arith.constant 0 : i32
    %c0_i32_0 = arith.constant 0 : i32
    %c0_i32_1 = arith.constant 0 : i32
    return %c0_i32, %c0_i32_0 : i32, i32
  }
  func.func @transform_6(%arg0: i32) -> (i32, i32) {
    %c0_i32 = arith.constant 0 : i32
    %c0_i32_0 = arith.constant 0 : i32
    %c0_i32_1 = arith.constant 0 : i32
    return %c0_i32, %c0_i32_0 : i32, i32
  }
  func.func @transform_7(%arg0: i32) -> (i32, i32) {
    %c0_i32 = arith.constant 0 : i32
    %c0_i32_0 = arith.constant 0 : i32
    %c0_i32_1 = arith.constant 0 : i32
    return %c0_i32, %c0_i32_0 : i32, i32
  }
  func.func @transform_8(%arg0: i32) -> (i32, i32, i32) {
    %c0_i32 = arith.constant 0 : i32
    %c0_i32_0 = arith.constant 0 : i32
    %c0_i32_1 = arith.constant 0 : i32
    return %arg0, %c0_i32, %c0_i32_0 : i32, i32, i32
  }
}

module attributes {stable_mosaic.version = 11 : i64} {
  func.func @_block_kernel(%arg0: i32, %arg1: memref<1x4x384xbf16, #tpu.memory_space<vmem>>, %arg2: memref<1x4x128xbf16, #tpu.memory_space<vmem>>, %arg3: memref<384x128xbf16, #tpu.memory_space<vmem>>, %arg4: memref<1x128xf32, #tpu.memory_space<vmem>>, %arg5: memref<1152x128xbf16, #tpu.memory_space<vmem>>, %arg6: memref<1x128xf32, #tpu.memory_space<vmem>>, %arg7: memref<128x128xbf16, #tpu.memory_space<vmem>>, %arg8: memref<1x128xf32, #tpu.memory_space<vmem>>, %arg9: memref<1x4x128xbf16, #tpu.memory_space<vmem>>, %arg10: memref<6x3x128xbf16, #tpu.memory_space<vmem>>) attributes {dimension_semantics = [#tpu.dimension_semantics<parallel>], iteration_bounds = array<i64: 2>, scalar_prefetch = 0 : i64, scratch_operands = 1 : i64, tpu.core_type = #tpu.core_type<tc>, window_params = [{transform_indices = @transform_0, window_bounds = array<i64: 1, 4, 384>}, {transform_indices = @transform_1, window_bounds = array<i64: 1, 4, 128>}, {pipeline_mode = #tpu.pipeline_mode<synchronous>, transform_indices = @transform_2, window_bounds = array<i64: 384, 128>}, {pipeline_mode = #tpu.pipeline_mode<synchronous>, transform_indices = @transform_3, window_bounds = array<i64: 1, 128>}, {pipeline_mode = #tpu.pipeline_mode<synchronous>, transform_indices = @transform_4, window_bounds = array<i64: 1152, 128>}, {pipeline_mode = #tpu.pipeline_mode<synchronous>, transform_indices = @transform_5, window_bounds = array<i64: 1, 128>}, {pipeline_mode = #tpu.pipeline_mode<synchronous>, transform_indices = @transform_6, window_bounds = array<i64: 128, 128>}, {pipeline_mode = #tpu.pipeline_mode<synchronous>, transform_indices = @transform_7, window_bounds = array<i64: 1, 128>}, {transform_indices = @transform_8, window_bounds = array<i64: 1, 4, 128>}]} {
    %c0 = arith.constant 0 : index
    %c0_0 = arith.constant 0 : index
    %c0_1 = arith.constant 0 : index
    %0 = vector.load %arg1[%c0, %c0_0, %c0_1] : memref<1x4x384xbf16, #tpu.memory_space<vmem>>, vector<1x4x384xbf16>
    %1 = vector.shape_cast %0 : vector<1x4x384xbf16> to vector<4x384xbf16>
    %c0_2 = arith.constant 0 : index
    %c0_3 = arith.constant 0 : index
    %2 = vector.load %arg3[%c0_2, %c0_3] : memref<384x128xbf16, #tpu.memory_space<vmem>>, vector<384x128xbf16>
    %cst = arith.constant dense<0.000000e+00> : vector<4x128xf32>
    %3 = tpu.matmul %1, %2, %cst {dimension_numbers = #tpu.dot_dimension_numbers<[1], [0], [0], [1], [0, 0, 1, 1], [], []>} : vector<4x384xbf16>, vector<384x128xbf16>, vector<4x128xf32> -> vector<4x128xf32>
    %c0_4 = arith.constant 0 : index
    %c0_5 = arith.constant 0 : index
    %4 = vector.load %arg4[%c0_4, %c0_5] : memref<1x128xf32, #tpu.memory_space<vmem>>, vector<1x128xf32>
    %5 = vector.broadcast %4 : vector<1x128xf32> to vector<4x128xf32>
    %6 = arith.addf %3, %5 : vector<4x128xf32>
    %cst_6 = arith.constant 0.000000e+00 : f32
    %7 = vector.broadcast %cst_6 : f32 to vector<4x128xf32>
    %8 = arith.maximumf %6, %7 : vector<4x128xf32>
    %9 = arith.truncf %8 : vector<4x128xf32> to vector<4x128xbf16>
    %c0_7 = arith.constant 0 : index
    %c0_8 = arith.constant 0 : index
    %c0_9 = arith.constant 0 : index
    %10 = vector.load %arg2[%c0_7, %c0_8, %c0_9] : memref<1x4x128xbf16, #tpu.memory_space<vmem>>, vector<1x4x128xbf16>
    %11 = vector.shape_cast %10 : vector<1x4x128xbf16> to vector<4x128xbf16>
    %c0_10 = arith.constant 0 : index
    %c0_11 = arith.constant 0 : index
    %12 = vector.load %arg7[%c0_10, %c0_11] : memref<128x128xbf16, #tpu.memory_space<vmem>>, vector<128x128xbf16>
    %cst_12 = arith.constant dense<0.000000e+00> : vector<4x128xf32>
    %13 = tpu.matmul %11, %12, %cst_12 {dimension_numbers = #tpu.dot_dimension_numbers<[1], [0], [0], [1], [0, 0, 1, 1], [], []>} : vector<4x128xbf16>, vector<128x128xbf16>, vector<4x128xf32> -> vector<4x128xf32>
    %c0_13 = arith.constant 0 : index
    %c0_14 = arith.constant 0 : index
    %14 = vector.load %arg8[%c0_13, %c0_14] : memref<1x128xf32, #tpu.memory_space<vmem>>, vector<1x128xf32>
    %15 = vector.broadcast %14 : vector<1x128xf32> to vector<4x128xf32>
    %16 = arith.addf %13, %15 : vector<4x128xf32>
    %cst_15 = arith.constant 0.000000e+00 : bf16
    %17 = vector.broadcast %cst_15 : bf16 to vector<6x3x128xbf16>
    %c0_16 = arith.constant 0 : index
    %c0_17 = arith.constant 0 : index
    %c0_18 = arith.constant 0 : index
    %18 = vector.load %arg10[%c0_16, %c0_17, %c0_18] : memref<6x3x128xbf16, #tpu.memory_space<vmem>>, vector<6x3x128xbf16>
    tpu.vector_store %arg10[%c0_16, %c0_17, %c0_18], %17 {strides = array<i32>} : memref<6x3x128xbf16, #tpu.memory_space<vmem>>, vector<6x3x128xbf16>,
    %19 = vector.extract_strided_slice %9 {offsets = [0, 0], sizes = [1, 128], strides = [1, 1]} : vector<4x128xbf16> to vector<1x128xbf16>
    %c1 = arith.constant 1 : index
    %c1_19 = arith.constant 1 : index
    %c0_20 = arith.constant 0 : index
    %20 = vector.load %arg10[%c1, %c1_19, %c0_20] : memref<6x3x128xbf16, #tpu.memory_space<vmem>>, vector<1x1x128xbf16>
    %21 = vector.shape_cast %20 : vector<1x1x128xbf16> to vector<1x128xbf16>
    %22 = vector.shape_cast %19 : vector<1x128xbf16> to vector<1x1x128xbf16>
    tpu.vector_store %arg10[%c1, %c1_19, %c0_20], %22 {strides = array<i32>} : memref<6x3x128xbf16, #tpu.memory_space<vmem>>, vector<1x1x128xbf16>,
    %23 = vector.extract_strided_slice %9 {offsets = [1, 0], sizes = [1, 128], strides = [1, 1]} : vector<4x128xbf16> to vector<1x128xbf16>
    %c2 = arith.constant 2 : index
    %c1_21 = arith.constant 1 : index
    %c0_22 = arith.constant 0 : index
    %24 = vector.load %arg10[%c2, %c1_21, %c0_22] : memref<6x3x128xbf16, #tpu.memory_space<vmem>>, vector<1x1x128xbf16>
    %25 = vector.shape_cast %24 : vector<1x1x128xbf16> to vector<1x128xbf16>
    %26 = vector.shape_cast %23 : vector<1x128xbf16> to vector<1x1x128xbf16>
    tpu.vector_store %arg10[%c2, %c1_21, %c0_22], %26 {strides = array<i32>} : memref<6x3x128xbf16, #tpu.memory_space<vmem>>, vector<1x1x128xbf16>,
    %27 = vector.extract_strided_slice %9 {offsets = [2, 0], sizes = [1, 128], strides = [1, 1]} : vector<4x128xbf16> to vector<1x128xbf16>
    %c3 = arith.constant 3 : index
    %c1_23 = arith.constant 1 : index
    %c0_24 = arith.constant 0 : index
    %28 = vector.load %arg10[%c3, %c1_23, %c0_24] : memref<6x3x128xbf16, #tpu.memory_space<vmem>>, vector<1x1x128xbf16>
    %29 = vector.shape_cast %28 : vector<1x1x128xbf16> to vector<1x128xbf16>
    %30 = vector.shape_cast %27 : vector<1x128xbf16> to vector<1x1x128xbf16>
    tpu.vector_store %arg10[%c3, %c1_23, %c0_24], %30 {strides = array<i32>} : memref<6x3x128xbf16, #tpu.memory_space<vmem>>, vector<1x1x128xbf16>,
    %31 = vector.extract_strided_slice %9 {offsets = [3, 0], sizes = [1, 128], strides = [1, 1]} : vector<4x128xbf16> to vector<1x128xbf16>
    %c4 = arith.constant 4 : index
    %c1_25 = arith.constant 1 : index
    %c0_26 = arith.constant 0 : index
    %32 = vector.load %arg10[%c4, %c1_25, %c0_26] : memref<6x3x128xbf16, #tpu.memory_space<vmem>>, vector<1x1x128xbf16>
    %33 = vector.shape_cast %32 : vector<1x1x128xbf16> to vector<1x128xbf16>
    %34 = vector.shape_cast %31 : vector<1x128xbf16> to vector<1x1x128xbf16>
    tpu.vector_store %arg10[%c4, %c1_25, %c0_26], %34 {strides = array<i32>} : memref<6x3x128xbf16, #tpu.memory_space<vmem>>, vector<1x1x128xbf16>,
    %c0_27 = arith.constant 0 : index
    %c0_28 = arith.constant 0 : index
    %c0_29 = arith.constant 0 : index
    %35 = vector.load %arg10[%c0_27, %c0_28, %c0_29] : memref<6x3x128xbf16, #tpu.memory_space<vmem>>, vector<1x1x128xbf16>
    %36 = vector.shape_cast %35 : vector<1x1x128xbf16> to vector<1x128xbf16>
    %c0_30 = arith.constant 0 : index
    %c1_31 = arith.constant 1 : index
    %c0_32 = arith.constant 0 : index
    %37 = vector.load %arg10[%c0_30, %c1_31, %c0_32] : memref<6x3x128xbf16, #tpu.memory_space<vmem>>, vector<1x1x128xbf16>
    %38 = vector.shape_cast %37 : vector<1x1x128xbf16> to vector<1x128xbf16>
    %c0_33 = arith.constant 0 : index
    %c2_34 = arith.constant 2 : index
    %c0_35 = arith.constant 0 : index
    %39 = vector.load %arg10[%c0_33, %c2_34, %c0_35] : memref<6x3x128xbf16, #tpu.memory_space<vmem>>, vector<1x1x128xbf16>
    %40 = vector.shape_cast %39 : vector<1x1x128xbf16> to vector<1x128xbf16>
    %c1_36 = arith.constant 1 : index
    %c0_37 = arith.constant 0 : index
    %c0_38 = arith.constant 0 : index
    %41 = vector.load %arg10[%c1_36, %c0_37, %c0_38] : memref<6x3x128xbf16, #tpu.memory_space<vmem>>, vector<1x1x128xbf16>
    %42 = vector.shape_cast %41 : vector<1x1x128xbf16> to vector<1x128xbf16>
    %c1_39 = arith.constant 1 : index
    %c1_40 = arith.constant 1 : index
    %c0_41 = arith.constant 0 : index
    %43 = vector.load %arg10[%c1_39, %c1_40, %c0_41] : memref<6x3x128xbf16, #tpu.memory_space<vmem>>, vector<1x1x128xbf16>
    %44 = vector.shape_cast %43 : vector<1x1x128xbf16> to vector<1x128xbf16>
    %c1_42 = arith.constant 1 : index
    %c2_43 = arith.constant 2 : index
    %c0_44 = arith.constant 0 : index
    %45 = vector.load %arg10[%c1_42, %c2_43, %c0_44] : memref<6x3x128xbf16, #tpu.memory_space<vmem>>, vector<1x1x128xbf16>
    %46 = vector.shape_cast %45 : vector<1x1x128xbf16> to vector<1x128xbf16>
    %c2_45 = arith.constant 2 : index
    %c0_46 = arith.constant 0 : index
    %c0_47 = arith.constant 0 : index
    %47 = vector.load %arg10[%c2_45, %c0_46, %c0_47] : memref<6x3x128xbf16, #tpu.memory_space<vmem>>, vector<1x1x128xbf16>
    %48 = vector.shape_cast %47 : vector<1x1x128xbf16> to vector<1x128xbf16>
    %c2_48 = arith.constant 2 : index
    %c1_49 = arith.constant 1 : index
    %c0_50 = arith.constant 0 : index
    %49 = vector.load %arg10[%c2_48, %c1_49, %c0_50] : memref<6x3x128xbf16, #tpu.memory_space<vmem>>, vector<1x1x128xbf16>
    %50 = vector.shape_cast %49 : vector<1x1x128xbf16> to vector<1x128xbf16>
    %c2_51 = arith.constant 2 : index
    %c2_52 = arith.constant 2 : index
    %c0_53 = arith.constant 0 : index
    %51 = vector.load %arg10[%c2_51, %c2_52, %c0_53] : memref<6x3x128xbf16, #tpu.memory_space<vmem>>, vector<1x1x128xbf16>
    %52 = vector.shape_cast %51 : vector<1x1x128xbf16> to vector<1x128xbf16>
    %53 = tpu.concatenate %36, %38, %40, %42, %44, %46, %48, %50, %52 in 1 : vector<1x128xbf16>, vector<1x128xbf16>, vector<1x128xbf16>, vector<1x128xbf16>, vector<1x128xbf16>, vector<1x128xbf16>, vector<1x128xbf16>, vector<1x128xbf16>, vector<1x128xbf16> -> vector<1x1152xbf16>
    %c0_54 = arith.constant 0 : index
    %c0_55 = arith.constant 0 : index
    %54 = vector.load %arg5[%c0_54, %c0_55] : memref<1152x128xbf16, #tpu.memory_space<vmem>>, vector<1152x128xbf16>
    %cst_56 = arith.constant dense<0.000000e+00> : vector<1x128xf32>
    %55 = tpu.matmul %53, %54, %cst_56 {dimension_numbers = #tpu.dot_dimension_numbers<[1], [0], [0], [1], [0, 0, 1, 1], [], []>} : vector<1x1152xbf16>, vector<1152x128xbf16>, vector<1x128xf32> -> vector<1x128xf32>
    %c1_57 = arith.constant 1 : index
    %c0_58 = arith.constant 0 : index
    %c0_59 = arith.constant 0 : index
    %56 = vector.load %arg10[%c1_57, %c0_58, %c0_59] : memref<6x3x128xbf16, #tpu.memory_space<vmem>>, vector<1x1x128xbf16>
    %57 = vector.shape_cast %56 : vector<1x1x128xbf16> to vector<1x128xbf16>
    %c1_60 = arith.constant 1 : index
    %c1_61 = arith.constant 1 : index
    %c0_62 = arith.constant 0 : index
    %58 = vector.load %arg10[%c1_60, %c1_61, %c0_62] : memref<6x3x128xbf16, #tpu.memory_space<vmem>>, vector<1x1x128xbf16>
    %59 = vector.shape_cast %58 : vector<1x1x128xbf16> to vector<1x128xbf16>
    %c1_63 = arith.constant 1 : index
    %c2_64 = arith.constant 2 : index
    %c0_65 = arith.constant 0 : index
    %60 = vector.load %arg10[%c1_63, %c2_64, %c0_65] : memref<6x3x128xbf16, #tpu.memory_space<vmem>>, vector<1x1x128xbf16>
    %61 = vector.shape_cast %60 : vector<1x1x128xbf16> to vector<1x128xbf16>
    %c2_66 = arith.constant 2 : index
    %c0_67 = arith.constant 0 : index
    %c0_68 = arith.constant 0 : index
    %62 = vector.load %arg10[%c2_66, %c0_67, %c0_68] : memref<6x3x128xbf16, #tpu.memory_space<vmem>>, vector<1x1x128xbf16>
    %63 = vector.shape_cast %62 : vector<1x1x128xbf16> to vector<1x128xbf16>
    %c2_69 = arith.constant 2 : index
    %c1_70 = arith.constant 1 : index
    %c0_71 = arith.constant 0 : index
    %64 = vector.load %arg10[%c2_69, %c1_70, %c0_71] : memref<6x3x128xbf16, #tpu.memory_space<vmem>>, vector<1x1x128xbf16>
    %65 = vector.shape_cast %64 : vector<1x1x128xbf16> to vector<1x128xbf16>
    %c2_72 = arith.constant 2 : index
    %c2_73 = arith.constant 2 : index
    %c0_74 = arith.constant 0 : index
    %66 = vector.load %arg10[%c2_72, %c2_73, %c0_74] : memref<6x3x128xbf16, #tpu.memory_space<vmem>>, vector<1x1x128xbf16>
    %67 = vector.shape_cast %66 : vector<1x1x128xbf16> to vector<1x128xbf16>
    %c3_75 = arith.constant 3 : index
    %c0_76 = arith.constant 0 : index
    %c0_77 = arith.constant 0 : index
    %68 = vector.load %arg10[%c3_75, %c0_76, %c0_77] : memref<6x3x128xbf16, #tpu.memory_space<vmem>>, vector<1x1x128xbf16>
    %69 = vector.shape_cast %68 : vector<1x1x128xbf16> to vector<1x128xbf16>
    %c3_78 = arith.constant 3 : index
    %c1_79 = arith.constant 1 : index
    %c0_80 = arith.constant 0 : index
    %70 = vector.load %arg10[%c3_78, %c1_79, %c0_80] : memref<6x3x128xbf16, #tpu.memory_space<vmem>>, vector<1x1x128xbf16>
    %71 = vector.shape_cast %70 : vector<1x1x128xbf16> to vector<1x128xbf16>
    %c3_81 = arith.constant 3 : index
    %c2_82 = arith.constant 2 : index
    %c0_83 = arith.constant 0 : index
    %72 = vector.load %arg10[%c3_81, %c2_82, %c0_83] : memref<6x3x128xbf16, #tpu.memory_space<vmem>>, vector<1x1x128xbf16>
    %73 = vector.shape_cast %72 : vector<1x1x128xbf16> to vector<1x128xbf16>
    %74 = tpu.concatenate %57, %59, %61, %63, %65, %67, %69, %71, %73 in 1 : vector<1x128xbf16>, vector<1x128xbf16>, vector<1x128xbf16>, vector<1x128xbf16>, vector<1x128xbf16>, vector<1x128xbf16>, vector<1x128xbf16>, vector<1x128xbf16>, vector<1x128xbf16> -> vector<1x1152xbf16>
    %c0_84 = arith.constant 0 : index
    %c0_85 = arith.constant 0 : index
    %75 = vector.load %arg5[%c0_84, %c0_85] : memref<1152x128xbf16, #tpu.memory_space<vmem>>, vector<1152x128xbf16>
    %cst_86 = arith.constant dense<0.000000e+00> : vector<1x128xf32>
    %76 = tpu.matmul %74, %75, %cst_86 {dimension_numbers = #tpu.dot_dimension_numbers<[1], [0], [0], [1], [0, 0, 1, 1], [], []>} : vector<1x1152xbf16>, vector<1152x128xbf16>, vector<1x128xf32> -> vector<1x128xf32>
    %c2_87 = arith.constant 2 : index
    %c0_88 = arith.constant 0 : index
    %c0_89 = arith.constant 0 : index
    %77 = vector.load %arg10[%c2_87, %c0_88, %c0_89] : memref<6x3x128xbf16, #tpu.memory_space<vmem>>, vector<1x1x128xbf16>
    %78 = vector.shape_cast %77 : vector<1x1x128xbf16> to vector<1x128xbf16>
    %c2_90 = arith.constant 2 : index
    %c1_91 = arith.constant 1 : index
    %c0_92 = arith.constant 0 : index
    %79 = vector.load %arg10[%c2_90, %c1_91, %c0_92] : memref<6x3x128xbf16, #tpu.memory_space<vmem>>, vector<1x1x128xbf16>
    %80 = vector.shape_cast %79 : vector<1x1x128xbf16> to vector<1x128xbf16>
    %c2_93 = arith.constant 2 : index
    %c2_94 = arith.constant 2 : index
    %c0_95 = arith.constant 0 : index
    %81 = vector.load %arg10[%c2_93, %c2_94, %c0_95] : memref<6x3x128xbf16, #tpu.memory_space<vmem>>, vector<1x1x128xbf16>
    %82 = vector.shape_cast %81 : vector<1x1x128xbf16> to vector<1x128xbf16>
    %c3_96 = arith.constant 3 : index
    %c0_97 = arith.constant 0 : index
    %c0_98 = arith.constant 0 : index
    %83 = vector.load %arg10[%c3_96, %c0_97, %c0_98] : memref<6x3x128xbf16, #tpu.memory_space<vmem>>, vector<1x1x128xbf16>
    %84 = vector.shape_cast %83 : vector<1x1x128xbf16> to vector<1x128xbf16>
    %c3_99 = arith.constant 3 : index
    %c1_100 = arith.constant 1 : index
    %c0_101 = arith.constant 0 : index
    %85 = vector.load %arg10[%c3_99, %c1_100, %c0_101] : memref<6x3x128xbf16, #tpu.memory_space<vmem>>, vector<1x1x128xbf16>
    %86 = vector.shape_cast %85 : vector<1x1x128xbf16> to vector<1x128xbf16>
    %c3_102 = arith.constant 3 : index
    %c2_103 = arith.constant 2 : index
    %c0_104 = arith.constant 0 : index
    %87 = vector.load %arg10[%c3_102, %c2_103, %c0_104] : memref<6x3x128xbf16, #tpu.memory_space<vmem>>, vector<1x1x128xbf16>
    %88 = vector.shape_cast %87 : vector<1x1x128xbf16> to vector<1x128xbf16>
    %c4_105 = arith.constant 4 : index
    %c0_106 = arith.constant 0 : index
    %c0_107 = arith.constant 0 : index
    %89 = vector.load %arg10[%c4_105, %c0_106, %c0_107] : memref<6x3x128xbf16, #tpu.memory_space<vmem>>, vector<1x1x128xbf16>
    %90 = vector.shape_cast %89 : vector<1x1x128xbf16> to vector<1x128xbf16>
    %c4_108 = arith.constant 4 : index
    %c1_109 = arith.constant 1 : index
    %c0_110 = arith.constant 0 : index
    %91 = vector.load %arg10[%c4_108, %c1_109, %c0_110] : memref<6x3x128xbf16, #tpu.memory_space<vmem>>, vector<1x1x128xbf16>
    %92 = vector.shape_cast %91 : vector<1x1x128xbf16> to vector<1x128xbf16>
    %c4_111 = arith.constant 4 : index
    %c2_112 = arith.constant 2 : index
    %c0_113 = arith.constant 0 : index
    %93 = vector.load %arg10[%c4_111, %c2_112, %c0_113] : memref<6x3x128xbf16, #tpu.memory_space<vmem>>, vector<1x1x128xbf16>
    %94 = vector.shape_cast %93 : vector<1x1x128xbf16> to vector<1x128xbf16>
    %95 = tpu.concatenate %78, %80, %82, %84, %86, %88, %90, %92, %94 in 1 : vector<1x128xbf16>, vector<1x128xbf16>, vector<1x128xbf16>, vector<1x128xbf16>, vector<1x128xbf16>, vector<1x128xbf16>, vector<1x128xbf16>, vector<1x128xbf16>, vector<1x128xbf16> -> vector<1x1152xbf16>
    %c0_114 = arith.constant 0 : index
    %c0_115 = arith.constant 0 : index
    %96 = vector.load %arg5[%c0_114, %c0_115] : memref<1152x128xbf16, #tpu.memory_space<vmem>>, vector<1152x128xbf16>
    %cst_116 = arith.constant dense<0.000000e+00> : vector<1x128xf32>
    %97 = tpu.matmul %95, %96, %cst_116 {dimension_numbers = #tpu.dot_dimension_numbers<[1], [0], [0], [1], [0, 0, 1, 1], [], []>} : vector<1x1152xbf16>, vector<1152x128xbf16>, vector<1x128xf32> -> vector<1x128xf32>
    %c3_117 = arith.constant 3 : index
    %c0_118 = arith.constant 0 : index
    %c0_119 = arith.constant 0 : index
    %98 = vector.load %arg10[%c3_117, %c0_118, %c0_119] : memref<6x3x128xbf16, #tpu.memory_space<vmem>>, vector<1x1x128xbf16>
    %99 = vector.shape_cast %98 : vector<1x1x128xbf16> to vector<1x128xbf16>
    %c3_120 = arith.constant 3 : index
    %c1_121 = arith.constant 1 : index
    %c0_122 = arith.constant 0 : index
    %100 = vector.load %arg10[%c3_120, %c1_121, %c0_122] : memref<6x3x128xbf16, #tpu.memory_space<vmem>>, vector<1x1x128xbf16>
    %101 = vector.shape_cast %100 : vector<1x1x128xbf16> to vector<1x128xbf16>
    %c3_123 = arith.constant 3 : index
    %c2_124 = arith.constant 2 : index
    %c0_125 = arith.constant 0 : index
    %102 = vector.load %arg10[%c3_123, %c2_124, %c0_125] : memref<6x3x128xbf16, #tpu.memory_space<vmem>>, vector<1x1x128xbf16>
    %103 = vector.shape_cast %102 : vector<1x1x128xbf16> to vector<1x128xbf16>
    %c4_126 = arith.constant 4 : index
    %c0_127 = arith.constant 0 : index
    %c0_128 = arith.constant 0 : index
    %104 = vector.load %arg10[%c4_126, %c0_127, %c0_128] : memref<6x3x128xbf16, #tpu.memory_space<vmem>>, vector<1x1x128xbf16>
    %105 = vector.shape_cast %104 : vector<1x1x128xbf16> to vector<1x128xbf16>
    %c4_129 = arith.constant 4 : index
    %c1_130 = arith.constant 1 : index
    %c0_131 = arith.constant 0 : index
    %106 = vector.load %arg10[%c4_129, %c1_130, %c0_131] : memref<6x3x128xbf16, #tpu.memory_space<vmem>>, vector<1x1x128xbf16>
    %107 = vector.shape_cast %106 : vector<1x1x128xbf16> to vector<1x128xbf16>
    %c4_132 = arith.constant 4 : index
    %c2_133 = arith.constant 2 : index
    %c0_134 = arith.constant 0 : index
    %108 = vector.load %arg10[%c4_132, %c2_133, %c0_134] : memref<6x3x128xbf16, #tpu.memory_space<vmem>>, vector<1x1x128xbf16>
    %109 = vector.shape_cast %108 : vector<1x1x128xbf16> to vector<1x128xbf16>
    %c5 = arith.constant 5 : index
    %c0_135 = arith.constant 0 : index
    %c0_136 = arith.constant 0 : index
    %110 = vector.load %arg10[%c5, %c0_135, %c0_136] : memref<6x3x128xbf16, #tpu.memory_space<vmem>>, vector<1x1x128xbf16>
    %111 = vector.shape_cast %110 : vector<1x1x128xbf16> to vector<1x128xbf16>
    %c5_137 = arith.constant 5 : index
    %c1_138 = arith.constant 1 : index
    %c0_139 = arith.constant 0 : index
    %112 = vector.load %arg10[%c5_137, %c1_138, %c0_139] : memref<6x3x128xbf16, #tpu.memory_space<vmem>>, vector<1x1x128xbf16>
    %113 = vector.shape_cast %112 : vector<1x1x128xbf16> to vector<1x128xbf16>
    %c5_140 = arith.constant 5 : index
    %c2_141 = arith.constant 2 : index
    %c0_142 = arith.constant 0 : index
    %114 = vector.load %arg10[%c5_140, %c2_141, %c0_142] : memref<6x3x128xbf16, #tpu.memory_space<vmem>>, vector<1x1x128xbf16>
    %115 = vector.shape_cast %114 : vector<1x1x128xbf16> to vector<1x128xbf16>
    %116 = tpu.concatenate %99, %101, %103, %105, %107, %109, %111, %113, %115 in 1 : vector<1x128xbf16>, vector<1x128xbf16>, vector<1x128xbf16>, vector<1x128xbf16>, vector<1x128xbf16>, vector<1x128xbf16>, vector<1x128xbf16>, vector<1x128xbf16>, vector<1x128xbf16> -> vector<1x1152xbf16>
    %c0_143 = arith.constant 0 : index
    %c0_144 = arith.constant 0 : index
    %117 = vector.load %arg5[%c0_143, %c0_144] : memref<1152x128xbf16, #tpu.memory_space<vmem>>, vector<1152x128xbf16>
    %cst_145 = arith.constant dense<0.000000e+00> : vector<1x128xf32>
    %118 = tpu.matmul %116, %117, %cst_145 {dimension_numbers = #tpu.dot_dimension_numbers<[1], [0], [0], [1], [0, 0, 1, 1], [], []>} : vector<1x1152xbf16>, vector<1152x128xbf16>, vector<1x128xf32> -> vector<1x128xf32>
    %119 = tpu.concatenate %55, %76, %97, %118 in 0 : vector<1x128xf32>, vector<1x128xf32>, vector<1x128xf32>, vector<1x128xf32> -> vector<4x128xf32>
    %c0_146 = arith.constant 0 : index
    %c0_147 = arith.constant 0 : index
    %120 = vector.load %arg6[%c0_146, %c0_147] : memref<1x128xf32, #tpu.memory_space<vmem>>, vector<1x128xf32>
    %121 = vector.broadcast %120 : vector<1x128xf32> to vector<4x128xf32>
    %122 = arith.addf %119, %121 : vector<4x128xf32>
    %123 = arith.addf %122, %16 : vector<4x128xf32>
    %cst_148 = arith.constant 0.000000e+00 : f32
    %124 = vector.broadcast %cst_148 : f32 to vector<4x128xf32>
    %125 = arith.maximumf %123, %124 : vector<4x128xf32>
    %126 = arith.truncf %125 : vector<4x128xf32> to vector<4x128xbf16>
    %c0_149 = arith.constant 0 : index
    %c0_150 = arith.constant 0 : index
    %c0_151 = arith.constant 0 : index
    %127 = vector.load %arg9[%c0_149, %c0_150, %c0_151] : memref<1x4x128xbf16, #tpu.memory_space<vmem>>, vector<1x4x128xbf16>
    %128 = vector.shape_cast %127 : vector<1x4x128xbf16> to vector<4x128xbf16>
    %129 = vector.shape_cast %126 : vector<4x128xbf16> to vector<1x4x128xbf16>
    tpu.vector_store %arg9[%c0_149, %c0_150, %c0_151], %129 {strides = array<i32>} : memref<1x4x128xbf16, #tpu.memory_space<vmem>>, vector<1x4x128xbf16>,
    return
  }
  func.func @transform_0(%arg0: i32) -> (i32, i32, i32) {
    %c0_i32 = arith.constant 0 : i32
    %c0_i32_0 = arith.constant 0 : i32
    %c0_i32_1 = arith.constant 0 : i32
    return %arg0, %c0_i32, %c0_i32_0 : i32, i32, i32
  }
  func.func @transform_1(%arg0: i32) -> (i32, i32, i32) {
    %c0_i32 = arith.constant 0 : i32
    %c0_i32_0 = arith.constant 0 : i32
    %c0_i32_1 = arith.constant 0 : i32
    return %arg0, %c0_i32, %c0_i32_0 : i32, i32, i32
  }
  func.func @transform_2(%arg0: i32) -> (i32, i32) {
    %c0_i32 = arith.constant 0 : i32
    %c0_i32_0 = arith.constant 0 : i32
    %c0_i32_1 = arith.constant 0 : i32
    return %c0_i32, %c0_i32_0 : i32, i32
  }
  func.func @transform_3(%arg0: i32) -> (i32, i32) {
    %c0_i32 = arith.constant 0 : i32
    %c0_i32_0 = arith.constant 0 : i32
    %c0_i32_1 = arith.constant 0 : i32
    return %c0_i32, %c0_i32_0 : i32, i32
  }
  func.func @transform_4(%arg0: i32) -> (i32, i32) {
    %c0_i32 = arith.constant 0 : i32
    %c0_i32_0 = arith.constant 0 : i32
    %c0_i32_1 = arith.constant 0 : i32
    return %c0_i32, %c0_i32_0 : i32, i32
  }
  func.func @transform_5(%arg0: i32) -> (i32, i32) {
    %c0_i32 = arith.constant 0 : i32
    %c0_i32_0 = arith.constant 0 : i32
    %c0_i32_1 = arith.constant 0 : i32
    return %c0_i32, %c0_i32_0 : i32, i32
  }
  func.func @transform_6(%arg0: i32) -> (i32, i32) {
    %c0_i32 = arith.constant 0 : i32
    %c0_i32_0 = arith.constant 0 : i32
    %c0_i32_1 = arith.constant 0 : i32
    return %c0_i32, %c0_i32_0 : i32, i32
  }
  func.func @transform_7(%arg0: i32) -> (i32, i32) {
    %c0_i32 = arith.constant 0 : i32
    %c0_i32_0 = arith.constant 0 : i32
    %c0_i32_1 = arith.constant 0 : i32
    return %c0_i32, %c0_i32_0 : i32, i32
  }
  func.func @transform_8(%arg0: i32) -> (i32, i32, i32) {
    %c0_i32 = arith.constant 0 : i32
    %c0_i32_0 = arith.constant 0 : i32
    %c0_i32_1 = arith.constant 0 : i32
    return %arg0, %c0_i32, %c0_i32_0 : i32, i32, i32
  }
}

</mosaic_0001>

<bundles_post_ra>
// kernel: _lambda_.6
= control target key start
LH: loop header
LB: loop body
LE: loop exit
PB: predicated region body
PF: predicated region fallthrough
CT: control target
= control target key end

     0   :  { %s746_s12 = smov 0   ;;  %s842_s0 = inlined_call_operand.vmem [shape: bf16[2,64,256], index: 0, kind: input, shape index: {}]   ;;  %s843_s1 = inlined_call_operand.vmem [shape: bf16[256,128], index: 1, kind: input, shape index: {}]   ;;  %s844_s2 = inlined_call_operand.vmem [shape: f32[1,128], index: 2, kind: input, shape index: {}]   ;;  %s845_s3 = inlined_call_operand.vmem [shape: bf16[2,16,128], index: 3, kind: output, shape index: {}]  }
   0x1 LB: > { %s579_s13 = sadd.s32 4294967295, %s724_s12   ;;  %p583_p0 = scmp.ge.s32.totalorder %s724_s12, 1  ;;  %s724_s12 = sphi %s746_s12, %s13_s12  }
   0x2   : > { %p137_p1 = scmp.lt.s32.totalorder %s724_s12, 3 }
   0x4   : > { %p138_p2 = pnand %p583_p0, %p137_p1 }
   0x5   : > { %v690_v0 = vld [vmem:[%s843_s1 + $0x40] sm:$0xff] (!%p138_p2)   ;;  %v692_v2 = vld [vmem:[%s843_s1 + $0x48] sm:$0xff] (!%p138_p2)   ;;  %p161_p3 = scmp.lt.s32.totalorder (!%p138_p2), %s579_s13, 1  ;;  %v694_v4 = vld [vmem:[%s843_s1 + $0x50] sm:$0xff] (!%p138_p2)   ;;  %vm493_vm0 = vcmask (!%p138_p2), 1040384   ;;  %vm495_vm1 = vcmask (!%p138_p2), 1041408  }
   0x6   : > { %141 = sbr.rel (%p138_p2) target bundleno = 288 (0x120), region = 32  ;;  %v691_v1 = vld [vmem:[%s843_s1] sm:$0xff] (!%p138_p2)   ;;  %626 = vmatprep.subr.bf16.mxu0 (!%p138_p2), %v690_v0  ;;  %666 = vmatprep.subr.bf16.mxu1 (!%p138_p2), %v690_v0  ;;  %v693_v3 = vld [vmem:[%s843_s1 + $0x8] sm:$0xff] (!%p138_p2)   ;;  %v695_v5 = vld [vmem:[%s843_s1 + $0x10] sm:$0xff] (!%p138_p2)   ;;  %vm497_vm2 = vcmask (!%p138_p2), 1042432   ;;  %vm499_vm3 = vcmask (!%p138_p2), 1043456  }
   0x7   : > { %627 = vmatpush3.bf16.msra.mxu0 (!%p138_p2), %v691_v1  ;;  %674 = vmatpush3.bf16.msra.mxu1 (!%p138_p2), %v691_v1  ;;  %v696_v6 = vld [vmem:[%s843_s1 + $0x58] sm:$0xff] (!%p138_p2)   ;;  %v698_v8 = vld [vmem:[%s843_s1 + $0x60] sm:$0xff] (!%p138_p2)   ;;  %v700_v10 = vld [vmem:[%s843_s1 + $0x68] sm:$0xff] (!%p138_p2)   ;;  %vm501_vm4 = vcmask (!%p138_p2), 1044480   ;;  %vm503_vm5 = vcmask (!%p138_p2), 1045504   ;;  %vm505_vm6 = vcmask (!%p138_p2), 1046528  }
   0x8   : > { %628 = vmatprep.subr.bf16.mxu0 (!%p138_p2), %v692_v2  ;;  %667 = vmatprep.subr.bf16.mxu1 (!%p138_p2), %v692_v2  ;;  %v697_v7 = vld [vmem:[%s843_s1 + $0x18] sm:$0xff] (!%p138_p2)   ;;  %v699_v9 = vld [vmem:[%s843_s1 + $0x20] sm:$0xff] (!%p138_p2)   ;;  %v701_v13 = vld [vmem:[%s843_s1 + $0x28] sm:$0xff] (!%p138_p2)  }
   0x9   : > { %v702_v14 = vld [vmem:[%s843_s1 + $0x70] sm:$0xff] (!%p138_p2)   ;;  %v704_v16 = vld [vmem:[%s843_s1 + $0x78] sm:$0xff] (!%p138_p2)   ;;  %v588_v26 = vld [vmem:[%s844_s2] ss:$0 sm:$0xff] (!%p138_p2) }
   0xa   : > { %v703_v15 = vld [vmem:[%s843_s1 + $0x30] sm:$0xff] (!%p138_p2)   ;;  %v705_v17 = vld [vmem:[%s843_s1 + $0x38] sm:$0xff] (!%p138_p2)  }
   0xb   : > { %629 = vmatpush3.bf16.msra.mxu0 (!%p138_p2), %v693_v3  ;;  %675 = vmatpush3.bf16.msra.mxu1 (!%p138_p2), %v693_v3 }
   0xc   : > { %630 = vmatprep.subr.bf16.mxu0 (!%p138_p2), %v694_v4  ;;  %668 = vmatprep.subr.bf16.mxu1 (!%p138_p2), %v694_v4 }
   0xd   : > { %s847_s13 = smov (!%p161_p3, %s579_s13), 1 }
   0xe   : > { %s617_s30 = sshll.u32 %s847_s13, 6  ;;  %s618_s27 = sshll.u32 %s847_s13, 3 }
   0xf   : > { %631 = vmatpush3.bf16.msra.mxu0 %v695_v5  ;;  %676 = vmatpush3.bf16.msra.mxu1 %v695_v5  ;;  %s787_s8 = scalar_lea.vmem %s842_s0, %s617_s30  ;;  %s170_s30 = scalar_lea.vmem %s845_s3, %s618_s27 }
  0x10   : > { %632 = vmatprep.subr.bf16.mxu0 %v696_v6  ;;  %669 = vmatprep.subr.bf16.mxu1 %v696_v6  ;;  %v708_v11 = vld [vmem:[%s787_s8 + $0x4] ss:$8 sps:$4 sm:$0xff]   ;;  %v706_v18 = vld [vmem:[%s787_s8] ss:$8 sps:$4 sm:$0xff]   ;;  %v712_v20 = vld [vmem:[%s787_s8 + $0x14] ss:$8 sps:$4 sm:$0xff]  }
  0x11   : > { %v711_v12 = vld [vmem:[%s787_s8 + $0x24] ss:$8 sps:$4 sm:$0xff]   ;;  %387 = vmatprep.mubr.bf16.mxu0 %v708_v11  ;;  %v709_v19 = vld [vmem:[%s787_s8 + $0x20] ss:$8 sps:$4 sm:$0xff]   ;;  %v714_v21 = vld [vmem:[%s787_s8 + $0x34] ss:$8 sps:$4 sm:$0xff]  }
  0x12   : > { %403 = vmatprep.mubr.bf16.mxu1 %v711_v12  ;;  %v716_v22 = vld [vmem:[%s787_s8 + $0x10] ss:$8 sps:$4 sm:$0xff]  }
  0x13   : > { %633 = vmatpush3.bf16.msra.mxu0 %v697_v7  ;;  %677 = vmatpush3.bf16.msra.mxu1 %v697_v7  ;;  %v717_v23 = vld [vmem:[%s787_s8 + $0x30] ss:$8 sps:$4 sm:$0xff]  }
  0x14   : > { %634 = vmatprep.subr.bf16.mxu0 %v698_v8  ;;  %670 = vmatprep.subr.bf16.mxu1 %v698_v8 }
  0x17   : > { %635 = vmatpush3.bf16.msra.mxu0 %v699_v9  ;;  %678 = vmatpush3.bf16.msra.mxu1 %v699_v9 }
  0x18   : > { %636 = vmatprep.subr.bf16.mxu0 %v700_v10  ;;  %671 = vmatprep.subr.bf16.mxu1 %v700_v10 }
  0x1b   : > { %637 = vmatpush3.bf16.msra.mxu0 %v701_v13  ;;  %679 = vmatpush3.bf16.msra.mxu1 %v701_v13 }
  0x1c   : > { %638 = vmatprep.subr.bf16.mxu0 %v702_v14  ;;  %672 = vmatprep.subr.bf16.mxu1 %v702_v14 }
  0x1f   : > { %639 = vmatpush3.bf16.msra.mxu0 %v703_v15  ;;  %680 = vmatpush3.bf16.msra.mxu1 %v703_v15 }
  0x20   : > { %640 = vmatprep.subr.bf16.mxu0 %v704_v16  ;;  %673 = vmatprep.subr.bf16.mxu1 %v704_v16 }
  0x23   : > { %641 = vmatpush3.bf16.msra.mxu0 %v705_v17  ;;  %681 = vmatpush3.bf16.msra.mxu1 %v705_v17 }
  0x26   : > { %388 = vmatmul.mubr.bf16.vlgmr.msra.gmra.mrb[0].mxu0 %v706_v18  ;;  %404 = vmatmul.mubr.bf16.vlgmr.msra.gmra.mrb[0].mxu1 %v709_v19 }
  0x27   : > { %395 = vmatprep.mubr.bf16.mxu0 %v712_v20  ;;  %411 = vmatprep.mubr.bf16.mxu1 %v714_v21 }
  0x2e   : > { %396 = vmatmul.mubr.bf16.gmra.mrb[4].mxu0 %v716_v22  ;;  %412 = vmatmul.mubr.bf16.gmra.mrb[4].mxu1 %v717_v23 }
  0xf9   : > { %v642_v24 = vpop.f32.mrb[0].mxu0  ;;  %v654_v25 = vpop.f32.mrb[0].mxu1 }
  0xfa   : > { %v643_v27 = vpop.f32.mrb[1].mxu0  ;;  %v655_v28 = vpop.f32.mrb[1].mxu1 }
  0xfb   : > { %v644_v29 = vadd.f32 %v643_v27, %v642_v24  ;;  %v645_v30 = vpop.f32.mrb[2].mxu0  ;;  %v656_v31 = vadd.f32 %v655_v28, %v654_v25  ;;  %v657_v32 = vpop.f32.mrb[2].mxu1 }
  0xfc   : > { %v646_v33 = vpop.f32.mrb[3].mxu0  ;;  %v658_v34 = vpop.f32.mrb[3].mxu1 }
  0xfd   : > { %v390_v35 = vadd.f32 %v644_v29, %v588_v26  ;;  %v647_v36 = vadd.f32 %v646_v33, %v645_v30  ;;  %v659_v37 = vadd.f32 %v658_v34, %v657_v32  ;;  %v406_v56 = vadd.f32 %v656_v31, %v588_v26 }
  0xff   : > { %v393_v38 = vadd.f32 %v647_v36, %v588_v26  ;;  %v420_v39 = vmax.f32 %v390_v35, 0.0  ;;  %v409_v43 = vadd.f32 %v659_v37, %v588_v26  ;;  %v424_v5 = vmax.f32 %v406_v56, 0.0 }
 0x101   : > { %v421_v40 = vmax.f32 %v393_v38, 0.0  ;;  %v648_v41 = vpop.f32.mrb[4].mxu0  ;;  %v660_v42 = vpop.f32.mrb[4].mxu1  ;;  %v425_v57 = vmax.f32 %v409_v43, 0.0 }
 0x102   : > { %v649_v44 = vpop.f32.mrb[5].mxu0  ;;  %v661_v45 = vpop.f32.mrb[5].mxu1 }
 0x103   : > { %v428_v46 = vmax.f32 %v420_v39, %v421_v40  ;;  %v650_v47 = vadd.f32 %v649_v44, %v648_v41  ;;  %v662_v48 = vadd.f32 %v661_v45, %v660_v42  ;;  %v651_v49 = vpop.f32.mrb[6].mxu0  ;;  %v663_v50 = vpop.f32.mrb[6].mxu1 }
 0x104   : > { %v652_v51 = vpop.f32.mrb[7].mxu0  ;;  %v664_v52 = vpop.f32.mrb[7].mxu1 }
 0x105   : > { %v430_v53 = vrot.slane %v428_v46, 1  ;;  %v398_v54 = vadd.f32 %v650_v47, %v588_v26  ;;  %v414_v55 = vadd.f32 %v662_v48, %v588_v26  ;;  %v653_v58 = vadd.f32 %v652_v51, %v651_v49 }
 0x106   : > { %v665_v59 = vadd.f32 %v664_v52, %v663_v50  ;;  %v433_v61 = vrot.slane %v428_v46, 2 }
 0x107   : > { %v432_v60 = vmax.f32 %v428_v46, %v430_v53  ;;  %v422_v62 = vmax.f32 %v398_v54, 0.0  ;;  %v426_v63 = vmax.f32 %v414_v55, 0.0  ;;  %v401_v0 = vadd.f32 %v653_v58, %v588_v26 }
 0x108   : > { %v417_v1 = vadd.f32 %v665_v59, %v588_v26 }
 0x109   : > { %v435_v2 = vmax.f32 %v432_v60, %v433_v61  ;;  %v436_v3 = vmax.f32 %v421_v40, %v422_v62  ;;  %v454_v4 = vmax.f32 %v425_v57, %v426_v63  ;;  %v423_v6 = vmax.f32 %v401_v0, 0.0 }
 0x10a   : > { %v427_v7 = vmax.f32 %v417_v1, 0.0 }
 0x10b   : > { %v437_v8 = vmax.f32 %v436_v3, %v423_v6  ;;  %v445_v9 = vmax.f32 %v423_v6, %v424_v5  ;;  %v464_v11 = vrot.slane %v435_v2, 1  ;;  %v494_v12 = vsel %vm493_vm0, %v432_v60, %v435_v2 }
 0x10c   : > { %v455_v10 = vmax.f32 %v454_v4, %v427_v7  ;;  %v466_v16 = vrot.slane %v435_v2, 2 }
 0x10d   : > { %v439_v13 = vrot.slane %v437_v8, 1  ;;  %v446_v14 = vmax.f32 %v445_v9, %v425_v57  ;;  %v442_v18 = vrot.slane %v437_v8, 2  ;;  %v496_v20 = vsel %vm495_vm1, %v494_v12, %v464_v11 }
 0x10e   : > { %v457_v15 = vrot.slane %v455_v10, 1  ;;  %v460_v26 = vrot.slane %v455_v10, 2  ;;  %v498_v30 = vsel %vm497_vm2, %v496_v20, %v466_v16 }
 0x10f   : > { %v441_v17 = vmax.f32 %v437_v8, %v439_v13  ;;  %v448_v19 = vrot.slane %v446_v14, 1  ;;  %v451_v24 = vrot.slane %v446_v14, 2 }
 0x110   : > { %v459_v21 = vmax.f32 %v455_v10, %v457_v15 }
 0x111   : > { %v444_v22 = vmax.f32 %v441_v17, %v442_v18  ;;  %v450_v23 = vmax.f32 %v446_v14, %v448_v19  ;;  %v469_v25 = vrot.slane %v441_v17, 4 }
 0x112   : > { %v462_v33 = vmax.f32 %v459_v21, %v460_v26  ;;  %v484_v41 = vrot.slane %v459_v21, 4 }
 0x113   : > { %v453_v27 = vmax.f32 %v450_v23, %v451_v24  ;;  %v472_v28 = vrot.slane %v444_v22, 4  ;;  %v474_v29 = vrot.slane %v444_v22, 5  ;;  %v476_v31 = vrot.slane %v444_v22, 6 }
 0x114   : > { %v500_v32 = vsel %vm499_vm3, %v498_v30, %v469_v25  ;;  %v487_v42 = vrot.slane %v462_v33, 4  ;;  %v489_v44 = vrot.slane %v462_v33, 5  ;;  %v491_v46 = vrot.slane %v462_v33, 6 }
 0x115   : > { %v479_v34 = vrot.slane %v453_v27, 1  ;;  %v481_v35 = vrot.slane %v453_v27, 2  ;;  %v502_v36 = vsel %vm501_vm4, %v500_v32, %v472_v28  ;;  %v507_v37 = vsel %vm493_vm0, %v450_v23, %v453_v27 }
 0x116   : > { %v504_v38 = vsel %vm503_vm5, %v502_v36, %v474_v29 }
 0x117   : > { %v506_v39 = vsel %vm505_vm6, %v504_v38, %v476_v31  ;;  %v508_v40 = vsel %vm495_vm1, %v507_v37, %v479_v34 }
 0x118   : > { %v509_v43 = vsel %vm497_vm2, %v508_v40, %v481_v35 }
 0x119   : > { %v510_v45 = vsel %vm499_vm3, %v509_v43, %v484_v41 }
 0x11a   : > { %v511_v47 = vsel %vm501_vm4, %v510_v45, %v487_v42 }
 0x11b   : > { %v512_v48 = vsel %vm503_vm5, %v511_v47, %v489_v44 }
 0x11c   : > { %v513_v49 = vsel %vm505_vm6, %v512_v48, %v491_v46 }
 0x11d   : > { %v624_v50 = vpack.c.bf16 %v513_v49, %v506_v39 }
 0x11f   : > { %625 = vst [vmem:[%s170_s30] sm:$0xff] %v624_v50  }
 0x120 PF: > { %s13_s12 = sadd.s32 1, %s724_s12  }
 0x121   : > { %p10_p4 = scmp.ge.s32.totalorder %s13_s12, 4  }
 0x123   :  { %12 = sbr.rel (!%p10_p4) target bundleno = 1 (0x1), region = 62 }

// kernel: _lambda_.7
= control target key start
LH: loop header
LB: loop body
LE: loop exit
PB: predicated region body
PF: predicated region fallthrough
CT: control target
= control target key end

     0   :  { %s2844_s21 = smov 0   ;;  %s3731_s0 = inlined_call_operand.vmem [shape: bf16[2,16,128], index: 0, kind: input, shape index: {}]   ;;  %s3732_s1 = inlined_call_operand.vmem [shape: bf16[2,16,128], index: 1, kind: input, shape index: {}]   ;;  %s3733_s2 = inlined_call_operand.vmem [shape: bf16[128,128], index: 2, kind: input, shape index: {}]   ;;  %s3734_s3 = inlined_call_operand.vmem [shape: f32[1,128], index: 3, kind: input, shape index: {}]   ;;  %s3735_s4 = inlined_call_operand.vmem [shape: bf16[1152,128], index: 4, kind: input, shape index: {}]   ;;  %s3736_s5 = inlined_call_operand.vmem [shape: f32[1,128], index: 5, kind: input, shape index: {}]   ;;  %s3737_s6 = inlined_call_operand.vmem [shape: bf16[2,16,128], index: 6, kind: output, shape index: {}]  }
   0x1 LB: > { %s2046_s22 = sadd.s32 4294967295, %s2804_s21   ;;  %p2050_p0 = scmp.ge.s32.totalorder %s2804_s21, 1  ;;  %s2804_s21 = sphi %s2844_s21, %s16_s21  }
   0x2   : > { %p222_p1 = scmp.lt.s32.totalorder %s2804_s21, 3 }
   0x4   : > { %p223_p2 = pnand %p2050_p0, %p222_p1 }
   0x6   : > { %226 = sbr.rel (%p223_p2) target bundleno = 794 (0x31a), region = 44 }
   0xd   : > { %v2682_v0 = vld [vmem:[%s3733_s2] sm:$0xff]   ;;  %v3738_v1 = vmov 0.0   ;;  %v2683_v2 = vld [vmem:[%s3733_s2 + $0x8] sm:$0xff]   ;;  %vm2807_vm0 = vmmov 0   ;;  %p257_p3 = scmp.lt.s32.totalorder %s2046_s22, 1  ;;  %v2808_v3 = vmov 0  }
   0xe   : > { %2571 = vmatprep.subr.bf16.mxu0 %v3738_v1  ;;  %2587 = vmatprep.mubr.msk.bf16.mxu0 %vm2807_vm0, %v3738_v1  ;;  %400 = vst [vmem:[#allocation2] sm:$0x7] %v2808_v3  ;;  %401 = vst [vmem:[#allocation2 + $0x4] sm:$0x7] %v2808_v3  ;;  %v2684_v4 = vld [vmem:[%s3733_s2 + $0x10] sm:$0xff]   ;;  %v2685_v5 = vld [vmem:[%s3733_s2 + $0x18] sm:$0xff]  }
   0xf   : > { %2572 = vmatpush3.bf16.msra.mxu0 %v2682_v0  ;;  %s3856_s22 = smov (!%p257_p3, %s2046_s22), 1  ;;  %402 = vst [vmem:[#allocation2 + $0x8] sm:$0x7] %v2808_v3  ;;  %403 = vst [vmem:[#allocation2 + $0xc] sm:$0x7] %v2808_v3  ;;  %v2878_v6 = vld [vmem:[%s3735_s4 + $0x40] sm:$0xff]  }
  0x10   : > { %2573 = vmatprep.subr.bf16.mxu0 %v3738_v1  ;;  %404 = vst [vmem:[#allocation2 + $0x10] sm:$0x7] %v2808_v3  ;;  %405 = vst [vmem:[#allocation2 + $0x14] sm:$0x7] %v2808_v3  ;;  %s2865_s29 = sshll.u32 %s3856_s22, 3  ;;  %v2884_v7 = vld [vmem:[%s3735_s4] sm:$0xff]   ;;  %2183 = vmatprep.subr.bf16.mxu1 %v2878_v6 }
  0x11   : > { %s261_s8 = scalar_lea.vmem %s3731_s0, %s2865_s29  ;;  %3794 = vst [vmem:[#allocation3_spill] sm:$0xff] %v2878_v6  ;;  %v2686_v8 = vld [vmem:[%s3733_s2 + $0x20] sm:$0xff]   ;;  %v2893_v9 = vld [vmem:[%s3735_s4 + $0x48] sm:$0xff]   ;;  %2184 = vmatpush3.bf16.msra.mxu1 %v2884_v7  ;;  %v2905_v11 = vld [vmem:[%s3735_s4 + $0x50] sm:$0xff]   ;;  %vm418_vm1 = vcmask 1042432   ;;  %s266_s18 = scalar_lea.vmem %s3732_s1, %s2865_s29  ;;  %vm1953_vm4 = vcmask 1043456  }
  0x12   : > { %v2899_v10 = vld [vmem:[%s3735_s4 + $0x8] sm:$0xff]   ;;  %2185 = vmatprep.subr.bf16.mxu1 %v2893_v9  ;;  %v2915_v13 = vld [vmem:[%s3735_s4 + $0x10] sm:$0xff]   ;;  %v2921_v14 = vld [vmem:[%s3735_s4 + $0x58] sm:$0xff]   ;;  %vm419_vm2 = vsmask.f32 2306  ;;  %s271_s24 = scalar_lea.vmem %s3737_s6, %s2865_s29 }
  0x13   : > { %2574 = vmatpush3.bf16.msra.mxu0 %v2683_v2  ;;  %v2687_v12 = vld [vmem:[%s3733_s2 + $0x28] sm:$0xff]   ;;  %v2688_v15 = vld [vmem:[%s3733_s2 + $0x30] sm:$0xff]   ;;  %v2931_v16 = vld [vmem:[%s3735_s4 + $0x18] sm:$0xff]  }
  0x14   : > { %2575 = vmatprep.subr.bf16.mxu0 %v3738_v1  ;;  %v2937_v17 = vld [vmem:[%s3735_s4 + $0x60] sm:$0xff]   ;;  %v2689_v18 = vld [vmem:[%s3733_s2 + $0x38] sm:$0xff]   ;;  %v2953_v20 = vld [vmem:[%s3735_s4 + $0x68] sm:$0xff]  }
  0x15   : > { %2186 = vmatpush3.bf16.msra.mxu1 %v2899_v10  ;;  %v2947_v19 = vld [vmem:[%s3735_s4 + $0x20] sm:$0xff]   ;;  %v2969_v23 = vld [vmem:[%s3735_s4 + $0x28] sm:$0xff]   ;;  %v2975_v24 = vld [vmem:[%s3735_s4 + $0x70] sm:$0xff]  }
  0x16   : > { %2187 = vmatprep.subr.bf16.mxu1 %v2905_v11  ;;  %v2690_v21 = vld [vmem:[%s261_s8] sm:$0xff]   ;;  %v2987_v27 = vld [vmem:[%s3735_s4 + $0xc8] sm:$0xff]   ;;  %v2992_v30 = vld [vmem:[%s3735_s4 + $0x30] sm:$0xff]  }
  0x17   : > { %2576 = vmatpush3.bf16.msra.mxu0 %v2684_v4  ;;  %v2964_v22 = vld [vmem:[%s3735_s4 + $0xc0] sm:$0xff]   ;;  %v2998_v31 = vld [vmem:[%s3735_s4 + $0x78] sm:$0xff]   ;;  %v3005_v33 = vld [vmem:[%s3735_s4 + $0x88] sm:$0xff]  }
  0x18   : > { %2577 = vmatprep.subr.bf16.mxu0 %v3738_v1  ;;  %v2711_v25 = vld [vmem:[#allocation2] ss:$0 sps:$4 sm:$0x77]   ;;  %v3010_v34 = vld [vmem:[%s3735_s4 + $0xd0] sm:$0xff]   ;;  %v3015_v35 = vld [vmem:[%s3735_s4 + $0x38] sm:$0xff]  }
  0x19   : > { %2188 = vmatpush3.bf16.msra.mxu1 %v2915_v13  ;;  %v2981_v26 = vld [vmem:[%s3735_s4 + $0x80] sm:$0xff]   ;;  %v469_v28 = vshrl.u32 %v2711_v25, 16  ;;  %v471_v29 = vshll.u32 %v2711_v25, 16  ;;  %v3026_v38 = vld [vmem:[%s3735_s4 + $0x90] sm:$0xff]   ;;  %v3044_v41 = vld [vmem:[%s3735_s4 + $0x148] sm:$0xff]  }
  0x1a   : > { %2189 = vmatprep.subr.bf16.mxu1 %v2921_v14  ;;  %v3021_v37 = vld [vmem:[%s3735_s4 + $0x140] sm:$0xff]   ;;  %v3050_v42 = vld [vmem:[%s3735_s4 + $0x108] sm:$0xff]   ;;  %v3055_v43 = vld [vmem:[%s3735_s4 + $0xd8] sm:$0xff]  }
  0x1b   : > { %2578 = vmatpush3.bf16.msra.mxu0 %v2685_v5  ;;  %v473_v32 = vrot.slane %v471_v29, 1  ;;  %v456_v39 = vld [vmem:[#allocation2] sm:$0x3]  ;;  %v3061_v44 = vld [vmem:[%s3735_s4 + $0x98] sm:$0xff]   ;;  %v3067_v45 = vld [vmem:[%s3735_s4 + $0x150] sm:$0xff]  }
  0x1c   : > { %2579 = vmatprep.subr.bf16.mxu0 %v3738_v1  ;;  %v3035_v40 = vld [vmem:[%s3735_s4 + $0x100] sm:$0xff]   ;;  %v3073_v46 = vld [vmem:[%s3735_s4 + $0x110] sm:$0xff]   ;;  %v3091_v49 = vld [vmem:[%s3735_s4 + $0x158] sm:$0xff]  }
  0x1d   : > { %2190 = vmatpush3.bf16.msra.mxu1 %v2931_v16  ;;  %v474_v36 = vor.u32 %v473_v32, %v469_v28  ;;  %v3079_v47 = vld [vmem:[%s3735_s4 + $0xe0] sm:$0xff]   ;;  %v3097_v50 = vld [vmem:[%s3735_s4 + $0x118] sm:$0xff]   ;;  %v3103_v51 = vld [vmem:[%s3735_s4 + $0xe8] sm:$0xff]  }
  0x1e   : > { %2191 = vmatprep.subr.bf16.mxu1 %v2937_v17  ;;  %v3085_v48 = vld [vmem:[%s3735_s4 + $0xa0] sm:$0xff]   ;;  %3795 = vst [vmem:[#allocation4_spill] sm:$0xff] %v3103_v51  ;;  %v3109_v52 = vld [vmem:[%s3735_s4 + $0xa8] sm:$0xff]   ;;  %v3127_v55 = vld [vmem:[%s3735_s4 + $0xf0] sm:$0xff]  }
  0x1f   : > { %2580 = vmatpush3.bf16.msra.mxu0 %v2686_v8  ;;  %1121 = vmatprep.mubr.bf16.mxu1 %v474_v36  ;;  %3796 = vst [vmem:[#allocation5_spill] sm:$0xff] %v3109_v52  ;;  %v3115_v53 = vld [vmem:[%s3735_s4 + $0x160] sm:$0xff]   ;;  %v3133_v56 = vld [vmem:[%s3735_s4 + $0xb0] sm:$0xff]   ;;  %v3139_v57 = vld [vmem:[%s3735_s4 + $0x168] sm:$0xff]  }
  0x20   : > { %2581 = vmatprep.subr.bf16.mxu0 %v3738_v1  ;;  %v3121_v54 = vld [vmem:[%s3735_s4 + $0x120] sm:$0xff]   ;;  %3797 = vst [vmem:[#allocation6_spill] sm:$0xff] %v3133_v56  ;;  %3798 = vst [vmem:[#allocation7_spill] sm:$0xff] %v3139_v57  ;;  %v3145_v58 = vld [vmem:[%s3735_s4 + $0x128] sm:$0xff]  }
  0x21   : > { %2192 = vmatpush3.bf16.msra.mxu1 %v2947_v19  ;;  %3799 = vst [vmem:[#allocation8_spill] sm:$0xff] %v3145_v58  ;;  %v3151_v59 = vld [vmem:[%s3735_s4 + $0xf8] sm:$0xff]   ;;  %v3163_v61 = vld [vmem:[%s3735_s4 + $0x170] sm:$0xff]   ;;  %v3175_v63 = vld [vmem:[%s3735_s4 + $0x1c0] sm:$0xff]  }
  0x22   : > { %2193 = vmatprep.subr.bf16.mxu1 %v2953_v20  ;;  %v3157_v60 = vld [vmem:[%s3735_s4 + $0xb8] sm:$0xff]   ;;  %3800 = vst [vmem:[#allocation9_spill] sm:$0xff] %v3163_v61  ;;  %v3169_v62 = vld [vmem:[%s3735_s4 + $0x130] sm:$0xff]   ;;  %v2057_v3 = vld [vmem:[%s3734_s3] ss:$0 sm:$0xff] }
  0x23   : > { %2582 = vmatpush3.bf16.msra.mxu0 %v2687_v12  ;;  %3801 = vst [vmem:[#allocation10_spill] sm:$0xff] %v3169_v62  ;;  %v3182_v0 = vld [vmem:[%s3735_s4 + $0x178] sm:$0xff]   ;;  %vm3195_vm3 = vmand %vm418_vm1, %vm419_vm2 }
  0x24   : > { %2583 = vmatprep.subr.bf16.mxu0 %v3738_v1  ;;  %3802 = vst [vmem:[#allocation11_spill] sm:$0xff] %v3182_v0  ;;  %v3187_v2 = vld [vmem:[%s3735_s4 + $0x138] sm:$0xff]  }
  0x25   : > { %2194 = vmatpush3.bf16.msra.mxu1 %v2969_v23  ;;  %3803 = vst [vmem:[#allocation12_spill] sm:$0xff] %v3187_v2 }
  0x26   : > { %2195 = vmatprep.subr.bf16.mxu1 %v2975_v24 }
  0x27   : > { %2584 = vmatpush3.bf16.msra.mxu0 %v2688_v15 }
  0x28   : > { %2585 = vmatprep.subr.bf16.mxu0 %v3738_v1 }
  0x29   : > { %2196 = vmatpush3.bf16.msra.mxu1 %v2992_v30 }
  0x2a   : > { %2197 = vmatprep.subr.bf16.mxu1 %v2998_v31 }
  0x2b   : > { %2586 = vmatpush3.bf16.msra.mxu0 %v2689_v18 }
  0x2c   : > { %2205 = vmatprep.subr.bf16.mxu0 %v2964_v22 }
  0x2d   : > { %2198 = vmatpush3.bf16.msra.mxu1 %v3015_v35 }
  0x2e   : > { %2588 = vmatmul.mubr.bf16.vlgmr.msra.gmra.mrb[0].mxu0 %v2690_v21  ;;  %2227 = vmatprep.subr.bf16.mxu1 %v3021_v37 }
  0x2f   : > { %2206 = vmatpush3.bf16.msra.mxu0 %v2981_v26 }
  0x30   : > { %2207 = vmatprep.subr.bf16.mxu0 %v2987_v27  ;;  %1122 = vmatmul.mubr.bf16.vlgmr.msra.gmra.mrb[0].mxu1 %v456_v39 }
  0x31   : > { %2228 = vmatpush3.bf16.msra.mxu1 %v3035_v40 }
  0x32   : > { %2229 = vmatprep.subr.bf16.mxu1 %v3044_v41 }
  0x33   : > { %2208 = vmatpush3.bf16.msra.mxu0 %v3005_v33 }
  0x34   : > { %2209 = vmatprep.subr.bf16.mxu0 %v3010_v34 }
  0x35   : > { %2230 = vmatpush3.bf16.msra.mxu1 %v3050_v42 }
  0x36   : > { %2231 = vmatprep.subr.bf16.mxu1 %v3067_v45 }
  0x37   : > { %2210 = vmatpush3.bf16.msra.mxu0 %v3026_v38 }
  0x38   : > { %2211 = vmatprep.subr.bf16.mxu0 %v3055_v43 }
  0x39   : > { %2232 = vmatpush3.bf16.msra.mxu1 %v3073_v46 }
  0x3a   : > { %2233 = vmatprep.subr.bf16.mxu1 %v3091_v49 }
  0x3b   : > { %2212 = vmatpush3.bf16.msra.mxu0 %v3061_v44 }
  0x3c   : > { %2213 = vmatprep.subr.bf16.mxu0 %v3079_v47 }
  0x3d   : > { %2234 = vmatpush3.bf16.msra.mxu1 %v3097_v50 }
  0x3e   : > { %2235 = vmatprep.subr.bf16.mxu1 %v3115_v53 }
  0x3f   : > { %2214 = vmatpush3.bf16.msra.mxu0 %v3085_v48 }
  0x40   : > { %2215 = vmatprep.subr.bf16.mxu0 %v3103_v51 }
  0x41   : > { %2236 = vmatpush3.bf16.msra.mxu1 %v3121_v54 }
  0x42   : > { %2237 = vmatprep.subr.bf16.mxu1 %v3139_v57 }
  0x43   : > { %2216 = vmatpush3.bf16.msra.mxu0 %v3109_v52 }
  0x44   : > { %2217 = vmatprep.subr.bf16.mxu0 %v3127_v55 }
  0x45   : > { %2238 = vmatpush3.bf16.msra.mxu1 %v3145_v58 }
  0x46   : > { %2239 = vmatprep.subr.bf16.mxu1 %v3163_v61 }
  0x47   : > { %2218 = vmatpush3.bf16.msra.mxu0 %v3133_v56 }
  0x48   : > { %2219 = vmatprep.subr.bf16.mxu0 %v3151_v59 }
  0x49   : > { %2240 = vmatpush3.bf16.msra.mxu1 %v3169_v62 }
  0x4a   : > { %2241 = vmatprep.subr.bf16.mxu1 %v3182_v0 }
  0x4b   : > { %2220 = vmatpush3.bf16.msra.mxu0 %v3157_v60 }
  0x4c   : > { %2249 = vmatprep.subr.bf16.mxu0 %v3175_v63 }
  0x4d   : > { %2242 = vmatpush3.bf16.msra.mxu1 %v3187_v2 }
  0x4e   : > { %2591 = vmatprep.subr.bf16.mxu1 %v3738_v1 }
 0x101   : > { %v386_v4 = vpop.f32.mrb[0].mxu0 }
 0x102   : > { %v387_v5 = vadd.f32 %v2057_v3, %v386_v4  ;;  %v2589_v8 = vpop.f32.mrb[1].mxu0  ;;  %v421_v4 = vld [vmem:[#allocation2 + $0x4] sm:$0x7] }
 0x103   : > { %v389_v12 = vpop.f32.mrb[2].mxu0 }
 0x104   : > { %v393_v15 = vmax.f32 %v387_v5, 0.0  ;;  %v390_v18 = vadd.f32 %v2057_v3, %v389_v12  ;;  %v2590_v21 = vpop.f32.mrb[3].mxu0 }
 0x105   : > { %v444_v21 = vld [vmem:[#allocation2 + $0xc] sm:$0x7] }
 0x106   : > { %v2161_v25 = vpack.c.bf16 %v393_v15, %v393_v15  ;;  %v394_v28 = vmax.f32 %v390_v18, 0.0  ;;  %v430_v18 = vld [vmem:[#allocation2 + $0x8] sm:$0x7] }
 0x108   : > { %v410_v29 = vshrl.u32 %v2161_v25, 16  ;;  %v413_v32 = vshll.u32 %v2161_v25, 16  ;;  %v2162_v36 = vpack.c.bf16 %v394_v28, %v394_v28 }
 0x10a   : > { %v412_v39 = vrot.slane %v410_v29, 7  ;;  %v424_v1 = vrot.slane %v410_v29, 5  ;;  %v425_v2 = vrot.slane %v413_v32, 6  ;;  %v436_v0 = vshrl.u32 %v2162_v36, 16 }
 0x10b   : > { %v439_v8 = vshll.u32 %v2162_v36, 16 }
 0x10c   : > { %v415_v5 = vor.u32 %v413_v32, %v412_v39  ;;  %v426_v3 = vor.u32 %v425_v2, %v424_v1  ;;  %v438_v12 = vrot.slane %v436_v0, 7  ;;  %v447_v15 = vrot.slane %v436_v0, 5  ;;  %v453_v32 = vld [vmem:[#allocation2 + $0x10] sm:$0x7] }
 0x10d   : > { %v448_v61 = vrot.slane %v439_v8, 6  ;;  %v2739_v1 = vld [vmem:[#allocation2] ss:$0 sps:$4 sm:$0x66]  }
 0x10e   : > { %v422_v25 = vsel %vm3195_vm3, %v415_v5, %v421_v4  ;;  %v427_v28 = vrot.slane %v426_v3, 4  ;;  %v441_v29 = vor.u32 %v439_v8, %v438_v12  ;;  %v479_v39 = vrot.slane %v2739_v1, 1  ;;  %v3215_v4 = vld [vmem:[%s3735_s4 + $0x1c8] sm:$0xff]   ;;  %v3246_v1 = vld [vmem:[%s3735_s4 + $0x190] sm:$0xff]  }
 0x10f   : > { %423 = vst [vmem:[#allocation2 + $0x4] sm:$0x7] %v422_v25  ;;  %v449_v58 = vor.u32 %v448_v61, %v447_v15  ;;  %v3210_v61 = vld [vmem:[%s3735_s4 + $0x180] sm:$0xff]   ;;  %v3227_v3 = vld [vmem:[%s3735_s4 + $0x188] sm:$0xff]   ;;  %v3233_v15 = vld [vmem:[%s3735_s4 + $0x1d0] sm:$0xff]  }
 0x110   : > { %v431_v57 = vsel %vm3195_vm3, %v427_v28, %v430_v18  ;;  %v445_v36 = vsel %vm3195_vm3, %v441_v29, %v444_v21  ;;  %v3240_v28 = vld [vmem:[%s3735_s4 + $0x200] sm:$0xff]  }
 0x111   : > { %432 = vst [vmem:[#allocation2 + $0x8] sm:$0x7] %v431_v57  ;;  %446 = vst [vmem:[#allocation2 + $0xc] sm:$0x7] %v445_v36  ;;  %v450_v0 = vrot.slane %v449_v58, 4 }
 0x112   : > { %3806 = vst [vmem:[#allocation13_spill] sm:$0xff] %v3240_v28 }
 0x113   : > { %v454_v2 = vsel %vm3195_vm3, %v450_v0, %v453_v32 }
 0x114   : > { %455 = vst [vmem:[#allocation2 + $0x10] sm:$0x7] %v454_v2  ;;  %v3254_v2 = vld [vmem:[%s3735_s4 + $0x1d8] sm:$0xff]  }
 0x116   : > { %v3217_v8 = vld [vmem:[#allocation2 + $0x4] sm:$0x3] }
 0x117   : > { %1161 = vmatprep.mubr.bf16.mxu0 %v3217_v8  ;;  %v3220_v57 = vld [vmem:[#allocation2 + $0x4] ss:$0 sps:$4 sm:$0x66]  }
 0x118   : > { %v2746_v58 = vld [vmem:[#allocation2 + $0x4] ss:$0 sps:$4 sm:$0x77]   ;;  %1162 = vmatmul.mubr.bf16.vlgmr.msra.gmra.mrb[4].mxu0 %v479_v39  ;;  %v2750_v62 = vld [vmem:[#allocation2 + $0x8] ss:$0 sps:$4 sm:$0x77]  }
 0x119   : > { %2250 = vmatpush3.bf16.msra.mxu0 %v3210_v61  ;;  %v3752_v5 = vrot.slane %v3220_v57, 1  ;;  %v487_v12 = vshll.u32 %v2746_v58, 16  ;;  %v503_v18 = vshll.u32 %v2750_v62, 16  ;;  %v485_v21 = vshrl.u32 %v2746_v58, 16  ;;  %v3261_v39 = vld [vmem:[%s3735_s4 + $0x208] sm:$0xff]  }
 0x11a   : > { %2251 = vmatprep.subr.bf16.mxu0 %v3215_v4  ;;  %v501_v29 = vshrl.u32 %v2750_v62, 16  ;;  %3808 = vst [vmem:[#allocation15_spill] sm:$0xff] %v3261_v39  ;;  %v3809_v58 = vmov 0.0   ;;  %v3268_v62 = vld [vmem:[%s3735_s4 + $0x198] sm:$0xff]  }
 0x11b   : > { %1201 = vmatprep.mubr.bf16.mxu1 %v3752_v5  ;;  %v489_v25 = vrot.slane %v487_v12, 1  ;;  %v505_v36 = vrot.slane %v503_v18, 1  ;;  %3810 = vst [vmem:[#allocation16_spill] sm:$0xff] %v3268_v62  ;;  %v3274_v12 = vld [vmem:[%s3735_s4 + $0x1e0] sm:$0xff]   ;;  %v3282_v18 = vld [vmem:[%s3735_s4 + $0x210] sm:$0xff]  }
 0x11c   : > { %3811 = vst [vmem:[#allocation17_spill] sm:$0xff] %v3274_v12  ;;  %3812 = vst [vmem:[#allocation18_spill] sm:$0xff] %v3282_v18  ;;  %v3314_v5 = vld [vmem:[%s3735_s4 + $0x1f0] sm:$0xff]  }
 0x11d   : > { %2252 = vmatpush3.bf16.msra.mxu0 %v3227_v3  ;;  %v490_v32 = vor.u32 %v489_v25, %v485_v21  ;;  %v3249_v0 = vor.u32 %v505_v36, %v501_v29  ;;  %v3289_v21 = vld [vmem:[%s3735_s4 + $0x1a0] sm:$0xff]   ;;  %v3295_v25 = vld [vmem:[%s3735_s4 + $0x1e8] sm:$0xff]   ;;  %v3301_v29 = vld [vmem:[%s3735_s4 + $0x218] sm:$0xff]   ;;  %3817 = vst [vmem:[#allocation23_spill] sm:$0xff] %v3314_v5 }
 0x11e   : > { %2253 = vmatprep.subr.bf16.mxu0 %v3233_v15  ;;  %3813 = vst [vmem:[#allocation19_spill] sm:$0xff] %v3289_v21  ;;  %3814 = vst [vmem:[#allocation20_spill] sm:$0xff] %v3295_v25  ;;  %v3308_v36 = vld [vmem:[%s3735_s4 + $0x1a8] sm:$0xff]  }
 0x11f   : > { %3807 = vst [vmem:[#allocation14_spill] sm:$0xff] %v3249_v0  ;;  %1202 = vmatmul.mubr.bf16.vlgmr.msra.gmra.mrb[4].mxu1 %v490_v32  ;;  %1241 = vmatprep.mubr.bf16.mxu0 %v3249_v0  ;;  %3815 = vst [vmem:[#allocation21_spill] sm:$0xff] %v3301_v29  ;;  %v3346_v0 = vld [vmem:[%s3735_s4 + $0x1b8] sm:$0xff]  }
 0x120   : > { %2592 = vmatpush3.bf16.msra.mxu1 %v3240_v28  ;;  %2607 = vmatprep.mubr.msk.bf16.mxu1 %vm2807_vm0, %v3809_v58  ;;  %3816 = vst [vmem:[#allocation22_spill] sm:$0xff] %v3308_v36  ;;  %v3339_v28 = vld [vmem:[%s3735_s4 + $0x228] sm:$0xff]   ;;  %3822 = vst [vmem:[#allocation28_spill] sm:$0xff] %v3346_v0 }
 0x121   : > { %2254 = vmatpush3.bf16.msra.mxu0 %v3246_v1  ;;  %2593 = vmatprep.subr.bf16.mxu1 %v3809_v58  ;;  %3821 = vst [vmem:[#allocation27_spill] sm:$0xff] %v3339_v28 }
 0x122   : > { %2255 = vmatprep.subr.bf16.mxu0 %v3254_v2 }
 0x124   : > { %2594 = vmatpush3.bf16.msra.mxu1 %v3261_v39  ;;  %v3327_v39 = vld [vmem:[%s3735_s4 + $0x1b0] sm:$0xff]  }
 0x125   : > { %2256 = vmatpush3.bf16.msra.mxu0 %v3268_v62  ;;  %2595 = vmatprep.subr.bf16.mxu1 %v3809_v58  ;;  %3819 = vst [vmem:[#allocation25_spill] sm:$0xff] %v3327_v39 }
 0x126   : > { %2257 = vmatprep.subr.bf16.mxu0 %v3274_v12 }
 0x128   : > { %2596 = vmatpush3.bf16.msra.mxu1 %v3282_v18  ;;  %v3320_v18 = vld [vmem:[%s3735_s4 + $0x220] sm:$0xff]  }
 0x129   : > { %2258 = vmatpush3.bf16.msra.mxu0 %v3289_v21  ;;  %2597 = vmatprep.subr.bf16.mxu1 %v3809_v58  ;;  %3818 = vst [vmem:[#allocation24_spill] sm:$0xff] %v3320_v18 }
 0x12a   : > { %2259 = vmatprep.subr.bf16.mxu0 %v3295_v25 }
 0x12c   : > { %2598 = vmatpush3.bf16.msra.mxu1 %v3301_v29  ;;  %v3333_v29 = vld [vmem:[%s3735_s4 + $0x1f8] sm:$0xff]  }
 0x12d   : > { %2260 = vmatpush3.bf16.msra.mxu0 %v3308_v36  ;;  %2599 = vmatprep.subr.bf16.mxu1 %v3809_v58  ;;  %3820 = vst [vmem:[#allocation26_spill] sm:$0xff] %v3333_v29 }
 0x12e   : > { %2261 = vmatprep.subr.bf16.mxu0 %v3314_v5 }
 0x130   : > { %2600 = vmatpush3.bf16.msra.mxu1 %v3320_v18  ;;  %v3353_v18 = vld [vmem:[%s3735_s4 + $0x230] sm:$0xff]  }
 0x131   : > { %2262 = vmatpush3.bf16.msra.mxu0 %v3327_v39  ;;  %2601 = vmatprep.subr.bf16.mxu1 %v3809_v58  ;;  %v3358_v39 = vld [vmem:[#allocation2 + $0x8] sm:$0x3] }
 0x132   : > { %2263 = vmatprep.subr.bf16.mxu0 %v3333_v29  ;;  %v2768_v29 = vld [vmem:[#allocation2 + $0x8] ss:$0 sps:$4 sm:$0x66]  }
 0x134   : > { %2602 = vmatpush3.bf16.msra.mxu1 %v3339_v28  ;;  %v3365_v28 = vld [vmem:[%s3735_s4 + $0x238] sm:$0xff]  }
 0x135   : > { %2264 = vmatpush3.bf16.msra.mxu0 %v3346_v0  ;;  %2603 = vmatprep.subr.bf16.mxu1 %v3809_v58 }
 0x136   : > { %2280 = vmatprep.subr.bf16.mxu0 %v2878_v6  ;;  %v3372_v6 = vrot.slane %v2768_v29, 1 }
 0x138   : > { %1242 = vmatmul.mubr.bf16.vlgmr.msra.gmra.mrb[8].mxu0 %v3358_v39  ;;  %2604 = vmatpush3.bf16.msra.mxu1 %v3353_v18 }
 0x139   : > { %2281 = vmatpush3.bf16.msra.mxu0 %v2884_v7  ;;  %1340 = vmatprep.mubr.bf16.mxu0 %v490_v32  ;;  %v2769_v32 = vld [vmem:[#allocation2 + $0xc] ss:$0 sps:$4 sm:$0x77]  }
 0x13a   : > { %2605 = vmatprep.subr.bf16.mxu1 %v3809_v58  ;;  %2282 = vmatprep.subr.bf16.mxu0 %v2893_v9  ;;  %v1298_v29 = vshll.u32 %v2769_v32, 16 }
 0x13c   : > { %2606 = vmatpush3.bf16.msra.mxu1 %v3365_v28 }
 0x13d   : > { %2283 = vmatpush3.bf16.msra.mxu0 %v2899_v10  ;;  %2302 = vmatprep.subr.bf16.mxu1 %v2964_v22 }
 0x13e   : > { %2284 = vmatprep.subr.bf16.mxu0 %v2905_v11 }
 0x13f   : > { %2608 = vmatmul.mubr.bf16.vlgmr.msra.gmra.mrb[8].mxu1 %v3372_v6 }
 0x140   : > { %2303 = vmatpush3.bf16.msra.mxu1 %v2981_v26  ;;  %1380 = vmatprep.mubr.bf16.mxu1 %v3358_v39 }
 0x141   : > { %2285 = vmatpush3.bf16.msra.mxu0 %v2915_v13  ;;  %2304 = vmatprep.subr.bf16.mxu1 %v2987_v27 }
 0x142   : > { %2286 = vmatprep.subr.bf16.mxu0 %v2921_v14 }
 0x144   : > { %2305 = vmatpush3.bf16.msra.mxu1 %v3005_v33 }
 0x145   : > { %2287 = vmatpush3.bf16.msra.mxu0 %v2931_v16  ;;  %2306 = vmatprep.subr.bf16.mxu1 %v3010_v34 }
 0x146   : > { %2288 = vmatprep.subr.bf16.mxu0 %v2937_v17 }
 0x148   : > { %2307 = vmatpush3.bf16.msra.mxu1 %v3026_v38 }
 0x149   : > { %2289 = vmatpush3.bf16.msra.mxu0 %v2947_v19  ;;  %2308 = vmatprep.subr.bf16.mxu1 %v3055_v43 }
 0x14a   : > { %2290 = vmatprep.subr.bf16.mxu0 %v2953_v20 }
 0x14c   : > { %2309 = vmatpush3.bf16.msra.mxu1 %v3061_v44 }
 0x14d   : > { %2291 = vmatpush3.bf16.msra.mxu0 %v2969_v23  ;;  %2310 = vmatprep.subr.bf16.mxu1 %v3079_v47 }
 0x14e   : > { %2292 = vmatprep.subr.bf16.mxu0 %v2975_v24 }
 0x150   : > { %2311 = vmatpush3.bf16.msra.mxu1 %v3085_v48 }
 0x151   : > { %2293 = vmatpush3.bf16.msra.mxu0 %v2992_v30  ;;  %2312 = vmatprep.subr.bf16.mxu1 %v3103_v51  ;;  %v1296_v51 = vshrl.u32 %v2769_v32, 16  ;;  %v2199_v32 = vpop.f32.mrb[0].mxu1 }
 0x152   : > { %2294 = vmatprep.subr.bf16.mxu0 %v2998_v31 }
 0x154   : > { %2313 = vmatpush3.bf16.msra.mxu1 %v3109_v52  ;;  %v1300_v52 = vrot.slane %v1298_v29, 1  ;;  %v2200_v29 = vpop.f32.mrb[1].mxu1 }
 0x155   : > { %2295 = vmatpush3.bf16.msra.mxu0 %v3015_v35  ;;  %2314 = vmatprep.subr.bf16.mxu1 %v3127_v55 }
 0x156   : > { %2324 = vmatprep.subr.bf16.mxu0 %v3021_v37 }
 0x158   : > { %1341 = vmatmul.mubr.bf16.vlgmr.msra.gmra.mrb[12].mxu0 %v3217_v8  ;;  %2315 = vmatpush3.bf16.msra.mxu1 %v3133_v56  ;;  %v3412_v8 = vor.u32 %v1300_v52, %v1296_v51  ;;  %v3824_v56 = vrot.slane %v3220_v57, 1  ;;  %v3424_v51 = vadd.f32 %v2200_v29, %v2199_v32  ;;  %v2202_v52 = vpop.f32.mrb[2].mxu1  ;;  %v3826_v57 = vld [vmem:[#allocation7_spill] sm:$0xff]  ;;  %v3828_v32 = vld [vmem:[#allocation9_spill] sm:$0xff]  ;;  %v3829_v29 = vld [vmem:[#allocation10_spill] sm:$0xff] }
 0x159   : > { %2325 = vmatpush3.bf16.msra.mxu0 %v3035_v40  ;;  %1420 = vmatprep.mubr.bf16.mxu0 %v3372_v6  ;;  %v3830_v52 = vld [vmem:[#allocation11_spill] sm:$0xff] }
 0x15a   : > { %2316 = vmatprep.subr.bf16.mxu1 %v3151_v59  ;;  %2326 = vmatprep.subr.bf16.mxu0 %v3044_v41  ;;  %3823 = vst [vmem:[#allocation29_spill] sm:$0xff] %v3412_v8  ;;  %3825 = vst [vmem:[#allocation30_spill] sm:$0xff] %v3424_v51  ;;  %v3832_v51 = vld [vmem:[#allocation14_spill] sm:$0xff] }
 0x15c   : > { %2317 = vmatpush3.bf16.msra.mxu1 %v3157_v60 }
 0x15d   : > { %2327 = vmatpush3.bf16.msra.mxu0 %v3050_v42  ;;  %2346 = vmatprep.subr.bf16.mxu1 %v3175_v63 }
 0x15e   : > { %2328 = vmatprep.subr.bf16.mxu0 %v3067_v45 }
 0x15f   : > { %1381 = vmatmul.mubr.bf16.vlgmr.msra.gmra.mrb[12].mxu1 %v3824_v56  ;;  %v2203_v56 = vpop.f32.mrb[3].mxu1 }
 0x160   : > { %2347 = vmatpush3.bf16.msra.mxu1 %v3210_v61  ;;  %1460 = vmatprep.mubr.bf16.mxu1 %v3412_v8  ;;  %v3827_v8 = vld [vmem:[#allocation8_spill] sm:$0xff] }
 0x161   : > { %2329 = vmatpush3.bf16.msra.mxu0 %v3073_v46  ;;  %2348 = vmatprep.subr.bf16.mxu1 %v3215_v4  ;;  %v3831_v56 = vld [vmem:[#allocation12_spill] sm:$0xff] }
 0x162   : > { %2330 = vmatprep.subr.bf16.mxu0 %v3091_v49 }
 0x164   : > { %2349 = vmatpush3.bf16.msra.mxu1 %v3227_v3 }
 0x165   : > { %2331 = vmatpush3.bf16.msra.mxu0 %v3097_v50  ;;  %2350 = vmatprep.subr.bf16.mxu1 %v3233_v15 }
 0x166   : > { %2332 = vmatprep.subr.bf16.mxu0 %v3115_v53 }
 0x168   : > { %2351 = vmatpush3.bf16.msra.mxu1 %v3246_v1 }
 0x169   : > { %2333 = vmatpush3.bf16.msra.mxu0 %v3121_v54  ;;  %2352 = vmatprep.subr.bf16.mxu1 %v3254_v2 }
 0x16a   : > { %2334 = vmatprep.subr.bf16.mxu0 %v3826_v57 }
 0x16c   : > { %2353 = vmatpush3.bf16.msra.mxu1 %v3268_v62  ;;  %v3834_v62 = vld [vmem:[#allocation13_spill] sm:$0xff] }
 0x16d   : > { %2335 = vmatpush3.bf16.msra.mxu0 %v3827_v8  ;;  %2354 = vmatprep.subr.bf16.mxu1 %v3274_v12  ;;  %v3833_v12 = vld [vmem:[#allocation25_spill] sm:$0xff] }
 0x16e   : > { %2336 = vmatprep.subr.bf16.mxu0 %v3828_v32 }
 0x170   : > { %2355 = vmatpush3.bf16.msra.mxu1 %v3289_v21  ;;  %v3835_v21 = vld [vmem:[#allocation26_spill] sm:$0xff] }
 0x171   : > { %2337 = vmatpush3.bf16.msra.mxu0 %v3829_v29  ;;  %2356 = vmatprep.subr.bf16.mxu1 %v3295_v25  ;;  %v3453_v25 = vld [vmem:[#allocation2 + $0xc] sm:$0x3] }
 0x172   : > { %2338 = vmatprep.subr.bf16.mxu0 %v3830_v52 }
 0x174   : > { %2357 = vmatpush3.bf16.msra.mxu1 %v3308_v36  ;;  %v3836_v36 = vld [vmem:[#allocation15_spill] sm:$0xff] }
 0x175   : > { %2339 = vmatpush3.bf16.msra.mxu0 %v3831_v56  ;;  %2358 = vmatprep.subr.bf16.mxu1 %v3314_v5  ;;  %v3837_v5 = vld [vmem:[#allocation3_spill] sm:$0xff] }
 0x176   : > { %2611 = vmatprep.subr.bf16.mxu0 %v3809_v58 }
 0x178   : > { %1421 = vmatmul.mubr.bf16.vlgmr.msra.gmra.mrb[16].mxu0 %v3832_v51  ;;  %2359 = vmatpush3.bf16.msra.mxu1 %v3833_v12 }
 0x179   : > { %2612 = vmatpush3.bf16.msra.mxu0 %v3834_v62  ;;  %2360 = vmatprep.subr.bf16.mxu1 %v3835_v21  ;;  %v3838_v21 = vld [vmem:[#allocation18_spill] sm:$0xff] }
 0x17a   : > { %2613 = vmatprep.subr.bf16.mxu0 %v3809_v58  ;;  %2627 = vmatprep.mubr.msk.bf16.mxu0 %vm2807_vm0, %v3809_v58 }
 0x17c   : > { %2361 = vmatpush3.bf16.msra.mxu1 %v3346_v0  ;;  %v3839_v0 = vld [vmem:[#allocation21_spill] sm:$0xff] }
 0x17d   : > { %2614 = vmatpush3.bf16.msra.mxu0 %v3836_v36  ;;  %2377 = vmatprep.subr.bf16.mxu1 %v3837_v5  ;;  %v3840_v5 = vld [vmem:[#allocation24_spill] sm:$0xff] }
 0x17e   : > { %2615 = vmatprep.subr.bf16.mxu0 %v3809_v58 }
 0x17f   : > { %1461 = vmatmul.mubr.bf16.vlgmr.msra.gmra.mrb[16].mxu1 %v3453_v25 }
 0x180   : > { %2378 = vmatpush3.bf16.msra.mxu1 %v2884_v7  ;;  %1559 = vmatprep.mubr.bf16.mxu1 %v3832_v51  ;;  %v3841_v7 = vld [vmem:[#allocation27_spill] sm:$0xff]  ;;  %v2777_v51 = vld [vmem:[%s3735_s4 + $0x48] sm:$0xff]  }
 0x181   : > { %2616 = vmatpush3.bf16.msra.mxu0 %v3838_v21  ;;  %2379 = vmatprep.subr.bf16.mxu1 %v2893_v9  ;;  %v2770_v9 = vld [vmem:[#allocation2 + $0xc] ss:$0 sps:$4 sm:$0x66]  }
 0x182   : > { %2617 = vmatprep.subr.bf16.mxu0 %v3809_v58 }
 0x184   : > { %2380 = vmatpush3.bf16.msra.mxu1 %v2899_v10  ;;  %v3481_v10 = vrot.slane %v2770_v9, 1  ;;  %v2778_v9 = vld [vmem:[%s3735_s4 + $0x8] sm:$0xff]  }
 0x185   : > { %2618 = vmatpush3.bf16.msra.mxu0 %v3839_v0  ;;  %2381 = vmatprep.subr.bf16.mxu1 %v2905_v11  ;;  %v3842_v11 = vld [vmem:[#allocation4_spill] sm:$0xff] }
 0x186   : > { %2619 = vmatprep.subr.bf16.mxu0 %v3809_v58 }
 0x188   : > { %2382 = vmatpush3.bf16.msra.mxu1 %v2915_v13  ;;  %v2771_v13 = vld [vmem:[#allocation2 + $0x10] ss:$0 sps:$4 sm:$0x77]  }
 0x189   : > { %2620 = vmatpush3.bf16.msra.mxu0 %v3840_v5  ;;  %2383 = vmatprep.subr.bf16.mxu1 %v2921_v14  ;;  %v3843_v14 = vld [vmem:[#allocation5_spill] sm:$0xff] }
 0x18a   : > { %2621 = vmatprep.subr.bf16.mxu0 %v3809_v58 }
 0x18c   : > { %2384 = vmatpush3.bf16.msra.mxu1 %v2931_v16  ;;  %v1517_v16 = vshll.u32 %v2771_v13, 16 }
 0x18d   : > { %2622 = vmatpush3.bf16.msra.mxu0 %v3841_v7  ;;  %2385 = vmatprep.subr.bf16.mxu1 %v2937_v17  ;;  %v3844_v17 = vld [vmem:[#allocation6_spill] sm:$0xff] }
 0x18e   : > { %2623 = vmatprep.subr.bf16.mxu0 %v3809_v58 }
 0x190   : > { %2386 = vmatpush3.bf16.msra.mxu1 %v2947_v19  ;;  %v1519_v19 = vrot.slane %v1517_v16, 1  ;;  %v2779_v16 = vld [vmem:[%s3735_s4 + $0xc0] sm:$0xff]  }
 0x191   : > { %2624 = vmatpush3.bf16.msra.mxu0 %v3353_v18  ;;  %2387 = vmatprep.subr.bf16.mxu1 %v2953_v20  ;;  %v1515_v20 = vshrl.u32 %v2771_v13, 16 }
 0x192   : > { %2625 = vmatprep.subr.bf16.mxu0 %v3809_v58 }
 0x194   : > { %2388 = vmatpush3.bf16.msra.mxu1 %v2969_v23  ;;  %v3845_v23 = vld [vmem:[#allocation29_spill] sm:$0xff] }
 0x195   : > { %2626 = vmatpush3.bf16.msra.mxu0 %v3365_v28  ;;  %2389 = vmatprep.subr.bf16.mxu1 %v2975_v24  ;;  %v3847_v24 = vld [vmem:[#allocation17_spill] sm:$0xff] }
 0x196   : > { %2399 = vmatprep.subr.bf16.mxu0 %v2964_v22  ;;  %v3520_v22 = vor.u32 %v1519_v19, %v1515_v20  ;;  %v2780_v19 = vld [vmem:[%s3735_s4 + $0x50] sm:$0xff]   ;;  %v2781_v20 = vld [vmem:[%s3735_s4 + $0x80] sm:$0xff]  }
 0x198   : > { %2628 = vmatmul.mubr.bf16.vlgmr.msra.gmra.mrb[20].mxu0 %v3481_v10  ;;  %2390 = vmatpush3.bf16.msra.mxu1 %v2992_v30  ;;  %v3850_v30 = vld [vmem:[#allocation22_spill] sm:$0xff] }
 0x199   : > { %2400 = vmatpush3.bf16.msra.mxu0 %v2981_v26  ;;  %1599 = vmatprep.mubr.bf16.mxu0 %v3453_v25  ;;  %v3848_v26 = vld [vmem:[#allocation19_spill] sm:$0xff] }
 0x19a   : > { %2391 = vmatprep.subr.bf16.mxu1 %v2998_v31  ;;  %2401 = vmatprep.subr.bf16.mxu0 %v2987_v27  ;;  %v3849_v27 = vld [vmem:[#allocation20_spill] sm:$0xff]  ;;  %v3851_v31 = vld [vmem:[#allocation23_spill] sm:$0xff] }
 0x19c   : > { %2392 = vmatpush3.bf16.msra.mxu1 %v3015_v35  ;;  %v2775_v35 = vld [vmem:[%s3735_s4 + $0x40] sm:$0xff]  }
 0x19d   : > { %2402 = vmatpush3.bf16.msra.mxu0 %v3005_v33  ;;  %2421 = vmatprep.subr.bf16.mxu1 %v3021_v37  ;;  %v3852_v33 = vld [vmem:[#allocation26_spill] sm:$0xff] }
 0x19e   : > { %2403 = vmatprep.subr.bf16.mxu0 %v3010_v34  ;;  %v3853_v34 = vld [vmem:[#allocation28_spill] sm:$0xff]  ;;  %v1508_v37 = vld [vmem:[#allocation2 + $0x10] sm:$0x3] }
 0x19f   : > { %1560 = vmatmul.mubr.bf16.vlgmr.msra.gmra.mrb[20].mxu1 %v3358_v39  ;;  %v3566_v39 = vld [vmem:[#allocation2 + $0x10] ss:$0 sps:$4 sm:$0x66]  }
 0x1a0   : > { %2422 = vmatpush3.bf16.msra.mxu1 %v3035_v40  ;;  %1639 = vmatprep.mubr.bf16.mxu1 %v3481_v10  ;;  %v2776_v40 = vld [vmem:[%s3735_s4] sm:$0xff]   ;;  %v1525_v13 = vrot.slane %v3566_v39, 1 }
 0x1a1   : > { %2404 = vmatpush3.bf16.msra.mxu0 %v3026_v38  ;;  %2423 = vmatprep.subr.bf16.mxu1 %v3044_v41 }
 0x1a2   : > { %2405 = vmatprep.subr.bf16.mxu0 %v3055_v43 }
 0x1a4   : > { %2424 = vmatpush3.bf16.msra.mxu1 %v3050_v42 }
 0x1a5   : > { %2406 = vmatpush3.bf16.msra.mxu0 %v3061_v44  ;;  %2425 = vmatprep.subr.bf16.mxu1 %v3067_v45 }
 0x1a6   : > { %2407 = vmatprep.subr.bf16.mxu0 %v3079_v47 }
 0x1a8   : > { %2426 = vmatpush3.bf16.msra.mxu1 %v3073_v46 }
 0x1a9   : > { %2408 = vmatpush3.bf16.msra.mxu0 %v3085_v48  ;;  %2427 = vmatprep.subr.bf16.mxu1 %v3091_v49 }
 0x1aa   : > { %2409 = vmatprep.subr.bf16.mxu0 %v3842_v11 }
 0x1ac   : > { %2428 = vmatpush3.bf16.msra.mxu1 %v3097_v50 }
 0x1ad   : > { %2410 = vmatpush3.bf16.msra.mxu0 %v3843_v14  ;;  %2429 = vmatprep.subr.bf16.mxu1 %v3115_v53 }
 0x1ae   : > { %2411 = vmatprep.subr.bf16.mxu0 %v3127_v55 }
 0x1b0   : > { %2430 = vmatpush3.bf16.msra.mxu1 %v3121_v54 }
 0x1b1   : > { %2412 = vmatpush3.bf16.msra.mxu0 %v3844_v17  ;;  %2431 = vmatprep.subr.bf16.mxu1 %v3826_v57 }
 0x1b2   : > { %2413 = vmatprep.subr.bf16.mxu0 %v3151_v59 }
 0x1b4   : > { %2432 = vmatpush3.bf16.msra.mxu1 %v3827_v8 }
 0x1b5   : > { %2414 = vmatpush3.bf16.msra.mxu0 %v3157_v60  ;;  %2433 = vmatprep.subr.bf16.mxu1 %v3828_v32 }
 0x1b6   : > { %2443 = vmatprep.subr.bf16.mxu0 %v3175_v63 }
 0x1b8   : > { %1600 = vmatmul.mubr.bf16.vlgmr.msra.gmra.mrb[24].mxu0 %v3372_v6  ;;  %2434 = vmatpush3.bf16.msra.mxu1 %v3829_v29  ;;  %v3846_v6 = vld [vmem:[#allocation16_spill] sm:$0xff] }
 0x1b9   : > { %2444 = vmatpush3.bf16.msra.mxu0 %v3210_v61  ;;  %1679 = vmatprep.mubr.bf16.mxu0 %v3520_v22 }
 0x1ba   : > { %2435 = vmatprep.subr.bf16.mxu1 %v3830_v52  ;;  %2445 = vmatprep.subr.bf16.mxu0 %v3215_v4 }
 0x1bc   : > { %2436 = vmatpush3.bf16.msra.mxu1 %v3831_v56 }
 0x1bd   : > { %2446 = vmatpush3.bf16.msra.mxu0 %v3227_v3  ;;  %2631 = vmatprep.subr.bf16.mxu1 %v3809_v58 }
 0x1be   : > { %2447 = vmatprep.subr.bf16.mxu0 %v3233_v15 }
 0x1bf   : > { %1640 = vmatmul.mubr.bf16.vlgmr.msra.gmra.mrb[24].mxu1 %v3845_v23 }
 0x1c0   : > { %2632 = vmatpush3.bf16.msra.mxu1 %v3834_v62  ;;  %2647 = vmatprep.mubr.msk.bf16.mxu1 %vm2807_vm0, %v3809_v58 }
 0x1c1   : > { %2448 = vmatpush3.bf16.msra.mxu0 %v3246_v1  ;;  %2633 = vmatprep.subr.bf16.mxu1 %v3809_v58 }
 0x1c2   : > { %2449 = vmatprep.subr.bf16.mxu0 %v3254_v2 }
 0x1c4   : > { %2634 = vmatpush3.bf16.msra.mxu1 %v3836_v36 }
 0x1c5   : > { %2450 = vmatpush3.bf16.msra.mxu0 %v3846_v6  ;;  %2635 = vmatprep.subr.bf16.mxu1 %v3809_v58 }
 0x1c6   : > { %2451 = vmatprep.subr.bf16.mxu0 %v3847_v24 }
 0x1c8   : > { %2636 = vmatpush3.bf16.msra.mxu1 %v3838_v21 }
 0x1c9   : > { %2452 = vmatpush3.bf16.msra.mxu0 %v3848_v26  ;;  %2637 = vmatprep.subr.bf16.mxu1 %v3809_v58 }
 0x1ca   : > { %2453 = vmatprep.subr.bf16.mxu0 %v3849_v27 }
 0x1cc   : > { %2638 = vmatpush3.bf16.msra.mxu1 %v3839_v0 }
 0x1cd   : > { %2454 = vmatpush3.bf16.msra.mxu0 %v3850_v30  ;;  %2639 = vmatprep.subr.bf16.mxu1 %v3809_v58 }
 0x1ce   : > { %2455 = vmatprep.subr.bf16.mxu0 %v3851_v31 }
 0x1d0   : > { %2640 = vmatpush3.bf16.msra.mxu1 %v3840_v5 }
 0x1d1   : > { %2456 = vmatpush3.bf16.msra.mxu0 %v3833_v12  ;;  %2641 = vmatprep.subr.bf16.mxu1 %v3809_v58 }
 0x1d2   : > { %2457 = vmatprep.subr.bf16.mxu0 %v3852_v33 }
 0x1d4   : > { %2642 = vmatpush3.bf16.msra.mxu1 %v3841_v7 }
 0x1d5   : > { %2458 = vmatpush3.bf16.msra.mxu0 %v3853_v34  ;;  %2643 = vmatprep.subr.bf16.mxu1 %v3809_v58 }
 0x1d6   : > { %2474 = vmatprep.subr.bf16.mxu0 %v2775_v35  ;;  %v2783_v35 = vld [vmem:[%s3735_s4 + $0xc8] sm:$0xff]  }
 0x1d8   : > { %1680 = vmatmul.mubr.bf16.vlgmr.msra.gmra.mrb[28].mxu0 %v1508_v37  ;;  %2644 = vmatpush3.bf16.msra.mxu1 %v3353_v18 }
 0x1d9   : > { %2475 = vmatpush3.bf16.msra.mxu0 %v2776_v40  ;;  %1779 = vmatprep.mubr.bf16.mxu0 %v3845_v23  ;;  %v2782_v23 = vld [vmem:[%s3735_s4 + $0x10] sm:$0xff]   ;;  %v2784_v40 = vld [vmem:[%s3735_s4 + $0x58] sm:$0xff]  }
 0x1da   : > { %2645 = vmatprep.subr.bf16.mxu1 %v3809_v58  ;;  %2476 = vmatprep.subr.bf16.mxu0 %v2777_v51  ;;  %v2785_v51 = vld [vmem:[%s3735_s4 + $0x88] sm:$0xff]  }
 0x1dc   : > { %2646 = vmatpush3.bf16.msra.mxu1 %v3365_v28 }
 0x1dd   : > { %2477 = vmatpush3.bf16.msra.mxu0 %v2778_v9  ;;  %2496 = vmatprep.subr.bf16.mxu1 %v2779_v16  ;;  %v2787_v9 = vld [vmem:[%s3735_s4 + $0xd0] sm:$0xff]   ;;  %v2788_v16 = vld [vmem:[%s3735_s4 + $0x60] sm:$0xff]  }
 0x1de   : > { %2478 = vmatprep.subr.bf16.mxu0 %v2780_v19  ;;  %v2789_v19 = vld [vmem:[%s3735_s4 + $0x20] sm:$0xff]  }
 0x1df   : > { %2648 = vmatmul.mubr.bf16.vlgmr.msra.gmra.mrb[28].mxu1 %v1525_v13 }
 0x1e0   : > { %2497 = vmatpush3.bf16.msra.mxu1 %v2781_v20  ;;  %1819 = vmatprep.mubr.bf16.mxu1 %v1508_v37  ;;  %v2786_v37 = vld [vmem:[%s3735_s4 + $0x18] sm:$0xff]   ;;  %v2790_v20 = vld [vmem:[%s3735_s4 + $0x68] sm:$0xff]  }
 0x1e1   : > { %2479 = vmatpush3.bf16.msra.mxu0 %v2782_v23  ;;  %2498 = vmatprep.subr.bf16.mxu1 %v2783_v35 }
 0x1e2   : > { %2480 = vmatprep.subr.bf16.mxu0 %v2784_v40 }
 0x1e4   : > { %2499 = vmatpush3.bf16.msra.mxu1 %v2785_v51 }
 0x1e5   : > { %2481 = vmatpush3.bf16.msra.mxu0 %v2786_v37  ;;  %2500 = vmatprep.subr.bf16.mxu1 %v2787_v9  ;;  %v3854_v9 = vld [vmem:[#allocation30_spill] sm:$0xff] }
 0x1e6   : > { %2482 = vmatprep.subr.bf16.mxu0 %v2788_v16 }
 0x1e8   : > { %2501 = vmatpush3.bf16.msra.mxu1 %v3026_v38  ;;  %v2791_v38 = vld [vmem:[%s3735_s4 + $0x28] sm:$0xff]  }
 0x1e9   : > { %2483 = vmatpush3.bf16.msra.mxu0 %v2789_v19  ;;  %2502 = vmatprep.subr.bf16.mxu1 %v3055_v43  ;;  %v2792_v43 = vld [vmem:[%s3735_s4 + $0x70] sm:$0xff]  }
 0x1ea   : > { %2484 = vmatprep.subr.bf16.mxu0 %v2790_v20  ;;  %v2793_v19 = vld [vmem:[%s3735_s4 + $0x30] sm:$0xff]  }
 0x1eb   : > { %v2221_v23 = vpop.f32.mrb[4].mxu0 }
 0x1ec   : > { %2503 = vmatpush3.bf16.msra.mxu1 %v3061_v44  ;;  %v2222_v35 = vpop.f32.mrb[5].mxu0  ;;  %v2773_v44 = vld [vmem:[#allocation2 + $0x14] ss:$0 sps:$4 sm:$0x77]  }
 0x1ed   : > { %v2223_v40 = vadd.f32 %v2222_v35, %v2221_v23  ;;  %2485 = vmatpush3.bf16.msra.mxu0 %v2791_v38  ;;  %v2224_v51 = vpop.f32.mrb[6].mxu0  ;;  %2504 = vmatprep.subr.bf16.mxu1 %v3079_v47  ;;  %v2794_v47 = vld [vmem:[%s3735_s4 + $0x78] sm:$0xff]  }
 0x1ee   : > { %v2225_v37 = vpop.f32.mrb[7].mxu0  ;;  %2486 = vmatprep.subr.bf16.mxu0 %v2792_v43  ;;  %v2795_v38 = vld [vmem:[%s3735_s4 + $0x38] sm:$0xff]  }
 0x1ef   : > { %v1164_v16 = vadd.f32 %v2223_v40, %v3854_v9  ;;  %v2796_v37 = vld [vmem:[%s3735_s4 + $0x140] sm:$0xff]  }
 0x1f0   : > { %2505 = vmatpush3.bf16.msra.mxu1 %v3085_v48  ;;  %v1737_v48 = vshll.u32 %v2773_v44, 16  ;;  %v2797_v9 = vld [vmem:[%s3735_s4 + $0x100] sm:$0xff]  }
 0x1f1   : > { %2487 = vmatpush3.bf16.msra.mxu0 %v2793_v19  ;;  %2506 = vmatprep.subr.bf16.mxu1 %v3842_v11 }
 0x1f2   : > { %v2243_v20 = vpop.f32.mrb[4].mxu1  ;;  %2488 = vmatprep.subr.bf16.mxu0 %v2794_v47  ;;  %v1739_v43 = vrot.slane %v1737_v48, 1 }
 0x1f3   : > { %v2244_v23 = vpop.f32.mrb[5].mxu1 }
 0x1f4   : > { %v2245_v35 = vadd.f32 %v2244_v23, %v2243_v20  ;;  %2507 = vmatpush3.bf16.msra.mxu1 %v3843_v14  ;;  %v2246_v40 = vpop.f32.mrb[6].mxu1  ;;  %v1735_v14 = vshrl.u32 %v2773_v44, 16 }
 0x1f5   : > { %2489 = vmatpush3.bf16.msra.mxu0 %v2795_v38  ;;  %v2247_v51 = vpop.f32.mrb[7].mxu1  ;;  %2508 = vmatprep.subr.bf16.mxu1 %v3127_v55 }
 0x1f6   : > { %v1204_v11 = vadd.f32 %v2245_v35, %v1164_v16  ;;  %2518 = vmatprep.subr.bf16.mxu0 %v2796_v37  ;;  %v1740_v55 = vor.u32 %v1739_v43, %v1735_v14 }
 0x1f8   : > { %1780 = vmatmul.mubr.bf16.vlgmr.msra.gmra.mrb[32].mxu0 %v3453_v25  ;;  %2509 = vmatpush3.bf16.msra.mxu1 %v3844_v17 }
 0x1f9   : > { %2519 = vmatpush3.bf16.msra.mxu0 %v2797_v9  ;;  %1859 = vmatprep.mubr.bf16.mxu0 %v1525_v13 }
 0x1fa   : > { %2510 = vmatprep.subr.bf16.mxu1 %v3151_v59  ;;  %2520 = vmatprep.subr.bf16.mxu0 %v3044_v41 }
 0x1fc   : > { %2511 = vmatpush3.bf16.msra.mxu1 %v3157_v60 }
 0x1fd   : > { %2521 = vmatpush3.bf16.msra.mxu0 %v3050_v42  ;;  %2540 = vmatprep.subr.bf16.mxu1 %v3175_v63 }
 0x1fe   : > { %2522 = vmatprep.subr.bf16.mxu0 %v3067_v45 }
 0x1ff   : > { %1820 = vmatmul.mubr.bf16.vlgmr.msra.gmra.mrb[32].mxu1 %v3481_v10 }
 0x200   : > { %2541 = vmatpush3.bf16.msra.mxu1 %v3210_v61  ;;  %1899 = vmatprep.mubr.bf16.mxu1 %v1740_v55  ;;  %v1728_v61 = vld [vmem:[#allocation2 + $0x14] sm:$0x3] }
 0x201   : > { %2523 = vmatpush3.bf16.msra.mxu0 %v3073_v46  ;;  %2542 = vmatprep.subr.bf16.mxu1 %v3215_v4 }
 0x202   : > { %2524 = vmatprep.subr.bf16.mxu0 %v3091_v49 }
 0x204   : > { %2543 = vmatpush3.bf16.msra.mxu1 %v3227_v3 }
 0x205   : > { %2525 = vmatpush3.bf16.msra.mxu0 %v3097_v50  ;;  %2544 = vmatprep.subr.bf16.mxu1 %v3233_v15 }
 0x206   : > { %2526 = vmatprep.subr.bf16.mxu0 %v3115_v53 }
 0x208   : > { %2545 = vmatpush3.bf16.msra.mxu1 %v3246_v1 }
 0x209   : > { %2527 = vmatpush3.bf16.msra.mxu0 %v3121_v54  ;;  %2546 = vmatprep.subr.bf16.mxu1 %v3254_v2 }
 0x20a   : > { %2528 = vmatprep.subr.bf16.mxu0 %v3826_v57 }
 0x20b   : > { %v2265_v41 = vpop.f32.mrb[8].mxu0 }
 0x20c   : > { %v2266_v42 = vpop.f32.mrb[9].mxu0  ;;  %2547 = vmatpush3.bf16.msra.mxu1 %v3846_v6 }
 0x20d   : > { %v2267_v45 = vadd.f32 %v2266_v42, %v2265_v41  ;;  %v2268_v46 = vpop.f32.mrb[10].mxu0  ;;  %2529 = vmatpush3.bf16.msra.mxu0 %v3827_v8  ;;  %2548 = vmatprep.subr.bf16.mxu1 %v3847_v24 }
 0x20e   : > { %v2269_v49 = vpop.f32.mrb[11].mxu0  ;;  %2530 = vmatprep.subr.bf16.mxu0 %v3828_v32 }
 0x20f   : > { %v1244_v50 = vadd.f32 %v2267_v45, %v1204_v11 }
 0x210   : > { %2549 = vmatpush3.bf16.msra.mxu1 %v3848_v26 }
 0x211   : > { %2531 = vmatpush3.bf16.msra.mxu0 %v3829_v29  ;;  %2550 = vmatprep.subr.bf16.mxu1 %v3849_v27 }
 0x212   : > { %v1283_v53 = vpop.f32.mrb[8].mxu1  ;;  %2532 = vmatprep.subr.bf16.mxu0 %v3830_v52 }
 0x213   : > { %v3676_v54 = vadd.f32 %v1283_v53, %v1244_v50  ;;  %v2609_v59 = vpop.f32.mrb[9].mxu1 }
 0x214   : > { %v1286_v60 = vpop.f32.mrb[10].mxu1  ;;  %2551 = vmatpush3.bf16.msra.mxu1 %v3850_v30 }
 0x215   : > { %v2610_v63 = vpop.f32.mrb[11].mxu1  ;;  %2533 = vmatpush3.bf16.msra.mxu0 %v3831_v56  ;;  %2552 = vmatprep.subr.bf16.mxu1 %v3851_v31 }
 0x216   : > { %2651 = vmatprep.subr.bf16.mxu0 %v3809_v58 }
 0x218   : > { %1860 = vmatmul.mubr.bf16.vlgmr.msra.gmra.mrb[36].mxu0 %v3520_v22  ;;  %2553 = vmatpush3.bf16.msra.mxu1 %v3833_v12 }
 0x219   : > { %2652 = vmatpush3.bf16.msra.mxu0 %v3834_v62  ;;  %2554 = vmatprep.subr.bf16.mxu1 %v3852_v33  ;;  %v2774_v62 = vld [vmem:[#allocation2 + $0x14] ss:$0 sps:$4 sm:$0x66]   ;;  %v3712_v33 = vld [vmem:[%s3736_s5] ss:$0 sm:$0xff] }
 0x21a   : > { %2653 = vmatprep.subr.bf16.mxu0 %v3809_v58  ;;  %2667 = vmatprep.mubr.msk.bf16.mxu0 %vm2807_vm0, %v3809_v58 }
 0x21c   : > { %2555 = vmatpush3.bf16.msra.mxu1 %v3853_v34 }
 0x21d   : > { %2654 = vmatpush3.bf16.msra.mxu0 %v3836_v36  ;;  %v1745_v36 = vrot.slane %v2774_v62, 1 }
 0x21e   : > { %2655 = vmatprep.subr.bf16.mxu0 %v3809_v58 }
 0x21f   : > { %1900 = vmatmul.mubr.bf16.vlgmr.msra.gmra.mrb[36].mxu1 %v1728_v61 }
 0x221   : > { %2656 = vmatpush3.bf16.msra.mxu0 %v3838_v21 }
 0x222   : > { %2657 = vmatprep.subr.bf16.mxu0 %v3809_v58 }
 0x225   : > { %2658 = vmatpush3.bf16.msra.mxu0 %v3839_v0 }
 0x226   : > { %2659 = vmatprep.subr.bf16.mxu0 %v3809_v58 }
 0x229   : > { %2660 = vmatpush3.bf16.msra.mxu0 %v3840_v5 }
 0x22a   : > { %2661 = vmatprep.subr.bf16.mxu0 %v3809_v58 }
 0x22b   : > { %v2296_v4 = vpop.f32.mrb[12].mxu0 }
 0x22c   : > { %v2297_v3 = vpop.f32.mrb[13].mxu0 }
 0x22d   : > { %v2298_v15 = vadd.f32 %v2297_v3, %v2296_v4  ;;  %v2299_v1 = vpop.f32.mrb[14].mxu0  ;;  %2662 = vmatpush3.bf16.msra.mxu0 %v3841_v7 }
 0x22e   : > { %v2300_v2 = vpop.f32.mrb[15].mxu0  ;;  %2663 = vmatprep.subr.bf16.mxu0 %v3809_v58 }
 0x231   : > { %2664 = vmatpush3.bf16.msra.mxu0 %v3353_v18 }
 0x232   : > { %v2318_v12 = vpop.f32.mrb[12].mxu1  ;;  %2665 = vmatprep.subr.bf16.mxu0 %v3809_v58 }
 0x233   : > { %v2319_v0 = vpop.f32.mrb[13].mxu1 }
 0x234   : > { %v2320_v21 = vadd.f32 %v2319_v0, %v2318_v12  ;;  %v2321_v25 = vpop.f32.mrb[14].mxu1 }
 0x235   : > { %v2322_v8 = vpop.f32.mrb[15].mxu1  ;;  %2666 = vmatpush3.bf16.msra.mxu0 %v3365_v28  ;;  %v3707_v28 = vld [vmem:[%s266_s18] sm:$0xff]  }
 0x236   : > { %v1383_v57 = vadd.f32 %v2320_v21, %v2298_v15  ;;  %v2167_v39 = vunpack.c.l.bf16 %v3707_v28 }
 0x238   : > { %2668 = vmatmul.mubr.bf16.vlgmr.msra.gmra.mrb[40].mxu0 %v1745_v36 }
 0x24b   : > { %v2340_v32 = vpop.f32.mrb[16].mxu0 }
 0x24c   : > { %v2341_v29 = vpop.f32.mrb[17].mxu0 }
 0x24d   : > { %v2342_v52 = vadd.f32 %v2341_v29, %v2340_v32  ;;  %v2343_v56 = vpop.f32.mrb[18].mxu0 }
 0x24e   : > { %v2344_v5 = vpop.f32.mrb[19].mxu0 }
 0x24f   : > { %v1423_v7 = vadd.f32 %v2342_v52, %v1383_v57 }
 0x252   : > { %v2362_v18 = vpop.f32.mrb[16].mxu1 }
 0x253   : > { %v2363_v10 = vpop.f32.mrb[17].mxu1 }
 0x254   : > { %v2364_v17 = vadd.f32 %v2363_v10, %v2362_v18  ;;  %v2365_v58 = vpop.f32.mrb[18].mxu1 }
 0x255   : > { %v2366_v22 = vpop.f32.mrb[19].mxu1 }
 0x256   : > { %v1463_v6 = vadd.f32 %v2364_v17, %v1423_v7 }
 0x26b   : > { %v1502_v24 = vpop.f32.mrb[20].mxu0 }
 0x26c   : > { %v1503_v26 = vadd.f32 %v1502_v24, %v1463_v6  ;;  %v2629_v27 = vpop.f32.mrb[21].mxu0 }
 0x26d   : > { %v1505_v30 = vpop.f32.mrb[22].mxu0 }
 0x26e   : > { %v1948_v31 = vrot.slane %v1503_v26, 4  ;;  %v2630_v34 = vpop.f32.mrb[23].mxu0 }
 0x26f   : > { %v2168_v34 = vunpack.c.h.bf16 %v3707_v28 }
 0x270   : > { %v1954_v13 = vsel %vm1953_vm4, %v3676_v54, %v1948_v31 }
 0x271   : > { %v1963_v16 = vadd.f32 %v3712_v33, %v1954_v13 }
 0x272   : > { %v2393_v44 = vpop.f32.mrb[20].mxu1 }
 0x273   : > { %v3718_v19 = vadd.f32 %v2167_v39, %v1963_v16  ;;  %v2394_v20 = vpop.f32.mrb[21].mxu1 }
 0x274   : > { %v2395_v47 = vadd.f32 %v2394_v20, %v2393_v44  ;;  %v2396_v23 = vpop.f32.mrb[22].mxu1 }
 0x275   : > { %v2397_v35 = vpop.f32.mrb[23].mxu1  ;;  %v1967_v44 = vmax.f32 %v3718_v19, 0.0 }
 0x28b   : > { %v2415_v40 = vpop.f32.mrb[24].mxu0 }
 0x28c   : > { %v2416_v48 = vpop.f32.mrb[25].mxu0 }
 0x28d   : > { %v2417_v38 = vadd.f32 %v2416_v48, %v2415_v40  ;;  %v2418_v51 = vpop.f32.mrb[26].mxu0 }
 0x28e   : > { %v2419_v11 = vpop.f32.mrb[27].mxu0 }
 0x28f   : > { %v1602_v37 = vadd.f32 %v2417_v38, %v2395_v47 }
 0x292   : > { %v2437_v14 = vpop.f32.mrb[24].mxu1 }
 0x293   : > { %v2438_v43 = vpop.f32.mrb[25].mxu1 }
 0x294   : > { %v2439_v9 = vadd.f32 %v2438_v43, %v2437_v14  ;;  %v2440_v55 = vpop.f32.mrb[26].mxu1 }
 0x295   : > { %v2441_v41 = vpop.f32.mrb[27].mxu1 }
 0x296   : > { %v1642_v42 = vadd.f32 %v2439_v9, %v1602_v37 }
 0x2ab   : > { %v2459_v45 = vpop.f32.mrb[28].mxu0 }
 0x2ac   : > { %v2460_v46 = vpop.f32.mrb[29].mxu0 }
 0x2ad   : > { %v2461_v49 = vadd.f32 %v2460_v46, %v2459_v45  ;;  %v2462_v50 = vpop.f32.mrb[30].mxu0 }
 0x2ae   : > { %v2463_v53 = vpop.f32.mrb[31].mxu0 }
 0x2af   : > { %v1682_v54 = vadd.f32 %v2461_v49, %v1642_v42 }
 0x2b2   : > { %v1721_v59 = vpop.f32.mrb[28].mxu1 }
 0x2b3   : > { %v1722_v60 = vadd.f32 %v1721_v59, %v1682_v54  ;;  %v2649_v63 = vpop.f32.mrb[29].mxu1 }
 0x2b4   : > { %v1724_v61 = vpop.f32.mrb[30].mxu1 }
 0x2b5   : > { %v2650_v4 = vpop.f32.mrb[31].mxu1 }
 0x2cb   : > { %v2490_v3 = vpop.f32.mrb[32].mxu0 }
 0x2cc   : > { %v2491_v15 = vpop.f32.mrb[33].mxu0 }
 0x2cd   : > { %v2492_v1 = vadd.f32 %v2491_v15, %v2490_v3  ;;  %v2493_v2 = vpop.f32.mrb[34].mxu0 }
 0x2ce   : > { %v2494_v62 = vpop.f32.mrb[35].mxu0 }
 0x2d2   : > { %v2512_v12 = vpop.f32.mrb[32].mxu1 }
 0x2d3   : > { %v2513_v0 = vpop.f32.mrb[33].mxu1 }
 0x2d4   : > { %v2514_v21 = vadd.f32 %v2513_v0, %v2512_v12  ;;  %v2515_v25 = vpop.f32.mrb[34].mxu1 }
 0x2d5   : > { %v2516_v36 = vpop.f32.mrb[35].mxu1 }
 0x2d6   : > { %v1822_v8 = vadd.f32 %v2514_v21, %v2492_v1 }
 0x2eb   : > { %v2534_v57 = vpop.f32.mrb[36].mxu0 }
 0x2ec   : > { %v2535_v32 = vpop.f32.mrb[37].mxu0 }
 0x2ed   : > { %v2536_v29 = vadd.f32 %v2535_v32, %v2534_v57  ;;  %v2537_v52 = vpop.f32.mrb[38].mxu0 }
 0x2ee   : > { %v2538_v56 = vpop.f32.mrb[39].mxu0 }
 0x2ef   : > { %v1862_v5 = vadd.f32 %v2536_v29, %v1822_v8 }
 0x2f2   : > { %v2556_v7 = vpop.f32.mrb[36].mxu1 }
 0x2f3   : > { %v2557_v18 = vpop.f32.mrb[37].mxu1 }
 0x2f4   : > { %v2558_v10 = vadd.f32 %v2557_v18, %v2556_v7  ;;  %v2559_v17 = vpop.f32.mrb[38].mxu1 }
 0x2f5   : > { %v2560_v58 = vpop.f32.mrb[39].mxu1 }
 0x2f6   : > { %v1902_v22 = vadd.f32 %v2558_v10, %v1862_v5 }
 0x30b   : > { %v1941_v6 = vpop.f32.mrb[40].mxu0 }
 0x30c   : > { %v1942_v24 = vadd.f32 %v1941_v6, %v1902_v22  ;;  %v2669_v26 = vpop.f32.mrb[41].mxu0 }
 0x30d   : > { %v1944_v27 = vpop.f32.mrb[42].mxu0 }
 0x30e   : > { %v1951_v30 = vrot.slane %v1942_v24, 4  ;;  %v2670_v31 = vpop.f32.mrb[43].mxu0 }
 0x310   : > { %v1955_v39 = vsel %vm1953_vm4, %v1722_v60, %v1951_v30 }
 0x311   : > { %v1964_v13 = vadd.f32 %v3712_v33, %v1955_v39 }
 0x313   : > { %v1966_v16 = vadd.f32 %v2168_v34, %v1964_v13 }
 0x315   : > { %v1968_v20 = vmax.f32 %v1966_v16, 0.0 }
 0x317   : > { %v2172_v47 = vpack.c.bf16 %v1968_v20, %v1967_v44 }
 0x319   : > { %2173 = vst [vmem:[%s271_s24] sm:$0xff] %v2172_v47  }
 0x31a PF: > { %s16_s21 = sadd.s32 1, %s2804_s21  }
 0x31b   : > { %p13_p4 = scmp.ge.s32.totalorder %s16_s21, 4  }
 0x31d   :  { %15 = sbr.rel (!%p13_p4) target bundleno = 1 (0x1), region = 82 }

// kernel: _lambda_.9
= control target key start
LH: loop header
LB: loop body
LE: loop exit
PB: predicated region body
PF: predicated region fallthrough
CT: control target
= control target key end

     0   :  { %s3059_s27 = smov 0   ;;  %s3954_s0 = inlined_call_operand.vmem [shape: bf16[2,8,128], index: 0, kind: input, shape index: {}]   ;;  %s3955_s1 = inlined_call_operand.vmem [shape: bf16[2,8,128], index: 1, kind: input, shape index: {}]   ;;  %s3956_s2 = inlined_call_operand.vmem [shape: bf16[128,128], index: 2, kind: input, shape index: {}]   ;;  %s3957_s3 = inlined_call_operand.vmem [shape: f32[1,128], index: 3, kind: input, shape index: {}]   ;;  %s3958_s4 = inlined_call_operand.vmem [shape: bf16[1152,128], index: 4, kind: input, shape index: {}]   ;;  %s3959_s5 = inlined_call_operand.vmem [shape: f32[1,128], index: 5, kind: input, shape index: {}]   ;;  %s3960_s6 = inlined_call_operand.vmem [shape: bf16[128,128], index: 6, kind: input, shape index: {}]   ;;  %s3961_s7 = inlined_call_operand.vmem [shape: f32[1,128], index: 7, kind: input, shape index: {}]   ;;  %s3962_s8 = inlined_call_operand.vmem [shape: bf16[2,8,128], index: 8, kind: output, shape index: {}]  }
   0x1 LB: > { %s2248_s28 = sadd.s32 4294967295, %s3008_s27   ;;  %p2252_p0 = scmp.ge.s32.totalorder %s3008_s27, 1  ;;  %s3008_s27 = sphi %s3059_s27, %s18_s27  }
   0x2   : > { %p270_p1 = scmp.lt.s32.totalorder %s3008_s27, 3 }
   0x4   : > { %p271_p2 = pnand %p2252_p0, %p270_p1 }
   0x6   : > { %274 = sbr.rel (%p271_p2) target bundleno = 796 (0x31c), region = 52 }
   0xd   : > { %v2899_v0 = vld [vmem:[%s3956_s2] sm:$0xff]   ;;  %v3965_v1 = vmov 0.0   ;;  %v2900_v2 = vld [vmem:[%s3956_s2 + $0x8] sm:$0xff]   ;;  %vm3011_vm0 = vmmov 0   ;;  %v3012_v3 = vmov 0   ;;  %v2901_v4 = vld [vmem:[%s3956_s2 + $0x10] sm:$0xff]  }
   0xe   : > { %2767 = vmatprep.subr.bf16.mxu0 %v3965_v1  ;;  %2787 = vmatprep.subr.bf16.mxu1 %v3965_v1  ;;  %545 = vst [vmem:[#allocation2] sm:$0x3] %v3012_v3  ;;  %546 = vst [vmem:[#allocation2 + $0x2] sm:$0x3] %v3012_v3  ;;  %v2907_v5 = vld [vmem:[%s3960_s6] sm:$0xff]   ;;  %v2902_v6 = vld [vmem:[%s3956_s2 + $0x18] sm:$0xff]  }
   0xf   : > { %2768 = vmatpush3.bf16.msra.mxu0 %v2899_v0  ;;  %2783 = vmatprep.mubr.msk.bf16.mxu0 %vm3011_vm0, %v3965_v1  ;;  %547 = vst [vmem:[#allocation2 + $0x4] sm:$0x3] %v3012_v3  ;;  %548 = vst [vmem:[#allocation2 + $0x6] sm:$0x3] %v3012_v3  ;;  %v2908_v7 = vld [vmem:[%s3960_s6 + $0x8] sm:$0xff]   ;;  %v2903_v8 = vld [vmem:[%s3956_s2 + $0x20] sm:$0xff]  }
  0x10   : > { %2769 = vmatprep.subr.bf16.mxu0 %v3965_v1  ;;  %2803 = vmatprep.mubr.msk.bf16.mxu1 %vm3011_vm0, %v3965_v1  ;;  %549 = vst [vmem:[#allocation2 + $0x8] sm:$0x3] %v3012_v3  ;;  %550 = vst [vmem:[#allocation2 + $0xa] sm:$0x3] %v3012_v3  ;;  %p306_p3 = scmp.lt.s32.totalorder %s2248_s28, 1  ;;  %v2911_v9 = vld [vmem:[%s3960_s6 + $0x10] sm:$0xff]  }
  0x11   : > { %2788 = vmatpush3.bf16.msra.mxu1 %v2907_v5  ;;  %v2904_v10 = vld [vmem:[%s3956_s2 + $0x28] sm:$0xff]   ;;  %v2914_v11 = vld [vmem:[%s3960_s6 + $0x18] sm:$0xff]   ;;  %v2905_v12 = vld [vmem:[%s3956_s2 + $0x30] sm:$0xff]   ;;  %vm568_vm1 = vcmask 1041408   ;;  %vm569_vm2 = vsmask.f32 1282 }
  0x12   : > { %2789 = vmatprep.subr.bf16.mxu1 %v3965_v1  ;;  %s4082_s28 = smov (!%p306_p3, %s2248_s28), 1  ;;  %v2917_v13 = vld [vmem:[%s3960_s6 + $0x20] sm:$0xff]   ;;  %v2906_v14 = vld [vmem:[%s3956_s2 + $0x38] sm:$0xff]   ;;  %v2920_v16 = vld [vmem:[%s3960_s6 + $0x28] sm:$0xff]   ;;  %vm2167_vm4 = vcmask 1043456   ;;  %vm2169_vm5 = vcmask 1045504  }
  0x13   : > { %2770 = vmatpush3.bf16.msra.mxu0 %v2900_v2  ;;  %s3119_s9 = sshll.u32 %s4082_s28, 2  ;;  %v3135_v15 = vld [vmem:[%s3958_s4 + $0x40] sm:$0xff]   ;;  %v3150_v19 = vld [vmem:[%s3958_s4 + $0x48] sm:$0xff]   ;;  %v2923_v20 = vld [vmem:[%s3960_s6 + $0x30] sm:$0xff]  }
  0x14   : > { %2771 = vmatprep.subr.bf16.mxu0 %v3965_v1  ;;  %s309_s16 = scalar_lea.vmem %s3954_s0, %s3119_s9  ;;  %v3145_v18 = vld [vmem:[%s3958_s4] sm:$0xff]   ;;  %v3159_v21 = vld [vmem:[%s3958_s4 + $0x8] sm:$0xff]   ;;  %v3165_v22 = vld [vmem:[%s3958_s4 + $0x50] sm:$0xff]   ;;  %s313_s15 = scalar_lea.vmem %s3955_s1, %s3119_s9 }
  0x15   : > { %2790 = vmatpush3.bf16.msra.mxu1 %v2908_v7  ;;  %v319_v17 = vld [vmem:[%s309_s16] sm:$0xf]  ;;  %v2926_v23 = vld [vmem:[%s3960_s6 + $0x38] sm:$0xff]   ;;  %v3185_v26 = vld [vmem:[%s3958_s4 + $0x10] sm:$0xff]   ;;  %s317_s29 = scalar_lea.vmem %s3962_s8, %s3119_s9 }
  0x16   : > { %2791 = vmatprep.subr.bf16.mxu1 %v3965_v1  ;;  %v3179_v24 = vld [vmem:[%s3958_s4 + $0xc0] sm:$0xff]   ;;  %v3190_v27 = vld [vmem:[%s3958_s4 + $0x58] sm:$0xff]   ;;  %v3202_v32 = vld [vmem:[%s3958_s4 + $0xc8] sm:$0xff]  }
  0x17   : > { %2772 = vmatpush3.bf16.msra.mxu0 %v2901_v4  ;;  %v2274_v25 = vld.sshfl [vmem:[#allocation2] sm:$0x3 pattern:$0x76325410]  ;;  %4018 = vst [vmem:[#allocation3_spill] sm:$0xff] %v3202_v32  ;;  %v3207_v34 = vld [vmem:[%s3958_s4 + $0x18] sm:$0xff]   ;;  %vm3448_vm3 = vmand %vm568_vm1, %vm569_vm2 }
  0x18   : > { %2773 = vmatprep.subr.bf16.mxu0 %v3965_v1  ;;  %v623_v28 = vshrl.u32 %v2274_v25, 16  ;;  %v625_v29 = vshll.u32 %v2274_v25, 16  ;;  %v433_v30 = vld [vmem:[%s313_s15] sm:$0xf]  ;;  %v3218_v37 = vld [vmem:[%s3958_s4 + $0x88] sm:$0xff]   ;;  %v3245_v41 = vld [vmem:[%s3958_s4 + $0x70] sm:$0xff]  }
  0x19   : > { %2792 = vmatpush3.bf16.msra.mxu1 %v2911_v9  ;;  %v3197_v31 = vld [vmem:[%s3958_s4 + $0x80] sm:$0xff]   ;;  %v3232_v39 = vld [vmem:[%s3958_s4 + $0x68] sm:$0xff]   ;;  %v3252_v42 = vld [vmem:[%s3958_s4 + $0x30] sm:$0xff]  }
  0x1a   : > { %2793 = vmatprep.subr.bf16.mxu1 %v3965_v1  ;;  %v627_v33 = vrot.slane %v625_v29, 1  ;;  %v3213_v35 = vld [vmem:[%s3958_s4 + $0x60] sm:$0xff]   ;;  %v3240_v40 = vld [vmem:[%s3958_s4 + $0x28] sm:$0xff]   ;;  %v3257_v43 = vld [vmem:[%s3958_s4 + $0x78] sm:$0xff]  }
  0x1b   : > { %2774 = vmatpush3.bf16.msra.mxu0 %v2902_v6  ;;  %v3226_v38 = vld [vmem:[%s3958_s4 + $0x20] sm:$0xff]   ;;  %v3264_v44 = vld [vmem:[%s3958_s4 + $0x38] sm:$0xff]   ;;  %v3284_v48 = vld [vmem:[%s3958_s4 + $0xd0] sm:$0xff]  }
  0x1c   : > { %2775 = vmatprep.subr.bf16.mxu0 %v3965_v1  ;;  %v628_v36 = vor.u32 %v627_v33, %v623_v28  ;;  %v3269_v45 = vld [vmem:[%s3958_s4 + $0x140] sm:$0xff]   ;;  %v3289_v49 = vld [vmem:[%s3958_s4 + $0x90] sm:$0xff]   ;;  %v3294_v50 = vld [vmem:[%s3958_s4 + $0x148] sm:$0xff]  }
  0x1d   : > { %2794 = vmatpush3.bf16.msra.mxu1 %v2914_v11  ;;  %v605_v46 = vld [vmem:[#allocation2] sm:$0x1]  ;;  %v3300_v51 = vld [vmem:[%s3958_s4 + $0x108] sm:$0xff]   ;;  %v3308_v52 = vld [vmem:[%s3958_s4 + $0xd8] sm:$0xff]  }
  0x1e   : > { %2795 = vmatprep.subr.bf16.mxu1 %v3965_v1  ;;  %v3276_v47 = vld [vmem:[%s3958_s4 + $0x100] sm:$0xff]   ;;  %v3313_v53 = vld [vmem:[%s3958_s4 + $0x98] sm:$0xff]   ;;  %v3318_v54 = vld [vmem:[%s3958_s4 + $0x150] sm:$0xff]  }
  0x1f   : > { %2776 = vmatpush3.bf16.msra.mxu0 %v2903_v8  ;;  %v3324_v55 = vld [vmem:[%s3958_s4 + $0x110] sm:$0xff]   ;;  %v3332_v56 = vld [vmem:[%s3958_s4 + $0xe0] sm:$0xff]   ;;  %v3342_v58 = vld [vmem:[%s3958_s4 + $0x158] sm:$0xff]  }
  0x20   : > { %2777 = vmatprep.subr.bf16.mxu0 %v3965_v1  ;;  %v3337_v57 = vld [vmem:[%s3958_s4 + $0xa0] sm:$0xff]   ;;  %v3348_v59 = vld [vmem:[%s3958_s4 + $0x118] sm:$0xff]   ;;  %v3356_v60 = vld [vmem:[%s3958_s4 + $0xe8] sm:$0xff]  }
  0x21   : > { %2796 = vmatpush3.bf16.msra.mxu1 %v2917_v13  ;;  %v3361_v61 = vld [vmem:[%s3958_s4 + $0xa8] sm:$0xff]   ;;  %v3366_v62 = vld [vmem:[%s3958_s4 + $0x160] sm:$0xff]   ;;  %v3380_v0 = vld [vmem:[%s3958_s4 + $0xf0] sm:$0xff]  }
  0x22   : > { %2797 = vmatprep.subr.bf16.mxu1 %v3965_v1  ;;  %v3372_v63 = vld [vmem:[%s3958_s4 + $0x120] sm:$0xff]   ;;  %4019 = vst [vmem:[#allocation4_spill] sm:$0xff] %v3380_v0  ;;  %v3385_v2 = vld [vmem:[%s3958_s4 + $0xb0] sm:$0xff]   ;;  %v3390_v3 = vld [vmem:[%s3958_s4 + $0x168] sm:$0xff]  }
  0x23   : > { %2778 = vmatpush3.bf16.msra.mxu0 %v2904_v10  ;;  %4020 = vst [vmem:[#allocation5_spill] sm:$0xff] %v3390_v3  ;;  %v3396_v4 = vld [vmem:[%s3958_s4 + $0x128] sm:$0xff]   ;;  %v3404_v5 = vld [vmem:[%s3958_s4 + $0xf8] sm:$0xff]   ;;  %v3414_v7 = vld [vmem:[%s3958_s4 + $0x170] sm:$0xff]  }
  0x24   : > { %2779 = vmatprep.subr.bf16.mxu0 %v3965_v1  ;;  %4021 = vst [vmem:[#allocation6_spill] sm:$0xff] %v3396_v4  ;;  %v3409_v6 = vld [vmem:[%s3958_s4 + $0xb8] sm:$0xff]   ;;  %4022 = vst [vmem:[#allocation7_spill] sm:$0xff] %v3414_v7  ;;  %v3420_v8 = vld [vmem:[%s3958_s4 + $0x130] sm:$0xff]  }
  0x25   : > { %2798 = vmatpush3.bf16.msra.mxu1 %v2920_v16  ;;  %4023 = vst [vmem:[#allocation8_spill] sm:$0xff] %v3420_v8  ;;  %v3428_v9 = vld [vmem:[%s3958_s4 + $0x1c0] sm:$0xff]   ;;  %v3433_v10 = vld [vmem:[%s3958_s4 + $0x178] sm:$0xff]  }
  0x26   : > { %2799 = vmatprep.subr.bf16.mxu1 %v3965_v1  ;;  %4024 = vst [vmem:[#allocation9_spill] sm:$0xff] %v3433_v10  ;;  %v3439_v11 = vld [vmem:[%s3958_s4 + $0x138] sm:$0xff]   ;;  %v2256_v16 = vld [vmem:[%s3957_s3] ss:$0 sm:$0xff] }
  0x27   : > { %2780 = vmatpush3.bf16.msra.mxu0 %v2905_v12  ;;  %4025 = vst [vmem:[#allocation10_spill] sm:$0xff] %v3439_v11  ;;  %v3013_v12 = vmov 1983009808  }
  0x28   : > { %2781 = vmatprep.subr.bf16.mxu0 %v3965_v1  ;;  %v553_v13 = vunpack.c.l.s4 %v3013_v12 }
  0x29   : > { %2800 = vmatpush3.bf16.msra.mxu1 %v2923_v20 }
  0x2a   : > { %2801 = vmatprep.subr.bf16.mxu1 %v3965_v1 }
  0x2b   : > { %2782 = vmatpush3.bf16.msra.mxu0 %v2906_v14  ;;  %v555_v14 = vlaneseq }
  0x2c   : > { %2379 = vmatprep.subr.bf16.mxu0 %v3135_v15 }
  0x2d   : > { %2802 = vmatpush3.bf16.msra.mxu1 %v2926_v23  ;;  %v556_v20 = vshrl.u32 %v555_v14, 7  ;;  %v571_v14 = vld [vmem:[#allocation2 + $0x2] sm:$0x3] }
  0x2e   : > { %2784 = vmatmul.mubr.bf16.vlgmr.msra.gmra.mrb[0].mxu0 %v319_v17  ;;  %2401 = vmatprep.subr.bf16.mxu1 %v3179_v24  ;;  %v554_v17 = vunpack.c.0.s8 %v553_v13 }
  0x2f   : > { %2380 = vmatpush3.bf16.msra.mxu0 %v3145_v18  ;;  %1300 = vmatprep.mubr.bf16.mxu0 %v628_v36 }
  0x30   : > { %2381 = vmatprep.subr.bf16.mxu0 %v3150_v19  ;;  %2804 = vmatmul.mubr.bf16.vlgmr.msra.gmra.mrb[0].mxu1 %v433_v30  ;;  %v557_v33 = vsub.s32 %v554_v17, %v556_v20 }
  0x31   : > { %2402 = vmatpush3.bf16.msra.mxu1 %v3197_v31 }
  0x32   : > { %2403 = vmatprep.subr.bf16.mxu1 %v3202_v32 }
  0x33   : > { %2382 = vmatpush3.bf16.msra.mxu0 %v3159_v21 }
  0x34   : > { %2383 = vmatprep.subr.bf16.mxu0 %v3165_v22 }
  0x35   : > { %2404 = vmatpush3.bf16.msra.mxu1 %v3218_v37 }
  0x36   : > { %2405 = vmatprep.subr.bf16.mxu1 %v3284_v48 }
  0x37   : > { %2384 = vmatpush3.bf16.msra.mxu0 %v3185_v26 }
  0x38   : > { %2385 = vmatprep.subr.bf16.mxu0 %v3190_v27 }
  0x39   : > { %2406 = vmatpush3.bf16.msra.mxu1 %v3289_v49 }
  0x3a   : > { %2407 = vmatprep.subr.bf16.mxu1 %v3308_v52 }
  0x3b   : > { %2386 = vmatpush3.bf16.msra.mxu0 %v3207_v34 }
  0x3c   : > { %2387 = vmatprep.subr.bf16.mxu0 %v3213_v35 }
  0x3d   : > { %2408 = vmatpush3.bf16.msra.mxu1 %v3313_v53 }
  0x3e   : > { %2409 = vmatprep.subr.bf16.mxu1 %v3332_v56 }
  0x3f   : > { %2388 = vmatpush3.bf16.msra.mxu0 %v3226_v38 }
  0x40   : > { %2389 = vmatprep.subr.bf16.mxu0 %v3232_v39 }
  0x41   : > { %2410 = vmatpush3.bf16.msra.mxu1 %v3337_v57 }
  0x42   : > { %2411 = vmatprep.subr.bf16.mxu1 %v3356_v60 }
  0x43   : > { %2390 = vmatpush3.bf16.msra.mxu0 %v3240_v40 }
  0x44   : > { %2391 = vmatprep.subr.bf16.mxu0 %v3245_v41 }
  0x45   : > { %2412 = vmatpush3.bf16.msra.mxu1 %v3361_v61 }
  0x46   : > { %2413 = vmatprep.subr.bf16.mxu1 %v3380_v0 }
  0x47   : > { %2392 = vmatpush3.bf16.msra.mxu0 %v3252_v42 }
  0x48   : > { %2393 = vmatprep.subr.bf16.mxu0 %v3257_v43 }
  0x49   : > { %2414 = vmatpush3.bf16.msra.mxu1 %v3385_v2 }
  0x4a   : > { %2415 = vmatprep.subr.bf16.mxu1 %v3404_v5 }
  0x4b   : > { %2394 = vmatpush3.bf16.msra.mxu0 %v3264_v44 }
  0x4c   : > { %2423 = vmatprep.subr.bf16.mxu0 %v3269_v45 }
  0x4d   : > { %2416 = vmatpush3.bf16.msra.mxu1 %v3409_v6 }
  0x4e   : > { %1301 = vmatmul.mubr.bf16.vlgmr.msra.gmra.mrb[4].mxu0 %v605_v46  ;;  %2445 = vmatprep.subr.bf16.mxu1 %v3428_v9 }
  0x4f   : > { %2424 = vmatpush3.bf16.msra.mxu0 %v3276_v47 }
  0x50   : > { %2425 = vmatprep.subr.bf16.mxu0 %v3294_v50 }
  0x53   : > { %2426 = vmatpush3.bf16.msra.mxu0 %v3300_v51 }
  0x54   : > { %2427 = vmatprep.subr.bf16.mxu0 %v3318_v54 }
  0x57   : > { %2428 = vmatpush3.bf16.msra.mxu0 %v3324_v55 }
  0x58   : > { %2429 = vmatprep.subr.bf16.mxu0 %v3342_v58 }
  0x5b   : > { %2430 = vmatpush3.bf16.msra.mxu0 %v3348_v59 }
  0x5c   : > { %2431 = vmatprep.subr.bf16.mxu0 %v3366_v62 }
  0x5f   : > { %2432 = vmatpush3.bf16.msra.mxu0 %v3372_v63 }
  0x60   : > { %2433 = vmatprep.subr.bf16.mxu0 %v3390_v3 }
  0x63   : > { %2434 = vmatpush3.bf16.msra.mxu0 %v3396_v4 }
  0x64   : > { %2435 = vmatprep.subr.bf16.mxu0 %v3414_v7 }
  0x67   : > { %2436 = vmatpush3.bf16.msra.mxu0 %v3420_v8 }
  0x68   : > { %2437 = vmatprep.subr.bf16.mxu0 %v3433_v10 }
  0x6b   : > { %2438 = vmatpush3.bf16.msra.mxu0 %v3439_v11 }
  0x6c   : > { %2807 = vmatprep.subr.bf16.mxu0 %v3965_v1 }
 0x101   : > { %v425_v23 = vpop.f32.mrb[0].mxu0 }
 0x102   : > { %v426_v25 = vadd.f32 %v2256_v16, %v425_v23  ;;  %v2785_v28 = vpop.f32.mrb[1].mxu0 }
 0x103   : > { %v428_v29 = vpop.f32.mrb[2].mxu0  ;;  %v580_v28 = vld [vmem:[#allocation2 + $0x4] sm:$0x3] }
 0x104   : > { %v431_v30 = vmax.f32 %v426_v25, 0.0  ;;  %v2786_v36 = vpop.f32.mrb[3].mxu0  ;;  %v593_v29 = vld [vmem:[#allocation2 + $0x6] sm:$0x3] }
 0x106   : > { %v432_v46 = vpack.c.bf16 %v431_v30, %v431_v30 }
 0x108   : > { %v558_v11 = vrot.slane %v432_v46, %v557_v33 }
 0x10a   : > { %v560_v1 = vshrl.u32 %v558_v11, 16  ;;  %v563_v10 = vshll.u32 %v558_v11, 16  ;;  %v583_v12 = vcombine.high %v558_v11, %v558_v11 }
 0x10c   : > { %v562_v8 = vrot.slane %v560_v1, 7  ;;  %v574_v7 = vrot.slane %v560_v1, 6  ;;  %v575_v4 = vrot.slane %v563_v10, 7  ;;  %v585_v3 = vshrl.u32 %v583_v12, 16 }
 0x10d   : > { %v588_v16 = vshll.u32 %v583_v12, 16 }
 0x10e   : > { %v565_v17 = vor.u32 %v563_v10, %v562_v8  ;;  %v576_v20 = vor.u32 %v575_v4, %v574_v7  ;;  %v587_v23 = vrot.slane %v585_v3, 7  ;;  %v596_v25 = vrot.slane %v585_v3, 6  ;;  %v602_v8 = vld [vmem:[#allocation2 + $0x8] sm:$0x3] }
 0x10f   : > { %v597_v30 = vrot.slane %v588_v16, 7  ;;  %v2275_v4 = vld.sshfl [vmem:[#allocation2] sm:$0x2 pattern:$0x76325410] }
 0x110   : > { %v572_v11 = vsel %vm3448_vm3, %v565_v17, %v571_v14  ;;  %v577_v1 = vrot.slane %v576_v20, 2  ;;  %v590_v33 = vor.u32 %v588_v16, %v587_v23  ;;  %v638_v10 = vrot.slane %v2275_v4, 1  ;;  %v3463_v14 = vld [vmem:[%s3958_s4 + $0x180] sm:$0xff]   ;;  %v3468_v16 = vld [vmem:[%s3958_s4 + $0x1c8] sm:$0xff]   ;;  %v3501_v4 = vld [vmem:[%s3958_s4 + $0x190] sm:$0xff]  }
 0x111   : > { %573 = vst [vmem:[#allocation2 + $0x2] sm:$0x3] %v572_v11  ;;  %v598_v36 = vor.u32 %v597_v30, %v596_v25 }
 0x112   : > { %v581_v46 = vsel %vm3448_vm3, %v577_v1, %v580_v28  ;;  %v594_v12 = vsel %vm3448_vm3, %v590_v33, %v593_v29  ;;  %v3482_v29 = vld [vmem:[%s3958_s4 + $0x188] sm:$0xff]   ;;  %v3488_v33 = vld [vmem:[%s3958_s4 + $0x1d0] sm:$0xff]  }
 0x113   : > { %582 = vst [vmem:[#allocation2 + $0x4] sm:$0x3] %v581_v46  ;;  %595 = vst [vmem:[#allocation2 + $0x6] sm:$0x3] %v594_v12  ;;  %v599_v3 = vrot.slane %v598_v36, 2  ;;  %v3493_v36 = vld [vmem:[%s3958_s4 + $0x200] sm:$0xff]  }
 0x114   : > { %4028 = vst [vmem:[#allocation11_spill] sm:$0xff] %v3488_v33  ;;  %4029 = vst [vmem:[#allocation12_spill] sm:$0xff] %v3493_v36 }
 0x115   : > { %v603_v7 = vsel %vm3448_vm3, %v599_v3, %v602_v8 }
 0x116   : > { %604 = vst [vmem:[#allocation2 + $0x8] sm:$0x3] %v603_v7  ;;  %v3507_v7 = vld [vmem:[%s3958_s4 + $0x1d8] sm:$0xff]  }
 0x118   : > { %v3470_v17 = vld [vmem:[#allocation2 + $0x2] sm:$0x1]  ;;  %v3472_v20 = vld.sshfl [vmem:[#allocation2 + $0x2] sm:$0x2 pattern:$0x76325410] }
 0x119   : > { %1340 = vmatprep.mubr.bf16.mxu1 %v3470_v17  ;;  %v3977_v13 = vrot.slane %v3472_v20, 1  ;;  %v2276_v23 = vld.sshfl [vmem:[#allocation2 + $0x2] sm:$0x3 pattern:$0x76325410] }
 0x11a   : > { %1341 = vmatmul.mubr.bf16.vlgmr.msra.gmra.mrb[4].mxu1 %v638_v10  ;;  %v651_v25 = vshll.u32 %v2276_v23, 16  ;;  %v2278_v28 = vld.sshfl [vmem:[#allocation2 + $0x4] sm:$0x3 pattern:$0x76325410]  ;;  %v649_v11 = vshrl.u32 %v2276_v23, 16 }
 0x11b   : > { %2446 = vmatpush3.bf16.msra.mxu1 %v3463_v14  ;;  %1380 = vmatprep.mubr.bf16.mxu0 %v3977_v13  ;;  %v677_v30 = vshll.u32 %v2278_v28, 16  ;;  %v675_v46 = vshrl.u32 %v2278_v28, 16  ;;  %v3514_v10 = vld [vmem:[%s3958_s4 + $0x208] sm:$0xff]   ;;  %v4032_v23 = vmov 0.0   ;;  %v3529_v28 = vld [vmem:[%s3958_s4 + $0x1e0] sm:$0xff]   ;;  %v3567_v13 = vld [vmem:[%s3958_s4 + $0x1f0] sm:$0xff]  }
 0x11c   : > { %2447 = vmatprep.subr.bf16.mxu1 %v3468_v16  ;;  %v653_v1 = vrot.slane %v651_v25, 1  ;;  %4031 = vst [vmem:[#allocation14_spill] sm:$0xff] %v3514_v10  ;;  %v3523_v25 = vld [vmem:[%s3958_s4 + $0x198] sm:$0xff]   ;;  %4034 = vst [vmem:[#allocation16_spill] sm:$0xff] %v3529_v28 }
 0x11d   : > { %v679_v12 = vrot.slane %v677_v30, 1  ;;  %4033 = vst [vmem:[#allocation15_spill] sm:$0xff] %v3523_v25  ;;  %v3535_v30 = vld [vmem:[%s3958_s4 + $0x210] sm:$0xff]   ;;  %4039 = vst [vmem:[#allocation21_spill] sm:$0xff] %v3567_v13 }
 0x11e   : > { %v654_v8 = vor.u32 %v653_v1, %v649_v11  ;;  %4035 = vst [vmem:[#allocation17_spill] sm:$0xff] %v3535_v30  ;;  %v3542_v11 = vld [vmem:[%s3958_s4 + $0x1a0] sm:$0xff]   ;;  %v3548_v1 = vld [vmem:[%s3958_s4 + $0x1e8] sm:$0xff]  }
 0x11f   : > { %2448 = vmatpush3.bf16.msra.mxu1 %v3482_v29  ;;  %v3496_v3 = vor.u32 %v679_v12, %v675_v46  ;;  %4036 = vst [vmem:[#allocation18_spill] sm:$0xff] %v3542_v11  ;;  %v3554_v46 = vld [vmem:[%s3958_s4 + $0x218] sm:$0xff]   ;;  %v3561_v12 = vld [vmem:[%s3958_s4 + $0x1a8] sm:$0xff]  }
 0x120   : > { %1381 = vmatmul.mubr.bf16.vlgmr.msra.gmra.mrb[8].mxu0 %v654_v8  ;;  %2449 = vmatprep.subr.bf16.mxu1 %v3488_v33  ;;  %4037 = vst [vmem:[#allocation19_spill] sm:$0xff] %v3554_v46  ;;  %4038 = vst [vmem:[#allocation20_spill] sm:$0xff] %v3561_v12 }
 0x121   : > { %4030 = vst [vmem:[#allocation13_spill] sm:$0xff] %v3496_v3  ;;  %2808 = vmatpush3.bf16.msra.mxu0 %v3493_v36  ;;  %1420 = vmatprep.mubr.bf16.mxu1 %v3496_v3  ;;  %v3592_v36 = vld [vmem:[%s3958_s4 + $0x228] sm:$0xff]   ;;  %v3599_v3 = vld [vmem:[%s3958_s4 + $0x1b8] sm:$0xff]  }
 0x122   : > { %2809 = vmatprep.subr.bf16.mxu0 %v4032_v23  ;;  %2823 = vmatprep.mubr.msk.bf16.mxu0 %vm3011_vm0, %v4032_v23  ;;  %4043 = vst [vmem:[#allocation25_spill] sm:$0xff] %v3592_v36 }
 0x123   : > { %2450 = vmatpush3.bf16.msra.mxu1 %v3501_v4 }
 0x124   : > { %2451 = vmatprep.subr.bf16.mxu1 %v3507_v7 }
 0x125   : > { %2810 = vmatpush3.bf16.msra.mxu0 %v3514_v10  ;;  %v3580_v10 = vld [vmem:[%s3958_s4 + $0x1b0] sm:$0xff]  }
 0x126   : > { %2811 = vmatprep.subr.bf16.mxu0 %v4032_v23  ;;  %4041 = vst [vmem:[#allocation23_spill] sm:$0xff] %v3580_v10 }
 0x127   : > { %2452 = vmatpush3.bf16.msra.mxu1 %v3523_v25 }
 0x128   : > { %2453 = vmatprep.subr.bf16.mxu1 %v3529_v28 }
 0x129   : > { %2812 = vmatpush3.bf16.msra.mxu0 %v3535_v30  ;;  %v3573_v30 = vld [vmem:[%s3958_s4 + $0x220] sm:$0xff]  }
 0x12a   : > { %2813 = vmatprep.subr.bf16.mxu0 %v4032_v23  ;;  %4040 = vst [vmem:[#allocation22_spill] sm:$0xff] %v3573_v30 }
 0x12b   : > { %2454 = vmatpush3.bf16.msra.mxu1 %v3542_v11 }
 0x12c   : > { %2455 = vmatprep.subr.bf16.mxu1 %v3548_v1 }
 0x12d   : > { %2814 = vmatpush3.bf16.msra.mxu0 %v3554_v46  ;;  %v3586_v46 = vld [vmem:[%s3958_s4 + $0x1f8] sm:$0xff]  }
 0x12e   : > { %2815 = vmatprep.subr.bf16.mxu0 %v4032_v23  ;;  %4042 = vst [vmem:[#allocation24_spill] sm:$0xff] %v3586_v46 }
 0x12f   : > { %2456 = vmatpush3.bf16.msra.mxu1 %v3561_v12 }
 0x130   : > { %2457 = vmatprep.subr.bf16.mxu1 %v3567_v13 }
 0x131   : > { %2816 = vmatpush3.bf16.msra.mxu0 %v3573_v30  ;;  %v3606_v30 = vld [vmem:[%s3958_s4 + $0x230] sm:$0xff]  }
 0x132   : > { %2817 = vmatprep.subr.bf16.mxu0 %v4032_v23  ;;  %4044 = vst [vmem:[#allocation26_spill] sm:$0xff] %v3606_v30 }
 0x133   : > { %2458 = vmatpush3.bf16.msra.mxu1 %v3580_v10  ;;  %v3612_v10 = vld [vmem:[#allocation2 + $0x4] sm:$0x1] }
 0x134   : > { %2459 = vmatprep.subr.bf16.mxu1 %v3586_v46  ;;  %4045 = vst [vmem:[#allocation27_spill] sm:$0xff] %v3612_v10  ;;  %v3617_v46 = vld [vmem:[%s3958_s4 + $0x238] sm:$0xff]  }
 0x135   : > { %2818 = vmatpush3.bf16.msra.mxu0 %v3592_v36  ;;  %v2279_v36 = vld.sshfl [vmem:[#allocation2 + $0x4] sm:$0x2 pattern:$0x76325410] }
 0x136   : > { %2819 = vmatprep.subr.bf16.mxu0 %v4032_v23 }
 0x137   : > { %2460 = vmatpush3.bf16.msra.mxu1 %v3599_v3 }
 0x138   : > { %2476 = vmatprep.subr.bf16.mxu1 %v3135_v15 }
 0x139   : > { %2820 = vmatpush3.bf16.msra.mxu0 %v3606_v30  ;;  %v3624_v30 = vrot.slane %v2279_v36, 1  ;;  %v3640_v36 = vpop.f32.mrb[0].mxu1 }
 0x13a   : > { %1421 = vmatmul.mubr.bf16.vlgmr.msra.gmra.mrb[8].mxu1 %v3612_v10  ;;  %2821 = vmatprep.subr.bf16.mxu0 %v4032_v23  ;;  %4046 = vst [vmem:[#allocation28_spill] sm:$0xff] %v3640_v36 }
 0x13b   : > { %2477 = vmatpush3.bf16.msra.mxu1 %v3145_v18  ;;  %1529 = vmatprep.mubr.bf16.mxu1 %v654_v8  ;;  %v2805_v8 = vpop.f32.mrb[1].mxu1 }
 0x13c   : > { %2478 = vmatprep.subr.bf16.mxu1 %v3150_v19 }
 0x13d   : > { %2822 = vmatpush3.bf16.msra.mxu0 %v3617_v46 }
 0x13e   : > { %2498 = vmatprep.subr.bf16.mxu0 %v3179_v24 }
 0x13f   : > { %2479 = vmatpush3.bf16.msra.mxu1 %v3159_v21 }
 0x140   : > { %2824 = vmatmul.mubr.bf16.vlgmr.msra.gmra.mrb[12].mxu0 %v3624_v30  ;;  %2480 = vmatprep.subr.bf16.mxu1 %v3165_v22 }
 0x141   : > { %2499 = vmatpush3.bf16.msra.mxu0 %v3197_v31  ;;  %1569 = vmatprep.mubr.bf16.mxu0 %v3612_v10  ;;  %v542_v10 = vpop.f32.mrb[2].mxu1 }
 0x142   : > { %2500 = vmatprep.subr.bf16.mxu0 %v3202_v32  ;;  %v2806_v32 = vpop.f32.mrb[3].mxu1  ;;  %v2352_v10 = vld.sshfl [vmem:[#allocation2 + $0x6] sm:$0x3 pattern:$0x76325410] }
 0x143   : > { %2481 = vmatpush3.bf16.msra.mxu1 %v3185_v26  ;;  %v1482_v32 = vshll.u32 %v2352_v10, 16  ;;  %v1480_v36 = vshrl.u32 %v2352_v10, 16  ;;  %v2395_v10 = vpop.f32.mrb[4].mxu0 }
 0x144   : > { %2482 = vmatprep.subr.bf16.mxu1 %v3190_v27 }
 0x145   : > { %2501 = vmatpush3.bf16.msra.mxu0 %v3218_v37  ;;  %v1484_v8 = vrot.slane %v1482_v32, 1 }
 0x146   : > { %2502 = vmatprep.subr.bf16.mxu0 %v3284_v48 }
 0x147   : > { %2483 = vmatpush3.bf16.msra.mxu1 %v3207_v34 }
 0x148   : > { %2484 = vmatprep.subr.bf16.mxu1 %v3213_v35 }
 0x149   : > { %2503 = vmatpush3.bf16.msra.mxu0 %v3289_v49 }
 0x14a   : > { %2504 = vmatprep.subr.bf16.mxu0 %v3308_v52 }
 0x14b   : > { %2485 = vmatpush3.bf16.msra.mxu1 %v3226_v38 }
 0x14c   : > { %2486 = vmatprep.subr.bf16.mxu1 %v3232_v39 }
 0x14d   : > { %2505 = vmatpush3.bf16.msra.mxu0 %v3313_v53 }
 0x14e   : > { %2506 = vmatprep.subr.bf16.mxu0 %v3332_v56 }
 0x14f   : > { %2487 = vmatpush3.bf16.msra.mxu1 %v3240_v40 }
 0x150   : > { %2488 = vmatprep.subr.bf16.mxu1 %v3245_v41 }
 0x151   : > { %2507 = vmatpush3.bf16.msra.mxu0 %v3337_v57 }
 0x152   : > { %2508 = vmatprep.subr.bf16.mxu0 %v3356_v60 }
 0x153   : > { %2489 = vmatpush3.bf16.msra.mxu1 %v3252_v42 }
 0x154   : > { %2490 = vmatprep.subr.bf16.mxu1 %v3257_v43 }
 0x155   : > { %2509 = vmatpush3.bf16.msra.mxu0 %v3361_v61 }
 0x156   : > { %2510 = vmatprep.subr.bf16.mxu0 %v3380_v0  ;;  %v3666_v0 = vor.u32 %v1484_v8, %v1480_v36  ;;  %v2396_v36 = vpop.f32.mrb[5].mxu0 }
 0x157   : > { %2491 = vmatpush3.bf16.msra.mxu1 %v3264_v44  ;;  %v2398_v32 = vpop.f32.mrb[6].mxu0 }
 0x158   : > { %2520 = vmatprep.subr.bf16.mxu1 %v3269_v45  ;;  %v2399_v8 = vpop.f32.mrb[7].mxu0  ;;  %v4053_v32 = vld [vmem:[#allocation9_spill] sm:$0xff] }
 0x159   : > { %2511 = vmatpush3.bf16.msra.mxu0 %v3385_v2  ;;  %v4054_v8 = vld [vmem:[#allocation10_spill] sm:$0xff] }
 0x15a   : > { %1530 = vmatmul.mubr.bf16.vlgmr.msra.gmra.mrb[12].mxu1 %v3470_v17  ;;  %2512 = vmatprep.subr.bf16.mxu0 %v3404_v5  ;;  %v4047_v17 = vrot.slane %v3472_v20, 1  ;;  %v3679_v20 = vadd.f32 %v2396_v36, %v2395_v10  ;;  %v4051_v10 = vld [vmem:[#allocation7_spill] sm:$0xff]  ;;  %v4052_v36 = vld [vmem:[#allocation8_spill] sm:$0xff] }
 0x15b   : > { %2521 = vmatpush3.bf16.msra.mxu1 %v3276_v47  ;;  %1609 = vmatprep.mubr.bf16.mxu1 %v3624_v30 }
 0x15c   : > { %2522 = vmatprep.subr.bf16.mxu1 %v3294_v50  ;;  %4048 = vst [vmem:[#allocation29_spill] sm:$0xff] %v3679_v20  ;;  %v4055_v20 = vld [vmem:[#allocation23_spill] sm:$0xff] }
 0x15d   : > { %2513 = vmatpush3.bf16.msra.mxu0 %v3409_v6 }
 0x15e   : > { %2542 = vmatprep.subr.bf16.mxu0 %v3428_v9 }
 0x15f   : > { %2523 = vmatpush3.bf16.msra.mxu1 %v3300_v51 }
 0x160   : > { %1570 = vmatmul.mubr.bf16.vlgmr.msra.gmra.mrb[16].mxu0 %v4047_v17  ;;  %2524 = vmatprep.subr.bf16.mxu1 %v3318_v54  ;;  %v4049_v17 = vld [vmem:[#allocation5_spill] sm:$0xff] }
 0x161   : > { %2543 = vmatpush3.bf16.msra.mxu0 %v3463_v14  ;;  %1649 = vmatprep.mubr.bf16.mxu0 %v3666_v0 }
 0x162   : > { %2544 = vmatprep.subr.bf16.mxu0 %v3468_v16 }
 0x163   : > { %2525 = vmatpush3.bf16.msra.mxu1 %v3324_v55 }
 0x164   : > { %2526 = vmatprep.subr.bf16.mxu1 %v3342_v58 }
 0x165   : > { %2545 = vmatpush3.bf16.msra.mxu0 %v3482_v29 }
 0x166   : > { %2546 = vmatprep.subr.bf16.mxu0 %v3488_v33  ;;  %v4050_v33 = vld [vmem:[#allocation6_spill] sm:$0xff] }
 0x167   : > { %2527 = vmatpush3.bf16.msra.mxu1 %v3348_v59 }
 0x168   : > { %2528 = vmatprep.subr.bf16.mxu1 %v3366_v62 }
 0x169   : > { %2547 = vmatpush3.bf16.msra.mxu0 %v3501_v4 }
 0x16a   : > { %2548 = vmatprep.subr.bf16.mxu0 %v3507_v7 }
 0x16b   : > { %2529 = vmatpush3.bf16.msra.mxu1 %v3372_v63 }
 0x16c   : > { %2530 = vmatprep.subr.bf16.mxu1 %v4049_v17 }
 0x16d   : > { %2549 = vmatpush3.bf16.msra.mxu0 %v3523_v25  ;;  %v4057_v25 = vld [vmem:[#allocation24_spill] sm:$0xff] }
 0x16e   : > { %2550 = vmatprep.subr.bf16.mxu0 %v3529_v28  ;;  %v4056_v28 = vld [vmem:[#allocation13_spill] sm:$0xff] }
 0x16f   : > { %2531 = vmatpush3.bf16.msra.mxu1 %v4050_v33 }
 0x170   : > { %2532 = vmatprep.subr.bf16.mxu1 %v4051_v10 }
 0x171   : > { %2551 = vmatpush3.bf16.msra.mxu0 %v3542_v11  ;;  %v4058_v11 = vld [vmem:[#allocation12_spill] sm:$0xff] }
 0x172   : > { %2552 = vmatprep.subr.bf16.mxu0 %v3548_v1 }
 0x173   : > { %2533 = vmatpush3.bf16.msra.mxu1 %v4052_v36 }
 0x174   : > { %2534 = vmatprep.subr.bf16.mxu1 %v4053_v32 }
 0x175   : > { %2553 = vmatpush3.bf16.msra.mxu0 %v3561_v12  ;;  %v4059_v12 = vld [vmem:[#allocation14_spill] sm:$0xff] }
 0x176   : > { %2554 = vmatprep.subr.bf16.mxu0 %v3567_v13  ;;  %v3707_v13 = vld [vmem:[#allocation2 + $0x6] sm:$0x1] }
 0x177   : > { %2535 = vmatpush3.bf16.msra.mxu1 %v4054_v8 }
 0x178   : > { %2827 = vmatprep.subr.bf16.mxu1 %v4032_v23 }
 0x179   : > { %2555 = vmatpush3.bf16.msra.mxu0 %v4055_v20 }
 0x17a   : > { %1610 = vmatmul.mubr.bf16.vlgmr.msra.gmra.mrb[16].mxu1 %v4056_v28  ;;  %2556 = vmatprep.subr.bf16.mxu0 %v4057_v25  ;;  %v4060_v25 = vld [vmem:[#allocation17_spill] sm:$0xff] }
 0x17b   : > { %2828 = vmatpush3.bf16.msra.mxu1 %v4058_v11  ;;  %2843 = vmatprep.mubr.msk.bf16.mxu1 %vm3011_vm0, %v4032_v23 }
 0x17c   : > { %2829 = vmatprep.subr.bf16.mxu1 %v4032_v23 }
 0x17d   : > { %2557 = vmatpush3.bf16.msra.mxu0 %v3599_v3 }
 0x17e   : > { %2573 = vmatprep.subr.bf16.mxu0 %v3135_v15  ;;  %v4061_v15 = vld [vmem:[#allocation19_spill] sm:$0xff] }
 0x17f   : > { %2830 = vmatpush3.bf16.msra.mxu1 %v4059_v12 }
 0x180   : > { %1650 = vmatmul.mubr.bf16.vlgmr.msra.gmra.mrb[20].mxu0 %v3707_v13  ;;  %2831 = vmatprep.subr.bf16.mxu1 %v4032_v23 }
 0x181   : > { %2574 = vmatpush3.bf16.msra.mxu0 %v3145_v18  ;;  %1758 = vmatprep.mubr.bf16.mxu0 %v4056_v28  ;;  %v4062_v18 = vld [vmem:[#allocation22_spill] sm:$0xff]  ;;  %v4068_v28 = vld [vmem:[#allocation11_spill] sm:$0xff] }
 0x182   : > { %2575 = vmatprep.subr.bf16.mxu0 %v3150_v19  ;;  %v4063_v19 = vld [vmem:[#allocation25_spill] sm:$0xff] }
 0x183   : > { %2832 = vmatpush3.bf16.msra.mxu1 %v4060_v25 }
 0x184   : > { %2833 = vmatprep.subr.bf16.mxu1 %v4032_v23 }
 0x185   : > { %2576 = vmatpush3.bf16.msra.mxu0 %v3159_v21  ;;  %v4064_v21 = vld [vmem:[#allocation26_spill] sm:$0xff] }
 0x186   : > { %2577 = vmatprep.subr.bf16.mxu0 %v3165_v22  ;;  %v2353_v22 = vld.sshfl [vmem:[#allocation2 + $0x6] sm:$0x2 pattern:$0x76325410] }
 0x187   : > { %2834 = vmatpush3.bf16.msra.mxu1 %v4061_v15 }
 0x188   : > { %2835 = vmatprep.subr.bf16.mxu1 %v4032_v23 }
 0x189   : > { %2578 = vmatpush3.bf16.msra.mxu0 %v3185_v26  ;;  %v3736_v26 = vrot.slane %v2353_v22, 1  ;;  %v4070_v22 = vld [vmem:[#allocation16_spill] sm:$0xff] }
 0x18a   : > { %2579 = vmatprep.subr.bf16.mxu0 %v3190_v27  ;;  %v4065_v27 = vld [vmem:[#allocation3_spill] sm:$0xff] }
 0x18b   : > { %2836 = vmatpush3.bf16.msra.mxu1 %v4062_v18 }
 0x18c   : > { %2837 = vmatprep.subr.bf16.mxu1 %v4032_v23 }
 0x18d   : > { %2580 = vmatpush3.bf16.msra.mxu0 %v3207_v34  ;;  %v4066_v34 = vld [vmem:[#allocation27_spill] sm:$0xff] }
 0x18e   : > { %2581 = vmatprep.subr.bf16.mxu0 %v3213_v35 }
 0x18f   : > { %2838 = vmatpush3.bf16.msra.mxu1 %v4063_v19 }
 0x190   : > { %2839 = vmatprep.subr.bf16.mxu1 %v4032_v23 }
 0x191   : > { %2582 = vmatpush3.bf16.msra.mxu0 %v3226_v38 }
 0x192   : > { %2583 = vmatprep.subr.bf16.mxu0 %v3232_v39 }
 0x193   : > { %2840 = vmatpush3.bf16.msra.mxu1 %v4064_v21 }
 0x194   : > { %2841 = vmatprep.subr.bf16.mxu1 %v4032_v23 }
 0x195   : > { %2584 = vmatpush3.bf16.msra.mxu0 %v3240_v40 }
 0x196   : > { %2585 = vmatprep.subr.bf16.mxu0 %v3245_v41 }
 0x197   : > { %2842 = vmatpush3.bf16.msra.mxu1 %v3617_v46 }
 0x198   : > { %2595 = vmatprep.subr.bf16.mxu1 %v3179_v24  ;;  %v2354_v24 = vld.sshfl [vmem:[#allocation2 + $0x8] sm:$0x3 pattern:$0x76325410] }
 0x199   : > { %2586 = vmatpush3.bf16.msra.mxu0 %v3252_v42  ;;  %v1711_v35 = vshll.u32 %v2354_v24, 16  ;;  %v1709_v38 = vshrl.u32 %v2354_v24, 16  ;;  %v4073_v24 = vld [vmem:[#allocation21_spill] sm:$0xff] }
 0x19a   : > { %2844 = vmatmul.mubr.bf16.vlgmr.msra.gmra.mrb[20].mxu1 %v3736_v26  ;;  %2587 = vmatprep.subr.bf16.mxu0 %v3257_v43 }
 0x19b   : > { %2596 = vmatpush3.bf16.msra.mxu1 %v3197_v31  ;;  %1798 = vmatprep.mubr.bf16.mxu1 %v3707_v13  ;;  %v4067_v31 = vld [vmem:[#allocation4_spill] sm:$0xff] }
 0x19c   : > { %2597 = vmatprep.subr.bf16.mxu1 %v4065_v27  ;;  %v4071_v27 = vld [vmem:[#allocation18_spill] sm:$0xff] }
 0x19d   : > { %2588 = vmatpush3.bf16.msra.mxu0 %v3264_v44 }
 0x19e   : > { %2617 = vmatprep.subr.bf16.mxu0 %v3269_v45 }
 0x19f   : > { %2598 = vmatpush3.bf16.msra.mxu1 %v3218_v37  ;;  %v1713_v37 = vrot.slane %v1711_v35, 1  ;;  %v4074_v35 = vld [vmem:[#allocation24_spill] sm:$0xff] }
 0x1a0   : > { %1759 = vmatmul.mubr.bf16.vlgmr.msra.gmra.mrb[24].mxu0 %v4066_v34  ;;  %2599 = vmatprep.subr.bf16.mxu1 %v3284_v48  ;;  %v4072_v34 = vld [vmem:[#allocation20_spill] sm:$0xff] }
 0x1a1   : > { %2618 = vmatpush3.bf16.msra.mxu0 %v3276_v47  ;;  %1838 = vmatprep.mubr.bf16.mxu0 %v3736_v26  ;;  %v3776_v39 = vor.u32 %v1713_v37, %v1709_v38  ;;  %v2987_v37 = vld [vmem:[%s3958_s4 + $0x40] sm:$0xff]   ;;  %v1697_v38 = vld [vmem:[#allocation2 + $0x8] sm:$0x1] }
 0x1a2   : > { %2619 = vmatprep.subr.bf16.mxu0 %v3294_v50 }
 0x1a3   : > { %2600 = vmatpush3.bf16.msra.mxu1 %v3289_v49 }
 0x1a4   : > { %2601 = vmatprep.subr.bf16.mxu1 %v3308_v52 }
 0x1a5   : > { %2620 = vmatpush3.bf16.msra.mxu0 %v3300_v51 }
 0x1a6   : > { %2621 = vmatprep.subr.bf16.mxu0 %v3318_v54 }
 0x1a7   : > { %2602 = vmatpush3.bf16.msra.mxu1 %v3313_v53 }
 0x1a8   : > { %2603 = vmatprep.subr.bf16.mxu1 %v3332_v56 }
 0x1a9   : > { %2622 = vmatpush3.bf16.msra.mxu0 %v3324_v55 }
 0x1aa   : > { %2623 = vmatprep.subr.bf16.mxu0 %v3342_v58 }
 0x1ab   : > { %2604 = vmatpush3.bf16.msra.mxu1 %v3337_v57 }
 0x1ac   : > { %2605 = vmatprep.subr.bf16.mxu1 %v3356_v60 }
 0x1ad   : > { %2624 = vmatpush3.bf16.msra.mxu0 %v3348_v59 }
 0x1ae   : > { %2625 = vmatprep.subr.bf16.mxu0 %v3366_v62 }
 0x1af   : > { %2606 = vmatpush3.bf16.msra.mxu1 %v3361_v61 }
 0x1b0   : > { %2607 = vmatprep.subr.bf16.mxu1 %v4067_v31 }
 0x1b1   : > { %2626 = vmatpush3.bf16.msra.mxu0 %v3372_v63 }
 0x1b2   : > { %2627 = vmatprep.subr.bf16.mxu0 %v4049_v17 }
 0x1b3   : > { %2608 = vmatpush3.bf16.msra.mxu1 %v3385_v2 }
 0x1b4   : > { %2609 = vmatprep.subr.bf16.mxu1 %v3404_v5 }
 0x1b5   : > { %2628 = vmatpush3.bf16.msra.mxu0 %v4050_v33 }
 0x1b6   : > { %2629 = vmatprep.subr.bf16.mxu0 %v4051_v10 }
 0x1b7   : > { %2610 = vmatpush3.bf16.msra.mxu1 %v3409_v6 }
 0x1b8   : > { %2639 = vmatprep.subr.bf16.mxu1 %v3428_v9 }
 0x1b9   : > { %2630 = vmatpush3.bf16.msra.mxu0 %v4052_v36 }
 0x1ba   : > { %1799 = vmatmul.mubr.bf16.vlgmr.msra.gmra.mrb[24].mxu1 %v3624_v30  ;;  %2631 = vmatprep.subr.bf16.mxu0 %v4053_v32  ;;  %v4069_v30 = vld [vmem:[#allocation15_spill] sm:$0xff] }
 0x1bb   : > { %2640 = vmatpush3.bf16.msra.mxu1 %v3463_v14  ;;  %1878 = vmatprep.mubr.bf16.mxu1 %v3776_v39 }
 0x1bc   : > { %2641 = vmatprep.subr.bf16.mxu1 %v3468_v16 }
 0x1bd   : > { %2632 = vmatpush3.bf16.msra.mxu0 %v4054_v8 }
 0x1be   : > { %2847 = vmatprep.subr.bf16.mxu0 %v4032_v23 }
 0x1bf   : > { %2642 = vmatpush3.bf16.msra.mxu1 %v3482_v29 }
 0x1c0   : > { %1839 = vmatmul.mubr.bf16.vlgmr.msra.gmra.mrb[28].mxu0 %v3666_v0  ;;  %2643 = vmatprep.subr.bf16.mxu1 %v4068_v28 }
 0x1c1   : > { %2848 = vmatpush3.bf16.msra.mxu0 %v4058_v11  ;;  %2863 = vmatprep.mubr.msk.bf16.mxu0 %vm3011_vm0, %v4032_v23 }
 0x1c2   : > { %2849 = vmatprep.subr.bf16.mxu0 %v4032_v23 }
 0x1c3   : > { %2644 = vmatpush3.bf16.msra.mxu1 %v3501_v4 }
 0x1c4   : > { %2645 = vmatprep.subr.bf16.mxu1 %v3507_v7 }
 0x1c5   : > { %2850 = vmatpush3.bf16.msra.mxu0 %v4059_v12 }
 0x1c6   : > { %2851 = vmatprep.subr.bf16.mxu0 %v4032_v23 }
 0x1c7   : > { %2646 = vmatpush3.bf16.msra.mxu1 %v4069_v30 }
 0x1c8   : > { %2647 = vmatprep.subr.bf16.mxu1 %v4070_v22 }
 0x1c9   : > { %2852 = vmatpush3.bf16.msra.mxu0 %v4060_v25 }
 0x1ca   : > { %2853 = vmatprep.subr.bf16.mxu0 %v4032_v23 }
 0x1cb   : > { %2648 = vmatpush3.bf16.msra.mxu1 %v4071_v27 }
 0x1cc   : > { %2649 = vmatprep.subr.bf16.mxu1 %v3548_v1 }
 0x1cd   : > { %2854 = vmatpush3.bf16.msra.mxu0 %v4061_v15  ;;  %v2989_v15 = vld [vmem:[%s3958_s4 + $0x48] sm:$0xff]  }
 0x1ce   : > { %2855 = vmatprep.subr.bf16.mxu0 %v4032_v23 }
 0x1cf   : > { %2650 = vmatpush3.bf16.msra.mxu1 %v4072_v34 }
 0x1d0   : > { %2651 = vmatprep.subr.bf16.mxu1 %v4073_v24 }
 0x1d1   : > { %2856 = vmatpush3.bf16.msra.mxu0 %v4062_v18  ;;  %v2988_v18 = vld [vmem:[%s3958_s4] sm:$0xff]  }
 0x1d2   : > { %2857 = vmatprep.subr.bf16.mxu0 %v4032_v23 }
 0x1d3   : > { %2652 = vmatpush3.bf16.msra.mxu1 %v4055_v20 }
 0x1d4   : > { %2653 = vmatprep.subr.bf16.mxu1 %v4074_v35 }
 0x1d5   : > { %2858 = vmatpush3.bf16.msra.mxu0 %v4063_v19  ;;  %v3822_v19 = vld.sshfl [vmem:[#allocation2 + $0x8] sm:$0x2 pattern:$0x76325410] }
 0x1d6   : > { %2859 = vmatprep.subr.bf16.mxu0 %v4032_v23 }
 0x1d7   : > { %2654 = vmatpush3.bf16.msra.mxu1 %v3599_v3 }
 0x1d8   : > { %2670 = vmatprep.subr.bf16.mxu1 %v2987_v37  ;;  %v1724_v37 = vrot.slane %v3822_v19, 1  ;;  %v2994_v19 = vld [vmem:[%s3958_s4 + $0xc8] sm:$0xff]  }
 0x1d9   : > { %2860 = vmatpush3.bf16.msra.mxu0 %v4064_v21  ;;  %v2990_v21 = vld [vmem:[%s3958_s4 + $0xc0] sm:$0xff]  }
 0x1da   : > { %1879 = vmatmul.mubr.bf16.vlgmr.msra.gmra.mrb[28].mxu1 %v1697_v38  ;;  %2861 = vmatprep.subr.bf16.mxu0 %v4032_v23 }
 0x1db   : > { %2671 = vmatpush3.bf16.msra.mxu1 %v2988_v18  ;;  %1988 = vmatprep.mubr.bf16.mxu1 %v3666_v0  ;;  %v2991_v0 = vld [vmem:[%s3958_s4 + $0x8] sm:$0xff]   ;;  %v2992_v18 = vld [vmem:[%s3958_s4 + $0x50] sm:$0xff]  }
 0x1dc   : > { %2672 = vmatprep.subr.bf16.mxu1 %v2989_v15  ;;  %v2993_v15 = vld [vmem:[%s3958_s4 + $0x80] sm:$0xff]  }
 0x1dd   : > { %2862 = vmatpush3.bf16.msra.mxu0 %v3617_v46 }
 0x1de   : > { %2692 = vmatprep.subr.bf16.mxu0 %v2990_v21  ;;  %v2995_v21 = vld [vmem:[%s3958_s4 + $0x10] sm:$0xff]  }
 0x1df   : > { %2673 = vmatpush3.bf16.msra.mxu1 %v2991_v0  ;;  %v2996_v0 = vld [vmem:[%s3958_s4 + $0x58] sm:$0xff]  }
 0x1e0   : > { %2864 = vmatmul.mubr.bf16.vlgmr.msra.gmra.mrb[32].mxu0 %v1724_v37  ;;  %2674 = vmatprep.subr.bf16.mxu1 %v2992_v18  ;;  %v2997_v18 = vld [vmem:[%s3958_s4 + $0x88] sm:$0xff]  }
 0x1e1   : > { %2693 = vmatpush3.bf16.msra.mxu0 %v2993_v15  ;;  %2028 = vmatprep.mubr.bf16.mxu0 %v1697_v38  ;;  %v2998_v38 = vld [vmem:[%s3958_s4 + $0x18] sm:$0xff]   ;;  %v2999_v15 = vld [vmem:[%s3958_s4 + $0x60] sm:$0xff]  }
 0x1e2   : > { %2694 = vmatprep.subr.bf16.mxu0 %v2994_v19  ;;  %v3000_v19 = vld [vmem:[%s3958_s4 + $0x20] sm:$0xff]  }
 0x1e3   : > { %2675 = vmatpush3.bf16.msra.mxu1 %v2995_v21 }
 0x1e4   : > { %2676 = vmatprep.subr.bf16.mxu1 %v2996_v0 }
 0x1e5   : > { %2695 = vmatpush3.bf16.msra.mxu0 %v2997_v18 }
 0x1e6   : > { %2696 = vmatprep.subr.bf16.mxu0 %v3284_v48  ;;  %v3001_v48 = vld [vmem:[%s3958_s4 + $0x68] sm:$0xff]  }
 0x1e7   : > { %2677 = vmatpush3.bf16.msra.mxu1 %v2998_v38  ;;  %v4075_v38 = vld [vmem:[#allocation29_spill] sm:$0xff] }
 0x1e8   : > { %2678 = vmatprep.subr.bf16.mxu1 %v2999_v15 }
 0x1e9   : > { %2697 = vmatpush3.bf16.msra.mxu0 %v3289_v49 }
 0x1ea   : > { %2698 = vmatprep.subr.bf16.mxu0 %v3308_v52 }
 0x1eb   : > { %2679 = vmatpush3.bf16.msra.mxu1 %v3000_v19  ;;  %v2356_v19 = vld.sshfl [vmem:[#allocation2 + $0xa] sm:$0x3 pattern:$0x76325410] }
 0x1ec   : > { %2680 = vmatprep.subr.bf16.mxu1 %v3001_v48 }
 0x1ed   : > { %2699 = vmatpush3.bf16.msra.mxu0 %v3313_v53  ;;  %v2417_v21 = vpop.f32.mrb[4].mxu1 }
 0x1ee   : > { %v2418_v0 = vpop.f32.mrb[5].mxu1  ;;  %2700 = vmatprep.subr.bf16.mxu0 %v3332_v56 }
 0x1ef   : > { %v2419_v18 = vadd.f32 %v2418_v0, %v2417_v21  ;;  %2681 = vmatpush3.bf16.msra.mxu1 %v3240_v40  ;;  %v2420_v49 = vpop.f32.mrb[6].mxu1  ;;  %v1941_v21 = vshll.u32 %v2356_v19, 16 }
 0x1f0   : > { %v2421_v52 = vpop.f32.mrb[7].mxu1  ;;  %2682 = vmatprep.subr.bf16.mxu1 %v3245_v41 }
 0x1f1   : > { %v1343_v15 = vadd.f32 %v2419_v18, %v4075_v38  ;;  %2701 = vmatpush3.bf16.msra.mxu0 %v3337_v57  ;;  %v1939_v57 = vshrl.u32 %v2356_v19, 16 }
 0x1f2   : > { %2702 = vmatprep.subr.bf16.mxu0 %v3356_v60 }
 0x1f3   : > { %v2439_v48 = vpop.f32.mrb[8].mxu0  ;;  %2683 = vmatpush3.bf16.msra.mxu1 %v3252_v42  ;;  %v1943_v42 = vrot.slane %v1941_v21, 1 }
 0x1f4   : > { %v2440_v53 = vpop.f32.mrb[9].mxu0  ;;  %2684 = vmatprep.subr.bf16.mxu1 %v3257_v43 }
 0x1f5   : > { %v2441_v56 = vadd.f32 %v2440_v53, %v2439_v48  ;;  %2703 = vmatpush3.bf16.msra.mxu0 %v3361_v61  ;;  %v2442_v40 = vpop.f32.mrb[10].mxu0  ;;  %v1944_v43 = vor.u32 %v1943_v42, %v1939_v57 }
 0x1f6   : > { %v2443_v0 = vpop.f32.mrb[11].mxu0  ;;  %2704 = vmatprep.subr.bf16.mxu0 %v4067_v31 }
 0x1f7   : > { %v1383_v41 = vadd.f32 %v2441_v56, %v1343_v15  ;;  %2685 = vmatpush3.bf16.msra.mxu1 %v3264_v44 }
 0x1f8   : > { %2714 = vmatprep.subr.bf16.mxu1 %v3269_v45 }
 0x1f9   : > { %2705 = vmatpush3.bf16.msra.mxu0 %v3385_v2  ;;  %v4077_v2 = vld [vmem:[#allocation22_spill] sm:$0xff] }
 0x1fa   : > { %1989 = vmatmul.mubr.bf16.vlgmr.msra.gmra.mrb[32].mxu1 %v3707_v13  ;;  %2706 = vmatprep.subr.bf16.mxu0 %v3404_v5 }
 0x1fb   : > { %2715 = vmatpush3.bf16.msra.mxu1 %v3276_v47  ;;  %2068 = vmatprep.mubr.bf16.mxu1 %v1724_v37 }
 0x1fc   : > { %2716 = vmatprep.subr.bf16.mxu1 %v3294_v50 }
 0x1fd   : > { %2707 = vmatpush3.bf16.msra.mxu0 %v3409_v6 }
 0x1fe   : > { %2736 = vmatprep.subr.bf16.mxu0 %v3428_v9 }
 0x1ff   : > { %2717 = vmatpush3.bf16.msra.mxu1 %v3300_v51 }
 0x200   : > { %2029 = vmatmul.mubr.bf16.vlgmr.msra.gmra.mrb[36].mxu0 %v3736_v26  ;;  %2718 = vmatprep.subr.bf16.mxu1 %v3318_v54 }
 0x201   : > { %2737 = vmatpush3.bf16.msra.mxu0 %v3463_v14  ;;  %2108 = vmatprep.mubr.bf16.mxu0 %v1944_v43 }
 0x202   : > { %2738 = vmatprep.subr.bf16.mxu0 %v3468_v16  ;;  %v4078_v16 = vld [vmem:[#allocation25_spill] sm:$0xff] }
 0x203   : > { %2719 = vmatpush3.bf16.msra.mxu1 %v3324_v55 }
 0x204   : > { %2720 = vmatprep.subr.bf16.mxu1 %v3342_v58 }
 0x205   : > { %2739 = vmatpush3.bf16.msra.mxu0 %v3482_v29 }
 0x206   : > { %2740 = vmatprep.subr.bf16.mxu0 %v4068_v28 }
 0x207   : > { %2721 = vmatpush3.bf16.msra.mxu1 %v3348_v59 }
 0x208   : > { %2722 = vmatprep.subr.bf16.mxu1 %v3366_v62  ;;  %v1927_v62 = vld [vmem:[#allocation2 + $0xa] sm:$0x1] }
 0x209   : > { %2741 = vmatpush3.bf16.msra.mxu0 %v3501_v4 }
 0x20a   : > { %2742 = vmatprep.subr.bf16.mxu0 %v3507_v7 }
 0x20b   : > { %2723 = vmatpush3.bf16.msra.mxu1 %v3372_v63  ;;  %v4076_v63 = vld [vmem:[#allocation19_spill] sm:$0xff] }
 0x20c   : > { %2724 = vmatprep.subr.bf16.mxu1 %v4049_v17 }
 0x20d   : > { %2743 = vmatpush3.bf16.msra.mxu0 %v4069_v30  ;;  %v2461_v44 = vpop.f32.mrb[8].mxu1 }
 0x20e   : > { %v2462_v45 = vpop.f32.mrb[9].mxu1  ;;  %2744 = vmatprep.subr.bf16.mxu0 %v4070_v22 }
 0x20f   : > { %v2463_v47 = vadd.f32 %v2462_v45, %v2461_v44  ;;  %v2464_v50 = vpop.f32.mrb[10].mxu1  ;;  %2725 = vmatpush3.bf16.msra.mxu1 %v4050_v33  ;;  %v4079_v33 = vld [vmem:[#allocation26_spill] sm:$0xff] }
 0x210   : > { %v2465_v51 = vpop.f32.mrb[11].mxu1  ;;  %2726 = vmatprep.subr.bf16.mxu1 %v4051_v10 }
 0x211   : > { %2745 = vmatpush3.bf16.msra.mxu0 %v4071_v27  ;;  %v1423_v54 = vadd.f32 %v2463_v47, %v1383_v41 }
 0x212   : > { %2746 = vmatprep.subr.bf16.mxu0 %v3548_v1 }
 0x213   : > { %v1462_v55 = vpop.f32.mrb[12].mxu0  ;;  %2727 = vmatpush3.bf16.msra.mxu1 %v4052_v36 }
 0x214   : > { %v3910_v58 = vadd.f32 %v1462_v55, %v1423_v54  ;;  %v2825_v59 = vpop.f32.mrb[13].mxu0  ;;  %2728 = vmatprep.subr.bf16.mxu1 %v4053_v32 }
 0x215   : > { %v1465_v60 = vpop.f32.mrb[14].mxu0  ;;  %2747 = vmatpush3.bf16.msra.mxu0 %v4072_v34 }
 0x216   : > { %v2826_v61 = vpop.f32.mrb[15].mxu0  ;;  %2748 = vmatprep.subr.bf16.mxu0 %v4073_v24 }
 0x217   : > { %2729 = vmatpush3.bf16.msra.mxu1 %v4054_v8 }
 0x218   : > { %2867 = vmatprep.subr.bf16.mxu1 %v4032_v23 }
 0x219   : > { %2749 = vmatpush3.bf16.msra.mxu0 %v4055_v20 }
 0x21a   : > { %2069 = vmatmul.mubr.bf16.vlgmr.msra.gmra.mrb[36].mxu1 %v3776_v39  ;;  %2750 = vmatprep.subr.bf16.mxu0 %v4074_v35 }
 0x21b   : > { %2868 = vmatpush3.bf16.msra.mxu1 %v4058_v11  ;;  %2883 = vmatprep.mubr.msk.bf16.mxu1 %vm3011_vm0, %v4032_v23 }
 0x21c   : > { %2869 = vmatprep.subr.bf16.mxu1 %v4032_v23 }
 0x21d   : > { %2751 = vmatpush3.bf16.msra.mxu0 %v3599_v3  ;;  %v2357_v3 = vld.sshfl [vmem:[#allocation2 + $0xa] sm:$0x2 pattern:$0x76325410] }
 0x21e   : > { %v1954_v1 = vrot.slane %v2357_v3, 1 }
 0x21f   : > { %2870 = vmatpush3.bf16.msra.mxu1 %v4059_v12 }
 0x220   : > { %2109 = vmatmul.mubr.bf16.vlgmr.msra.gmra.mrb[40].mxu0 %v1927_v62  ;;  %2871 = vmatprep.subr.bf16.mxu1 %v4032_v23 }
 0x223   : > { %2872 = vmatpush3.bf16.msra.mxu1 %v4060_v25 }
 0x224   : > { %2873 = vmatprep.subr.bf16.mxu1 %v4032_v23 }
 0x227   : > { %2874 = vmatpush3.bf16.msra.mxu1 %v4076_v63 }
 0x228   : > { %2875 = vmatprep.subr.bf16.mxu1 %v4032_v23 }
 0x22b   : > { %2876 = vmatpush3.bf16.msra.mxu1 %v4077_v2 }
 0x22c   : > { %2877 = vmatprep.subr.bf16.mxu1 %v4032_v23 }
 0x22d   : > { %v2492_v5 = vpop.f32.mrb[12].mxu1 }
 0x22e   : > { %v2493_v6 = vpop.f32.mrb[13].mxu1 }
 0x22f   : > { %v2494_v9 = vadd.f32 %v2493_v6, %v2492_v5  ;;  %v2495_v14 = vpop.f32.mrb[14].mxu1  ;;  %2878 = vmatpush3.bf16.msra.mxu1 %v4078_v16 }
 0x230   : > { %v2496_v13 = vpop.f32.mrb[15].mxu1  ;;  %2879 = vmatprep.subr.bf16.mxu1 %v4032_v23 }
 0x233   : > { %v2514_v29 = vpop.f32.mrb[16].mxu0  ;;  %2880 = vmatpush3.bf16.msra.mxu1 %v4079_v33 }
 0x234   : > { %v2515_v4 = vpop.f32.mrb[17].mxu0  ;;  %2881 = vmatprep.subr.bf16.mxu1 %v4032_v23 }
 0x235   : > { %v2516_v7 = vadd.f32 %v2515_v4, %v2514_v29  ;;  %v2517_v25 = vpop.f32.mrb[18].mxu0 }
 0x236   : > { %v2518_v11 = vpop.f32.mrb[19].mxu0 }
 0x237   : > { %v1572_v12 = vadd.f32 %v2516_v7, %v2494_v9  ;;  %2882 = vmatpush3.bf16.msra.mxu1 %v3617_v46 }
 0x23a   : > { %2884 = vmatmul.mubr.bf16.vlgmr.msra.gmra.mrb[40].mxu1 %v1954_v1 }
 0x24d   : > { %v2536_v20 = vpop.f32.mrb[16].mxu1 }
 0x24e   : > { %v2537_v17 = vpop.f32.mrb[17].mxu1 }
 0x24f   : > { %v2538_v10 = vadd.f32 %v2537_v17, %v2536_v20  ;;  %v2539_v36 = vpop.f32.mrb[18].mxu1 }
 0x250   : > { %v2540_v32 = vpop.f32.mrb[19].mxu1 }
 0x251   : > { %v1612_v8 = vadd.f32 %v2538_v10, %v1572_v12 }
 0x253   : > { %v2558_v26 = vpop.f32.mrb[20].mxu0 }
 0x254   : > { %v2559_v31 = vpop.f32.mrb[21].mxu0 }
 0x255   : > { %v2560_v39 = vadd.f32 %v2559_v31, %v2558_v26  ;;  %v2561_v28 = vpop.f32.mrb[22].mxu0 }
 0x256   : > { %v2562_v30 = vpop.f32.mrb[23].mxu0 }
 0x257   : > { %v1652_v23 = vadd.f32 %v2560_v39, %v1612_v8 }
 0x26d   : > { %v1691_v22 = vpop.f32.mrb[20].mxu1 }
 0x26e   : > { %v1692_v27 = vadd.f32 %v1691_v22, %v1652_v23  ;;  %v2845_v34 = vpop.f32.mrb[21].mxu1  ;;  %v2265_v22 = vld [vmem:[%s3961_s7] ss:$0 sm:$0xff] }
 0x26f   : > { %v1694_v24 = vpop.f32.mrb[22].mxu1  ;;  %v2358_v34 = vld [vmem:[%s3959_s5] ss:$0 sm:$0xff] }
 0x270   : > { %v2157_v35 = vrot.slane %v1692_v27, 6  ;;  %v2846_v37 = vpop.f32.mrb[23].mxu1 }
 0x271   : > { %v4080_v37 = vld [vmem:[#allocation28_spill] sm:$0xff] }
 0x272   : > { %v2166_v46 = vsel %vm568_vm1, %v3910_v58, %v2157_v35 }
 0x273   : > { %v2589_v18 = vpop.f32.mrb[24].mxu0 }
 0x274   : > { %v2590_v49 = vpop.f32.mrb[25].mxu0 }
 0x275   : > { %v2591_v52 = vadd.f32 %v2590_v49, %v2589_v18  ;;  %v2592_v38 = vpop.f32.mrb[26].mxu0 }
 0x276   : > { %v2593_v15 = vpop.f32.mrb[27].mxu0 }
 0x28d   : > { %v2611_v19 = vpop.f32.mrb[24].mxu1 }
 0x28e   : > { %v2612_v48 = vpop.f32.mrb[25].mxu1 }
 0x28f   : > { %v2613_v53 = vadd.f32 %v2612_v48, %v2611_v19  ;;  %v2614_v56 = vpop.f32.mrb[26].mxu1 }
 0x290   : > { %v2615_v40 = vpop.f32.mrb[27].mxu1 }
 0x291   : > { %v1801_v21 = vadd.f32 %v2613_v53, %v2591_v52 }
 0x293   : > { %v2633_v0 = vpop.f32.mrb[28].mxu0 }
 0x294   : > { %v2634_v41 = vpop.f32.mrb[29].mxu0 }
 0x295   : > { %v2635_v57 = vadd.f32 %v2634_v41, %v2633_v0  ;;  %v2636_v42 = vpop.f32.mrb[30].mxu0 }
 0x296   : > { %v2637_v43 = vpop.f32.mrb[31].mxu0 }
 0x297   : > { %v1841_v44 = vadd.f32 %v2635_v57, %v1801_v21 }
 0x2ad   : > { %v2655_v45 = vpop.f32.mrb[28].mxu1 }
 0x2ae   : > { %v2656_v47 = vpop.f32.mrb[29].mxu1 }
 0x2af   : > { %v2657_v50 = vadd.f32 %v2656_v47, %v2655_v45  ;;  %v2658_v51 = vpop.f32.mrb[30].mxu1 }
 0x2b0   : > { %v2659_v54 = vpop.f32.mrb[31].mxu1 }
 0x2b1   : > { %v1881_v55 = vadd.f32 %v2657_v50, %v1841_v44 }
 0x2b3   : > { %v1920_v58 = vpop.f32.mrb[32].mxu0 }
 0x2b4   : > { %v1921_v59 = vadd.f32 %v1920_v58, %v1881_v55  ;;  %v2865_v60 = vpop.f32.mrb[33].mxu0 }
 0x2b5   : > { %v1923_v61 = vpop.f32.mrb[34].mxu0 }
 0x2b6   : > { %v2160_v62 = vrot.slane %v1921_v59, 4  ;;  %v2866_v63 = vpop.f32.mrb[35].mxu0 }
 0x2b8   : > { %v2168_v2 = vsel %vm2167_vm4, %v2166_v46, %v2160_v62  ;;  %v540_v46 = vadd.f32 %v2265_v22, %v4080_v37 }
 0x2cd   : > { %v2686_v5 = vpop.f32.mrb[32].mxu1 }
 0x2ce   : > { %v2687_v6 = vpop.f32.mrb[33].mxu1 }
 0x2cf   : > { %v2688_v9 = vadd.f32 %v2687_v6, %v2686_v5  ;;  %v2689_v14 = vpop.f32.mrb[34].mxu1 }
 0x2d0   : > { %v2690_v16 = vpop.f32.mrb[35].mxu1 }
 0x2d3   : > { %v2708_v13 = vpop.f32.mrb[36].mxu0 }
 0x2d4   : > { %v2709_v29 = vpop.f32.mrb[37].mxu0 }
 0x2d5   : > { %v2710_v33 = vadd.f32 %v2709_v29, %v2708_v13  ;;  %v2711_v3 = vpop.f32.mrb[38].mxu0 }
 0x2d6   : > { %v2712_v4 = vpop.f32.mrb[39].mxu0 }
 0x2d7   : > { %v2031_v7 = vadd.f32 %v2710_v33, %v2688_v9 }
 0x2ed   : > { %v2730_v25 = vpop.f32.mrb[36].mxu1 }
 0x2ee   : > { %v2731_v11 = vpop.f32.mrb[37].mxu1 }
 0x2ef   : > { %v2732_v1 = vadd.f32 %v2731_v11, %v2730_v25  ;;  %v2733_v12 = vpop.f32.mrb[38].mxu1 }
 0x2f0   : > { %v2734_v20 = vpop.f32.mrb[39].mxu1 }
 0x2f1   : > { %v2071_v17 = vadd.f32 %v2732_v1, %v2031_v7 }
 0x2f3   : > { %v2752_v10 = vpop.f32.mrb[40].mxu0 }
 0x2f4   : > { %v2753_v36 = vpop.f32.mrb[41].mxu0 }
 0x2f5   : > { %v2754_v32 = vadd.f32 %v2753_v36, %v2752_v10  ;;  %v2755_v8 = vpop.f32.mrb[42].mxu0 }
 0x2f6   : > { %v2756_v26 = vpop.f32.mrb[43].mxu0 }
 0x2f7   : > { %v2111_v31 = vadd.f32 %v2754_v32, %v2071_v17 }
 0x30d   : > { %v2150_v39 = vpop.f32.mrb[40].mxu1 }
 0x30e   : > { %v2151_v28 = vadd.f32 %v2150_v39, %v2111_v31  ;;  %v2885_v30 = vpop.f32.mrb[41].mxu1 }
 0x30f   : > { %v2153_v23 = vpop.f32.mrb[42].mxu1 }
 0x310   : > { %v2163_v27 = vrot.slane %v2151_v28, 2  ;;  %v2886_v24 = vpop.f32.mrb[43].mxu1 }
 0x312   : > { %v2170_v35 = vsel %vm2169_vm5, %v2168_v2, %v2163_v27 }
 0x313   : > { %v2178_v18 = vadd.f32 %v2358_v34, %v2170_v35 }
 0x315   : > { %v2179_v49 = vadd.f32 %v2178_v18, %v540_v46 }
 0x317   : > { %v2180_v52 = vmax.f32 %v2179_v49, 0.0 }
 0x319   : > { %v2181_v38 = vpack.c.bf16 %v2180_v52, %v2180_v52 }
 0x31b   : > { %2182 = vst [vmem:[%s317_s29] sm:$0xf] %v2181_v38 }
 0x31c PF: > { %s18_s27 = sadd.s32 1, %s3008_s27  }
 0x31d   : > { %p15_p4 = scmp.ge.s32.totalorder %s18_s27, 4  }
 0x31f   :  { %17 = sbr.rel (!%p15_p4) target bundleno = 1 (0x1), region = 90 }

// kernel: _lambda_.10
= control target key start
LH: loop header
LB: loop body
LE: loop exit
PB: predicated region body
PF: predicated region fallthrough
CT: control target
= control target key end

     0   :  { %s3111_s27 = smov 0   ;;  %s4053_s0 = inlined_call_operand.vmem [shape: bf16[2,4,256], index: 0, kind: input, shape index: {}]   ;;  %s4054_s1 = inlined_call_operand.vmem [shape: bf16[2,4,128], index: 1, kind: input, shape index: {}]   ;;  %s4055_s2 = inlined_call_operand.vmem [shape: bf16[256,128], index: 2, kind: input, shape index: {}]   ;;  %s4056_s3 = inlined_call_operand.vmem [shape: f32[1,128], index: 3, kind: input, shape index: {}]   ;;  %s4057_s4 = inlined_call_operand.vmem [shape: bf16[1152,128], index: 4, kind: input, shape index: {}]   ;;  %s4058_s5 = inlined_call_operand.vmem [shape: f32[1,128], index: 5, kind: input, shape index: {}]   ;;  %s4059_s6 = inlined_call_operand.vmem [shape: bf16[128,128], index: 6, kind: input, shape index: {}]   ;;  %s4060_s7 = inlined_call_operand.vmem [shape: f32[1,128], index: 7, kind: input, shape index: {}]   ;;  %s4061_s8 = inlined_call_operand.vmem [shape: bf16[2,4,128], index: 8, kind: output, shape index: {}]  }
   0x1 LB: > { %s2294_s28 = sadd.s32 4294967295, %s3061_s27   ;;  %p2298_p0 = scmp.ge.s32.totalorder %s3061_s27, 1  ;;  %s3061_s27 = sphi %s3111_s27, %s18_s27  }
   0x2   : > { %p271_p1 = scmp.lt.s32.totalorder %s3061_s27, 3 }
   0x4   : > { %p272_p2 = pnand %p2298_p0, %p271_p1 }
   0x6   : > { %275 = sbr.rel (%p272_p2) target bundleno = 795 (0x31b), region = 52 }
   0xd   : > { %v2944_v0 = vld [vmem:[%s4055_s2 + $0x40] sm:$0xff]   ;;  %v2946_v2 = vld [vmem:[%s4055_s2 + $0x48] sm:$0xff]   ;;  %p308_p3 = scmp.lt.s32.totalorder %s2294_s28, 1  ;;  %v4063_v3 = vmov 0.0   ;;  %v2948_v5 = vld [vmem:[%s4055_s2 + $0x50] sm:$0xff]   ;;  %vm3064_vm0 = vmmov 0   ;;  %v648_v36 = vlaneseq }
   0xe   : > { %v2945_v1 = vld [vmem:[%s4055_s2] sm:$0xff]   ;;  %2414 = vmatprep.subr.bf16.mxu0 %v2944_v0  ;;  %2833 = vmatprep.subr.bf16.mxu1 %v4063_v3  ;;  %v2947_v4 = vld [vmem:[%s4055_s2 + $0x8] sm:$0xff]   ;;  %v2949_v6 = vld [vmem:[%s4055_s2 + $0x10] sm:$0xff]   ;;  %vm623_vm1 = vcmask 1041408   ;;  %vm624_vm2 = vsmask.f32 1280 }
   0xf   : > { %2415 = vmatpush3.bf16.msra.mxu0 %v2945_v1  ;;  %2849 = vmatprep.mubr.msk.bf16.mxu1 %vm3064_vm0, %v4063_v3  ;;  %s4200_s28 = smov (!%p308_p3, %s2294_s28), 1  ;;  %v2950_v7 = vld [vmem:[%s4055_s2 + $0x58] sm:$0xff]   ;;  %v2952_v9 = vld [vmem:[%s4055_s2 + $0x60] sm:$0xff]   ;;  %v2954_v11 = vld [vmem:[%s4055_s2 + $0x68] sm:$0xff]   ;;  %v4125_v38 = vmov 0  ;;  %v649_v46 = vshrl.u32 %v648_v36, 7 }
  0x10   : > { %2416 = vmatprep.subr.bf16.mxu0 %v2946_v2  ;;  %s2413_s21 = sshll.u32 %s4200_s28, 2  ;;  %v2951_v8 = vld [vmem:[%s4055_s2 + $0x18] sm:$0xff]   ;;  %v2953_v10 = vld [vmem:[%s4055_s2 + $0x20] sm:$0xff]   ;;  %v2955_v15 = vld [vmem:[%s4055_s2 + $0x28] sm:$0xff]   ;;  %s2301_s11 = sshll.u32 %s4200_s28, 1  ;;  %vm657_vm4 = vcmask 1040384  }
  0x11   : > { %s312_s30 = scalar_lea.vmem %s4053_s0, %s2413_s21  ;;  %v2960_v14 = vld [vmem:[%s4059_s6] sm:$0xff]   ;;  %v2956_v16 = vld [vmem:[%s4055_s2 + $0x70] sm:$0xff]   ;;  %v2961_v17 = vld [vmem:[%s4059_s6 + $0x8] sm:$0xff]   ;;  %s316_s20 = scalar_lea.vmem %s4054_s1, %s2301_s11  ;;  %v3065_v39 = vmov 1983009808   ;;  %vm2215_vm7 = vcmask 1042432  }
  0x12   : > { %v2304_v12 = vld.sshfl [vmem:[%s312_s30] sm:$0x33 pattern:$0x76325410]  ;;  %2834 = vmatpush3.bf16.msra.mxu1 %v2960_v14  ;;  %v2957_v18 = vld [vmem:[%s4055_s2 + $0x30] sm:$0xff]   ;;  %v2958_v19 = vld [vmem:[%s4055_s2 + $0x78] sm:$0xff]   ;;  %v646_v40 = vunpack.c.l.s4 %v3065_v39  ;;  %s320_s14 = scalar_lea.vmem %s4061_s8, %s2301_s11 }
  0x13   : > { %2417 = vmatpush3.bf16.msra.mxu0 %v2947_v4  ;;  %v370_v13 = vcombine.high %v2304_v12, %v2304_v12  ;;  %2835 = vmatprep.subr.bf16.mxu1 %v4063_v3  ;;  %v2964_v20 = vld [vmem:[%s4059_s6 + $0x10] sm:$0xff]   ;;  %v2959_v21 = vld [vmem:[%s4055_s2 + $0x38] sm:$0xff]   ;;  %v3190_v22 = vld [vmem:[%s4057_s4 + $0x40] sm:$0xff]   ;;  %vm658_vm5 = vsmask.f32 7938 }
  0x14   : > { %2418 = vmatprep.subr.bf16.mxu0 %v2948_v5  ;;  %v2967_v23 = vld [vmem:[%s4059_s6 + $0x18] sm:$0xff]   ;;  %v3199_v24 = vld [vmem:[%s4057_s4] sm:$0xff]   ;;  %v3204_v25 = vld [vmem:[%s4057_s4 + $0x48] sm:$0xff]   ;;  %v647_v45 = vunpack.c.0.s8 %v646_v40 }
  0x15   : > { %501 = vmatprep.mubr.bf16.mxu0 %v370_v13  ;;  %v2970_v26 = vld [vmem:[%s4059_s6 + $0x20] sm:$0xff]   ;;  %v3214_v27 = vld [vmem:[%s4057_s4 + $0x8] sm:$0xff]   ;;  %v3220_v28 = vld [vmem:[%s4057_s4 + $0x50] sm:$0xff]  }
  0x16   : > { %2836 = vmatpush3.bf16.msra.mxu1 %v2961_v17  ;;  %v2973_v29 = vld [vmem:[%s4059_s6 + $0x28] sm:$0xff]   ;;  %v3230_v30 = vld [vmem:[%s4057_s4 + $0x10] sm:$0xff]   ;;  %v3236_v31 = vld [vmem:[%s4057_s4 + $0x58] sm:$0xff]   ;;  %v3310_v52 = vsub.s32 %v647_v45, %v649_v46 }
  0x17   : > { %2419 = vmatpush3.bf16.msra.mxu0 %v2949_v6  ;;  %2837 = vmatprep.subr.bf16.mxu1 %v4063_v3  ;;  %v2976_v32 = vld [vmem:[%s4059_s6 + $0x30] sm:$0xff]   ;;  %v3246_v33 = vld [vmem:[%s4057_s4 + $0x18] sm:$0xff]   ;;  %v3252_v34 = vld [vmem:[%s4057_s4 + $0x60] sm:$0xff]  }
  0x18   : > { %2420 = vmatprep.subr.bf16.mxu0 %v2950_v7  ;;  %v2979_v35 = vld [vmem:[%s4059_s6 + $0x38] sm:$0xff]   ;;  %v626_v37 = vld [vmem:[#allocation2] sm:$0x3]  ;;  %vm3265_vm3 = vmand %vm623_vm1, %vm624_vm2 }
  0x19   : > { %v4126_v38 = vsel %vm3265_vm3, 4294967295, %v4125_v38  ;;  %v3272_v41 = vld [vmem:[%s4057_s4 + $0x20] sm:$0xff]   ;;  %v627_v43 = vsel %vm3265_vm3, 0, %v626_v37  ;;  %v3285_v44 = vld [vmem:[%s4057_s4 + $0x68] sm:$0xff]   ;;  %v3308_v51 = vld [vmem:[%s4057_s4 + $0x70] sm:$0xff]  }
  0x1a   : > { %2838 = vmatpush3.bf16.msra.mxu1 %v2964_v20  ;;  %4127 = vst [vmem:[#allocation3_spill] sm:$0xff] %v4126_v38  ;;  %v3278_v42 = vld [vmem:[%s4057_s4 + $0xc0] sm:$0xff]   ;;  %628 = vst [vmem:[#allocation2] sm:$0x3] %v627_v43  ;;  %v3297_v49 = vld [vmem:[%s4057_s4 + $0x28] sm:$0xff]  }
  0x1b   : > { %2421 = vmatpush3.bf16.msra.mxu0 %v2951_v8  ;;  %2839 = vmatprep.subr.bf16.mxu1 %v4063_v3  ;;  %v511_v47 = vld [vmem:[%s316_s20] sm:$0x3]  ;;  %v3303_v50 = vld [vmem:[%s4057_s4 + $0xc8] sm:$0xff]   ;;  %v3321_v54 = vld [vmem:[%s4057_s4 + $0xd0] sm:$0xff]  }
  0x1c   : > { %2422 = vmatprep.subr.bf16.mxu0 %v2952_v9  ;;  %v3292_v48 = vld [vmem:[%s4057_s4 + $0x80] sm:$0xff]   ;;  %v3315_v53 = vld [vmem:[%s4057_s4 + $0x88] sm:$0xff]   ;;  %4129 = vst [vmem:[#allocation5_spill] sm:$0xff] %v3321_v54  ;;  %v3328_v55 = vld [vmem:[%s4057_s4 + $0x30] sm:$0xff]  }
  0x1d   : > { %4128 = vst [vmem:[#allocation4_spill] sm:$0xff] %v3315_v53  ;;  %v3337_v58 = vld [vmem:[%s4057_s4 + $0x78] sm:$0xff]   ;;  %v3349_v61 = vld [vmem:[%s4057_s4 + $0x140] sm:$0xff]   ;;  %v3361_v63 = vld [vmem:[%s4057_s4 + $0x148] sm:$0xff]  }
  0x1e   : > { %2840 = vmatpush3.bf16.msra.mxu1 %v2967_v23  ;;  %v3343_v60 = vld [vmem:[%s4057_s4 + $0x38] sm:$0xff]   ;;  %v3356_v62 = vld [vmem:[%s4057_s4 + $0x100] sm:$0xff]   ;;  %v3368_v0 = vld [vmem:[%s4057_s4 + $0x108] sm:$0xff]  }
  0x1f   : > { %2423 = vmatpush3.bf16.msra.mxu0 %v2953_v10  ;;  %2841 = vmatprep.subr.bf16.mxu1 %v4063_v3  ;;  %v3376_v1 = vld [vmem:[%s4057_s4 + $0x90] sm:$0xff]   ;;  %v632_v2 = vld [vmem:[#allocation2 + $0x4] sm:$0x3]  ;;  %v3389_v6 = vld [vmem:[%s4057_s4 + $0xd8] sm:$0xff]  }
  0x20   : > { %2424 = vmatprep.subr.bf16.mxu0 %v2954_v11  ;;  %v3382_v4 = vld [vmem:[%s4057_s4 + $0x150] sm:$0xff]   ;;  %v633_v5 = vsel %vm3265_vm3, 0, %v632_v2  ;;  %v3400_v8 = vld [vmem:[%s4057_s4 + $0x98] sm:$0xff]   ;;  %v629_v9 = vld [vmem:[#allocation2 + $0x2] sm:$0x3] }
  0x21   : > { %v681_v56 = vld [vmem:[#allocation2] sm:$0x1]  ;;  %v3394_v7 = vld [vmem:[%s4057_s4 + $0x110] sm:$0xff]   ;;  %634 = vst [vmem:[#allocation2 + $0x4] sm:$0x3] %v633_v5  ;;  %v3408_v11 = vld [vmem:[%s4057_s4 + $0x158] sm:$0xff]  }
  0x22   : > { %2842 = vmatpush3.bf16.msra.mxu1 %v2970_v26  ;;  %v694_v57 = vrot.slane %v681_v56, %v3310_v52  ;;  %v638_v10 = vld [vmem:[#allocation2 + $0x8] sm:$0x3]  ;;  %v3417_v14 = vld [vmem:[%s4057_s4 + $0xe0] sm:$0xff]   ;;  %v3486_v36 = vld [vmem:[%s4057_s4 + $0x170] sm:$0xff]  }
  0x23   : > { %2425 = vmatpush3.bf16.msra.mxu0 %v2955_v15  ;;  %2843 = vmatprep.subr.bf16.mxu1 %v4063_v3  ;;  %v639_v13 = vsel %vm3265_vm3, 0, %v638_v10  ;;  %v3422_v15 = vld [vmem:[%s4057_s4 + $0x118] sm:$0xff]   ;;  %v3428_v17 = vld [vmem:[%s4057_s4 + $0xa0] sm:$0xff]   ;;  %v3443_v20 = vld [vmem:[%s4057_s4 + $0xe8] sm:$0xff]   ;;  %4131 = vst [vmem:[#allocation7_spill] sm:$0xff] %v3486_v36 }
  0x24   : > { %2426 = vmatprep.subr.bf16.mxu0 %v2956_v16  ;;  %v696_v59 = vshrl.u32 %v694_v57, 16  ;;  %v635_v16 = vld [vmem:[#allocation2 + $0x6] sm:$0x3]  ;;  %640 = vst [vmem:[#allocation2 + $0x8] sm:$0x3] %v639_v13  ;;  %v3454_v23 = vld [vmem:[%s4057_s4 + $0xa8] sm:$0xff]   ;;  %vm3535_vm6 = vmand %vm657_vm4, %vm658_vm5 }
  0x25   : > { %v3462_v26 = vld [vmem:[%s4057_s4 + $0x168] sm:$0xff]   ;;  %v3491_v37 = vld [vmem:[%s4057_s4 + $0xf8] sm:$0xff]   ;;  %v3496_v39 = vld [vmem:[%s4057_s4 + $0x130] sm:$0xff]  }
  0x26   : > { %2844 = vmatpush3.bf16.msra.mxu1 %v2973_v29  ;;  %v3467_v29 = vld [vmem:[%s4057_s4 + $0xf0] sm:$0xff]   ;;  %4132 = vst [vmem:[#allocation8_spill] sm:$0xff] %v3496_v39  ;;  %v3501_v40 = vld [vmem:[%s4057_s4 + $0xb8] sm:$0xff]   ;;  %v3521_v46 = vld [vmem:[%s4057_s4 + $0x1c0] sm:$0xff]  }
  0x27   : > { %2427 = vmatpush3.bf16.msra.mxu0 %v2957_v18  ;;  %2845 = vmatprep.subr.bf16.mxu1 %v4063_v3  ;;  %v636_v18 = vsel %vm3265_vm3, 0, %v635_v16  ;;  %v3507_v43 = vld [vmem:[%s4057_s4 + $0x178] sm:$0xff]   ;;  %v3562_v16 = vld [vmem:[%s4057_s4 + $0x1c8] sm:$0xff]  }
  0x28   : > { %2428 = vmatprep.subr.bf16.mxu0 %v2958_v19  ;;  %637 = vst [vmem:[#allocation2 + $0x6] sm:$0x3] %v636_v18  ;;  %v3438_v19 = vld [vmem:[%s4057_s4 + $0x160] sm:$0xff]   ;;  %4133 = vst [vmem:[#allocation9_spill] sm:$0xff] %v3507_v43  ;;  %v3516_v45 = vld [vmem:[%s4057_s4 + $0x138] sm:$0xff]  }
  0x29   : > { %4134 = vst [vmem:[#allocation10_spill] sm:$0xff] %v3516_v45  ;;  %v664_v18 = vld [vmem:[#allocation2 + $0x4] sm:$0x1] }
  0x2a   : > { %2846 = vmatpush3.bf16.msra.mxu1 %v2976_v32  ;;  %v3473_v32 = vld [vmem:[%s4057_s4 + $0x128] sm:$0xff]  }
  0x2b   : > { %2429 = vmatpush3.bf16.msra.mxu0 %v2959_v21  ;;  %2847 = vmatprep.subr.bf16.mxu1 %v4063_v3  ;;  %v3449_v21 = vld [vmem:[%s4057_s4 + $0x120] sm:$0xff]   ;;  %4130 = vst [vmem:[#allocation6_spill] sm:$0xff] %v3473_v32 }
  0x2c   : > { %2445 = vmatprep.subr.bf16.mxu0 %v3190_v22 }
  0x2e   : > { %502 = vmatmul.mubr.bf16.vlgmr.msra.gmra.mrb[0].mxu0 %v2304_v12  ;;  %2848 = vmatpush3.bf16.msra.mxu1 %v2979_v35  ;;  %v630_v12 = vsel %vm3265_vm3, 0, %v629_v9  ;;  %v3478_v35 = vld [vmem:[%s4057_s4 + $0xb0] sm:$0xff]  }
  0x2f   : > { %2446 = vmatpush3.bf16.msra.mxu0 %v3199_v24  ;;  %2467 = vmatprep.subr.bf16.mxu1 %v3278_v42  ;;  %631 = vst [vmem:[#allocation2 + $0x2] sm:$0x3] %v630_v12 }
  0x30   : > { %2447 = vmatprep.subr.bf16.mxu0 %v3204_v25  ;;  %1361 = vmatprep.mubr.bf16.mxu0 %v696_v59  ;;  %v2303_v59 = vld [vmem:[%s4056_s3] ss:$0 sm:$0xff] }
  0x31   : > { %2850 = vmatmul.mubr.bf16.vlgmr.msra.gmra.mrb[0].mxu1 %v511_v47 }
  0x32   : > { %2468 = vmatpush3.bf16.msra.mxu1 %v3292_v48 }
  0x33   : > { %2448 = vmatpush3.bf16.msra.mxu0 %v3214_v27  ;;  %2469 = vmatprep.subr.bf16.mxu1 %v3303_v50 }
  0x34   : > { %2449 = vmatprep.subr.bf16.mxu0 %v3220_v28 }
  0x36   : > { %2470 = vmatpush3.bf16.msra.mxu1 %v3315_v53  ;;  %v3525_v47 = vld.sshfl [vmem:[#allocation2 + $0x2] sm:$0x2 pattern:$0x76325410] }
  0x37   : > { %2450 = vmatpush3.bf16.msra.mxu0 %v3230_v30  ;;  %2471 = vmatprep.subr.bf16.mxu1 %v3321_v54 }
  0x38   : > { %2451 = vmatprep.subr.bf16.mxu0 %v3236_v31 }
  0x3a   : > { %2472 = vmatpush3.bf16.msra.mxu1 %v3376_v1 }
  0x3b   : > { %2452 = vmatpush3.bf16.msra.mxu0 %v3246_v33  ;;  %2473 = vmatprep.subr.bf16.mxu1 %v3389_v6 }
  0x3c   : > { %2453 = vmatprep.subr.bf16.mxu0 %v3252_v34 }
  0x3e   : > { %2474 = vmatpush3.bf16.msra.mxu1 %v3400_v8 }
  0x3f   : > { %2454 = vmatpush3.bf16.msra.mxu0 %v3272_v41  ;;  %2475 = vmatprep.subr.bf16.mxu1 %v3417_v14 }
  0x40   : > { %2455 = vmatprep.subr.bf16.mxu0 %v3285_v44 }
  0x42   : > { %2476 = vmatpush3.bf16.msra.mxu1 %v3428_v17 }
  0x43   : > { %2456 = vmatpush3.bf16.msra.mxu0 %v3297_v49  ;;  %2477 = vmatprep.subr.bf16.mxu1 %v3443_v20 }
  0x44   : > { %2457 = vmatprep.subr.bf16.mxu0 %v3308_v51 }
  0x46   : > { %2478 = vmatpush3.bf16.msra.mxu1 %v3454_v23 }
  0x47   : > { %2458 = vmatpush3.bf16.msra.mxu0 %v3328_v55  ;;  %2479 = vmatprep.subr.bf16.mxu1 %v3467_v29 }
  0x48   : > { %2459 = vmatprep.subr.bf16.mxu0 %v3337_v58 }
  0x4a   : > { %2480 = vmatpush3.bf16.msra.mxu1 %v3478_v35 }
  0x4b   : > { %2460 = vmatpush3.bf16.msra.mxu0 %v3343_v60  ;;  %2481 = vmatprep.subr.bf16.mxu1 %v3491_v37 }
  0x4c   : > { %2489 = vmatprep.subr.bf16.mxu0 %v3349_v61 }
  0x4e   : > { %1362 = vmatmul.mubr.bf16.vlgmr.msra.gmra.mrb[4].mxu0 %v681_v56  ;;  %2482 = vmatpush3.bf16.msra.mxu1 %v3501_v40  ;;  %v4062_v56 = vrot.slane %v3525_v47, 1 }
  0x4f   : > { %2490 = vmatpush3.bf16.msra.mxu0 %v3356_v62  ;;  %2511 = vmatprep.subr.bf16.mxu1 %v3521_v46 }
  0x50   : > { %2491 = vmatprep.subr.bf16.mxu0 %v3361_v63  ;;  %1441 = vmatprep.mubr.bf16.mxu0 %v4062_v56 }
  0x53   : > { %2492 = vmatpush3.bf16.msra.mxu0 %v3368_v0 }
  0x54   : > { %2493 = vmatprep.subr.bf16.mxu0 %v3382_v4 }
  0x57   : > { %2494 = vmatpush3.bf16.msra.mxu0 %v3394_v7 }
  0x58   : > { %2495 = vmatprep.subr.bf16.mxu0 %v3408_v11 }
  0x5b   : > { %2496 = vmatpush3.bf16.msra.mxu0 %v3422_v15 }
  0x5c   : > { %2497 = vmatprep.subr.bf16.mxu0 %v3438_v19 }
  0x5f   : > { %2498 = vmatpush3.bf16.msra.mxu0 %v3449_v21 }
  0x60   : > { %2499 = vmatprep.subr.bf16.mxu0 %v3462_v26 }
  0x63   : > { %2500 = vmatpush3.bf16.msra.mxu0 %v3473_v32  ;;  %v3669_v32 = vld [vmem:[%s4057_s4 + $0x228] sm:$0xff]  }
  0x64   : > { %2501 = vmatprep.subr.bf16.mxu0 %v3486_v36  ;;  %v3657_v36 = vld [vmem:[%s4057_s4 + $0x1a8] sm:$0xff]   ;;  %4153 = vst [vmem:[#allocation26_spill] sm:$0xff] %v3669_v32 }
  0x65   : > { %4151 = vst [vmem:[#allocation24_spill] sm:$0xff] %v3657_v36 }
  0x67   : > { %2502 = vmatpush3.bf16.msra.mxu0 %v3496_v39  ;;  %v3650_v39 = vld [vmem:[%s4057_s4 + $0x220] sm:$0xff]  }
  0x68   : > { %2503 = vmatprep.subr.bf16.mxu0 %v3507_v43  ;;  %v3638_v43 = vld [vmem:[%s4057_s4 + $0x1a0] sm:$0xff]   ;;  %4150 = vst [vmem:[#allocation23_spill] sm:$0xff] %v3650_v39 }
  0x69   : > { %4148 = vst [vmem:[#allocation21_spill] sm:$0xff] %v3638_v43 }
  0x6b   : > { %2504 = vmatpush3.bf16.msra.mxu0 %v3516_v45  ;;  %v660_v45 = vld [vmem:[#allocation2 + $0x2] sm:$0x1] }
  0x6c   : > { %2853 = vmatprep.subr.bf16.mxu0 %v4063_v3 }
 0x101   : > { %v2430_v57 = vpop.f32.mrb[0].mxu0 }
 0x102   : > { %v2431_v2 = vpop.f32.mrb[1].mxu0 }
 0x103   : > { %v2432_v5 = vadd.f32 %v2431_v2, %v2430_v57  ;;  %v2433_v9 = vpop.f32.mrb[2].mxu0  ;;  %v678_v57 = vld [vmem:[#allocation2 + $0x8] sm:$0x1] }
 0x104   : > { %v2434_v10 = vpop.f32.mrb[3].mxu0 }
 0x105   : > { %v504_v12 = vadd.f32 %v2432_v5, %v2303_v59  ;;  %v671_v5 = vld [vmem:[#allocation2 + $0x6] sm:$0x1] }
 0x107   : > { %v509_v13 = vmax.f32 %v504_v12, 0.0 }
 0x109   : > { %v510_v56 = vpack.c.bf16 %v509_v13, %v509_v13 }
 0x10b   : > { %v651_v3 = vrot.slane %v510_v56, %v3310_v52  ;;  %v665_v38 = vsel %vm3535_vm6, %v510_v56, %v664_v18  ;;  %v2332_v56 = vld.sshfl [vmem:[#allocation2] sm:$0x2 pattern:$0x76325410] }
 0x10c   : > { %666 = vst [vmem:[#allocation2 + $0x4] sm:$0x1] %v665_v38  ;;  %v707_v38 = vrot.slane %v2332_v56, 1  ;;  %v4142_v56 = vmov 0.0  }
 0x10d   : > { %v653_v2 = vshll.u32 %v651_v3, 16  ;;  %v2331_v59 = vrot.slane %v651_v3, 9 }
 0x10f   : > { %v661_v9 = vsel %vm3535_vm6, %v653_v2, %v660_v45  ;;  %v2330_v10 = vrot.slane %v653_v2, 9  ;;  %v679_v12 = vsel %vm3535_vm6, %v2331_v59, %v678_v57  ;;  %v3555_v45 = vld [vmem:[%s4057_s4 + $0x180] sm:$0xff]  }
 0x110   : > { %662 = vst [vmem:[#allocation2 + $0x2] sm:$0x1] %v661_v9  ;;  %680 = vst [vmem:[#allocation2 + $0x8] sm:$0x1] %v679_v12  ;;  %v3585_v12 = vld [vmem:[%s4057_s4 + $0x1d0] sm:$0xff]  }
 0x111   : > { %v672_v13 = vsel %vm3535_vm6, %v2330_v10, %v671_v5  ;;  %v3572_v5 = vld [vmem:[%s4057_s4 + $0x200] sm:$0xff]   ;;  %v3579_v10 = vld [vmem:[%s4057_s4 + $0x188] sm:$0xff]   ;;  %4140 = vst [vmem:[#allocation14_spill] sm:$0xff] %v3585_v12 }
 0x112   : > { %673 = vst [vmem:[#allocation2 + $0x6] sm:$0x1] %v672_v13  ;;  %4138 = vst [vmem:[#allocation12_spill] sm:$0xff] %v3572_v5  ;;  %v3591_v13 = vld [vmem:[%s4057_s4 + $0x208] sm:$0xff]  }
 0x113   : > { %v3548_v18 = vld [vmem:[#allocation2 + $0x4] sm:$0x1]  ;;  %4139 = vst [vmem:[#allocation13_spill] sm:$0xff] %v3579_v10  ;;  %4141 = vst [vmem:[#allocation15_spill] sm:$0xff] %v3591_v13 }
 0x114   : > { %v738_v3 = vrot.slane %v3548_v18, %v3310_v52 }
 0x116   : > { %v3567_v59 = vshrl.u32 %v738_v3, 16  ;;  %v3600_v3 = vld [vmem:[%s4057_s4 + $0x190] sm:$0xff]  }
 0x117   : > { %v3557_v2 = vld [vmem:[#allocation2 + $0x2] sm:$0x1]  ;;  %4143 = vst [vmem:[#allocation16_spill] sm:$0xff] %v3600_v3 }
 0x118   : > { %v716_v57 = vrot.slane %v3557_v2, %v3310_v52  ;;  %1401 = vmatprep.mubr.bf16.mxu1 %v3557_v2  ;;  %4137 = vst [vmem:[#allocation11_spill] sm:$0xff] %v3567_v59 }
 0x119   : > { %1402 = vmatmul.mubr.bf16.vlgmr.msra.gmra.mrb[4].mxu1 %v707_v38  ;;  %v3606_v38 = vld [vmem:[%s4057_s4 + $0x1d8] sm:$0xff]  }
 0x11a   : > { %v718_v9 = vshrl.u32 %v716_v57, 16  ;;  %2512 = vmatpush3.bf16.msra.mxu1 %v3555_v45  ;;  %1481 = vmatprep.mubr.bf16.mxu1 %v3567_v59  ;;  %v3612_v57 = vld [vmem:[%s4057_s4 + $0x210] sm:$0xff]   ;;  %v3631_v59 = vld [vmem:[%s4057_s4 + $0x218] sm:$0xff]  }
 0x11b   : > { %2513 = vmatprep.subr.bf16.mxu1 %v3562_v16  ;;  %4144 = vst [vmem:[#allocation17_spill] sm:$0xff] %v3612_v57  ;;  %4147 = vst [vmem:[#allocation20_spill] sm:$0xff] %v3631_v59 }
 0x11c   : > { %1442 = vmatmul.mubr.bf16.vlgmr.msra.gmra.mrb[8].mxu0 %v718_v9 }
 0x11d   : > { %2854 = vmatpush3.bf16.msra.mxu0 %v3572_v5  ;;  %2869 = vmatprep.mubr.msk.bf16.mxu0 %vm3064_vm0, %v4142_v56  ;;  %v3619_v5 = vld [vmem:[%s4057_s4 + $0x198] sm:$0xff]  }
 0x11e   : > { %2514 = vmatpush3.bf16.msra.mxu1 %v3579_v10  ;;  %2855 = vmatprep.subr.bf16.mxu0 %v4142_v56  ;;  %4145 = vst [vmem:[#allocation18_spill] sm:$0xff] %v3619_v5 }
 0x11f   : > { %2515 = vmatprep.subr.bf16.mxu1 %v3585_v12 }
 0x121   : > { %2856 = vmatpush3.bf16.msra.mxu0 %v3591_v13  ;;  %v3625_v13 = vld [vmem:[%s4057_s4 + $0x1e0] sm:$0xff]  }
 0x122   : > { %2516 = vmatpush3.bf16.msra.mxu1 %v3600_v3  ;;  %2857 = vmatprep.subr.bf16.mxu0 %v4142_v56  ;;  %4146 = vst [vmem:[#allocation19_spill] sm:$0xff] %v3625_v13 }
 0x123   : > { %2517 = vmatprep.subr.bf16.mxu1 %v3606_v38 }
 0x125   : > { %2858 = vmatpush3.bf16.msra.mxu0 %v3612_v57  ;;  %v3644_v57 = vld [vmem:[%s4057_s4 + $0x1e8] sm:$0xff]  }
 0x126   : > { %2518 = vmatpush3.bf16.msra.mxu1 %v3619_v5  ;;  %2859 = vmatprep.subr.bf16.mxu0 %v4142_v56  ;;  %4149 = vst [vmem:[#allocation22_spill] sm:$0xff] %v3644_v57 }
 0x127   : > { %2519 = vmatprep.subr.bf16.mxu1 %v3625_v13 }
 0x129   : > { %2860 = vmatpush3.bf16.msra.mxu0 %v3631_v59  ;;  %v3663_v59 = vld [vmem:[%s4057_s4 + $0x1f0] sm:$0xff]  }
 0x12a   : > { %2520 = vmatpush3.bf16.msra.mxu1 %v3638_v43  ;;  %2861 = vmatprep.subr.bf16.mxu0 %v4142_v56  ;;  %4152 = vst [vmem:[#allocation25_spill] sm:$0xff] %v3663_v59  ;;  %v2334_v43 = vld.sshfl [vmem:[#allocation2 + $0x4] sm:$0x2 pattern:$0x76325410] }
 0x12b   : > { %2521 = vmatprep.subr.bf16.mxu1 %v3644_v57  ;;  %v3676_v57 = vld [vmem:[%s4057_s4 + $0x1b0] sm:$0xff]  }
 0x12c   : > { %4154 = vst [vmem:[#allocation27_spill] sm:$0xff] %v3676_v57 }
 0x12d   : > { %2862 = vmatpush3.bf16.msra.mxu0 %v3650_v39  ;;  %v3682_v39 = vld [vmem:[%s4057_s4 + $0x1f8] sm:$0xff]  }
 0x12e   : > { %2522 = vmatpush3.bf16.msra.mxu1 %v3657_v36  ;;  %2863 = vmatprep.subr.bf16.mxu0 %v4142_v56  ;;  %4155 = vst [vmem:[#allocation28_spill] sm:$0xff] %v3682_v39  ;;  %v3688_v36 = vld [vmem:[%s4057_s4 + $0x230] sm:$0xff]  }
 0x12f   : > { %2523 = vmatprep.subr.bf16.mxu1 %v3663_v59  ;;  %4156 = vst [vmem:[#allocation29_spill] sm:$0xff] %v3688_v36  ;;  %v3695_v59 = vld [vmem:[%s4057_s4 + $0x1b8] sm:$0xff]  }
 0x130   : > { %4157 = vst [vmem:[#allocation30_spill] sm:$0xff] %v3695_v59 }
 0x131   : > { %2864 = vmatpush3.bf16.msra.mxu0 %v3669_v32  ;;  %v3702_v32 = vld [vmem:[%s4057_s4 + $0x238] sm:$0xff]  }
 0x132   : > { %2524 = vmatpush3.bf16.msra.mxu1 %v3676_v57  ;;  %2865 = vmatprep.subr.bf16.mxu0 %v4142_v56  ;;  %v3707_v57 = vrot.slane %v2334_v43, 1  ;;  %v3729_v43 = vpop.f32.mrb[0].mxu1 }
 0x133   : > { %2525 = vmatprep.subr.bf16.mxu1 %v3682_v39  ;;  %4158 = vst [vmem:[#allocation31_spill] sm:$0xff] %v3729_v43  ;;  %v4160_v43 = vrot.slane %v3525_v47, 1 }
 0x135   : > { %2866 = vmatpush3.bf16.msra.mxu0 %v3688_v36 }
 0x136   : > { %2526 = vmatpush3.bf16.msra.mxu1 %v3695_v59  ;;  %2867 = vmatprep.subr.bf16.mxu0 %v4142_v56 }
 0x137   : > { %2542 = vmatprep.subr.bf16.mxu1 %v3190_v22 }
 0x139   : > { %1482 = vmatmul.mubr.bf16.vlgmr.msra.gmra.mrb[8].mxu1 %v3548_v18  ;;  %2868 = vmatpush3.bf16.msra.mxu0 %v3702_v32 }
 0x13a   : > { %2543 = vmatpush3.bf16.msra.mxu1 %v3199_v24  ;;  %1585 = vmatprep.mubr.bf16.mxu1 %v718_v9  ;;  %v2851_v9 = vpop.f32.mrb[1].mxu1 }
 0x13b   : > { %2564 = vmatprep.subr.bf16.mxu0 %v3278_v42  ;;  %2544 = vmatprep.subr.bf16.mxu1 %v3204_v25  ;;  %v3742_v9 = vld [vmem:[#allocation2 + $0x6] sm:$0x1] }
 0x13c   : > { %2870 = vmatmul.mubr.bf16.vlgmr.msra.gmra.mrb[12].mxu0 %v3707_v57 }
 0x13d   : > { %2565 = vmatpush3.bf16.msra.mxu0 %v3292_v48  ;;  %1625 = vmatprep.mubr.bf16.mxu0 %v3548_v18 }
 0x13e   : > { %2545 = vmatpush3.bf16.msra.mxu1 %v3214_v27  ;;  %2566 = vmatprep.subr.bf16.mxu0 %v3303_v50 }
 0x13f   : > { %2546 = vmatprep.subr.bf16.mxu1 %v3220_v28 }
 0x141   : > { %2567 = vmatpush3.bf16.msra.mxu0 %v3315_v53 }
 0x142   : > { %2547 = vmatpush3.bf16.msra.mxu1 %v3230_v30  ;;  %2568 = vmatprep.subr.bf16.mxu0 %v3321_v54  ;;  %v620_v54 = vpop.f32.mrb[2].mxu1 }
 0x143   : > { %2548 = vmatprep.subr.bf16.mxu1 %v3236_v31  ;;  %v2852_v53 = vpop.f32.mrb[3].mxu1 }
 0x144   : > { %v1538_v53 = vrot.slane %v3742_v9, %v3310_v52 }
 0x145   : > { %2569 = vmatpush3.bf16.msra.mxu0 %v3376_v1 }
 0x146   : > { %2549 = vmatpush3.bf16.msra.mxu1 %v3246_v33  ;;  %2570 = vmatprep.subr.bf16.mxu0 %v3389_v6  ;;  %v3755_v54 = vshrl.u32 %v1538_v53, 16 }
 0x147   : > { %2550 = vmatprep.subr.bf16.mxu1 %v3252_v34 }
 0x148   : > { %4159 = vst [vmem:[#allocation32_spill] sm:$0xff] %v3755_v54 }
 0x149   : > { %2571 = vmatpush3.bf16.msra.mxu0 %v3400_v8 }
 0x14a   : > { %2551 = vmatpush3.bf16.msra.mxu1 %v3272_v41  ;;  %2572 = vmatprep.subr.bf16.mxu0 %v3417_v14 }
 0x14b   : > { %2552 = vmatprep.subr.bf16.mxu1 %v3285_v44 }
 0x14d   : > { %2573 = vmatpush3.bf16.msra.mxu0 %v3428_v17 }
 0x14e   : > { %2553 = vmatpush3.bf16.msra.mxu1 %v3297_v49  ;;  %2574 = vmatprep.subr.bf16.mxu0 %v3443_v20 }
 0x14f   : > { %2554 = vmatprep.subr.bf16.mxu1 %v3308_v51 }
 0x151   : > { %2575 = vmatpush3.bf16.msra.mxu0 %v3454_v23 }
 0x152   : > { %2555 = vmatpush3.bf16.msra.mxu1 %v3328_v55  ;;  %2576 = vmatprep.subr.bf16.mxu0 %v3467_v29 }
 0x153   : > { %2556 = vmatprep.subr.bf16.mxu1 %v3337_v58 }
 0x155   : > { %2577 = vmatpush3.bf16.msra.mxu0 %v3478_v35 }
 0x156   : > { %2557 = vmatpush3.bf16.msra.mxu1 %v3343_v60  ;;  %2578 = vmatprep.subr.bf16.mxu0 %v3491_v37 }
 0x157   : > { %2586 = vmatprep.subr.bf16.mxu1 %v3349_v61 }
 0x159   : > { %1586 = vmatmul.mubr.bf16.vlgmr.msra.gmra.mrb[12].mxu1 %v3557_v2  ;;  %2579 = vmatpush3.bf16.msra.mxu0 %v3501_v40  ;;  %v2461_v2 = vpop.f32.mrb[4].mxu0 }
 0x15a   : > { %2587 = vmatpush3.bf16.msra.mxu1 %v3356_v62  ;;  %2608 = vmatprep.subr.bf16.mxu0 %v3521_v46  ;;  %v2462_v47 = vpop.f32.mrb[5].mxu0 }
 0x15b   : > { %2588 = vmatprep.subr.bf16.mxu1 %v3361_v63  ;;  %1665 = vmatprep.mubr.bf16.mxu1 %v3707_v57  ;;  %v2464_v53 = vpop.f32.mrb[6].mxu0 }
 0x15c   : > { %1626 = vmatmul.mubr.bf16.vlgmr.msra.gmra.mrb[16].mxu0 %v4160_v43  ;;  %v3772_v43 = vadd.f32 %v2462_v47, %v2461_v2  ;;  %v4165_v2 = vld [vmem:[#allocation7_spill] sm:$0xff]  ;;  %v4166_v47 = vld [vmem:[#allocation24_spill] sm:$0xff] }
 0x15d   : > { %2609 = vmatpush3.bf16.msra.mxu0 %v3555_v45  ;;  %1705 = vmatprep.mubr.bf16.mxu0 %v3755_v54  ;;  %v4164_v54 = vld [vmem:[#allocation22_spill] sm:$0xff]  ;;  %v4167_v53 = vld [vmem:[#allocation8_spill] sm:$0xff] }
 0x15e   : > { %2589 = vmatpush3.bf16.msra.mxu1 %v3368_v0  ;;  %2610 = vmatprep.subr.bf16.mxu0 %v3562_v16  ;;  %4161 = vst [vmem:[#allocation33_spill] sm:$0xff] %v3772_v43  ;;  %v4169_v43 = vld [vmem:[#allocation9_spill] sm:$0xff] }
 0x15f   : > { %2590 = vmatprep.subr.bf16.mxu1 %v3382_v4 }
 0x161   : > { %2611 = vmatpush3.bf16.msra.mxu0 %v3579_v10  ;;  %v2465_v10 = vpop.f32.mrb[7].mxu0 }
 0x162   : > { %2591 = vmatpush3.bf16.msra.mxu1 %v3394_v7  ;;  %2612 = vmatprep.subr.bf16.mxu0 %v3585_v12  ;;  %v4163_v12 = vld [vmem:[#allocation6_spill] sm:$0xff]  ;;  %v4168_v10 = vld [vmem:[#allocation25_spill] sm:$0xff] }
 0x163   : > { %2592 = vmatprep.subr.bf16.mxu1 %v3408_v11 }
 0x165   : > { %2613 = vmatpush3.bf16.msra.mxu0 %v3600_v3  ;;  %v4162_v3 = vld [vmem:[#allocation21_spill] sm:$0xff] }
 0x166   : > { %2593 = vmatpush3.bf16.msra.mxu1 %v3422_v15  ;;  %2614 = vmatprep.subr.bf16.mxu0 %v3606_v38 }
 0x167   : > { %2594 = vmatprep.subr.bf16.mxu1 %v3438_v19 }
 0x169   : > { %2615 = vmatpush3.bf16.msra.mxu0 %v3619_v5  ;;  %v4170_v5 = vld [vmem:[#allocation27_spill] sm:$0xff] }
 0x16a   : > { %2595 = vmatpush3.bf16.msra.mxu1 %v3449_v21  ;;  %2616 = vmatprep.subr.bf16.mxu0 %v3625_v13  ;;  %v4171_v13 = vld [vmem:[#allocation10_spill] sm:$0xff] }
 0x16b   : > { %2596 = vmatprep.subr.bf16.mxu1 %v3462_v26 }
 0x16d   : > { %2617 = vmatpush3.bf16.msra.mxu0 %v4162_v3  ;;  %v4172_v3 = vld [vmem:[#allocation11_spill] sm:$0xff] }
 0x16e   : > { %2597 = vmatpush3.bf16.msra.mxu1 %v4163_v12  ;;  %2618 = vmatprep.subr.bf16.mxu0 %v4164_v54  ;;  %v4173_v54 = vld [vmem:[#allocation12_spill] sm:$0xff] }
 0x16f   : > { %2598 = vmatprep.subr.bf16.mxu1 %v4165_v2 }
 0x171   : > { %2619 = vmatpush3.bf16.msra.mxu0 %v4166_v47 }
 0x172   : > { %2599 = vmatpush3.bf16.msra.mxu1 %v4167_v53  ;;  %2620 = vmatprep.subr.bf16.mxu0 %v4168_v10 }
 0x173   : > { %2600 = vmatprep.subr.bf16.mxu1 %v4169_v43 }
 0x175   : > { %2621 = vmatpush3.bf16.msra.mxu0 %v4170_v5 }
 0x176   : > { %2601 = vmatpush3.bf16.msra.mxu1 %v4171_v13  ;;  %2622 = vmatprep.subr.bf16.mxu0 %v3682_v39  ;;  %v4174_v39 = vld [vmem:[#allocation15_spill] sm:$0xff] }
 0x177   : > { %2873 = vmatprep.subr.bf16.mxu1 %v4142_v56 }
 0x179   : > { %1666 = vmatmul.mubr.bf16.vlgmr.msra.gmra.mrb[16].mxu1 %v4172_v3  ;;  %2623 = vmatpush3.bf16.msra.mxu0 %v3695_v59  ;;  %v4176_v59 = vld [vmem:[#allocation20_spill] sm:$0xff] }
 0x17a   : > { %2874 = vmatpush3.bf16.msra.mxu1 %v4173_v54  ;;  %2639 = vmatprep.subr.bf16.mxu0 %v3190_v22  ;;  %v4175_v22 = vld [vmem:[#allocation17_spill] sm:$0xff] }
 0x17b   : > { %2875 = vmatprep.subr.bf16.mxu1 %v4142_v56  ;;  %2889 = vmatprep.mubr.msk.bf16.mxu1 %vm3064_vm0, %v4142_v56 }
 0x17c   : > { %1706 = vmatmul.mubr.bf16.vlgmr.msra.gmra.mrb[20].mxu0 %v3742_v9 }
 0x17d   : > { %2640 = vmatpush3.bf16.msra.mxu0 %v3199_v24  ;;  %1809 = vmatprep.mubr.bf16.mxu0 %v4172_v3  ;;  %v4177_v24 = vld [vmem:[#allocation23_spill] sm:$0xff]  ;;  %v4185_v3 = vld [vmem:[#allocation16_spill] sm:$0xff] }
 0x17e   : > { %2876 = vmatpush3.bf16.msra.mxu1 %v4174_v39  ;;  %2641 = vmatprep.subr.bf16.mxu0 %v3204_v25  ;;  %v641_v25 = vld [vmem:[#allocation2 + $0xa] sm:$0x3] }
 0x17f   : > { %2877 = vmatprep.subr.bf16.mxu1 %v4142_v56 }
 0x181   : > { %2642 = vmatpush3.bf16.msra.mxu0 %v3214_v27  ;;  %v4178_v27 = vld [vmem:[#allocation26_spill] sm:$0xff] }
 0x182   : > { %2878 = vmatpush3.bf16.msra.mxu1 %v4175_v22  ;;  %2643 = vmatprep.subr.bf16.mxu0 %v3220_v28  ;;  %v4188_v28 = vld [vmem:[#allocation21_spill] sm:$0xff] }
 0x183   : > { %2879 = vmatprep.subr.bf16.mxu1 %v4142_v56 }
 0x185   : > { %2644 = vmatpush3.bf16.msra.mxu0 %v3230_v30  ;;  %v642_v30 = vsel %vm3265_vm3, 0, %v641_v25  ;;  %v4187_v25 = vld [vmem:[#allocation19_spill] sm:$0xff] }
 0x186   : > { %2880 = vmatpush3.bf16.msra.mxu1 %v4176_v59  ;;  %2645 = vmatprep.subr.bf16.mxu0 %v3236_v31  ;;  %643 = vst [vmem:[#allocation2 + $0xa] sm:$0x3] %v642_v30  ;;  %v2407_v31 = vld.sshfl [vmem:[#allocation2 + $0x6] sm:$0x2 pattern:$0x76325410] }
 0x187   : > { %2881 = vmatprep.subr.bf16.mxu1 %v4142_v56  ;;  %v4189_v30 = vld [vmem:[#allocation22_spill] sm:$0xff] }
 0x189   : > { %2646 = vmatpush3.bf16.msra.mxu0 %v3246_v33  ;;  %v3827_v33 = vrot.slane %v2407_v31, 1  ;;  %v4190_v31 = vld [vmem:[#allocation28_spill] sm:$0xff] }
 0x18a   : > { %2882 = vmatpush3.bf16.msra.mxu1 %v4177_v24  ;;  %2647 = vmatprep.subr.bf16.mxu0 %v3252_v34  ;;  %v4180_v34 = vld [vmem:[#allocation4_spill] sm:$0xff] }
 0x18b   : > { %2883 = vmatprep.subr.bf16.mxu1 %v4142_v56 }
 0x18d   : > { %2648 = vmatpush3.bf16.msra.mxu0 %v3272_v41  ;;  %v4181_v41 = vld [vmem:[#allocation5_spill] sm:$0xff] }
 0x18e   : > { %2884 = vmatpush3.bf16.msra.mxu1 %v4178_v27  ;;  %2649 = vmatprep.subr.bf16.mxu0 %v3285_v44 }
 0x18f   : > { %2885 = vmatprep.subr.bf16.mxu1 %v4142_v56 }
 0x191   : > { %2650 = vmatpush3.bf16.msra.mxu0 %v3297_v49 }
 0x192   : > { %2886 = vmatpush3.bf16.msra.mxu1 %v3688_v36  ;;  %2651 = vmatprep.subr.bf16.mxu0 %v3308_v51  ;;  %v4182_v51 = vld [vmem:[#allocation32_spill] sm:$0xff] }
 0x193   : > { %2887 = vmatprep.subr.bf16.mxu1 %v4142_v56 }
 0x195   : > { %2652 = vmatpush3.bf16.msra.mxu0 %v3328_v55  ;;  %v4183_v55 = vld [vmem:[#allocation13_spill] sm:$0xff] }
 0x196   : > { %2888 = vmatpush3.bf16.msra.mxu1 %v3702_v32  ;;  %2653 = vmatprep.subr.bf16.mxu0 %v3337_v58 }
 0x197   : > { %2661 = vmatprep.subr.bf16.mxu1 %v3278_v42  ;;  %v1753_v42 = vld [vmem:[#allocation2 + $0x8] sm:$0x1] }
 0x198   : > { %v1762_v44 = vrot.slane %v1753_v42, %v3310_v52 }
 0x199   : > { %2890 = vmatmul.mubr.bf16.vlgmr.msra.gmra.mrb[20].mxu1 %v3827_v33  ;;  %2654 = vmatpush3.bf16.msra.mxu0 %v3343_v60 }
 0x19a   : > { %2662 = vmatpush3.bf16.msra.mxu1 %v3292_v48  ;;  %1849 = vmatprep.mubr.bf16.mxu1 %v3742_v9  ;;  %v3869_v49 = vshrl.u32 %v1762_v44, 16  ;;  %v3905_v44 = vld.sshfl [vmem:[#allocation2 + $0x8] sm:$0x2 pattern:$0x76325410] }
 0x19b   : > { %2683 = vmatprep.subr.bf16.mxu0 %v3349_v61  ;;  %2663 = vmatprep.subr.bf16.mxu1 %v3303_v50 }
 0x19c   : > { %1810 = vmatmul.mubr.bf16.vlgmr.msra.gmra.mrb[24].mxu0 %v3548_v18  ;;  %v4184_v18 = vld [vmem:[#allocation14_spill] sm:$0xff] }
 0x19d   : > { %2684 = vmatpush3.bf16.msra.mxu0 %v3356_v62  ;;  %1889 = vmatprep.mubr.bf16.mxu0 %v3827_v33 }
 0x19e   : > { %2664 = vmatpush3.bf16.msra.mxu1 %v4180_v34  ;;  %2685 = vmatprep.subr.bf16.mxu0 %v3361_v63 }
 0x19f   : > { %2665 = vmatprep.subr.bf16.mxu1 %v4181_v41 }
 0x1a1   : > { %2686 = vmatpush3.bf16.msra.mxu0 %v3368_v0 }
 0x1a2   : > { %2666 = vmatpush3.bf16.msra.mxu1 %v3376_v1  ;;  %2687 = vmatprep.subr.bf16.mxu0 %v3382_v4 }
 0x1a3   : > { %2667 = vmatprep.subr.bf16.mxu1 %v3389_v6 }
 0x1a5   : > { %2688 = vmatpush3.bf16.msra.mxu0 %v3394_v7 }
 0x1a6   : > { %2668 = vmatpush3.bf16.msra.mxu1 %v3400_v8  ;;  %2689 = vmatprep.subr.bf16.mxu0 %v3408_v11 }
 0x1a7   : > { %2669 = vmatprep.subr.bf16.mxu1 %v3417_v14 }
 0x1a9   : > { %2690 = vmatpush3.bf16.msra.mxu0 %v3422_v15 }
 0x1aa   : > { %2670 = vmatpush3.bf16.msra.mxu1 %v3428_v17  ;;  %2691 = vmatprep.subr.bf16.mxu0 %v3438_v19 }
 0x1ab   : > { %2671 = vmatprep.subr.bf16.mxu1 %v3443_v20 }
 0x1ad   : > { %2692 = vmatpush3.bf16.msra.mxu0 %v3449_v21 }
 0x1ae   : > { %2672 = vmatpush3.bf16.msra.mxu1 %v3454_v23  ;;  %2693 = vmatprep.subr.bf16.mxu0 %v3462_v26 }
 0x1af   : > { %2673 = vmatprep.subr.bf16.mxu1 %v3467_v29 }
 0x1b1   : > { %2694 = vmatpush3.bf16.msra.mxu0 %v4163_v12 }
 0x1b2   : > { %2674 = vmatpush3.bf16.msra.mxu1 %v3478_v35  ;;  %2695 = vmatprep.subr.bf16.mxu0 %v4165_v2 }
 0x1b3   : > { %2675 = vmatprep.subr.bf16.mxu1 %v3491_v37 }
 0x1b5   : > { %2696 = vmatpush3.bf16.msra.mxu0 %v4167_v53 }
 0x1b6   : > { %2676 = vmatpush3.bf16.msra.mxu1 %v3501_v40  ;;  %2697 = vmatprep.subr.bf16.mxu0 %v4169_v43 }
 0x1b7   : > { %2705 = vmatprep.subr.bf16.mxu1 %v3521_v46 }
 0x1b9   : > { %1850 = vmatmul.mubr.bf16.vlgmr.msra.gmra.mrb[24].mxu1 %v3707_v57  ;;  %2698 = vmatpush3.bf16.msra.mxu0 %v4171_v13  ;;  %v4186_v57 = vld [vmem:[#allocation18_spill] sm:$0xff] }
 0x1ba   : > { %2706 = vmatpush3.bf16.msra.mxu1 %v3555_v45  ;;  %1929 = vmatprep.mubr.bf16.mxu1 %v3869_v49 }
 0x1bb   : > { %2893 = vmatprep.subr.bf16.mxu0 %v4142_v56  ;;  %2707 = vmatprep.subr.bf16.mxu1 %v3562_v16 }
 0x1bc   : > { %1890 = vmatmul.mubr.bf16.vlgmr.msra.gmra.mrb[28].mxu0 %v4182_v51 }
 0x1bd   : > { %2894 = vmatpush3.bf16.msra.mxu0 %v4173_v54  ;;  %2909 = vmatprep.mubr.msk.bf16.mxu0 %vm3064_vm0, %v4142_v56 }
 0x1be   : > { %2708 = vmatpush3.bf16.msra.mxu1 %v4183_v55  ;;  %2895 = vmatprep.subr.bf16.mxu0 %v4142_v56 }
 0x1bf   : > { %2709 = vmatprep.subr.bf16.mxu1 %v4184_v18 }
 0x1c1   : > { %2896 = vmatpush3.bf16.msra.mxu0 %v4174_v39 }
 0x1c2   : > { %2710 = vmatpush3.bf16.msra.mxu1 %v4185_v3  ;;  %2897 = vmatprep.subr.bf16.mxu0 %v4142_v56 }
 0x1c3   : > { %2711 = vmatprep.subr.bf16.mxu1 %v3606_v38 }
 0x1c5   : > { %2898 = vmatpush3.bf16.msra.mxu0 %v4175_v22  ;;  %v3042_v22 = vld [vmem:[%s4057_s4 + $0xc0] sm:$0xff]  }
 0x1c6   : > { %2712 = vmatpush3.bf16.msra.mxu1 %v4186_v57  ;;  %2899 = vmatprep.subr.bf16.mxu0 %v4142_v56 }
 0x1c7   : > { %2713 = vmatprep.subr.bf16.mxu1 %v4187_v25 }
 0x1c9   : > { %2900 = vmatpush3.bf16.msra.mxu0 %v4176_v59  ;;  %v4191_v59 = vld [vmem:[#allocation30_spill] sm:$0xff] }
 0x1ca   : > { %2714 = vmatpush3.bf16.msra.mxu1 %v4188_v28  ;;  %2901 = vmatprep.subr.bf16.mxu0 %v4142_v56 }
 0x1cb   : > { %2715 = vmatprep.subr.bf16.mxu1 %v4189_v30 }
 0x1cd   : > { %2902 = vmatpush3.bf16.msra.mxu0 %v4177_v24  ;;  %v3040_v24 = vld [vmem:[%s4057_s4 + $0x40] sm:$0xff]  }
 0x1ce   : > { %2716 = vmatpush3.bf16.msra.mxu1 %v4166_v47  ;;  %2903 = vmatprep.subr.bf16.mxu0 %v4142_v56 }
 0x1cf   : > { %2717 = vmatprep.subr.bf16.mxu1 %v4168_v10 }
 0x1d1   : > { %2904 = vmatpush3.bf16.msra.mxu0 %v4178_v27  ;;  %v1775_v27 = vrot.slane %v3905_v44, 1 }
 0x1d2   : > { %2718 = vmatpush3.bf16.msra.mxu1 %v4170_v5  ;;  %2905 = vmatprep.subr.bf16.mxu0 %v4142_v56 }
 0x1d3   : > { %2719 = vmatprep.subr.bf16.mxu1 %v4190_v31 }
 0x1d5   : > { %2906 = vmatpush3.bf16.msra.mxu0 %v3688_v36  ;;  %v3041_v36 = vld [vmem:[%s4057_s4] sm:$0xff]  }
 0x1d6   : > { %2720 = vmatpush3.bf16.msra.mxu1 %v4191_v59  ;;  %2907 = vmatprep.subr.bf16.mxu0 %v4142_v56 }
 0x1d7   : > { %2736 = vmatprep.subr.bf16.mxu1 %v3040_v24  ;;  %v3043_v24 = vld [vmem:[%s4057_s4 + $0x48] sm:$0xff]  }
 0x1d9   : > { %1930 = vmatmul.mubr.bf16.vlgmr.msra.gmra.mrb[28].mxu1 %v1753_v42  ;;  %2908 = vmatpush3.bf16.msra.mxu0 %v3702_v32 }
 0x1da   : > { %2737 = vmatpush3.bf16.msra.mxu1 %v3041_v36  ;;  %2034 = vmatprep.mubr.bf16.mxu1 %v4182_v51  ;;  %v3044_v36 = vld [vmem:[%s4057_s4 + $0x8] sm:$0xff]   ;;  %v3046_v51 = vld [vmem:[%s4057_s4 + $0x10] sm:$0xff]  }
 0x1db   : > { %2758 = vmatprep.subr.bf16.mxu0 %v3042_v22  ;;  %2738 = vmatprep.subr.bf16.mxu1 %v3043_v24  ;;  %v3045_v22 = vld [vmem:[%s4057_s4 + $0x50] sm:$0xff]  }
 0x1dc   : > { %2910 = vmatmul.mubr.bf16.vlgmr.msra.gmra.mrb[32].mxu0 %v1775_v27 }
 0x1dd   : > { %2759 = vmatpush3.bf16.msra.mxu0 %v3292_v48  ;;  %2074 = vmatprep.mubr.bf16.mxu0 %v1753_v42  ;;  %v3047_v48 = vld [vmem:[%s4057_s4 + $0x58] sm:$0xff]  }
 0x1de   : > { %2739 = vmatpush3.bf16.msra.mxu1 %v3044_v36  ;;  %2760 = vmatprep.subr.bf16.mxu0 %v3303_v50  ;;  %v3048_v50 = vld [vmem:[%s4057_s4 + $0x18] sm:$0xff]  }
 0x1df   : > { %2740 = vmatprep.subr.bf16.mxu1 %v3045_v22 }
 0x1e1   : > { %2761 = vmatpush3.bf16.msra.mxu0 %v4180_v34  ;;  %v3049_v34 = vld [vmem:[%s4057_s4 + $0x60] sm:$0xff]  }
 0x1e2   : > { %2741 = vmatpush3.bf16.msra.mxu1 %v3046_v51  ;;  %2762 = vmatprep.subr.bf16.mxu0 %v4181_v41  ;;  %v3050_v41 = vld [vmem:[%s4057_s4 + $0x20] sm:$0xff]   ;;  %v3053_v51 = vld [vmem:[%s4057_s4 + $0x70] sm:$0xff]  }
 0x1e3   : > { %2742 = vmatprep.subr.bf16.mxu1 %v3047_v48  ;;  %v4192_v48 = vld [vmem:[#allocation33_spill] sm:$0xff] }
 0x1e5   : > { %2763 = vmatpush3.bf16.msra.mxu0 %v3376_v1  ;;  %v3051_v1 = vld [vmem:[%s4057_s4 + $0x68] sm:$0xff]  }
 0x1e6   : > { %2743 = vmatpush3.bf16.msra.mxu1 %v3048_v50  ;;  %2764 = vmatprep.subr.bf16.mxu0 %v3389_v6 }
 0x1e7   : > { %2744 = vmatprep.subr.bf16.mxu1 %v3049_v34 }
 0x1e9   : > { %2765 = vmatpush3.bf16.msra.mxu0 %v3400_v8  ;;  %v3052_v8 = vld [vmem:[%s4057_s4 + $0x28] sm:$0xff]  }
 0x1ea   : > { %2745 = vmatpush3.bf16.msra.mxu1 %v3050_v41  ;;  %2766 = vmatprep.subr.bf16.mxu0 %v3417_v14 }
 0x1eb   : > { %2746 = vmatprep.subr.bf16.mxu1 %v3051_v1  ;;  %v3054_v1 = vld [vmem:[%s4057_s4 + $0x30] sm:$0xff]  }
 0x1ec   : > { %v2483_v6 = vpop.f32.mrb[4].mxu1 }
 0x1ed   : > { %2767 = vmatpush3.bf16.msra.mxu0 %v3428_v17  ;;  %v2484_v42 = vpop.f32.mrb[5].mxu1 }
 0x1ee   : > { %v2485_v24 = vadd.f32 %v2484_v42, %v2483_v6  ;;  %2747 = vmatpush3.bf16.msra.mxu1 %v3052_v8  ;;  %v2486_v36 = vpop.f32.mrb[6].mxu1  ;;  %2768 = vmatprep.subr.bf16.mxu0 %v3443_v20  ;;  %v1978_v6 = vld [vmem:[#allocation2 + $0xa] sm:$0x1] }
 0x1ef   : > { %v2487_v22 = vpop.f32.mrb[7].mxu1  ;;  %v2505_v14 = vpop.f32.mrb[8].mxu0  ;;  %2748 = vmatprep.subr.bf16.mxu1 %v3053_v51 }
 0x1f0   : > { %v1404_v50 = vadd.f32 %v2485_v24, %v4192_v48  ;;  %v2506_v17 = vpop.f32.mrb[9].mxu0  ;;  %v1987_v24 = vrot.slane %v1978_v6, %v3310_v52 }
 0x1f1   : > { %v2507_v34 = vadd.f32 %v2506_v17, %v2505_v14  ;;  %2769 = vmatpush3.bf16.msra.mxu0 %v3454_v23  ;;  %v2508_v41 = vpop.f32.mrb[10].mxu0 }
 0x1f2   : > { %2749 = vmatpush3.bf16.msra.mxu1 %v3054_v1  ;;  %v2509_v20 = vpop.f32.mrb[11].mxu0  ;;  %2770 = vmatprep.subr.bf16.mxu0 %v3467_v29  ;;  %v1989_v23 = vshrl.u32 %v1987_v24, 16 }
 0x1f3   : > { %v1444_v42 = vadd.f32 %v2507_v34, %v1404_v50  ;;  %2750 = vmatprep.subr.bf16.mxu1 %v3337_v58 }
 0x1f5   : > { %2771 = vmatpush3.bf16.msra.mxu0 %v3478_v35 }
 0x1f6   : > { %2751 = vmatpush3.bf16.msra.mxu1 %v3343_v60  ;;  %2772 = vmatprep.subr.bf16.mxu0 %v3491_v37 }
 0x1f7   : > { %2780 = vmatprep.subr.bf16.mxu1 %v3349_v61 }
 0x1f9   : > { %2035 = vmatmul.mubr.bf16.vlgmr.msra.gmra.mrb[32].mxu1 %v3742_v9  ;;  %2773 = vmatpush3.bf16.msra.mxu0 %v3501_v40 }
 0x1fa   : > { %2781 = vmatpush3.bf16.msra.mxu1 %v3356_v62  ;;  %2802 = vmatprep.subr.bf16.mxu0 %v3521_v46  ;;  %v4196_v46 = vld [vmem:[#allocation26_spill] sm:$0xff] }
 0x1fb   : > { %2782 = vmatprep.subr.bf16.mxu1 %v3361_v63  ;;  %2114 = vmatprep.mubr.bf16.mxu1 %v1775_v27 }
 0x1fc   : > { %2075 = vmatmul.mubr.bf16.vlgmr.msra.gmra.mrb[36].mxu0 %v3827_v33 }
 0x1fd   : > { %2803 = vmatpush3.bf16.msra.mxu0 %v3555_v45  ;;  %2154 = vmatprep.mubr.bf16.mxu0 %v1989_v23 }
 0x1fe   : > { %2783 = vmatpush3.bf16.msra.mxu1 %v3368_v0  ;;  %2804 = vmatprep.subr.bf16.mxu0 %v3562_v16 }
 0x1ff   : > { %2784 = vmatprep.subr.bf16.mxu1 %v3382_v4 }
 0x201   : > { %2805 = vmatpush3.bf16.msra.mxu0 %v4183_v55 }
 0x202   : > { %2785 = vmatpush3.bf16.msra.mxu1 %v3394_v7  ;;  %2806 = vmatprep.subr.bf16.mxu0 %v4184_v18 }
 0x203   : > { %2786 = vmatprep.subr.bf16.mxu1 %v3408_v11 }
 0x205   : > { %2807 = vmatpush3.bf16.msra.mxu0 %v4185_v3 }
 0x206   : > { %2787 = vmatpush3.bf16.msra.mxu1 %v3422_v15  ;;  %2808 = vmatprep.subr.bf16.mxu0 %v3606_v38 }
 0x207   : > { %2788 = vmatprep.subr.bf16.mxu1 %v3438_v19  ;;  %v4193_v19 = vld [vmem:[#allocation17_spill] sm:$0xff] }
 0x209   : > { %2809 = vmatpush3.bf16.msra.mxu0 %v4186_v57 }
 0x20a   : > { %2789 = vmatpush3.bf16.msra.mxu1 %v3449_v21  ;;  %2810 = vmatprep.subr.bf16.mxu0 %v4187_v25  ;;  %v4194_v21 = vld [vmem:[#allocation20_spill] sm:$0xff] }
 0x20b   : > { %2790 = vmatprep.subr.bf16.mxu1 %v3462_v26  ;;  %v4195_v26 = vld [vmem:[#allocation23_spill] sm:$0xff] }
 0x20c   : > { %v2527_v52 = vpop.f32.mrb[8].mxu1 }
 0x20d   : > { %v2528_v58 = vpop.f32.mrb[9].mxu1  ;;  %2811 = vmatpush3.bf16.msra.mxu0 %v4188_v28 }
 0x20e   : > { %v2529_v60 = vadd.f32 %v2528_v58, %v2527_v52  ;;  %v2530_v61 = vpop.f32.mrb[10].mxu1  ;;  %2791 = vmatpush3.bf16.msra.mxu1 %v4163_v12  ;;  %2812 = vmatprep.subr.bf16.mxu0 %v4189_v30  ;;  %v4197_v12 = vld [vmem:[#allocation29_spill] sm:$0xff] }
 0x20f   : > { %v2531_v62 = vpop.f32.mrb[11].mxu1  ;;  %v1523_v63 = vpop.f32.mrb[12].mxu0  ;;  %2792 = vmatprep.subr.bf16.mxu1 %v4165_v2 }
 0x210   : > { %v1484_v0 = vadd.f32 %v2529_v60, %v1444_v42  ;;  %v2871_v4 = vpop.f32.mrb[13].mxu0 }
 0x211   : > { %2813 = vmatpush3.bf16.msra.mxu0 %v4166_v47  ;;  %v1526_v7 = vpop.f32.mrb[14].mxu0 }
 0x212   : > { %v4007_v11 = vadd.f32 %v1523_v63, %v1484_v0  ;;  %2793 = vmatpush3.bf16.msra.mxu1 %v4167_v53  ;;  %2814 = vmatprep.subr.bf16.mxu0 %v4168_v10  ;;  %v2872_v15 = vpop.f32.mrb[15].mxu0 }
 0x213   : > { %2794 = vmatprep.subr.bf16.mxu1 %v4169_v43 }
 0x215   : > { %2815 = vmatpush3.bf16.msra.mxu0 %v4170_v5 }
 0x216   : > { %2795 = vmatpush3.bf16.msra.mxu1 %v4171_v13  ;;  %2816 = vmatprep.subr.bf16.mxu0 %v4190_v31  ;;  %v2409_v13 = vld.sshfl [vmem:[#allocation2 + $0xa] sm:$0x2 pattern:$0x76325410] }
 0x217   : > { %2913 = vmatprep.subr.bf16.mxu1 %v4142_v56 }
 0x219   : > { %2115 = vmatmul.mubr.bf16.vlgmr.msra.gmra.mrb[36].mxu1 %v3869_v49  ;;  %2817 = vmatpush3.bf16.msra.mxu0 %v4191_v59 }
 0x21a   : > { %2914 = vmatpush3.bf16.msra.mxu1 %v4173_v54  ;;  %2929 = vmatprep.mubr.msk.bf16.mxu1 %vm3064_vm0, %v4142_v56  ;;  %v2000_v54 = vrot.slane %v2409_v13, 1 }
 0x21b   : > { %2915 = vmatprep.subr.bf16.mxu1 %v4142_v56 }
 0x21c   : > { %2155 = vmatmul.mubr.bf16.vlgmr.msra.gmra.mrb[40].mxu0 %v1978_v6 }
 0x21e   : > { %2916 = vmatpush3.bf16.msra.mxu1 %v4174_v39 }
 0x21f   : > { %2917 = vmatprep.subr.bf16.mxu1 %v4142_v56 }
 0x222   : > { %2918 = vmatpush3.bf16.msra.mxu1 %v4193_v19 }
 0x223   : > { %2919 = vmatprep.subr.bf16.mxu1 %v4142_v56 }
 0x226   : > { %2920 = vmatpush3.bf16.msra.mxu1 %v4194_v21 }
 0x227   : > { %2921 = vmatprep.subr.bf16.mxu1 %v4142_v56 }
 0x22a   : > { %2922 = vmatpush3.bf16.msra.mxu1 %v4195_v26 }
 0x22b   : > { %2923 = vmatprep.subr.bf16.mxu1 %v4142_v56 }
 0x22c   : > { %v2558_v29 = vpop.f32.mrb[12].mxu1 }
 0x22d   : > { %v2559_v35 = vpop.f32.mrb[13].mxu1 }
 0x22e   : > { %v2560_v37 = vadd.f32 %v2559_v35, %v2558_v29  ;;  %v2561_v40 = vpop.f32.mrb[14].mxu1  ;;  %2924 = vmatpush3.bf16.msra.mxu1 %v4196_v46 }
 0x22f   : > { %v2562_v39 = vpop.f32.mrb[15].mxu1  ;;  %v2580_v45 = vpop.f32.mrb[16].mxu0  ;;  %2925 = vmatprep.subr.bf16.mxu1 %v4142_v56 }
 0x230   : > { %v2581_v16 = vpop.f32.mrb[17].mxu0 }
 0x231   : > { %v2582_v59 = vadd.f32 %v2581_v16, %v2580_v45  ;;  %v2583_v5 = vpop.f32.mrb[18].mxu0 }
 0x232   : > { %2926 = vmatpush3.bf16.msra.mxu1 %v4197_v12  ;;  %v2584_v38 = vpop.f32.mrb[19].mxu0 }
 0x233   : > { %v1628_v9 = vadd.f32 %v2582_v59, %v2560_v37  ;;  %2927 = vmatprep.subr.bf16.mxu1 %v4142_v56 }
 0x236   : > { %2928 = vmatpush3.bf16.msra.mxu1 %v3702_v32 }
 0x239   : > { %2930 = vmatmul.mubr.bf16.vlgmr.msra.gmra.mrb[40].mxu1 %v2000_v54 }
 0x24c   : > { %v2602_v43 = vpop.f32.mrb[16].mxu1 }
 0x24d   : > { %v2603_v2 = vpop.f32.mrb[17].mxu1 }
 0x24e   : > { %v2604_v47 = vadd.f32 %v2603_v2, %v2602_v43  ;;  %v2605_v53 = vpop.f32.mrb[18].mxu1 }
 0x24f   : > { %v2606_v10 = vpop.f32.mrb[19].mxu1  ;;  %v2624_v27 = vpop.f32.mrb[20].mxu0 }
 0x250   : > { %v1668_v33 = vadd.f32 %v2604_v47, %v1628_v9  ;;  %v2625_v49 = vpop.f32.mrb[21].mxu0 }
 0x251   : > { %v2626_v55 = vadd.f32 %v2625_v49, %v2624_v27  ;;  %v2627_v18 = vpop.f32.mrb[22].mxu0 }
 0x252   : > { %v2628_v3 = vpop.f32.mrb[23].mxu0 }
 0x253   : > { %v1708_v57 = vadd.f32 %v2626_v55, %v1668_v33 }
 0x26c   : > { %v1747_v25 = vpop.f32.mrb[20].mxu1 }
 0x26d   : > { %v1748_v28 = vadd.f32 %v1747_v25, %v1708_v57  ;;  %v2891_v30 = vpop.f32.mrb[21].mxu1  ;;  %v2321_v25 = vld [vmem:[%s4060_s7] ss:$0 sm:$0xff] }
 0x26e   : > { %v1750_v56 = vpop.f32.mrb[22].mxu1  ;;  %v2410_v30 = vld [vmem:[%s4058_s5] ss:$0 sm:$0xff] }
 0x26f   : > { %v2203_v31 = vrot.slane %v1748_v28, 7  ;;  %v2892_v44 = vpop.f32.mrb[23].mxu1  ;;  %v2655_v32 = vpop.f32.mrb[24].mxu0 }
 0x270   : > { %v2656_v8 = vpop.f32.mrb[25].mxu0  ;;  %v4198_v44 = vld [vmem:[#allocation31_spill] sm:$0xff] }
 0x271   : > { %v2212_v36 = vsel %vm657_vm4, %v4007_v11, %v2203_v31  ;;  %v2657_v22 = vadd.f32 %v2656_v8, %v2655_v32  ;;  %v2658_v14 = vpop.f32.mrb[26].mxu0  ;;  %v618_v32 = vadd.f32 %v2321_v25, %v4198_v44 }
 0x272   : > { %v2659_v51 = vpop.f32.mrb[27].mxu0 }
 0x28c   : > { %v2677_v48 = vpop.f32.mrb[24].mxu1 }
 0x28d   : > { %v2678_v50 = vpop.f32.mrb[25].mxu1 }
 0x28e   : > { %v2679_v17 = vadd.f32 %v2678_v50, %v2677_v48  ;;  %v2680_v34 = vpop.f32.mrb[26].mxu1 }
 0x28f   : > { %v2681_v41 = vpop.f32.mrb[27].mxu1  ;;  %v2699_v1 = vpop.f32.mrb[28].mxu0 }
 0x290   : > { %v1852_v20 = vadd.f32 %v2679_v17, %v2657_v22  ;;  %v2700_v6 = vpop.f32.mrb[29].mxu0 }
 0x291   : > { %v2701_v42 = vadd.f32 %v2700_v6, %v2699_v1  ;;  %v2702_v24 = vpop.f32.mrb[30].mxu0 }
 0x292   : > { %v2703_v23 = vpop.f32.mrb[31].mxu0 }
 0x293   : > { %v1892_v52 = vadd.f32 %v2701_v42, %v1852_v20 }
 0x2ac   : > { %v2721_v58 = vpop.f32.mrb[28].mxu1 }
 0x2ad   : > { %v2722_v60 = vpop.f32.mrb[29].mxu1 }
 0x2ae   : > { %v2723_v61 = vadd.f32 %v2722_v60, %v2721_v58  ;;  %v2724_v62 = vpop.f32.mrb[30].mxu1 }
 0x2af   : > { %v2725_v63 = vpop.f32.mrb[31].mxu1  ;;  %v1971_v0 = vpop.f32.mrb[32].mxu0 }
 0x2b0   : > { %v1932_v4 = vadd.f32 %v2723_v61, %v1892_v52  ;;  %v2911_v7 = vpop.f32.mrb[33].mxu0 }
 0x2b1   : > { %v1974_v11 = vpop.f32.mrb[34].mxu0 }
 0x2b2   : > { %v1972_v15 = vadd.f32 %v1971_v0, %v1932_v4  ;;  %v2912_v19 = vpop.f32.mrb[35].mxu0 }
 0x2b4   : > { %v2206_v21 = vrot.slane %v1972_v15, 6 }
 0x2b6   : > { %v2214_v26 = vsel %vm623_vm1, %v2212_v36, %v2206_v21 }
 0x2cc   : > { %v2752_v29 = vpop.f32.mrb[32].mxu1 }
 0x2cd   : > { %v2753_v35 = vpop.f32.mrb[33].mxu1 }
 0x2ce   : > { %v2754_v37 = vadd.f32 %v2753_v35, %v2752_v29  ;;  %v2755_v40 = vpop.f32.mrb[34].mxu1 }
 0x2cf   : > { %v2756_v46 = vpop.f32.mrb[35].mxu1  ;;  %v2774_v39 = vpop.f32.mrb[36].mxu0 }
 0x2d0   : > { %v2775_v45 = vpop.f32.mrb[37].mxu0 }
 0x2d1   : > { %v2776_v16 = vadd.f32 %v2775_v45, %v2774_v39  ;;  %v2777_v59 = vpop.f32.mrb[38].mxu0 }
 0x2d2   : > { %v2778_v5 = vpop.f32.mrb[39].mxu0 }
 0x2d3   : > { %v2077_v12 = vadd.f32 %v2776_v16, %v2754_v37 }
 0x2ec   : > { %v2796_v13 = vpop.f32.mrb[36].mxu1 }
 0x2ed   : > { %v2797_v38 = vpop.f32.mrb[37].mxu1 }
 0x2ee   : > { %v2798_v9 = vadd.f32 %v2797_v38, %v2796_v13  ;;  %v2799_v54 = vpop.f32.mrb[38].mxu1 }
 0x2ef   : > { %v2800_v43 = vpop.f32.mrb[39].mxu1  ;;  %v2818_v2 = vpop.f32.mrb[40].mxu0 }
 0x2f0   : > { %v2117_v47 = vadd.f32 %v2798_v9, %v2077_v12  ;;  %v2819_v53 = vpop.f32.mrb[41].mxu0 }
 0x2f1   : > { %v2820_v10 = vadd.f32 %v2819_v53, %v2818_v2  ;;  %v2821_v27 = vpop.f32.mrb[42].mxu0 }
 0x2f2   : > { %v2822_v33 = vpop.f32.mrb[43].mxu0 }
 0x2f3   : > { %v2157_v49 = vadd.f32 %v2820_v10, %v2117_v47 }
 0x30c   : > { %v2196_v55 = vpop.f32.mrb[40].mxu1 }
 0x30d   : > { %v2197_v18 = vadd.f32 %v2196_v55, %v2157_v49  ;;  %v2931_v3 = vpop.f32.mrb[41].mxu1 }
 0x30e   : > { %v2199_v57 = vpop.f32.mrb[42].mxu1 }
 0x30f   : > { %v2209_v28 = vrot.slane %v2197_v18, 5  ;;  %v2932_v56 = vpop.f32.mrb[43].mxu1 }
 0x311   : > { %v2216_v31 = vsel %vm2215_vm7, %v2214_v26, %v2209_v28 }
 0x312   : > { %v2224_v8 = vadd.f32 %v2410_v30, %v2216_v31 }
 0x314   : > { %v2225_v36 = vadd.f32 %v2224_v8, %v618_v32 }
 0x316   : > { %v2226_v22 = vmax.f32 %v2225_v36, 0.0 }
 0x318   : > { %v2227_v14 = vpack.c.bf16 %v2226_v22, %v2226_v22 }
 0x31a   : > { %2228 = vst [vmem:[%s320_s14] sm:$0x3] %v2227_v14 }
 0x31b PF: > { %s18_s27 = sadd.s32 1, %s3061_s27  }
 0x31c   : > { %p15_p4 = scmp.ge.s32.totalorder %s18_s27, 4  }
 0x31e   :  { %17 = sbr.rel (!%p15_p4) target bundleno = 1 (0x1), region = 90 }

// kernel: _lambda_.11
= control target key start
LH: loop header
LB: loop body
LE: loop exit
PB: predicated region body
PF: predicated region fallthrough
CT: control target
= control target key end

     0   :  { %s3271_s27 = smov 0   ;;  %s4263_s0 = inlined_call_operand.vmem [shape: bf16[2,4,384], index: 0, kind: input, shape index: {}]   ;;  %s4264_s1 = inlined_call_operand.vmem [shape: bf16[2,4,128], index: 1, kind: input, shape index: {}]   ;;  %s4265_s2 = inlined_call_operand.vmem [shape: bf16[384,128], index: 2, kind: input, shape index: {}]   ;;  %s4266_s3 = inlined_call_operand.vmem [shape: f32[1,128], index: 3, kind: input, shape index: {}]   ;;  %s4267_s4 = inlined_call_operand.vmem [shape: bf16[1152,128], index: 4, kind: input, shape index: {}]   ;;  %s4268_s5 = inlined_call_operand.vmem [shape: f32[1,128], index: 5, kind: input, shape index: {}]   ;;  %s4269_s6 = inlined_call_operand.vmem [shape: bf16[128,128], index: 6, kind: input, shape index: {}]   ;;  %s4270_s7 = inlined_call_operand.vmem [shape: f32[1,128], index: 7, kind: input, shape index: {}]   ;;  %s4271_s8 = inlined_call_operand.vmem [shape: bf16[2,4,128], index: 8, kind: output, shape index: {}]  }
   0x1 LB: > { %s2407_s28 = sadd.s32 4294967295, %s3221_s27   ;;  %p2411_p0 = scmp.ge.s32.totalorder %s3221_s27, 1  ;;  %s3221_s27 = sphi %s3271_s27, %s18_s27  }
   0x2   : > { %p271_p1 = scmp.lt.s32.totalorder %s3221_s27, 3 }
   0x4   : > { %p272_p2 = pnand %p2411_p0, %p271_p1 }
   0x6   : > { %275 = sbr.rel (%p272_p2) target bundleno = 797 (0x31d), region = 52 }
   0xd   : > { %v3092_v0 = vld [vmem:[%s4265_s2 + $0x40] sm:$0xff]   ;;  %v4275_v2 = vmov 0.0   ;;  %v3095_v4 = vld [vmem:[%s4265_s2 + $0x48] sm:$0xff]   ;;  %v3098_v7 = vld [vmem:[%s4265_s2 + $0x50] sm:$0xff]   ;;  %vm3224_vm0 = vmmov 0   ;;  %p308_p3 = scmp.lt.s32.totalorder %s2407_s28, 1  ;;  %v383_v20 = vlaneseq }
   0xe   : > { %v3093_v1 = vld [vmem:[%s4265_s2] sm:$0xff]   ;;  %2960 = vmatprep.subr.bf16.mxu1 %v4275_v2  ;;  %2532 = vmatprep.subr.bf16.mxu0 %v3092_v0  ;;  %v3096_v5 = vld [vmem:[%s4265_s2 + $0x8] sm:$0xff]   ;;  %v3099_v8 = vld [vmem:[%s4265_s2 + $0x10] sm:$0xff]   ;;  %v3225_v24 = vmov 1983009808   ;;  %vm736_vm1 = vcmask 1041408  }
   0xf   : > { %v3094_v3 = vld [vmem:[%s4265_s2 + $0x80] sm:$0xff]   ;;  %2533 = vmatpush3.bf16.msra.mxu0 %v3093_v1  ;;  %v3097_v6 = vld [vmem:[%s4265_s2 + $0x88] sm:$0xff]   ;;  %2976 = vmatprep.mubr.msk.bf16.mxu1 %vm3224_vm0, %v4275_v2  ;;  %v3100_v9 = vld [vmem:[%s4265_s2 + $0x90] sm:$0xff]   ;;  %s4404_s28 = smov (!%p308_p3, %s2407_s28), 1  ;;  %v381_v25 = vunpack.c.l.s4 %v3225_v24  ;;  %v384_v26 = vshrl.u32 %v383_v20, 7  ;;  %v4332_v55 = vmov 0 }
  0x10   : > { %2961 = vmatpush3.bf16.msra.mxu1 %v3094_v3  ;;  %2534 = vmatprep.subr.bf16.mxu0 %v3095_v4  ;;  %v3101_v10 = vld [vmem:[%s4265_s2 + $0x58] sm:$0xff]   ;;  %v3104_v13 = vld [vmem:[%s4265_s2 + $0x60] sm:$0xff]   ;;  %v3107_v16 = vld [vmem:[%s4265_s2 + $0x68] sm:$0xff]   ;;  %s3080_s23 = smul.u32 6, %s4404_s28  ;;  %vm737_vm2 = vsmask.f32 1280 }
  0x11   : > { %2962 = vmatprep.subr.bf16.mxu1 %v4275_v2  ;;  %v3102_v11 = vld [vmem:[%s4265_s2 + $0x18] sm:$0xff]   ;;  %v3105_v14 = vld [vmem:[%s4265_s2 + $0x20] sm:$0xff]   ;;  %v3108_v17 = vld [vmem:[%s4265_s2 + $0x28] sm:$0xff]   ;;  %v382_v28 = vunpack.c.0.s8 %v381_v25  ;;  %s2413_s21 = sshll.u32 %s4404_s28, 1  ;;  %vm770_vm4 = vcmask 1040384   ;;  %vm2328_vm7 = vcmask 1042432  }
  0x12   : > { %v3103_v12 = vld [vmem:[%s4265_s2 + $0x98] sm:$0xff]   ;;  %v3106_v15 = vld [vmem:[%s4265_s2 + $0xa0] sm:$0xff]   ;;  %v3109_v18 = vld [vmem:[%s4265_s2 + $0xa8] sm:$0xff]   ;;  %s312_s12 = scalar_lea.vmem %s4263_s0, %s3080_s23  ;;  %s316_s10 = scalar_lea.vmem %s4264_s1, %s2413_s21  ;;  %vm771_vm5 = vsmask.f32 7938 }
  0x13   : > { %2535 = vmatpush3.bf16.msra.mxu0 %v3096_v5  ;;  %v3110_v19 = vld [vmem:[%s4265_s2 + $0x70] sm:$0xff]   ;;  %v3113_v23 = vld [vmem:[%s4265_s2 + $0x78] sm:$0xff]   ;;  %v322_v27 = vld [vmem:[%s312_s12] sm:$0x3f]  ;;  %v3367_v31 = vsub.s32 %v382_v28, %v384_v26  ;;  %s320_s15 = scalar_lea.vmem %s4271_s8, %s2413_s21 }
  0x14   : > { %2963 = vmatpush3.bf16.msra.mxu1 %v3097_v6  ;;  %2536 = vmatprep.subr.bf16.mxu0 %v3098_v7  ;;  %v3111_v21 = vld [vmem:[%s4265_s2 + $0x30] sm:$0xff]   ;;  %v3114_v29 = vld [vmem:[%s4265_s2 + $0x38] sm:$0xff]   ;;  %v379_v30 = vcombine.high %v322_v27, %v322_v27  ;;  %v3376_v33 = vld [vmem:[%s4267_s4 + $0x40] sm:$0xff]  }
  0x15   : > { %2964 = vmatprep.subr.bf16.mxu1 %v4275_v2  ;;  %v3112_v22 = vld [vmem:[%s4265_s2 + $0xb0] sm:$0xff]   ;;  %v3116_v32 = vld [vmem:[%s4265_s2 + $0xb8] sm:$0xff]   ;;  %v386_v34 = vrot.slane %v322_v27, %v3367_v31  ;;  %v3117_v36 = vld [vmem:[%s4269_s6] sm:$0xff]  }
  0x16   : > { %v393_v35 = vrot.slane %v379_v30, %v3367_v31  ;;  %v3387_v38 = vld [vmem:[%s4267_s4] sm:$0xff]   ;;  %v3393_v39 = vld [vmem:[%s4267_s4 + $0x48] sm:$0xff]   ;;  %v3409_v42 = vld [vmem:[%s4267_s4 + $0x50] sm:$0xff]  }
  0x17   : > { %2537 = vmatpush3.bf16.msra.mxu0 %v3099_v8  ;;  %v394_v37 = vcombine.high %v386_v34, %v386_v34  ;;  %v3118_v40 = vld [vmem:[%s4269_s6 + $0x8] sm:$0xff]   ;;  %v3121_v43 = vld [vmem:[%s4269_s6 + $0x10] sm:$0xff]   ;;  %v3427_v45 = vld [vmem:[%s4267_s4 + $0x58] sm:$0xff]  }
  0x18   : > { %2965 = vmatpush3.bf16.msra.mxu1 %v3100_v9  ;;  %2538 = vmatprep.subr.bf16.mxu0 %v3101_v10  ;;  %v3402_v41 = vld [vmem:[%s4267_s4 + $0x8] sm:$0xff]   ;;  %v3420_v44 = vld [vmem:[%s4267_s4 + $0x10] sm:$0xff]   ;;  %v3124_v46 = vld [vmem:[%s4269_s6 + $0x18] sm:$0xff]  }
  0x19   : > { %2966 = vmatprep.subr.bf16.mxu1 %v4275_v2  ;;  %574 = vmatprep.mubr.bf16.mxu0 %v394_v37  ;;  %v3436_v47 = vld [vmem:[%s4267_s4 + $0x18] sm:$0xff]   ;;  %v3443_v48 = vld [vmem:[%s4267_s4 + $0x60] sm:$0xff]   ;;  %v3459_v51 = vld [vmem:[%s4267_s4 + $0x68] sm:$0xff]  }
  0x1a   : > { %v3127_v49 = vld [vmem:[%s4269_s6 + $0x20] sm:$0xff]   ;;  %v3130_v52 = vld [vmem:[%s4269_s6 + $0x28] sm:$0xff]   ;;  %vm3471_vm3 = vmand %vm736_vm1, %vm737_vm2 }
  0x1b   : > { %2539 = vmatpush3.bf16.msra.mxu0 %v3102_v11  ;;  %v3452_v50 = vld [vmem:[%s4267_s4 + $0x20] sm:$0xff]   ;;  %v3468_v54 = vld [vmem:[%s4267_s4 + $0x28] sm:$0xff]   ;;  %v4333_v55 = vsel %vm3471_vm3, 4294967295, %v4332_v55  ;;  %v3480_v56 = vld [vmem:[%s4267_s4 + $0x70] sm:$0xff]  }
  0x1c   : > { %2967 = vmatpush3.bf16.msra.mxu1 %v3103_v12  ;;  %2540 = vmatprep.subr.bf16.mxu0 %v3104_v13  ;;  %v739_v53 = vld [vmem:[#allocation2] sm:$0x3]  ;;  %4334 = vst [vmem:[#allocation3_spill] sm:$0xff] %v4333_v55  ;;  %v3133_v58 = vld [vmem:[%s4269_s6 + $0x30] sm:$0xff]   ;;  %v3496_v60 = vld [vmem:[%s4267_s4 + $0x78] sm:$0xff]  }
  0x1d   : > { %2968 = vmatprep.subr.bf16.mxu1 %v4275_v2  ;;  %v740_v57 = vsel %vm3471_vm3, 0, %v739_v53  ;;  %v3490_v59 = vld [vmem:[%s4267_s4 + $0x30] sm:$0xff]   ;;  %v3136_v61 = vld [vmem:[%s4269_s6 + $0x38] sm:$0xff]   ;;  %v3517_v63 = vld [vmem:[%s4267_s4 + $0xc0] sm:$0xff]  }
  0x1e   : > { %741 = vst [vmem:[#allocation2] sm:$0x3] %v740_v57  ;;  %v3507_v62 = vld [vmem:[%s4267_s4 + $0x38] sm:$0xff]   ;;  %v3522_v0 = vld [vmem:[%s4267_s4 + $0x140] sm:$0xff]   ;;  %v3536_v6 = vld [vmem:[%s4267_s4 + $0xc8] sm:$0xff]  }
  0x1f   : > { %2541 = vmatpush3.bf16.msra.mxu0 %v3105_v14  ;;  %v624_v3 = vld [vmem:[%s316_s10] sm:$0x3]  ;;  %v3549_v9 = vld [vmem:[%s4267_s4 + $0x88] sm:$0xff]   ;;  %v3563_v11 = vld [vmem:[%s4267_s4 + $0xd0] sm:$0xff]  }
  0x20   : > { %2969 = vmatpush3.bf16.msra.mxu1 %v3106_v15  ;;  %2542 = vmatprep.subr.bf16.mxu0 %v3107_v16  ;;  %v3530_v4 = vld [vmem:[%s4267_s4 + $0x80] sm:$0xff]   ;;  %4335 = vst [vmem:[#allocation4_spill] sm:$0xff] %v3549_v9  ;;  %v3558_v10 = vld [vmem:[%s4267_s4 + $0x148] sm:$0xff]   ;;  %4336 = vst [vmem:[#allocation5_spill] sm:$0xff] %v3563_v11 }
  0x21   : > { %2970 = vmatprep.subr.bf16.mxu1 %v4275_v2  ;;  %v3542_v8 = vld [vmem:[%s4267_s4 + $0x100] sm:$0xff]   ;;  %v3568_v12 = vld [vmem:[%s4267_s4 + $0x108] sm:$0xff]   ;;  %v3574_v13 = vld [vmem:[%s4267_s4 + $0x90] sm:$0xff]  }
  0x22   : > { %v745_v14 = vld [vmem:[#allocation2 + $0x4] sm:$0x3]  ;;  %v3582_v15 = vld [vmem:[%s4267_s4 + $0x150] sm:$0xff]   ;;  %v742_v20 = vld [vmem:[#allocation2 + $0x2] sm:$0x3] }
  0x23   : > { %2543 = vmatpush3.bf16.msra.mxu0 %v3108_v17  ;;  %v746_v16 = vsel %vm3471_vm3, 0, %v745_v14  ;;  %v3589_v17 = vld [vmem:[%s4267_s4 + $0xd8] sm:$0xff]   ;;  %v3617_v25 = vld [vmem:[%s4267_s4 + $0xe0] sm:$0xff]   ;;  %v3667_v37 = vld [vmem:[%s4267_s4 + $0xf0] sm:$0xff]  }
  0x24   : > { %2971 = vmatpush3.bf16.msra.mxu1 %v3109_v18  ;;  %2544 = vmatprep.subr.bf16.mxu0 %v3110_v19  ;;  %v3594_v18 = vld [vmem:[%s4267_s4 + $0x110] sm:$0xff]   ;;  %747 = vst [vmem:[#allocation2 + $0x4] sm:$0x3] %v746_v16  ;;  %v3600_v19 = vld [vmem:[%s4267_s4 + $0x98] sm:$0xff]   ;;  %v748_v27 = vld [vmem:[#allocation2 + $0x6] sm:$0x3] }
  0x25   : > { %2972 = vmatprep.subr.bf16.mxu1 %v4275_v2  ;;  %v794_v1 = vld [vmem:[#allocation2] sm:$0x1]  ;;  %v3622_v26 = vld [vmem:[%s4267_s4 + $0x118] sm:$0xff]   ;;  %vm3735_vm6 = vmand %vm770_vm4, %vm771_vm5 }
  0x26   : > { %v807_v5 = vrot.slane %v794_v1, %v3367_v31  ;;  %v3628_v28 = vld [vmem:[%s4267_s4 + $0xa0] sm:$0xff]   ;;  %v3701_v53 = vld [vmem:[%s4267_s4 + $0xb8] sm:$0xff]  }
  0x27   : > { %2545 = vmatpush3.bf16.msra.mxu0 %v3111_v21  ;;  %v751_v21 = vld [vmem:[#allocation2 + $0x8] sm:$0x3]  ;;  %v3638_v30 = vld [vmem:[%s4267_s4 + $0x160] sm:$0xff]   ;;  %v3707_v57 = vld [vmem:[%s4267_s4 + $0x178] sm:$0xff]  }
  0x28   : > { %2973 = vmatpush3.bf16.msra.mxu1 %v3112_v22  ;;  %2546 = vmatprep.subr.bf16.mxu0 %v3113_v23  ;;  %v809_v7 = vshrl.u32 %v807_v5, 16  ;;  %v3608_v22 = vld [vmem:[%s4267_s4 + $0x158] sm:$0xff]   ;;  %v743_v23 = vsel %vm3471_vm3, 0, %v742_v20  ;;  %v752_v24 = vsel %vm3471_vm3, 0, %v751_v21  ;;  %4340 = vst [vmem:[#allocation9_spill] sm:$0xff] %v3707_v57 }
  0x29   : > { %2974 = vmatprep.subr.bf16.mxu1 %v4275_v2  ;;  %744 = vst [vmem:[#allocation2 + $0x2] sm:$0x3] %v743_v23  ;;  %753 = vst [vmem:[#allocation2 + $0x8] sm:$0x3] %v752_v24  ;;  %v2415_v16 = vld [vmem:[%s4266_s3] ss:$0 sm:$0xff] }
  0x2b   : > { %2547 = vmatpush3.bf16.msra.mxu0 %v3114_v29  ;;  %v749_v29 = vsel %vm3471_vm3, 0, %v748_v27 }
  0x2c   : > { %2975 = vmatpush3.bf16.msra.mxu1 %v3116_v32  ;;  %2980 = vmatprep.subr.bf16.mxu0 %v4275_v2  ;;  %750 = vst [vmem:[#allocation2 + $0x6] sm:$0x3] %v749_v29  ;;  %v3643_v32 = vld [vmem:[%s4267_s4 + $0xe8] sm:$0xff]  }
  0x2d   : > { %2572 = vmatprep.subr.bf16.mxu1 %v3376_v33 }
  0x2e   : > { %575 = vmatmul.mubr.bf16.vlgmr.msra.gmra.mrb[0].mxu0 %v386_v34  ;;  %v3649_v34 = vld [vmem:[%s4267_s4 + $0x120] sm:$0xff]  }
  0x2f   : > { %2977 = vmatmul.mubr.bf16.vlgmr.msra.gmra.mrb[0].mxu1 %v393_v35  ;;  %2981 = vmatpush3.bf16.msra.mxu0 %v3117_v36  ;;  %v3654_v35 = vld [vmem:[%s4267_s4 + $0xa8] sm:$0xff]  }
  0x30   : > { %2573 = vmatpush3.bf16.msra.mxu1 %v3387_v38  ;;  %2982 = vmatprep.subr.bf16.mxu0 %v4275_v2  ;;  %v3662_v36 = vld [vmem:[%s4267_s4 + $0x168] sm:$0xff]  }
  0x31   : > { %2574 = vmatprep.subr.bf16.mxu1 %v3393_v39  ;;  %2996 = vmatprep.mubr.msk.bf16.mxu0 %vm3224_vm0, %v4275_v2 }
  0x32   : > { %1474 = vmatprep.mubr.bf16.mxu1 %v809_v7 }
  0x33   : > { %2983 = vmatpush3.bf16.msra.mxu0 %v3118_v40  ;;  %v3673_v40 = vld [vmem:[%s4267_s4 + $0x128] sm:$0xff]  }
  0x34   : > { %2575 = vmatpush3.bf16.msra.mxu1 %v3402_v41  ;;  %2984 = vmatprep.subr.bf16.mxu0 %v4275_v2  ;;  %4337 = vst [vmem:[#allocation6_spill] sm:$0xff] %v3673_v40 }
  0x35   : > { %2576 = vmatprep.subr.bf16.mxu1 %v3409_v42 }
  0x37   : > { %2985 = vmatpush3.bf16.msra.mxu0 %v3121_v43  ;;  %v3678_v43 = vld [vmem:[%s4267_s4 + $0xb0] sm:$0xff]  }
  0x38   : > { %2577 = vmatpush3.bf16.msra.mxu1 %v3420_v44  ;;  %2986 = vmatprep.subr.bf16.mxu0 %v4275_v2 }
  0x39   : > { %2578 = vmatprep.subr.bf16.mxu1 %v3427_v45 }
  0x3b   : > { %2987 = vmatpush3.bf16.msra.mxu0 %v3124_v46  ;;  %v3686_v46 = vld [vmem:[%s4267_s4 + $0x170] sm:$0xff]  }
  0x3c   : > { %2579 = vmatpush3.bf16.msra.mxu1 %v3436_v47  ;;  %2988 = vmatprep.subr.bf16.mxu0 %v4275_v2  ;;  %4338 = vst [vmem:[#allocation7_spill] sm:$0xff] %v3686_v46 }
  0x3d   : > { %2580 = vmatprep.subr.bf16.mxu1 %v3443_v48 }
  0x3f   : > { %2989 = vmatpush3.bf16.msra.mxu0 %v3127_v49  ;;  %v3691_v49 = vld [vmem:[%s4267_s4 + $0xf8] sm:$0xff]  }
  0x40   : > { %2581 = vmatpush3.bf16.msra.mxu1 %v3452_v50  ;;  %2990 = vmatprep.subr.bf16.mxu0 %v4275_v2 }
  0x41   : > { %2582 = vmatprep.subr.bf16.mxu1 %v3459_v51 }
  0x43   : > { %2991 = vmatpush3.bf16.msra.mxu0 %v3130_v52  ;;  %v3696_v52 = vld [vmem:[%s4267_s4 + $0x130] sm:$0xff]  }
  0x44   : > { %2583 = vmatpush3.bf16.msra.mxu1 %v3468_v54  ;;  %2992 = vmatprep.subr.bf16.mxu0 %v4275_v2  ;;  %4339 = vst [vmem:[#allocation8_spill] sm:$0xff] %v3696_v52 }
  0x45   : > { %2584 = vmatprep.subr.bf16.mxu1 %v3480_v56 }
  0x47   : > { %2993 = vmatpush3.bf16.msra.mxu0 %v3133_v58  ;;  %v3716_v58 = vld [vmem:[%s4267_s4 + $0x138] sm:$0xff]  }
  0x48   : > { %2585 = vmatpush3.bf16.msra.mxu1 %v3490_v59  ;;  %2994 = vmatprep.subr.bf16.mxu0 %v4275_v2  ;;  %4341 = vst [vmem:[#allocation10_spill] sm:$0xff] %v3716_v58 }
  0x49   : > { %2586 = vmatprep.subr.bf16.mxu1 %v3496_v60 }
  0x4b   : > { %2995 = vmatpush3.bf16.msra.mxu0 %v3136_v61  ;;  %v3721_v61 = vld [vmem:[%s4267_s4 + $0x1c0] sm:$0xff]  }
  0x4c   : > { %2587 = vmatpush3.bf16.msra.mxu1 %v3507_v62  ;;  %2594 = vmatprep.subr.bf16.mxu0 %v3517_v63 }
  0x4d   : > { %2616 = vmatprep.subr.bf16.mxu1 %v3522_v0 }
  0x4e   : > { %2997 = vmatmul.mubr.bf16.vlgmr.msra.gmra.mrb[4].mxu0 %v624_v3 }
  0x4f   : > { %1475 = vmatmul.mubr.bf16.vlgmr.msra.gmra.mrb[4].mxu1 %v794_v1  ;;  %2595 = vmatpush3.bf16.msra.mxu0 %v3530_v4  ;;  %v3725_v1 = vld.sshfl [vmem:[#allocation2 + $0x2] sm:$0x2 pattern:$0x76325410] }
  0x50   : > { %2617 = vmatpush3.bf16.msra.mxu1 %v3542_v8  ;;  %2596 = vmatprep.subr.bf16.mxu0 %v3536_v6  ;;  %v4277_v3 = vrot.slane %v3725_v1, 1 }
  0x51   : > { %2618 = vmatprep.subr.bf16.mxu1 %v3558_v10 }
  0x52   : > { %1554 = vmatprep.mubr.bf16.mxu1 %v4277_v3  ;;  %v3762_v3 = vld [vmem:[%s4267_s4 + $0x1c8] sm:$0xff]  }
  0x53   : > { %2597 = vmatpush3.bf16.msra.mxu0 %v3549_v9 }
  0x54   : > { %2598 = vmatprep.subr.bf16.mxu0 %v3563_v11  ;;  %2619 = vmatpush3.bf16.msra.mxu1 %v3568_v12 }
  0x55   : > { %2620 = vmatprep.subr.bf16.mxu1 %v3582_v15 }
  0x57   : > { %2599 = vmatpush3.bf16.msra.mxu0 %v3574_v13 }
  0x58   : > { %2600 = vmatprep.subr.bf16.mxu0 %v3589_v17  ;;  %2621 = vmatpush3.bf16.msra.mxu1 %v3594_v18 }
  0x59   : > { %2622 = vmatprep.subr.bf16.mxu1 %v3608_v22 }
  0x5b   : > { %2601 = vmatpush3.bf16.msra.mxu0 %v3600_v19 }
  0x5c   : > { %2602 = vmatprep.subr.bf16.mxu0 %v3617_v25  ;;  %2623 = vmatpush3.bf16.msra.mxu1 %v3622_v26 }
  0x5d   : > { %2624 = vmatprep.subr.bf16.mxu1 %v3638_v30 }
  0x5f   : > { %2603 = vmatpush3.bf16.msra.mxu0 %v3628_v28 }
  0x60   : > { %2604 = vmatprep.subr.bf16.mxu0 %v3643_v32  ;;  %2625 = vmatpush3.bf16.msra.mxu1 %v3649_v34 }
  0x61   : > { %2626 = vmatprep.subr.bf16.mxu1 %v3662_v36 }
  0x63   : > { %2605 = vmatpush3.bf16.msra.mxu0 %v3654_v35 }
  0x64   : > { %2606 = vmatprep.subr.bf16.mxu0 %v3667_v37  ;;  %2627 = vmatpush3.bf16.msra.mxu1 %v3673_v40  ;;  %v3869_v40 = vld [vmem:[%s4267_s4 + $0x228] sm:$0xff]  }
  0x65   : > { %2628 = vmatprep.subr.bf16.mxu1 %v3686_v46  ;;  %4360 = vst [vmem:[#allocation26_spill] sm:$0xff] %v3869_v40 }
  0x67   : > { %2607 = vmatpush3.bf16.msra.mxu0 %v3678_v43 }
  0x68   : > { %2608 = vmatprep.subr.bf16.mxu0 %v3691_v49  ;;  %2629 = vmatpush3.bf16.msra.mxu1 %v3696_v52 }
  0x69   : > { %2630 = vmatprep.subr.bf16.mxu1 %v3707_v57  ;;  %v777_v57 = vld [vmem:[#allocation2 + $0x4] sm:$0x1] }
  0x6b   : > { %2609 = vmatpush3.bf16.msra.mxu0 %v3701_v53 }
  0x6c   : > { %2638 = vmatprep.subr.bf16.mxu0 %v3721_v61  ;;  %2631 = vmatpush3.bf16.msra.mxu1 %v3716_v58 }
  0x6d   : > { %3000 = vmatprep.subr.bf16.mxu1 %v4275_v2 }
 0x101   : > { %v2548_v5 = vpop.f32.mrb[0].mxu0 }
 0x102   : > { %v616_v7 = vpop.f32.mrb[0].mxu1  ;;  %v2549_v14 = vpop.f32.mrb[1].mxu0 }
 0x103   : > { %v2978_v20 = vpop.f32.mrb[1].mxu1  ;;  %v2550_v21 = vadd.f32 %v2549_v14, %v2548_v5  ;;  %v2551_v23 = vpop.f32.mrb[2].mxu0  ;;  %v773_v14 = vld [vmem:[#allocation2 + $0x2] sm:$0x1] }
 0x104   : > { %v619_v24 = vpop.f32.mrb[2].mxu1  ;;  %v2552_v27 = vpop.f32.mrb[3].mxu0  ;;  %v791_v20 = vld [vmem:[#allocation2 + $0x8] sm:$0x1] }
 0x105   : > { %v2979_v29 = vpop.f32.mrb[3].mxu1  ;;  %v577_v55 = vadd.f32 %v2550_v21, %v2415_v16  ;;  %v3755_v27 = vld [vmem:[%s4267_s4 + $0x180] sm:$0xff]  }
 0x107   : > { %v617_v58 = vadd.f32 %v616_v7, %v577_v55  ;;  %v784_v7 = vld [vmem:[#allocation2 + $0x6] sm:$0x1] }
 0x109   : > { %v622_v2 = vmax.f32 %v617_v58, 0.0 }
 0x10b   : > { %v623_v52 = vpack.c.bf16 %v622_v2, %v622_v2 }
 0x10d   : > { %v764_v46 = vrot.slane %v623_v52, %v3367_v31  ;;  %v778_v5 = vsel %vm3735_vm6, %v623_v52, %v777_v57  ;;  %v2451_v52 = vld.sshfl [vmem:[#allocation2] sm:$0x2 pattern:$0x76325410] }
 0x10e   : > { %779 = vst [vmem:[#allocation2 + $0x4] sm:$0x1] %v778_v5  ;;  %v820_v24 = vrot.slane %v2451_v52, 1  ;;  %v3812_v52 = vld [vmem:[%s4267_s4 + $0x210] sm:$0xff]  }
 0x10f   : > { %v766_v16 = vshll.u32 %v764_v46, 16  ;;  %v2450_v55 = vrot.slane %v764_v46, 9  ;;  %4351 = vst [vmem:[#allocation17_spill] sm:$0xff] %v3812_v52 }
 0x111   : > { %v774_v58 = vsel %vm3735_vm6, %v766_v16, %v773_v14  ;;  %v2449_v21 = vrot.slane %v766_v16, 9  ;;  %v792_v23 = vsel %vm3735_vm6, %v2450_v55, %v791_v20  ;;  %v3772_v20 = vld [vmem:[%s4267_s4 + $0x200] sm:$0xff]   ;;  %v3779_v55 = vld [vmem:[%s4267_s4 + $0x188] sm:$0xff]  }
 0x112   : > { %775 = vst [vmem:[#allocation2 + $0x2] sm:$0x1] %v774_v58  ;;  %793 = vst [vmem:[#allocation2 + $0x8] sm:$0x1] %v792_v23  ;;  %v3791_v58 = vld [vmem:[%s4267_s4 + $0x208] sm:$0xff]   ;;  %v3800_v23 = vld [vmem:[%s4267_s4 + $0x190] sm:$0xff]  }
 0x113   : > { %v785_v2 = vsel %vm3735_vm6, %v2449_v21, %v784_v7  ;;  %4345 = vst [vmem:[#allocation12_spill] sm:$0xff] %v3772_v20  ;;  %4346 = vst [vmem:[#allocation13_spill] sm:$0xff] %v3779_v55  ;;  %v3785_v7 = vld [vmem:[%s4267_s4 + $0x1d0] sm:$0xff]   ;;  %v4349_v21 = vmov 0.0  }
 0x114   : > { %786 = vst [vmem:[#allocation2 + $0x6] sm:$0x1] %v785_v2  ;;  %4347 = vst [vmem:[#allocation14_spill] sm:$0xff] %v3785_v7  ;;  %v3806_v2 = vld [vmem:[%s4267_s4 + $0x1d8] sm:$0xff]  }
 0x115   : > { %v3748_v57 = vld [vmem:[#allocation2 + $0x4] sm:$0x1]  ;;  %4348 = vst [vmem:[#allocation15_spill] sm:$0xff] %v3791_v58  ;;  %4350 = vst [vmem:[#allocation16_spill] sm:$0xff] %v3800_v23 }
 0x116   : > { %v851_v46 = vrot.slane %v3748_v57, %v3367_v31 }
 0x118   : > { %v3767_v14 = vshrl.u32 %v851_v46, 16  ;;  %v3819_v46 = vld [vmem:[%s4267_s4 + $0x198] sm:$0xff]  }
 0x119   : > { %v3757_v29 = vld [vmem:[#allocation2 + $0x2] sm:$0x1]  ;;  %4352 = vst [vmem:[#allocation18_spill] sm:$0xff] %v3819_v46 }
 0x11a   : > { %v829_v5 = vrot.slane %v3757_v29, %v3367_v31  ;;  %1514 = vmatprep.mubr.bf16.mxu0 %v3757_v29  ;;  %4344 = vst [vmem:[#allocation11_spill] sm:$0xff] %v3767_v14 }
 0x11b   : > { %1515 = vmatmul.mubr.bf16.vlgmr.msra.gmra.mrb[8].mxu0 %v820_v24  ;;  %v3825_v24 = vld [vmem:[%s4267_s4 + $0x1e0] sm:$0xff]  }
 0x11c   : > { %v831_v16 = vshrl.u32 %v829_v5, 16  ;;  %2639 = vmatpush3.bf16.msra.mxu0 %v3755_v27  ;;  %1594 = vmatprep.mubr.bf16.mxu0 %v3767_v14  ;;  %4353 = vst [vmem:[#allocation19_spill] sm:$0xff] %v3825_v24  ;;  %v3831_v5 = vld [vmem:[%s4267_s4 + $0x218] sm:$0xff]   ;;  %v3857_v14 = vld [vmem:[%s4267_s4 + $0x1a8] sm:$0xff]  }
 0x11d   : > { %2640 = vmatprep.subr.bf16.mxu0 %v3762_v3  ;;  %4354 = vst [vmem:[#allocation20_spill] sm:$0xff] %v3831_v5  ;;  %4358 = vst [vmem:[#allocation24_spill] sm:$0xff] %v3857_v14 }
 0x11e   : > { %1555 = vmatmul.mubr.bf16.vlgmr.msra.gmra.mrb[8].mxu1 %v831_v16 }
 0x11f   : > { %3001 = vmatpush3.bf16.msra.mxu1 %v3772_v20  ;;  %3016 = vmatprep.mubr.msk.bf16.mxu1 %vm3224_vm0, %v4349_v21  ;;  %v3850_v20 = vld [vmem:[%s4267_s4 + $0x220] sm:$0xff]  }
 0x120   : > { %2641 = vmatpush3.bf16.msra.mxu0 %v3779_v55  ;;  %3002 = vmatprep.subr.bf16.mxu1 %v4349_v21  ;;  %4357 = vst [vmem:[#allocation23_spill] sm:$0xff] %v3850_v20 }
 0x121   : > { %2642 = vmatprep.subr.bf16.mxu0 %v3785_v7 }
 0x123   : > { %3003 = vmatpush3.bf16.msra.mxu1 %v3791_v58  ;;  %v3838_v58 = vld [vmem:[%s4267_s4 + $0x1a0] sm:$0xff]  }
 0x124   : > { %2643 = vmatpush3.bf16.msra.mxu0 %v3800_v23  ;;  %3004 = vmatprep.subr.bf16.mxu1 %v4349_v21  ;;  %4355 = vst [vmem:[#allocation21_spill] sm:$0xff] %v3838_v58 }
 0x125   : > { %2644 = vmatprep.subr.bf16.mxu0 %v3806_v2 }
 0x127   : > { %3005 = vmatpush3.bf16.msra.mxu1 %v3812_v52  ;;  %v3844_v52 = vld [vmem:[%s4267_s4 + $0x1e8] sm:$0xff]  }
 0x128   : > { %2645 = vmatpush3.bf16.msra.mxu0 %v3819_v46  ;;  %3006 = vmatprep.subr.bf16.mxu1 %v4349_v21  ;;  %4356 = vst [vmem:[#allocation22_spill] sm:$0xff] %v3844_v52 }
 0x129   : > { %2646 = vmatprep.subr.bf16.mxu0 %v3825_v24 }
 0x12b   : > { %3007 = vmatpush3.bf16.msra.mxu1 %v3831_v5  ;;  %v3863_v5 = vld [vmem:[%s4267_s4 + $0x1f0] sm:$0xff]  }
 0x12c   : > { %2647 = vmatpush3.bf16.msra.mxu0 %v3838_v58  ;;  %3008 = vmatprep.subr.bf16.mxu1 %v4349_v21  ;;  %4359 = vst [vmem:[#allocation25_spill] sm:$0xff] %v3863_v5  ;;  %v2453_v58 = vld.sshfl [vmem:[#allocation2 + $0x4] sm:$0x2 pattern:$0x76325410] }
 0x12d   : > { %2648 = vmatprep.subr.bf16.mxu0 %v3844_v52  ;;  %v3876_v52 = vld [vmem:[%s4267_s4 + $0x1b0] sm:$0xff]  }
 0x12e   : > { %4361 = vst [vmem:[#allocation27_spill] sm:$0xff] %v3876_v52 }
 0x12f   : > { %3009 = vmatpush3.bf16.msra.mxu1 %v3850_v20  ;;  %v3882_v20 = vld [vmem:[%s4267_s4 + $0x1f8] sm:$0xff]  }
 0x130   : > { %2649 = vmatpush3.bf16.msra.mxu0 %v3857_v14  ;;  %3010 = vmatprep.subr.bf16.mxu1 %v4349_v21  ;;  %4362 = vst [vmem:[#allocation28_spill] sm:$0xff] %v3882_v20  ;;  %v3888_v14 = vld [vmem:[%s4267_s4 + $0x230] sm:$0xff]  }
 0x131   : > { %2650 = vmatprep.subr.bf16.mxu0 %v3863_v5  ;;  %4363 = vst [vmem:[#allocation29_spill] sm:$0xff] %v3888_v14  ;;  %v3895_v5 = vld [vmem:[%s4267_s4 + $0x1b8] sm:$0xff]  }
 0x132   : > { %4364 = vst [vmem:[#allocation30_spill] sm:$0xff] %v3895_v5 }
 0x133   : > { %3011 = vmatpush3.bf16.msra.mxu1 %v3869_v40  ;;  %v3902_v40 = vld [vmem:[%s4267_s4 + $0x238] sm:$0xff]  }
 0x134   : > { %2651 = vmatpush3.bf16.msra.mxu0 %v3876_v52  ;;  %3012 = vmatprep.subr.bf16.mxu1 %v4349_v21  ;;  %v3907_v52 = vrot.slane %v2453_v58, 1 }
 0x135   : > { %2652 = vmatprep.subr.bf16.mxu0 %v3882_v20 }
 0x137   : > { %3013 = vmatpush3.bf16.msra.mxu1 %v3888_v14 }
 0x138   : > { %2653 = vmatpush3.bf16.msra.mxu0 %v3895_v5  ;;  %3014 = vmatprep.subr.bf16.mxu1 %v4349_v21 }
 0x139   : > { %2669 = vmatprep.subr.bf16.mxu0 %v3376_v33 }
 0x13b   : > { %1595 = vmatmul.mubr.bf16.vlgmr.msra.gmra.mrb[12].mxu0 %v3748_v57  ;;  %3015 = vmatpush3.bf16.msra.mxu1 %v3902_v40 }
 0x13c   : > { %2670 = vmatpush3.bf16.msra.mxu0 %v3387_v38  ;;  %1698 = vmatprep.mubr.bf16.mxu0 %v831_v16  ;;  %v3929_v16 = vpop.f32.mrb[4].mxu0 }
 0x13d   : > { %2691 = vmatprep.subr.bf16.mxu1 %v3517_v63  ;;  %2671 = vmatprep.subr.bf16.mxu0 %v3393_v39  ;;  %4365 = vst [vmem:[#allocation31_spill] sm:$0xff] %v3929_v16  ;;  %v2998_v58 = vpop.f32.mrb[5].mxu0  ;;  %v4367_v16 = vrot.slane %v3725_v1, 1 }
 0x13e   : > { %3017 = vmatmul.mubr.bf16.vlgmr.msra.gmra.mrb[12].mxu1 %v3907_v52  ;;  %v3942_v58 = vld [vmem:[#allocation2 + $0x6] sm:$0x1] }
 0x13f   : > { %2692 = vmatpush3.bf16.msra.mxu1 %v3530_v4  ;;  %1738 = vmatprep.mubr.bf16.mxu1 %v3748_v57 }
 0x140   : > { %2672 = vmatpush3.bf16.msra.mxu0 %v3402_v41  ;;  %2693 = vmatprep.subr.bf16.mxu1 %v3536_v6 }
 0x141   : > { %2673 = vmatprep.subr.bf16.mxu0 %v3409_v42 }
 0x143   : > { %2694 = vmatpush3.bf16.msra.mxu1 %v3549_v9 }
 0x144   : > { %2674 = vmatpush3.bf16.msra.mxu0 %v3420_v44  ;;  %2695 = vmatprep.subr.bf16.mxu1 %v3563_v11  ;;  %v733_v11 = vpop.f32.mrb[6].mxu0 }
 0x145   : > { %2675 = vmatprep.subr.bf16.mxu0 %v3427_v45  ;;  %v2999_v9 = vpop.f32.mrb[7].mxu0 }
 0x146   : > { %v1651_v9 = vrot.slane %v3942_v58, %v3367_v31 }
 0x147   : > { %2696 = vmatpush3.bf16.msra.mxu1 %v3574_v13 }
 0x148   : > { %2676 = vmatpush3.bf16.msra.mxu0 %v3436_v47  ;;  %2697 = vmatprep.subr.bf16.mxu1 %v3589_v17  ;;  %v3955_v11 = vshrl.u32 %v1651_v9, 16 }
 0x149   : > { %2677 = vmatprep.subr.bf16.mxu0 %v3443_v48 }
 0x14a   : > { %4366 = vst [vmem:[#allocation32_spill] sm:$0xff] %v3955_v11 }
 0x14b   : > { %2698 = vmatpush3.bf16.msra.mxu1 %v3600_v19 }
 0x14c   : > { %2678 = vmatpush3.bf16.msra.mxu0 %v3452_v50  ;;  %2699 = vmatprep.subr.bf16.mxu1 %v3617_v25 }
 0x14d   : > { %2679 = vmatprep.subr.bf16.mxu0 %v3459_v51 }
 0x14f   : > { %2700 = vmatpush3.bf16.msra.mxu1 %v3628_v28 }
 0x150   : > { %2680 = vmatpush3.bf16.msra.mxu0 %v3468_v54  ;;  %2701 = vmatprep.subr.bf16.mxu1 %v3643_v32 }
 0x151   : > { %2681 = vmatprep.subr.bf16.mxu0 %v3480_v56 }
 0x153   : > { %2702 = vmatpush3.bf16.msra.mxu1 %v3654_v35 }
 0x154   : > { %2682 = vmatpush3.bf16.msra.mxu0 %v3490_v59  ;;  %2703 = vmatprep.subr.bf16.mxu1 %v3667_v37 }
 0x155   : > { %2683 = vmatprep.subr.bf16.mxu0 %v3496_v60 }
 0x157   : > { %2704 = vmatpush3.bf16.msra.mxu1 %v3678_v43 }
 0x158   : > { %2684 = vmatpush3.bf16.msra.mxu0 %v3507_v62  ;;  %2705 = vmatprep.subr.bf16.mxu1 %v3691_v49 }
 0x159   : > { %2713 = vmatprep.subr.bf16.mxu0 %v3522_v0 }
 0x15b   : > { %1699 = vmatmul.mubr.bf16.vlgmr.msra.gmra.mrb[16].mxu0 %v3757_v29  ;;  %2706 = vmatpush3.bf16.msra.mxu1 %v3701_v53  ;;  %v2588_v29 = vpop.f32.mrb[4].mxu1 }
 0x15c   : > { %2714 = vmatpush3.bf16.msra.mxu0 %v3542_v8  ;;  %2735 = vmatprep.subr.bf16.mxu1 %v3721_v61  ;;  %v2589_v1 = vpop.f32.mrb[5].mxu1 }
 0x15d   : > { %2715 = vmatprep.subr.bf16.mxu0 %v3558_v10  ;;  %1778 = vmatprep.mubr.bf16.mxu0 %v3907_v52  ;;  %v2591_v9 = vpop.f32.mrb[6].mxu1 }
 0x15e   : > { %1739 = vmatmul.mubr.bf16.vlgmr.msra.gmra.mrb[16].mxu1 %v4367_v16  ;;  %v3972_v16 = vadd.f32 %v2589_v1, %v2588_v29  ;;  %v4372_v29 = vld [vmem:[#allocation7_spill] sm:$0xff]  ;;  %v4373_v1 = vld [vmem:[#allocation24_spill] sm:$0xff] }
 0x15f   : > { %2736 = vmatpush3.bf16.msra.mxu1 %v3755_v27  ;;  %1818 = vmatprep.mubr.bf16.mxu1 %v3955_v11  ;;  %v4371_v11 = vld [vmem:[#allocation22_spill] sm:$0xff]  ;;  %v4374_v9 = vld [vmem:[#allocation8_spill] sm:$0xff] }
 0x160   : > { %2716 = vmatpush3.bf16.msra.mxu0 %v3568_v12  ;;  %2737 = vmatprep.subr.bf16.mxu1 %v3762_v3  ;;  %4368 = vst [vmem:[#allocation33_spill] sm:$0xff] %v3972_v16  ;;  %v4376_v16 = vld [vmem:[#allocation9_spill] sm:$0xff] }
 0x161   : > { %2717 = vmatprep.subr.bf16.mxu0 %v3582_v15 }
 0x163   : > { %2738 = vmatpush3.bf16.msra.mxu1 %v3779_v55  ;;  %v2592_v55 = vpop.f32.mrb[7].mxu1 }
 0x164   : > { %2718 = vmatpush3.bf16.msra.mxu0 %v3594_v18  ;;  %2739 = vmatprep.subr.bf16.mxu1 %v3785_v7  ;;  %v4370_v7 = vld [vmem:[#allocation6_spill] sm:$0xff]  ;;  %v4375_v55 = vld [vmem:[#allocation25_spill] sm:$0xff] }
 0x165   : > { %2719 = vmatprep.subr.bf16.mxu0 %v3608_v22 }
 0x167   : > { %2740 = vmatpush3.bf16.msra.mxu1 %v3800_v23  ;;  %v4369_v23 = vld [vmem:[#allocation21_spill] sm:$0xff] }
 0x168   : > { %2720 = vmatpush3.bf16.msra.mxu0 %v3622_v26  ;;  %2741 = vmatprep.subr.bf16.mxu1 %v3806_v2 }
 0x169   : > { %2721 = vmatprep.subr.bf16.mxu0 %v3638_v30 }
 0x16b   : > { %2742 = vmatpush3.bf16.msra.mxu1 %v3819_v46  ;;  %v4377_v46 = vld [vmem:[#allocation27_spill] sm:$0xff] }
 0x16c   : > { %2722 = vmatpush3.bf16.msra.mxu0 %v3649_v34  ;;  %2743 = vmatprep.subr.bf16.mxu1 %v3825_v24  ;;  %v4378_v24 = vld [vmem:[#allocation10_spill] sm:$0xff] }
 0x16d   : > { %2723 = vmatprep.subr.bf16.mxu0 %v3662_v36 }
 0x16f   : > { %2744 = vmatpush3.bf16.msra.mxu1 %v4369_v23  ;;  %v4379_v23 = vld [vmem:[#allocation11_spill] sm:$0xff] }
 0x170   : > { %2724 = vmatpush3.bf16.msra.mxu0 %v4370_v7  ;;  %2745 = vmatprep.subr.bf16.mxu1 %v4371_v11  ;;  %v4380_v11 = vld [vmem:[#allocation12_spill] sm:$0xff] }
 0x171   : > { %2725 = vmatprep.subr.bf16.mxu0 %v4372_v29 }
 0x173   : > { %2746 = vmatpush3.bf16.msra.mxu1 %v4373_v1 }
 0x174   : > { %2726 = vmatpush3.bf16.msra.mxu0 %v4374_v9  ;;  %2747 = vmatprep.subr.bf16.mxu1 %v4375_v55 }
 0x175   : > { %2727 = vmatprep.subr.bf16.mxu0 %v4376_v16 }
 0x177   : > { %2748 = vmatpush3.bf16.msra.mxu1 %v4377_v46 }
 0x178   : > { %2728 = vmatpush3.bf16.msra.mxu0 %v4378_v24  ;;  %2749 = vmatprep.subr.bf16.mxu1 %v3882_v20  ;;  %v4381_v20 = vld [vmem:[#allocation15_spill] sm:$0xff] }
 0x179   : > { %3020 = vmatprep.subr.bf16.mxu0 %v4349_v21 }
 0x17b   : > { %1779 = vmatmul.mubr.bf16.vlgmr.msra.gmra.mrb[20].mxu0 %v4379_v23  ;;  %2750 = vmatpush3.bf16.msra.mxu1 %v3895_v5  ;;  %v4383_v5 = vld [vmem:[#allocation20_spill] sm:$0xff] }
 0x17c   : > { %3021 = vmatpush3.bf16.msra.mxu0 %v4380_v11  ;;  %2766 = vmatprep.subr.bf16.mxu1 %v3376_v33  ;;  %v4382_v33 = vld [vmem:[#allocation17_spill] sm:$0xff] }
 0x17d   : > { %3022 = vmatprep.subr.bf16.mxu0 %v4349_v21  ;;  %3036 = vmatprep.mubr.msk.bf16.mxu0 %vm3224_vm0, %v4349_v21 }
 0x17e   : > { %1819 = vmatmul.mubr.bf16.vlgmr.msra.gmra.mrb[20].mxu1 %v3942_v58 }
 0x17f   : > { %2767 = vmatpush3.bf16.msra.mxu1 %v3387_v38  ;;  %1922 = vmatprep.mubr.bf16.mxu1 %v4379_v23  ;;  %v4384_v38 = vld [vmem:[#allocation23_spill] sm:$0xff]  ;;  %v4395_v23 = vld [vmem:[#allocation21_spill] sm:$0xff] }
 0x180   : > { %3023 = vmatpush3.bf16.msra.mxu0 %v4381_v20  ;;  %2768 = vmatprep.subr.bf16.mxu1 %v3393_v39  ;;  %v754_v39 = vld [vmem:[#allocation2 + $0xa] sm:$0x3] }
 0x181   : > { %3024 = vmatprep.subr.bf16.mxu0 %v4349_v21 }
 0x183   : > { %2769 = vmatpush3.bf16.msra.mxu1 %v3402_v41  ;;  %v4385_v41 = vld [vmem:[#allocation26_spill] sm:$0xff] }
 0x184   : > { %3025 = vmatpush3.bf16.msra.mxu0 %v4382_v33  ;;  %2770 = vmatprep.subr.bf16.mxu1 %v3409_v42  ;;  %v4105_v42 = vld.sshfl [vmem:[#allocation2 + $0x8] sm:$0x2 pattern:$0x76325410] }
 0x185   : > { %3026 = vmatprep.subr.bf16.mxu0 %v4349_v21 }
 0x187   : > { %2771 = vmatpush3.bf16.msra.mxu1 %v3420_v44  ;;  %v755_v44 = vsel %vm3471_vm3, 0, %v754_v39  ;;  %v4397_v39 = vld [vmem:[#allocation28_spill] sm:$0xff] }
 0x188   : > { %3027 = vmatpush3.bf16.msra.mxu0 %v4383_v5  ;;  %2772 = vmatprep.subr.bf16.mxu1 %v3427_v45  ;;  %756 = vst [vmem:[#allocation2 + $0xa] sm:$0x3] %v755_v44  ;;  %v2526_v45 = vld.sshfl [vmem:[#allocation2 + $0x6] sm:$0x2 pattern:$0x76325410] }
 0x189   : > { %3028 = vmatprep.subr.bf16.mxu0 %v4349_v21  ;;  %v4398_v44 = vld [vmem:[#allocation30_spill] sm:$0xff] }
 0x18b   : > { %2773 = vmatpush3.bf16.msra.mxu1 %v3436_v47  ;;  %v4027_v47 = vrot.slane %v2526_v45, 1  ;;  %v3197_v45 = vld [vmem:[%s4267_s4 + $0x40] sm:$0xff]  }
 0x18c   : > { %3029 = vmatpush3.bf16.msra.mxu0 %v4384_v38  ;;  %2774 = vmatprep.subr.bf16.mxu1 %v3443_v48  ;;  %v4387_v48 = vld [vmem:[#allocation4_spill] sm:$0xff] }
 0x18d   : > { %3030 = vmatprep.subr.bf16.mxu0 %v4349_v21 }
 0x18f   : > { %2775 = vmatpush3.bf16.msra.mxu1 %v3452_v50  ;;  %v4388_v50 = vld [vmem:[#allocation5_spill] sm:$0xff] }
 0x190   : > { %3031 = vmatpush3.bf16.msra.mxu0 %v4385_v41  ;;  %2776 = vmatprep.subr.bf16.mxu1 %v3459_v51  ;;  %v1866_v51 = vld [vmem:[#allocation2 + $0x8] sm:$0x1] }
 0x191   : > { %3032 = vmatprep.subr.bf16.mxu0 %v4349_v21 }
 0x193   : > { %2777 = vmatpush3.bf16.msra.mxu1 %v3468_v54  ;;  %v1875_v54 = vrot.slane %v1866_v51, %v3367_v31 }
 0x194   : > { %3033 = vmatpush3.bf16.msra.mxu0 %v3888_v14  ;;  %2778 = vmatprep.subr.bf16.mxu1 %v3480_v56 }
 0x195   : > { %3034 = vmatprep.subr.bf16.mxu0 %v4349_v21  ;;  %v4069_v56 = vshrl.u32 %v1875_v54, 16  ;;  %v1888_v54 = vrot.slane %v4105_v42, 1 }
 0x197   : > { %2779 = vmatpush3.bf16.msra.mxu1 %v3490_v59  ;;  %v4389_v59 = vld [vmem:[#allocation32_spill] sm:$0xff] }
 0x198   : > { %3035 = vmatpush3.bf16.msra.mxu0 %v3902_v40  ;;  %2780 = vmatprep.subr.bf16.mxu1 %v3496_v60  ;;  %v4390_v60 = vld [vmem:[#allocation13_spill] sm:$0xff] }
 0x199   : > { %2788 = vmatprep.subr.bf16.mxu0 %v3517_v63 }
 0x19b   : > { %3037 = vmatmul.mubr.bf16.vlgmr.msra.gmra.mrb[24].mxu0 %v4027_v47  ;;  %2781 = vmatpush3.bf16.msra.mxu1 %v3507_v62  ;;  %v4391_v62 = vld [vmem:[#allocation14_spill] sm:$0xff] }
 0x19c   : > { %2789 = vmatpush3.bf16.msra.mxu0 %v3530_v4  ;;  %1962 = vmatprep.mubr.bf16.mxu0 %v3942_v58 }
 0x19d   : > { %2810 = vmatprep.subr.bf16.mxu1 %v3522_v0  ;;  %2790 = vmatprep.subr.bf16.mxu0 %v3536_v6  ;;  %v4392_v0 = vld [vmem:[#allocation16_spill] sm:$0xff] }
 0x19e   : > { %1923 = vmatmul.mubr.bf16.vlgmr.msra.gmra.mrb[24].mxu1 %v3748_v57  ;;  %v4394_v57 = vld [vmem:[#allocation19_spill] sm:$0xff] }
 0x19f   : > { %2811 = vmatpush3.bf16.msra.mxu1 %v3542_v8  ;;  %2002 = vmatprep.mubr.bf16.mxu1 %v4027_v47  ;;  %v4393_v8 = vld [vmem:[#allocation18_spill] sm:$0xff] }
 0x1a0   : > { %2791 = vmatpush3.bf16.msra.mxu0 %v4387_v48  ;;  %2812 = vmatprep.subr.bf16.mxu1 %v3558_v10 }
 0x1a1   : > { %2792 = vmatprep.subr.bf16.mxu0 %v4388_v50 }
 0x1a3   : > { %2813 = vmatpush3.bf16.msra.mxu1 %v3568_v12 }
 0x1a4   : > { %2793 = vmatpush3.bf16.msra.mxu0 %v3574_v13  ;;  %2814 = vmatprep.subr.bf16.mxu1 %v3582_v15 }
 0x1a5   : > { %2794 = vmatprep.subr.bf16.mxu0 %v3589_v17 }
 0x1a7   : > { %2815 = vmatpush3.bf16.msra.mxu1 %v3594_v18 }
 0x1a8   : > { %2795 = vmatpush3.bf16.msra.mxu0 %v3600_v19  ;;  %2816 = vmatprep.subr.bf16.mxu1 %v3608_v22 }
 0x1a9   : > { %2796 = vmatprep.subr.bf16.mxu0 %v3617_v25 }
 0x1ab   : > { %2817 = vmatpush3.bf16.msra.mxu1 %v3622_v26 }
 0x1ac   : > { %2797 = vmatpush3.bf16.msra.mxu0 %v3628_v28  ;;  %2818 = vmatprep.subr.bf16.mxu1 %v3638_v30 }
 0x1ad   : > { %2798 = vmatprep.subr.bf16.mxu0 %v3643_v32 }
 0x1af   : > { %2819 = vmatpush3.bf16.msra.mxu1 %v3649_v34 }
 0x1b0   : > { %2799 = vmatpush3.bf16.msra.mxu0 %v3654_v35  ;;  %2820 = vmatprep.subr.bf16.mxu1 %v3662_v36 }
 0x1b1   : > { %2800 = vmatprep.subr.bf16.mxu0 %v3667_v37 }
 0x1b3   : > { %2821 = vmatpush3.bf16.msra.mxu1 %v4370_v7 }
 0x1b4   : > { %2801 = vmatpush3.bf16.msra.mxu0 %v3678_v43  ;;  %2822 = vmatprep.subr.bf16.mxu1 %v4372_v29 }
 0x1b5   : > { %2802 = vmatprep.subr.bf16.mxu0 %v3691_v49 }
 0x1b7   : > { %2823 = vmatpush3.bf16.msra.mxu1 %v4374_v9 }
 0x1b8   : > { %2803 = vmatpush3.bf16.msra.mxu0 %v3701_v53  ;;  %2824 = vmatprep.subr.bf16.mxu1 %v4376_v16 }
 0x1b9   : > { %2832 = vmatprep.subr.bf16.mxu0 %v3721_v61 }
 0x1bb   : > { %1963 = vmatmul.mubr.bf16.vlgmr.msra.gmra.mrb[28].mxu0 %v3907_v52  ;;  %2825 = vmatpush3.bf16.msra.mxu1 %v4378_v24  ;;  %v4396_v52 = vld [vmem:[#allocation22_spill] sm:$0xff] }
 0x1bc   : > { %2833 = vmatpush3.bf16.msra.mxu0 %v3755_v27  ;;  %2042 = vmatprep.mubr.bf16.mxu0 %v4069_v56 }
 0x1bd   : > { %3040 = vmatprep.subr.bf16.mxu1 %v4349_v21  ;;  %2834 = vmatprep.subr.bf16.mxu0 %v3762_v3 }
 0x1be   : > { %2003 = vmatmul.mubr.bf16.vlgmr.msra.gmra.mrb[28].mxu1 %v4389_v59 }
 0x1bf   : > { %3041 = vmatpush3.bf16.msra.mxu1 %v4380_v11  ;;  %3056 = vmatprep.mubr.msk.bf16.mxu1 %vm3224_vm0, %v4349_v21 }
 0x1c0   : > { %2835 = vmatpush3.bf16.msra.mxu0 %v4390_v60  ;;  %3042 = vmatprep.subr.bf16.mxu1 %v4349_v21 }
 0x1c1   : > { %2836 = vmatprep.subr.bf16.mxu0 %v4391_v62 }
 0x1c3   : > { %3043 = vmatpush3.bf16.msra.mxu1 %v4381_v20 }
 0x1c4   : > { %2837 = vmatpush3.bf16.msra.mxu0 %v4392_v0  ;;  %3044 = vmatprep.subr.bf16.mxu1 %v4349_v21 }
 0x1c5   : > { %2838 = vmatprep.subr.bf16.mxu0 %v3806_v2 }
 0x1c7   : > { %3045 = vmatpush3.bf16.msra.mxu1 %v4382_v33 }
 0x1c8   : > { %2839 = vmatpush3.bf16.msra.mxu0 %v4393_v8  ;;  %3046 = vmatprep.subr.bf16.mxu1 %v4349_v21 }
 0x1c9   : > { %2840 = vmatprep.subr.bf16.mxu0 %v4394_v57 }
 0x1cb   : > { %3047 = vmatpush3.bf16.msra.mxu1 %v4383_v5 }
 0x1cc   : > { %2841 = vmatpush3.bf16.msra.mxu0 %v4395_v23  ;;  %3048 = vmatprep.subr.bf16.mxu1 %v4349_v21 }
 0x1cd   : > { %2842 = vmatprep.subr.bf16.mxu0 %v4396_v52 }
 0x1cf   : > { %3049 = vmatpush3.bf16.msra.mxu1 %v4384_v38 }
 0x1d0   : > { %2843 = vmatpush3.bf16.msra.mxu0 %v4373_v1  ;;  %3050 = vmatprep.subr.bf16.mxu1 %v4349_v21 }
 0x1d1   : > { %2844 = vmatprep.subr.bf16.mxu0 %v4375_v55 }
 0x1d3   : > { %3051 = vmatpush3.bf16.msra.mxu1 %v4385_v41  ;;  %v3199_v41 = vld [vmem:[%s4267_s4 + $0x48] sm:$0xff]  }
 0x1d4   : > { %2845 = vmatpush3.bf16.msra.mxu0 %v4377_v46  ;;  %3052 = vmatprep.subr.bf16.mxu1 %v4349_v21 }
 0x1d5   : > { %2846 = vmatprep.subr.bf16.mxu0 %v4397_v39 }
 0x1d7   : > { %3053 = vmatpush3.bf16.msra.mxu1 %v3888_v14  ;;  %v3198_v14 = vld [vmem:[%s4267_s4] sm:$0xff]  }
 0x1d8   : > { %2847 = vmatpush3.bf16.msra.mxu0 %v4398_v44  ;;  %3054 = vmatprep.subr.bf16.mxu1 %v4349_v21 }
 0x1d9   : > { %2863 = vmatprep.subr.bf16.mxu0 %v3197_v45  ;;  %v3200_v45 = vld [vmem:[%s4267_s4 + $0x8] sm:$0xff]  }
 0x1db   : > { %2043 = vmatmul.mubr.bf16.vlgmr.msra.gmra.mrb[32].mxu0 %v1866_v51  ;;  %3055 = vmatpush3.bf16.msra.mxu1 %v3902_v40 }
 0x1dc   : > { %2864 = vmatpush3.bf16.msra.mxu0 %v3198_v14  ;;  %2147 = vmatprep.mubr.bf16.mxu0 %v4389_v59  ;;  %v3202_v14 = vld [vmem:[%s4267_s4 + $0x10] sm:$0xff]  }
 0x1dd   : > { %2885 = vmatprep.subr.bf16.mxu1 %v3517_v63  ;;  %2865 = vmatprep.subr.bf16.mxu0 %v3199_v41  ;;  %v3201_v63 = vld [vmem:[%s4267_s4 + $0x50] sm:$0xff]   ;;  %v3205_v41 = vld [vmem:[%s4267_s4 + $0x60] sm:$0xff]  }
 0x1de   : > { %3057 = vmatmul.mubr.bf16.vlgmr.msra.gmra.mrb[32].mxu1 %v1888_v54 }
 0x1df   : > { %2886 = vmatpush3.bf16.msra.mxu1 %v3530_v4  ;;  %2187 = vmatprep.mubr.bf16.mxu1 %v1866_v51  ;;  %v3203_v4 = vld [vmem:[%s4267_s4 + $0x58] sm:$0xff]  }
 0x1e0   : > { %2866 = vmatpush3.bf16.msra.mxu0 %v3200_v45  ;;  %2887 = vmatprep.subr.bf16.mxu1 %v3536_v6  ;;  %v3204_v6 = vld [vmem:[%s4267_s4 + $0x18] sm:$0xff]  }
 0x1e1   : > { %2867 = vmatprep.subr.bf16.mxu0 %v3201_v63  ;;  %v3209_v63 = vld [vmem:[%s4267_s4 + $0x70] sm:$0xff]  }
 0x1e3   : > { %2888 = vmatpush3.bf16.msra.mxu1 %v4387_v48  ;;  %v3206_v48 = vld [vmem:[%s4267_s4 + $0x20] sm:$0xff]  }
 0x1e4   : > { %2868 = vmatpush3.bf16.msra.mxu0 %v3202_v14  ;;  %2889 = vmatprep.subr.bf16.mxu1 %v4388_v50  ;;  %v4399_v14 = vld [vmem:[#allocation33_spill] sm:$0xff] }
 0x1e5   : > { %2869 = vmatprep.subr.bf16.mxu0 %v3203_v4 }
 0x1e7   : > { %2890 = vmatpush3.bf16.msra.mxu1 %v3574_v13  ;;  %v3207_v13 = vld [vmem:[%s4267_s4 + $0x68] sm:$0xff]  }
 0x1e8   : > { %2870 = vmatpush3.bf16.msra.mxu0 %v3204_v6  ;;  %2891 = vmatprep.subr.bf16.mxu1 %v3589_v17 }
 0x1e9   : > { %2871 = vmatprep.subr.bf16.mxu0 %v3205_v41 }
 0x1eb   : > { %2892 = vmatpush3.bf16.msra.mxu1 %v3600_v19  ;;  %v3208_v19 = vld [vmem:[%s4267_s4 + $0x28] sm:$0xff]  }
 0x1ec   : > { %2872 = vmatpush3.bf16.msra.mxu0 %v3206_v48  ;;  %2893 = vmatprep.subr.bf16.mxu1 %v3617_v25  ;;  %v3210_v48 = vld [vmem:[%s4267_s4 + $0x30] sm:$0xff]  }
 0x1ed   : > { %2873 = vmatprep.subr.bf16.mxu0 %v3207_v13  ;;  %v4170_v13 = vld [vmem:[#allocation2 + $0xa] sm:$0x1] }
 0x1ee   : > { %v2610_v17 = vpop.f32.mrb[8].mxu0 }
 0x1ef   : > { %2894 = vmatpush3.bf16.msra.mxu1 %v3628_v28  ;;  %v2611_v50 = vpop.f32.mrb[9].mxu0 }
 0x1f0   : > { %v2612_v51 = vadd.f32 %v2611_v50, %v2610_v17  ;;  %2874 = vmatpush3.bf16.msra.mxu0 %v3208_v19  ;;  %v2613_v59 = vpop.f32.mrb[10].mxu0  ;;  %2895 = vmatprep.subr.bf16.mxu1 %v3643_v32  ;;  %v3211_v50 = vld [vmem:[%s4267_s4 + $0x78] sm:$0xff]  }
 0x1f1   : > { %v2614_v45 = vpop.f32.mrb[11].mxu0  ;;  %v2632_v25 = vpop.f32.mrb[8].mxu1  ;;  %2875 = vmatprep.subr.bf16.mxu0 %v3209_v63 }
 0x1f2   : > { %v1517_v4 = vadd.f32 %v2612_v51, %v4399_v14  ;;  %v2633_v28 = vpop.f32.mrb[9].mxu1  ;;  %v3212_v51 = vld [vmem:[%s4267_s4 + $0x38] sm:$0xff]  }
 0x1f3   : > { %v2634_v6 = vadd.f32 %v2633_v28, %v2632_v25  ;;  %2896 = vmatpush3.bf16.msra.mxu1 %v3654_v35  ;;  %v2635_v41 = vpop.f32.mrb[10].mxu1  ;;  %v2100_v35 = vrot.slane %v4170_v13, %v3367_v31  ;;  %v3214_v31 = vld [vmem:[%s4267_s4 + $0x100] sm:$0xff]  }
 0x1f4   : > { %2876 = vmatpush3.bf16.msra.mxu0 %v3210_v48  ;;  %v2636_v32 = vpop.f32.mrb[11].mxu1  ;;  %2897 = vmatprep.subr.bf16.mxu1 %v3667_v37  ;;  %v3213_v37 = vld [vmem:[%s4267_s4 + $0x140] sm:$0xff]  }
 0x1f5   : > { %v1557_v17 = vadd.f32 %v2634_v6, %v1517_v4  ;;  %2877 = vmatprep.subr.bf16.mxu0 %v3211_v50 }
 0x1f7   : > { %2898 = vmatpush3.bf16.msra.mxu1 %v3678_v43  ;;  %v2102_v43 = vshrl.u32 %v2100_v35, 16 }
 0x1f8   : > { %2878 = vmatpush3.bf16.msra.mxu0 %v3212_v51  ;;  %2899 = vmatprep.subr.bf16.mxu1 %v3691_v49 }
 0x1f9   : > { %2907 = vmatprep.subr.bf16.mxu0 %v3213_v37 }
 0x1fb   : > { %2148 = vmatmul.mubr.bf16.vlgmr.msra.gmra.mrb[36].mxu0 %v3942_v58  ;;  %2900 = vmatpush3.bf16.msra.mxu1 %v3701_v53 }
 0x1fc   : > { %2908 = vmatpush3.bf16.msra.mxu0 %v3214_v31  ;;  %2929 = vmatprep.subr.bf16.mxu1 %v3721_v61 }
 0x1fd   : > { %2909 = vmatprep.subr.bf16.mxu0 %v3558_v10  ;;  %2227 = vmatprep.mubr.bf16.mxu0 %v1888_v54 }
 0x1fe   : > { %2188 = vmatmul.mubr.bf16.vlgmr.msra.gmra.mrb[36].mxu1 %v4027_v47 }
 0x1ff   : > { %2930 = vmatpush3.bf16.msra.mxu1 %v3755_v27  ;;  %2267 = vmatprep.mubr.bf16.mxu1 %v2102_v43 }
 0x200   : > { %2910 = vmatpush3.bf16.msra.mxu0 %v3568_v12  ;;  %2931 = vmatprep.subr.bf16.mxu1 %v3762_v3 }
 0x201   : > { %2911 = vmatprep.subr.bf16.mxu0 %v3582_v15 }
 0x203   : > { %2932 = vmatpush3.bf16.msra.mxu1 %v4390_v60 }
 0x204   : > { %2912 = vmatpush3.bf16.msra.mxu0 %v3594_v18  ;;  %2933 = vmatprep.subr.bf16.mxu1 %v4391_v62 }
 0x205   : > { %2913 = vmatprep.subr.bf16.mxu0 %v3608_v22 }
 0x207   : > { %2934 = vmatpush3.bf16.msra.mxu1 %v4392_v0 }
 0x208   : > { %2914 = vmatpush3.bf16.msra.mxu0 %v3622_v26  ;;  %2935 = vmatprep.subr.bf16.mxu1 %v3806_v2  ;;  %v4400_v2 = vld [vmem:[#allocation26_spill] sm:$0xff] }
 0x209   : > { %2915 = vmatprep.subr.bf16.mxu0 %v3638_v30 }
 0x20b   : > { %2936 = vmatpush3.bf16.msra.mxu1 %v4393_v8 }
 0x20c   : > { %2916 = vmatpush3.bf16.msra.mxu0 %v3649_v34  ;;  %2937 = vmatprep.subr.bf16.mxu1 %v4394_v57 }
 0x20d   : > { %2917 = vmatprep.subr.bf16.mxu0 %v3662_v36 }
 0x20e   : > { %v2654_v10 = vpop.f32.mrb[12].mxu0 }
 0x20f   : > { %v2655_v12 = vpop.f32.mrb[13].mxu0  ;;  %2938 = vmatpush3.bf16.msra.mxu1 %v4395_v23 }
 0x210   : > { %v2656_v15 = vadd.f32 %v2655_v12, %v2654_v10  ;;  %v2657_v18 = vpop.f32.mrb[14].mxu0  ;;  %2918 = vmatpush3.bf16.msra.mxu0 %v4370_v7  ;;  %2939 = vmatprep.subr.bf16.mxu1 %v4396_v52 }
 0x211   : > { %v2658_v22 = vpop.f32.mrb[15].mxu0  ;;  %v1636_v26 = vpop.f32.mrb[12].mxu1  ;;  %2919 = vmatprep.subr.bf16.mxu0 %v4372_v29 }
 0x212   : > { %v1597_v30 = vadd.f32 %v2656_v15, %v1557_v17  ;;  %v3018_v34 = vpop.f32.mrb[13].mxu1 }
 0x213   : > { %2940 = vmatpush3.bf16.msra.mxu1 %v4373_v1  ;;  %v1639_v49 = vpop.f32.mrb[14].mxu1 }
 0x214   : > { %v4216_v36 = vadd.f32 %v1636_v26, %v1597_v30  ;;  %2920 = vmatpush3.bf16.msra.mxu0 %v4374_v9  ;;  %2941 = vmatprep.subr.bf16.mxu1 %v4375_v55  ;;  %v3019_v53 = vpop.f32.mrb[15].mxu1 }
 0x215   : > { %2921 = vmatprep.subr.bf16.mxu0 %v4376_v16  ;;  %v2528_v16 = vld.sshfl [vmem:[#allocation2 + $0xa] sm:$0x2 pattern:$0x76325410] }
 0x216   : > { %v2113_v9 = vrot.slane %v2528_v16, 1 }
 0x217   : > { %2942 = vmatpush3.bf16.msra.mxu1 %v4377_v46 }
 0x218   : > { %2922 = vmatpush3.bf16.msra.mxu0 %v4378_v24  ;;  %2943 = vmatprep.subr.bf16.mxu1 %v4397_v39 }
 0x219   : > { %3060 = vmatprep.subr.bf16.mxu0 %v4349_v21 }
 0x21b   : > { %2228 = vmatmul.mubr.bf16.vlgmr.msra.gmra.mrb[40].mxu0 %v4069_v56  ;;  %2944 = vmatpush3.bf16.msra.mxu1 %v4398_v44 }
 0x21c   : > { %3061 = vmatpush3.bf16.msra.mxu0 %v4380_v11  ;;  %3076 = vmatprep.mubr.msk.bf16.mxu0 %vm3224_vm0, %v4349_v21 }
 0x21d   : > { %3062 = vmatprep.subr.bf16.mxu0 %v4349_v21 }
 0x21e   : > { %2268 = vmatmul.mubr.bf16.vlgmr.msra.gmra.mrb[40].mxu1 %v4170_v13 }
 0x220   : > { %3063 = vmatpush3.bf16.msra.mxu0 %v4381_v20 }
 0x221   : > { %3064 = vmatprep.subr.bf16.mxu0 %v4349_v21 }
 0x224   : > { %3065 = vmatpush3.bf16.msra.mxu0 %v4382_v33 }
 0x225   : > { %3066 = vmatprep.subr.bf16.mxu0 %v4349_v21 }
 0x228   : > { %3067 = vmatpush3.bf16.msra.mxu0 %v4383_v5  ;;  %v4401_v5 = vld [vmem:[#allocation29_spill] sm:$0xff] }
 0x229   : > { %3068 = vmatprep.subr.bf16.mxu0 %v4349_v21 }
 0x22c   : > { %3069 = vmatpush3.bf16.msra.mxu0 %v4384_v38 }
 0x22d   : > { %3070 = vmatprep.subr.bf16.mxu0 %v4349_v21 }
 0x22e   : > { %v2685_v61 = vpop.f32.mrb[16].mxu0 }
 0x22f   : > { %v2686_v27 = vpop.f32.mrb[17].mxu0 }
 0x230   : > { %v2687_v3 = vadd.f32 %v2686_v27, %v2685_v61  ;;  %v2688_v7 = vpop.f32.mrb[18].mxu0  ;;  %3071 = vmatpush3.bf16.msra.mxu0 %v4400_v2 }
 0x231   : > { %v2689_v20 = vpop.f32.mrb[19].mxu0  ;;  %v2707_v46 = vpop.f32.mrb[16].mxu1  ;;  %3072 = vmatprep.subr.bf16.mxu0 %v4349_v21 }
 0x232   : > { %v2708_v24 = vpop.f32.mrb[17].mxu1 }
 0x233   : > { %v2709_v58 = vadd.f32 %v2708_v24, %v2707_v46  ;;  %v2710_v11 = vpop.f32.mrb[18].mxu1 }
 0x234   : > { %3073 = vmatpush3.bf16.msra.mxu0 %v4401_v5  ;;  %v2711_v29 = vpop.f32.mrb[19].mxu1 }
 0x235   : > { %v1741_v1 = vadd.f32 %v2709_v58, %v2687_v3  ;;  %3074 = vmatprep.subr.bf16.mxu0 %v4349_v21 }
 0x238   : > { %3075 = vmatpush3.bf16.msra.mxu0 %v3902_v40 }
 0x23b   : > { %3077 = vmatmul.mubr.bf16.vlgmr.msra.gmra.mrb[44].mxu0 %v2113_v9 }
 0x24e   : > { %v2729_v55 = vpop.f32.mrb[20].mxu0 }
 0x24f   : > { %v2730_v33 = vpop.f32.mrb[21].mxu0 }
 0x250   : > { %v2731_v38 = vadd.f32 %v2730_v33, %v2729_v55  ;;  %v2732_v47 = vpop.f32.mrb[22].mxu0 }
 0x251   : > { %v2733_v56 = vpop.f32.mrb[23].mxu0  ;;  %v2751_v60 = vpop.f32.mrb[20].mxu1 }
 0x252   : > { %v1781_v62 = vadd.f32 %v2731_v38, %v1741_v1  ;;  %v2752_v0 = vpop.f32.mrb[21].mxu1 }
 0x253   : > { %v2753_v8 = vadd.f32 %v2752_v0, %v2751_v60  ;;  %v2754_v57 = vpop.f32.mrb[22].mxu1 }
 0x254   : > { %v2755_v23 = vpop.f32.mrb[23].mxu1 }
 0x255   : > { %v1821_v52 = vadd.f32 %v2753_v8, %v1781_v62 }
 0x26e   : > { %v1860_v39 = vpop.f32.mrb[24].mxu0 }
 0x26f   : > { %v1861_v42 = vadd.f32 %v1860_v39, %v1821_v52  ;;  %v3038_v44 = vpop.f32.mrb[25].mxu0  ;;  %v2440_v39 = vld [vmem:[%s4270_s7] ss:$0 sm:$0xff] }
 0x270   : > { %v1863_v21 = vpop.f32.mrb[26].mxu0  ;;  %v2529_v44 = vld [vmem:[%s4268_s5] ss:$0 sm:$0xff] }
 0x271   : > { %v2316_v54 = vrot.slane %v1861_v42, 7  ;;  %v3039_v19 = vpop.f32.mrb[27].mxu0  ;;  %v2782_v40 = vpop.f32.mrb[24].mxu1 }
 0x272   : > { %v2783_v59 = vpop.f32.mrb[25].mxu1  ;;  %v4402_v19 = vld [vmem:[#allocation31_spill] sm:$0xff] }
 0x273   : > { %v2325_v45 = vsel %vm770_vm4, %v4216_v36, %v2316_v54  ;;  %v2784_v25 = vadd.f32 %v2783_v59, %v2782_v40  ;;  %v2785_v63 = vpop.f32.mrb[26].mxu1  ;;  %v731_v40 = vadd.f32 %v2440_v39, %v4402_v19 }
 0x274   : > { %v2786_v14 = vpop.f32.mrb[27].mxu1 }
 0x28e   : > { %v2804_v4 = vpop.f32.mrb[28].mxu0 }
 0x28f   : > { %v2805_v28 = vpop.f32.mrb[29].mxu0 }
 0x290   : > { %v2806_v6 = vadd.f32 %v2805_v28, %v2804_v4  ;;  %v2807_v41 = vpop.f32.mrb[30].mxu0 }
 0x291   : > { %v2808_v48 = vpop.f32.mrb[31].mxu0  ;;  %v2826_v32 = vpop.f32.mrb[28].mxu1 }
 0x292   : > { %v1965_v13 = vadd.f32 %v2806_v6, %v2784_v25  ;;  %v2827_v17 = vpop.f32.mrb[29].mxu1 }
 0x293   : > { %v2828_v50 = vadd.f32 %v2827_v17, %v2826_v32  ;;  %v2829_v35 = vpop.f32.mrb[30].mxu1 }
 0x294   : > { %v2830_v51 = vpop.f32.mrb[31].mxu1 }
 0x295   : > { %v2005_v37 = vadd.f32 %v2828_v50, %v1965_v13 }
 0x2ae   : > { %v2848_v43 = vpop.f32.mrb[32].mxu0 }
 0x2af   : > { %v2849_v31 = vpop.f32.mrb[33].mxu0 }
 0x2b0   : > { %v2850_v10 = vadd.f32 %v2849_v31, %v2848_v43  ;;  %v2851_v12 = vpop.f32.mrb[34].mxu0 }
 0x2b1   : > { %v2852_v15 = vpop.f32.mrb[35].mxu0  ;;  %v2084_v18 = vpop.f32.mrb[32].mxu1 }
 0x2b2   : > { %v2045_v22 = vadd.f32 %v2850_v10, %v2005_v37  ;;  %v3058_v26 = vpop.f32.mrb[33].mxu1 }
 0x2b3   : > { %v2087_v30 = vpop.f32.mrb[34].mxu1 }
 0x2b4   : > { %v2085_v34 = vadd.f32 %v2084_v18, %v2045_v22  ;;  %v3059_v49 = vpop.f32.mrb[35].mxu1 }
 0x2b6   : > { %v2319_v36 = vrot.slane %v2085_v34, 6 }
 0x2b8   : > { %v2327_v53 = vsel %vm736_vm1, %v2325_v45, %v2319_v36 }
 0x2ce   : > { %v2879_v61 = vpop.f32.mrb[36].mxu0 }
 0x2cf   : > { %v2880_v27 = vpop.f32.mrb[37].mxu0 }
 0x2d0   : > { %v2881_v3 = vadd.f32 %v2880_v27, %v2879_v61  ;;  %v2882_v7 = vpop.f32.mrb[38].mxu0 }
 0x2d1   : > { %v2883_v2 = vpop.f32.mrb[39].mxu0  ;;  %v2901_v20 = vpop.f32.mrb[36].mxu1 }
 0x2d2   : > { %v2902_v46 = vpop.f32.mrb[37].mxu1 }
 0x2d3   : > { %v2903_v24 = vadd.f32 %v2902_v46, %v2901_v20  ;;  %v2904_v58 = vpop.f32.mrb[38].mxu1 }
 0x2d4   : > { %v2905_v11 = vpop.f32.mrb[39].mxu1 }
 0x2d5   : > { %v2190_v5 = vadd.f32 %v2903_v24, %v2881_v3 }
 0x2ee   : > { %v2923_v16 = vpop.f32.mrb[40].mxu0 }
 0x2ef   : > { %v2924_v29 = vpop.f32.mrb[41].mxu0 }
 0x2f0   : > { %v2925_v1 = vadd.f32 %v2924_v29, %v2923_v16  ;;  %v2926_v9 = vpop.f32.mrb[42].mxu0 }
 0x2f1   : > { %v2927_v55 = vpop.f32.mrb[43].mxu0  ;;  %v2945_v33 = vpop.f32.mrb[40].mxu1 }
 0x2f2   : > { %v2230_v38 = vadd.f32 %v2925_v1, %v2190_v5  ;;  %v2946_v47 = vpop.f32.mrb[41].mxu1 }
 0x2f3   : > { %v2947_v56 = vadd.f32 %v2946_v47, %v2945_v33  ;;  %v2948_v60 = vpop.f32.mrb[42].mxu1 }
 0x2f4   : > { %v2949_v62 = vpop.f32.mrb[43].mxu1 }
 0x2f5   : > { %v2270_v0 = vadd.f32 %v2947_v56, %v2230_v38 }
 0x30e   : > { %v2309_v8 = vpop.f32.mrb[44].mxu0 }
 0x30f   : > { %v2310_v57 = vadd.f32 %v2309_v8, %v2270_v0  ;;  %v3078_v23 = vpop.f32.mrb[45].mxu0 }
 0x310   : > { %v2312_v52 = vpop.f32.mrb[46].mxu0 }
 0x311   : > { %v2322_v42 = vrot.slane %v2310_v57, 5  ;;  %v3079_v21 = vpop.f32.mrb[47].mxu0 }
 0x313   : > { %v2329_v54 = vsel %vm2328_vm7, %v2327_v53, %v2322_v42 }
 0x314   : > { %v2337_v59 = vadd.f32 %v2529_v44, %v2329_v54 }
 0x316   : > { %v2338_v45 = vadd.f32 %v2337_v59, %v731_v40 }
 0x318   : > { %v2339_v25 = vmax.f32 %v2338_v45, 0.0 }
 0x31a   : > { %v2340_v63 = vpack.c.bf16 %v2339_v25, %v2339_v25 }
 0x31c   : > { %2341 = vst [vmem:[%s320_s15] sm:$0x3] %v2340_v63 }
 0x31d PF: > { %s18_s27 = sadd.s32 1, %s3221_s27  }
 0x31e   : > { %p15_p4 = scmp.ge.s32.totalorder %s18_s27, 4  }
 0x320   :  { %17 = sbr.rel (!%p15_p4) target bundleno = 1 (0x1), region = 90 }

</bundles_post_ra>
